<compile_context>
chip_gen: v5e
topology: v5e:2x2
jax: 0.10.0
libtpu: 0.0.40
codegen_flags: <defaults>
</compile_context>

<pallas_src>
import jax
import jax.numpy as jnp
from jax.experimental import pallas as pl
from jax.experimental.pallas import tpu as pltpu


# ----------------------------------------------------------------------------
# Fused (im2col-matmul conv) + GroupNorm (+ReLU / +residual) kernel
# ----------------------------------------------------------------------------

def _make_matmul_gn_kernel(*, cg, count, eps, relu, has_residual):
    """count = Ho*Wo spatial positions, cg = channels per GroupNorm group."""

    def kernel(*refs):
        i = 0
        x_ref = refs[i]; i += 1            # (1, M, K)   bf16 im2col patches
        w_ref = refs[i]; i += 1            # (K, Cout)   bf16 standardized weights
        res_ref = None
        if has_residual:
            res_ref = refs[i]; i += 1      # (1, M, Cout) f32
        a_ref = b_ref = None
        if cg > 1:
            a_ref = refs[i]; i += 1        # (Cout, G) f32 group indicator
            b_ref = refs[i]; i += 1        # (G, Cout) f32 indicator transpose
        gamma_ref = refs[i]; i += 1        # (1, Cout) f32
        beta_ref = refs[i]; i += 1         # (1, Cout) f32
        o_ref = refs[i]                    # (1, M, Cout) f32

        # ---- conv: single K-packed MXU matmul, f32 accumulation ----
        acc = jnp.dot(x_ref[0], w_ref[...], preferred_element_type=jnp.float32)

        # ---- GroupNorm (f32, biased variance as in torch) ----
        s1 = jnp.sum(acc, axis=0, keepdims=True)            # (1, Cout) sum
        s2 = jnp.sum(acc * acc, axis=0, keepdims=True)       # (1, Cout) sumsq
        denom = 1.0 / float(count * cg)
        if cg == 1:
            mean = s1 * denom
            ex2 = s2 * denom
        else:
            gs1 = jnp.dot(s1, a_ref[...], preferred_element_type=jnp.float32)
            gs2 = jnp.dot(s2, a_ref[...], preferred_element_type=jnp.float32)
            mean = jnp.dot(gs1, b_ref[...], preferred_element_type=jnp.float32) * denom
            ex2 = jnp.dot(gs2, b_ref[...], preferred_element_type=jnp.float32) * denom
        var = ex2 - mean * mean
        inv = jax.lax.rsqrt(var + eps)
        y = (acc - mean) * (inv * gamma_ref[...]) + beta_ref[...]

        if has_residual:
            y = y + res_ref[0]
        if relu:
            y = jnp.maximum(y, 0.0)
        o_ref[0] = y

    return kernel


def conv_gn(x, w_oihw, gn_params, *, stride, padding, groups, eps, relu,
            residual=None):
    """StdConv2d + GroupNorm(+ReLU, +residual add-ReLU), fused in one Pallas call.

    x: (N, H, W, Cin) f32 NHWC.  w_oihw: torch-style OIHW weights.  Returns NHWC f32.
    """
    Cout, Cin_w, kh, kw = w_oihw.shape

    # A strided 1x1 conv is a plain 1x1 conv on the subsampled input.
    if kh == 1 and kw == 1 and stride > 1:
        x = x[:, ::stride, ::stride, :]
        stride = 1

    N, H, W, Cin = x.shape
    assert Cin == Cin_w
    S = stride
    Ho = (H + 2 * padding - kh) // S + 1
    Wo = (W + 2 * padding - kw) // S + 1
    M = Ho * Wo
    K = kh * kw * Cin
    assert Cout % groups == 0
    cg = Cout // groups

    # ---- weight standardization (torch var_mean unbiased=False, eps 1e-5) ----
    wm = jnp.mean(w_oihw, axis=(1, 2, 3), keepdims=True)
    wv = jnp.var(w_oihw, axis=(1, 2, 3), keepdims=True)
    w_std = (w_oihw - wm) * jax.lax.rsqrt(wv + 1e-5)
    # (O,I,kh,kw) -> (kh,kw,I,O) -> (K, Cout): tap-major / channel-minor (matches im2col)
    w_mat = jnp.transpose(w_std, (2, 3, 1, 0)).reshape(K, Cout).astype(jnp.bfloat16)

    # ---- wrapper-side im2col: lane-dense (N, M, K), bf16 once ----
    if kh == 1 and kw == 1:
        patches = x.reshape(N, M, K)
    else:
        xp = x if padding == 0 else jnp.pad(
            x, ((0, 0), (padding, padding), (padding, padding), (0, 0)))
        taps = []
        for ky in range(kh):
            for kx in range(kw):
                taps.append(xp[:, ky:ky + (Ho - 1) * S + 1:S,
                               kx:kx + (Wo - 1) * S + 1:S, :])
        patches = jnp.concatenate(taps, axis=-1).reshape(N, M, K)
    patches = patches.astype(jnp.bfloat16)

    gamma = gn_params["g"].reshape(1, Cout).astype(jnp.float32)
    beta = gn_params["b"].reshape(1, Cout).astype(jnp.float32)

    inputs = [patches, w_mat]
    in_specs = [
        pl.BlockSpec((1, M, K), lambda n: (n, 0, 0)),
        pl.BlockSpec((K, Cout), lambda n: (0, 0)),
    ]
    if residual is not None:
        assert residual.shape == (N, Ho, Wo, Cout)
        inputs.append(residual.reshape(N, M, Cout))
        in_specs.append(pl.BlockSpec((1, M, Cout), lambda n: (n, 0, 0)))
    if cg > 1:
        gidx = jnp.arange(Cout) // cg
        A = (gidx[:, None] == jnp.arange(groups)[None, :]).astype(jnp.float32)
        inputs += [A, A.T]
        in_specs += [pl.BlockSpec((Cout, groups), lambda n: (0, 0)),
                     pl.BlockSpec((groups, Cout), lambda n: (0, 0))]
    inputs += [gamma, beta]
    in_specs += [pl.BlockSpec((1, Cout), lambda n: (0, 0)),
                 pl.BlockSpec((1, Cout), lambda n: (0, 0))]

    out = pl.pallas_call(
        _make_matmul_gn_kernel(cg=cg, count=M, eps=eps, relu=relu,
                               has_residual=residual is not None),
        out_shape=jax.ShapeDtypeStruct((N, M, Cout), jnp.float32),
        grid=(N,),
        in_specs=in_specs,
        out_specs=pl.BlockSpec((1, M, Cout), lambda n: (n, 0, 0)),
        compiler_params=pltpu.CompilerParams(dimension_semantics=("parallel",)),
    )(*inputs)

    return out.reshape(N, Ho, Wo, Cout)


# ----------------------------------------------------------------------------
# MaxPool2d(kernel=3, stride=2, padding=0): 9 stacked taps, max in-kernel
# ----------------------------------------------------------------------------

def _maxpool_kernel(x_ref, o_ref):
    m = x_ref[0, 0]
    for t in range(1, 9):
        m = jnp.maximum(m, x_ref[0, t])
    o_ref[0] = m


def maxpool_3x3_s2(x):
    N, H, W, C = x.shape
    k, S = 3, 2
    Ho = (H - k) // S + 1
    Wo = (W - k) // S + 1
    M = Ho * Wo

    taps = []
    for dy in range(k):
        for dx in range(k):
            taps.append(x[:, dy:dy + (Ho - 1) * S + 1:S,
                          dx:dx + (Wo - 1) * S + 1:S, :].reshape(N, 1, M, C))
    xt = jnp.concatenate(taps, axis=1)  # (N, 9, M, C)

    out = pl.pallas_call(
        _maxpool_kernel,
        out_shape=jax.ShapeDtypeStruct((N, M, C), jnp.float32),
        grid=(N,),
        in_specs=[pl.BlockSpec((1, 9, M, C), lambda n: (n, 0, 0, 0))],
        out_specs=pl.BlockSpec((1, M, C), lambda n: (n, 0, 0)),
        compiler_params=pltpu.CompilerParams(dimension_semantics=("parallel",)),
    )(xt)
    return out.reshape(N, Ho, Wo, C)


# ----------------------------------------------------------------------------
# Model: parameter init + forward
# ----------------------------------------------------------------------------

def init_resnetv2_params(key, channel, block_units, width_factor):
    width = int(64 * width_factor)
    counter = [0]

    def nk():
        counter[0] += 1
        return jax.random.fold_in(key, counter[0])

    def make_conv(cout, cin, k):
        return 0.1 * jax.random.normal(nk(), (cout, cin, k, k), jnp.float32)

    def make_gn(c):
        return {
            "g": 1.0 + 0.1 * jax.random.normal(nk(), (c,), jnp.float32),
            "b": 0.05 * jax.random.normal(nk(), (c,), jnp.float32),
        }

    params = {
        "root": {"conv": make_conv(width, channel, 7), "gn": make_gn(width)},
        "body": [],
    }
    cin = width
    for s, n_units in enumerate(block_units):
        cout = width * 4 * (2 ** s)
        cmid = width * (2 ** s)
        stage = []
        for u in range(n_units):
            u_cin = cin if u == 0 else cout
            stride = 2 if (s > 0 and u == 0) else 1
            unit = {
                "conv1": make_conv(cmid, u_cin, 1), "gn1": make_gn(cmid),
                "conv2": make_conv(cmid, cmid, 3), "gn2": make_gn(cmid),
                "conv3": make_conv(cout, cmid, 1), "gn3": make_gn(cout),
            }
            if stride != 1 or u_cin != cout:
                unit["conv_proj"] = make_conv(cout, u_cin, 1)
                unit["gn_proj"] = make_gn(cout)
            stage.append(unit)
        params["body"].append(stage)
        cin = cout
    return params


def _bottleneck(p, x, stride):
    if "conv_proj" in p:
        cout = p["conv_proj"].shape[0]
        # gn_proj = nn.GroupNorm(cout, cout): per-channel groups, torch default eps 1e-5
        residual = conv_gn(x, p["conv_proj"], p["gn_proj"], stride=stride,
                           padding=0, groups=cout, eps=1e-5, relu=False)
    else:
        residual = x
    y = conv_gn(x, p["conv1"], p["gn1"], stride=1, padding=0,
                groups=32, eps=1e-6, relu=True)
    y = conv_gn(y, p["conv2"], p["gn2"], stride=stride, padding=1,
                groups=32, eps=1e-6, relu=True)
    # conv3 + gn3 + residual add + ReLU fused into one kernel
    y = conv_gn(y, p["conv3"], p["gn3"], stride=1, padding=0,
                groups=32, eps=1e-6, relu=True, residual=residual)
    return y


def _run_stage(stage_params, stage_idx, x):
    for u, unit in enumerate(stage_params):
        stride = 2 if (stage_idx > 0 and u == 0) else 1
        x = _bottleneck(unit, x, stride)
    return x


def resnetv2_forward(params, x_nchw):
    b, c, h, w = x_nchw.shape
    x = jnp.transpose(x_nchw, (0, 2, 3, 1))  # NCHW -> NHWC internal layout

    # root: StdConv2d(7x7, s2, p3) + GroupNorm(32, width, eps 1e-6) + ReLU, fused
    x = conv_gn(x, params["root"]["conv"], params["root"]["gn"],
                stride=2, padding=3, groups=32, eps=1e-6, relu=True)
    features = [x]

    x = maxpool_3x3_s2(x)

    body = params["body"]
    n_stages = len(body)
    for i in range(n_stages - 1):
        x = _run_stage(body[i], i, x)
        right_h = int(h / 4 / (i + 1))
        right_w = int(w / 4 / (i + 1))
        if x.shape[1] != right_h or x.shape[2] != right_w:
            pad_h = right_h - x.shape[1]
            pad_w = right_w - x.shape[2]
            assert 0 < pad_h < 3 and 0 <= pad_w < 3
            feat = jnp.pad(x, ((0, 0), (0, pad_h), (0, pad_w), (0, 0)))
        else:
            feat = x
        features.append(feat)
    x = _run_stage(body[-1], n_stages - 1, x)

    x_out = jnp.transpose(x, (0, 3, 1, 2))                       # back to NCHW
    feats = [jnp.transpose(f, (0, 3, 1, 2)) for f in features[::-1]]
    return x_out, feats


# ----------------------------------------------------------------------------
# main
# ----------------------------------------------------------------------------

if __name__ == "__main__":
    key = jax.random.PRNGKey(0)
    pkey, xkey = jax.random.split(key)

    channel = 4
    block_units = (1, 1, 1)
    width_factor = 0.5        # width = 32 (multiple of 32 for GroupNorm(32, .))
    N, H, W = 2, 32, 32

    params = init_resnetv2_params(pkey, channel, block_units, width_factor)
    x = jax.random.normal(xkey, (N, channel, H, W), jnp.float32)

    fwd = jax.jit(resnetv2_forward)
    out, feats = fwd(params, x)
    out = jax.block_until_ready(out)
    feats = [jax.block_until_ready(f) for f in feats]

    width = int(64 * width_factor)
    assert out.shape == (N, width * 16, H // 16, W // 16), out.shape
    assert feats[0].shape == (N, width * 8, H // 8, W // 8), feats[0].shape
    assert feats[1].shape == (N, width * 4, H // 4, W // 4), feats[1].shape
    assert feats[2].shape == (N, width, H // 2, W // 2), feats[2].shape
    assert all(bool(jnp.all(jnp.isfinite(f))) for f in [out] + feats)

    print("KERNEL_OK")
</pallas_src>

<mosaic_0001>
module attributes {stable_mosaic.version = 11 : i64} {
  func.func @kernel(%arg0: i32, %arg1: memref<1x256x196xbf16, #tpu.memory_space<vmem>>, %arg2: memref<196x32xbf16, #tpu.memory_space<vmem>>, %arg3: memref<1x32xf32, #tpu.memory_space<vmem>>, %arg4: memref<1x32xf32, #tpu.memory_space<vmem>>, %arg5: memref<1x256x32xf32, #tpu.memory_space<vmem>>) attributes {dimension_semantics = [#tpu.dimension_semantics<parallel>], iteration_bounds = array<i64: 2>, scalar_prefetch = 0 : i64, scratch_operands = 0 : i64, tpu.core_type = #tpu.core_type<tc>, window_params = [{transform_indices = @transform_0, window_bounds = array<i64: 1, 256, 196>}, {pipeline_mode = #tpu.pipeline_mode<synchronous>, transform_indices = @transform_1, window_bounds = array<i64: 196, 32>}, {pipeline_mode = #tpu.pipeline_mode<synchronous>, transform_indices = @transform_2, window_bounds = array<i64: 1, 32>}, {pipeline_mode = #tpu.pipeline_mode<synchronous>, transform_indices = @transform_3, window_bounds = array<i64: 1, 32>}, {transform_indices = @transform_4, window_bounds = array<i64: 1, 256, 32>}]} {
    %c0 = arith.constant 0 : index
    %c0_0 = arith.constant 0 : index
    %c0_1 = arith.constant 0 : index
    %0 = vector.load %arg1[%c0, %c0_0, %c0_1] : memref<1x256x196xbf16, #tpu.memory_space<vmem>>, vector<1x256x196xbf16>
    %1 = vector.shape_cast %0 : vector<1x256x196xbf16> to vector<256x196xbf16>
    %c0_2 = arith.constant 0 : index
    %c0_3 = arith.constant 0 : index
    %2 = vector.load %arg2[%c0_2, %c0_3] : memref<196x32xbf16, #tpu.memory_space<vmem>>, vector<196x32xbf16>
    %cst = arith.constant dense<0.000000e+00> : vector<256x32xf32>
    %3 = tpu.matmul %1, %2, %cst {dimension_numbers = #tpu.dot_dimension_numbers<[1], [0], [0], [1], [0, 0, 1, 1], [], []>} : vector<256x196xbf16>, vector<196x32xbf16>, vector<256x32xf32> -> vector<256x32xf32>
    %cst_4 = arith.constant dense<0.000000e+00> : vector<32xf32>
    %4 = vector.multi_reduction <add>, %3, %cst_4 [0] : vector<256x32xf32> to vector<32xf32>
    %5 = vector.shape_cast %4 : vector<32xf32> to vector<1x32xf32>
    %6 = arith.mulf %3, %3 : vector<256x32xf32>
    %cst_5 = arith.constant dense<0.000000e+00> : vector<32xf32>
    %7 = vector.multi_reduction <add>, %6, %cst_5 [0] : vector<256x32xf32> to vector<32xf32>
    %8 = vector.shape_cast %7 : vector<32xf32> to vector<1x32xf32>
    %cst_6 = arith.constant 3.906250e-03 : f32
    %9 = vector.broadcast %cst_6 : f32 to vector<1x32xf32>
    %10 = arith.mulf %5, %9 : vector<1x32xf32>
    %cst_7 = arith.constant 3.906250e-03 : f32
    %11 = vector.broadcast %cst_7 : f32 to vector<1x32xf32>
    %12 = arith.mulf %8, %11 : vector<1x32xf32>
    %13 = arith.mulf %10, %10 : vector<1x32xf32>
    %14 = arith.subf %12, %13 : vector<1x32xf32>
    %cst_8 = arith.constant 9.99999997E-7 : f32
    %15 = vector.broadcast %cst_8 : f32 to vector<1x32xf32>
    %16 = arith.addf %14, %15 : vector<1x32xf32>
    %17 = math.rsqrt %16 : vector<1x32xf32>
    %18 = vector.broadcast %10 : vector<1x32xf32> to vector<256x32xf32>
    %19 = arith.subf %3, %18 : vector<256x32xf32>
    %c0_9 = arith.constant 0 : index
    %c0_10 = arith.constant 0 : index
    %20 = vector.load %arg3[%c0_9, %c0_10] : memref<1x32xf32, #tpu.memory_space<vmem>>, vector<1x32xf32>
    %21 = arith.mulf %17, %20 : vector<1x32xf32>
    %22 = vector.broadcast %21 : vector<1x32xf32> to vector<256x32xf32>
    %23 = arith.mulf %19, %22 : vector<256x32xf32>
    %c0_11 = arith.constant 0 : index
    %c0_12 = arith.constant 0 : index
    %24 = vector.load %arg4[%c0_11, %c0_12] : memref<1x32xf32, #tpu.memory_space<vmem>>, vector<1x32xf32>
    %25 = vector.broadcast %24 : vector<1x32xf32> to vector<256x32xf32>
    %26 = arith.addf %23, %25 : vector<256x32xf32>
    %cst_13 = arith.constant 0.000000e+00 : f32
    %27 = vector.broadcast %cst_13 : f32 to vector<256x32xf32>
    %28 = arith.maximumf %26, %27 : vector<256x32xf32>
    %c0_14 = arith.constant 0 : index
    %c0_15 = arith.constant 0 : index
    %c0_16 = arith.constant 0 : index
    %29 = vector.load %arg5[%c0_14, %c0_15, %c0_16] : memref<1x256x32xf32, #tpu.memory_space<vmem>>, vector<1x256x32xf32>
    %30 = vector.shape_cast %29 : vector<1x256x32xf32> to vector<256x32xf32>
    %31 = vector.shape_cast %28 : vector<256x32xf32> to vector<1x256x32xf32>
    tpu.vector_store %arg5[%c0_14, %c0_15, %c0_16], %31 {strides = array<i32>} : memref<1x256x32xf32, #tpu.memory_space<vmem>>, vector<1x256x32xf32>,
    return
  }
  func.func @transform_0(%arg0: i32) -> (i32, i32, i32) {
    %c0_i32 = arith.constant 0 : i32
    %c0_i32_0 = arith.constant 0 : i32
    %c0_i32_1 = arith.constant 0 : i32
    return %arg0, %c0_i32, %c0_i32_0 : i32, i32, i32
  }
  func.func @transform_1(%arg0: i32) -> (i32, i32) {
    %c0_i32 = arith.constant 0 : i32
    %c0_i32_0 = arith.constant 0 : i32
    %c0_i32_1 = arith.constant 0 : i32
    return %c0_i32, %c0_i32_0 : i32, i32
  }
  func.func @transform_2(%arg0: i32) -> (i32, i32) {
    %c0_i32 = arith.constant 0 : i32
    %c0_i32_0 = arith.constant 0 : i32
    %c0_i32_1 = arith.constant 0 : i32
    return %c0_i32, %c0_i32_0 : i32, i32
  }
  func.func @transform_3(%arg0: i32) -> (i32, i32) {
    %c0_i32 = arith.constant 0 : i32
    %c0_i32_0 = arith.constant 0 : i32
    %c0_i32_1 = arith.constant 0 : i32
    return %c0_i32, %c0_i32_0 : i32, i32
  }
  func.func @transform_4(%arg0: i32) -> (i32, i32, i32) {
    %c0_i32 = arith.constant 0 : i32
    %c0_i32_0 = arith.constant 0 : i32
    %c0_i32_1 = arith.constant 0 : i32
    return %arg0, %c0_i32, %c0_i32_0 : i32, i32, i32
  }
}

module attributes {stable_mosaic.version = 11 : i64} {
  func.func @_maxpool_kernel(%arg0: i32, %arg1: memref<1x9x49x32xf32, #tpu.memory_space<vmem>>, %arg2: memref<1x49x32xf32, #tpu.memory_space<vmem>>) attributes {dimension_semantics = [#tpu.dimension_semantics<parallel>], iteration_bounds = array<i64: 2>, scalar_prefetch = 0 : i64, scratch_operands = 0 : i64, tpu.core_type = #tpu.core_type<tc>, window_params = [{transform_indices = @transform_0, window_bounds = array<i64: 1, 9, 49, 32>}, {transform_indices = @transform_1, window_bounds = array<i64: 1, 49, 32>}]} {
    %c0 = arith.constant 0 : index
    %c0_0 = arith.constant 0 : index
    %c0_1 = arith.constant 0 : index
    %c0_2 = arith.constant 0 : index
    %0 = vector.load %arg1[%c0, %c0_0, %c0_1, %c0_2] : memref<1x9x49x32xf32, #tpu.memory_space<vmem>>, vector<1x1x49x32xf32>
    %1 = vector.shape_cast %0 : vector<1x1x49x32xf32> to vector<49x32xf32>
    %c0_3 = arith.constant 0 : index
    %c1 = arith.constant 1 : index
    %c0_4 = arith.constant 0 : index
    %c0_5 = arith.constant 0 : index
    %2 = vector.load %arg1[%c0_3, %c1, %c0_4, %c0_5] : memref<1x9x49x32xf32, #tpu.memory_space<vmem>>, vector<1x1x49x32xf32>
    %3 = vector.shape_cast %2 : vector<1x1x49x32xf32> to vector<49x32xf32>
    %4 = arith.maximumf %1, %3 : vector<49x32xf32>
    %c0_6 = arith.constant 0 : index
    %c2 = arith.constant 2 : index
    %c0_7 = arith.constant 0 : index
    %c0_8 = arith.constant 0 : index
    %5 = vector.load %arg1[%c0_6, %c2, %c0_7, %c0_8] : memref<1x9x49x32xf32, #tpu.memory_space<vmem>>, vector<1x1x49x32xf32>
    %6 = vector.shape_cast %5 : vector<1x1x49x32xf32> to vector<49x32xf32>
    %7 = arith.maximumf %4, %6 : vector<49x32xf32>
    %c0_9 = arith.constant 0 : index
    %c3 = arith.constant 3 : index
    %c0_10 = arith.constant 0 : index
    %c0_11 = arith.constant 0 : index
    %8 = vector.load %arg1[%c0_9, %c3, %c0_10, %c0_11] : memref<1x9x49x32xf32, #tpu.memory_space<vmem>>, vector<1x1x49x32xf32>
    %9 = vector.shape_cast %8 : vector<1x1x49x32xf32> to vector<49x32xf32>
    %10 = arith.maximumf %7, %9 : vector<49x32xf32>
    %c0_12 = arith.constant 0 : index
    %c4 = arith.constant 4 : index
    %c0_13 = arith.constant 0 : index
    %c0_14 = arith.constant 0 : index
    %11 = vector.load %arg1[%c0_12, %c4, %c0_13, %c0_14] : memref<1x9x49x32xf32, #tpu.memory_space<vmem>>, vector<1x1x49x32xf32>
    %12 = vector.shape_cast %11 : vector<1x1x49x32xf32> to vector<49x32xf32>
    %13 = arith.maximumf %10, %12 : vector<49x32xf32>
    %c0_15 = arith.constant 0 : index
    %c5 = arith.constant 5 : index
    %c0_16 = arith.constant 0 : index
    %c0_17 = arith.constant 0 : index
    %14 = vector.load %arg1[%c0_15, %c5, %c0_16, %c0_17] : memref<1x9x49x32xf32, #tpu.memory_space<vmem>>, vector<1x1x49x32xf32>
    %15 = vector.shape_cast %14 : vector<1x1x49x32xf32> to vector<49x32xf32>
    %16 = arith.maximumf %13, %15 : vector<49x32xf32>
    %c0_18 = arith.constant 0 : index
    %c6 = arith.constant 6 : index
    %c0_19 = arith.constant 0 : index
    %c0_20 = arith.constant 0 : index
    %17 = vector.load %arg1[%c0_18, %c6, %c0_19, %c0_20] : memref<1x9x49x32xf32, #tpu.memory_space<vmem>>, vector<1x1x49x32xf32>
    %18 = vector.shape_cast %17 : vector<1x1x49x32xf32> to vector<49x32xf32>
    %19 = arith.maximumf %16, %18 : vector<49x32xf32>
    %c0_21 = arith.constant 0 : index
    %c7 = arith.constant 7 : index
    %c0_22 = arith.constant 0 : index
    %c0_23 = arith.constant 0 : index
    %20 = vector.load %arg1[%c0_21, %c7, %c0_22, %c0_23] : memref<1x9x49x32xf32, #tpu.memory_space<vmem>>, vector<1x1x49x32xf32>
    %21 = vector.shape_cast %20 : vector<1x1x49x32xf32> to vector<49x32xf32>
    %22 = arith.maximumf %19, %21 : vector<49x32xf32>
    %c0_24 = arith.constant 0 : index
    %c8 = arith.constant 8 : index
    %c0_25 = arith.constant 0 : index
    %c0_26 = arith.constant 0 : index
    %23 = vector.load %arg1[%c0_24, %c8, %c0_25, %c0_26] : memref<1x9x49x32xf32, #tpu.memory_space<vmem>>, vector<1x1x49x32xf32>
    %24 = vector.shape_cast %23 : vector<1x1x49x32xf32> to vector<49x32xf32>
    %25 = arith.maximumf %22, %24 : vector<49x32xf32>
    %c0_27 = arith.constant 0 : index
    %c0_28 = arith.constant 0 : index
    %c0_29 = arith.constant 0 : index
    %26 = vector.load %arg2[%c0_27, %c0_28, %c0_29] : memref<1x49x32xf32, #tpu.memory_space<vmem>>, vector<1x49x32xf32>
    %27 = vector.shape_cast %26 : vector<1x49x32xf32> to vector<49x32xf32>
    %28 = vector.shape_cast %25 : vector<49x32xf32> to vector<1x49x32xf32>
    tpu.vector_store %arg2[%c0_27, %c0_28, %c0_29], %28 {strides = array<i32>} : memref<1x49x32xf32, #tpu.memory_space<vmem>>, vector<1x49x32xf32>,
    return
  }
  func.func @transform_0(%arg0: i32) -> (i32, i32, i32, i32) {
    %c0_i32 = arith.constant 0 : i32
    %c0_i32_0 = arith.constant 0 : i32
    %c0_i32_1 = arith.constant 0 : i32
    %c0_i32_2 = arith.constant 0 : i32
    return %arg0, %c0_i32, %c0_i32_0, %c0_i32_1 : i32, i32, i32, i32
  }
  func.func @transform_1(%arg0: i32) -> (i32, i32, i32) {
    %c0_i32 = arith.constant 0 : i32
    %c0_i32_0 = arith.constant 0 : i32
    %c0_i32_1 = arith.constant 0 : i32
    return %arg0, %c0_i32, %c0_i32_0 : i32, i32, i32
  }
}

module attributes {stable_mosaic.version = 11 : i64} {
  func.func @kernel(%arg0: i32, %arg1: memref<1x49x32xbf16, #tpu.memory_space<vmem>>, %arg2: memref<32x32xbf16, #tpu.memory_space<vmem>>, %arg3: memref<1x32xf32, #tpu.memory_space<vmem>>, %arg4: memref<1x32xf32, #tpu.memory_space<vmem>>, %arg5: memref<1x49x32xf32, #tpu.memory_space<vmem>>) attributes {dimension_semantics = [#tpu.dimension_semantics<parallel>], iteration_bounds = array<i64: 2>, scalar_prefetch = 0 : i64, scratch_operands = 0 : i64, tpu.core_type = #tpu.core_type<tc>, window_params = [{transform_indices = @transform_0, window_bounds = array<i64: 1, 49, 32>}, {pipeline_mode = #tpu.pipeline_mode<synchronous>, transform_indices = @transform_1, window_bounds = array<i64: 32, 32>}, {pipeline_mode = #tpu.pipeline_mode<synchronous>, transform_indices = @transform_2, window_bounds = array<i64: 1, 32>}, {pipeline_mode = #tpu.pipeline_mode<synchronous>, transform_indices = @transform_3, window_bounds = array<i64: 1, 32>}, {transform_indices = @transform_4, window_bounds = array<i64: 1, 49, 32>}]} {
    %c0 = arith.constant 0 : index
    %c0_0 = arith.constant 0 : index
    %c0_1 = arith.constant 0 : index
    %0 = vector.load %arg1[%c0, %c0_0, %c0_1] : memref<1x49x32xbf16, #tpu.memory_space<vmem>>, vector<1x49x32xbf16>
    %1 = vector.shape_cast %0 : vector<1x49x32xbf16> to vector<49x32xbf16>
    %c0_2 = arith.constant 0 : index
    %c0_3 = arith.constant 0 : index
    %2 = vector.load %arg2[%c0_2, %c0_3] : memref<32x32xbf16, #tpu.memory_space<vmem>>, vector<32x32xbf16>
    %cst = arith.constant dense<0.000000e+00> : vector<49x32xf32>
    %3 = tpu.matmul %1, %2, %cst {dimension_numbers = #tpu.dot_dimension_numbers<[1], [0], [0], [1], [0, 0, 1, 1], [], []>} : vector<49x32xbf16>, vector<32x32xbf16>, vector<49x32xf32> -> vector<49x32xf32>
    %cst_4 = arith.constant dense<0.000000e+00> : vector<32xf32>
    %4 = vector.multi_reduction <add>, %3, %cst_4 [0] : vector<49x32xf32> to vector<32xf32>
    %5 = vector.shape_cast %4 : vector<32xf32> to vector<1x32xf32>
    %6 = arith.mulf %3, %3 : vector<49x32xf32>
    %cst_5 = arith.constant dense<0.000000e+00> : vector<32xf32>
    %7 = vector.multi_reduction <add>, %6, %cst_5 [0] : vector<49x32xf32> to vector<32xf32>
    %8 = vector.shape_cast %7 : vector<32xf32> to vector<1x32xf32>
    %cst_6 = arith.constant 0.0204081628 : f32
    %9 = vector.broadcast %cst_6 : f32 to vector<1x32xf32>
    %10 = arith.mulf %5, %9 : vector<1x32xf32>
    %cst_7 = arith.constant 0.0204081628 : f32
    %11 = vector.broadcast %cst_7 : f32 to vector<1x32xf32>
    %12 = arith.mulf %8, %11 : vector<1x32xf32>
    %13 = arith.mulf %10, %10 : vector<1x32xf32>
    %14 = arith.subf %12, %13 : vector<1x32xf32>
    %cst_8 = arith.constant 9.99999997E-7 : f32
    %15 = vector.broadcast %cst_8 : f32 to vector<1x32xf32>
    %16 = arith.addf %14, %15 : vector<1x32xf32>
    %17 = math.rsqrt %16 : vector<1x32xf32>
    %18 = vector.broadcast %10 : vector<1x32xf32> to vector<49x32xf32>
    %19 = arith.subf %3, %18 : vector<49x32xf32>
    %c0_9 = arith.constant 0 : index
    %c0_10 = arith.constant 0 : index
    %20 = vector.load %arg3[%c0_9, %c0_10] : memref<1x32xf32, #tpu.memory_space<vmem>>, vector<1x32xf32>
    %21 = arith.mulf %17, %20 : vector<1x32xf32>
    %22 = vector.broadcast %21 : vector<1x32xf32> to vector<49x32xf32>
    %23 = arith.mulf %19, %22 : vector<49x32xf32>
    %c0_11 = arith.constant 0 : index
    %c0_12 = arith.constant 0 : index
    %24 = vector.load %arg4[%c0_11, %c0_12] : memref<1x32xf32, #tpu.memory_space<vmem>>, vector<1x32xf32>
    %25 = vector.broadcast %24 : vector<1x32xf32> to vector<49x32xf32>
    %26 = arith.addf %23, %25 : vector<49x32xf32>
    %cst_13 = arith.constant 0.000000e+00 : f32
    %27 = vector.broadcast %cst_13 : f32 to vector<49x32xf32>
    %28 = arith.maximumf %26, %27 : vector<49x32xf32>
    %c0_14 = arith.constant 0 : index
    %c0_15 = arith.constant 0 : index
    %c0_16 = arith.constant 0 : index
    %29 = vector.load %arg5[%c0_14, %c0_15, %c0_16] : memref<1x49x32xf32, #tpu.memory_space<vmem>>, vector<1x49x32xf32>
    %30 = vector.shape_cast %29 : vector<1x49x32xf32> to vector<49x32xf32>
    %31 = vector.shape_cast %28 : vector<49x32xf32> to vector<1x49x32xf32>
    tpu.vector_store %arg5[%c0_14, %c0_15, %c0_16], %31 {strides = array<i32>} : memref<1x49x32xf32, #tpu.memory_space<vmem>>, vector<1x49x32xf32>,
    return
  }
  func.func @transform_0(%arg0: i32) -> (i32, i32, i32) {
    %c0_i32 = arith.constant 0 : i32
    %c0_i32_0 = arith.constant 0 : i32
    %c0_i32_1 = arith.constant 0 : i32
    return %arg0, %c0_i32, %c0_i32_0 : i32, i32, i32
  }
  func.func @transform_1(%arg0: i32) -> (i32, i32) {
    %c0_i32 = arith.constant 0 : i32
    %c0_i32_0 = arith.constant 0 : i32
    %c0_i32_1 = arith.constant 0 : i32
    return %c0_i32, %c0_i32_0 : i32, i32
  }
  func.func @transform_2(%arg0: i32) -> (i32, i32) {
    %c0_i32 = arith.constant 0 : i32
    %c0_i32_0 = arith.constant 0 : i32
    %c0_i32_1 = arith.constant 0 : i32
    return %c0_i32, %c0_i32_0 : i32, i32
  }
  func.func @transform_3(%arg0: i32) -> (i32, i32) {
    %c0_i32 = arith.constant 0 : i32
    %c0_i32_0 = arith.constant 0 : i32
    %c0_i32_1 = arith.constant 0 : i32
    return %c0_i32, %c0_i32_0 : i32, i32
  }
  func.func @transform_4(%arg0: i32) -> (i32, i32, i32) {
    %c0_i32 = arith.constant 0 : i32
    %c0_i32_0 = arith.constant 0 : i32
    %c0_i32_1 = arith.constant 0 : i32
    return %arg0, %c0_i32, %c0_i32_0 : i32, i32, i32
  }
}

module attributes {stable_mosaic.version = 11 : i64} {
  func.func @kernel(%arg0: i32, %arg1: memref<1x49x288xbf16, #tpu.memory_space<vmem>>, %arg2: memref<288x32xbf16, #tpu.memory_space<vmem>>, %arg3: memref<1x32xf32, #tpu.memory_space<vmem>>, %arg4: memref<1x32xf32, #tpu.memory_space<vmem>>, %arg5: memref<1x49x32xf32, #tpu.memory_space<vmem>>) attributes {dimension_semantics = [#tpu.dimension_semantics<parallel>], iteration_bounds = array<i64: 2>, scalar_prefetch = 0 : i64, scratch_operands = 0 : i64, tpu.core_type = #tpu.core_type<tc>, window_params = [{transform_indices = @transform_0, window_bounds = array<i64: 1, 49, 288>}, {pipeline_mode = #tpu.pipeline_mode<synchronous>, transform_indices = @transform_1, window_bounds = array<i64: 288, 32>}, {pipeline_mode = #tpu.pipeline_mode<synchronous>, transform_indices = @transform_2, window_bounds = array<i64: 1, 32>}, {pipeline_mode = #tpu.pipeline_mode<synchronous>, transform_indices = @transform_3, window_bounds = array<i64: 1, 32>}, {transform_indices = @transform_4, window_bounds = array<i64: 1, 49, 32>}]} {
    %c0 = arith.constant 0 : index
    %c0_0 = arith.constant 0 : index
    %c0_1 = arith.constant 0 : index
    %0 = vector.load %arg1[%c0, %c0_0, %c0_1] : memref<1x49x288xbf16, #tpu.memory_space<vmem>>, vector<1x49x288xbf16>
    %1 = vector.shape_cast %0 : vector<1x49x288xbf16> to vector<49x288xbf16>
    %c0_2 = arith.constant 0 : index
    %c0_3 = arith.constant 0 : index
    %2 = vector.load %arg2[%c0_2, %c0_3] : memref<288x32xbf16, #tpu.memory_space<vmem>>, vector<288x32xbf16>
    %cst = arith.constant dense<0.000000e+00> : vector<49x32xf32>
    %3 = tpu.matmul %1, %2, %cst {dimension_numbers = #tpu.dot_dimension_numbers<[1], [0], [0], [1], [0, 0, 1, 1], [], []>} : vector<49x288xbf16>, vector<288x32xbf16>, vector<49x32xf32> -> vector<49x32xf32>
    %cst_4 = arith.constant dense<0.000000e+00> : vector<32xf32>
    %4 = vector.multi_reduction <add>, %3, %cst_4 [0] : vector<49x32xf32> to vector<32xf32>
    %5 = vector.shape_cast %4 : vector<32xf32> to vector<1x32xf32>
    %6 = arith.mulf %3, %3 : vector<49x32xf32>
    %cst_5 = arith.constant dense<0.000000e+00> : vector<32xf32>
    %7 = vector.multi_reduction <add>, %6, %cst_5 [0] : vector<49x32xf32> to vector<32xf32>
    %8 = vector.shape_cast %7 : vector<32xf32> to vector<1x32xf32>
    %cst_6 = arith.constant 0.0204081628 : f32
    %9 = vector.broadcast %cst_6 : f32 to vector<1x32xf32>
    %10 = arith.mulf %5, %9 : vector<1x32xf32>
    %cst_7 = arith.constant 0.0204081628 : f32
    %11 = vector.broadcast %cst_7 : f32 to vector<1x32xf32>
    %12 = arith.mulf %8, %11 : vector<1x32xf32>
    %13 = arith.mulf %10, %10 : vector<1x32xf32>
    %14 = arith.subf %12, %13 : vector<1x32xf32>
    %cst_8 = arith.constant 9.99999997E-7 : f32
    %15 = vector.broadcast %cst_8 : f32 to vector<1x32xf32>
    %16 = arith.addf %14, %15 : vector<1x32xf32>
    %17 = math.rsqrt %16 : vector<1x32xf32>
    %18 = vector.broadcast %10 : vector<1x32xf32> to vector<49x32xf32>
    %19 = arith.subf %3, %18 : vector<49x32xf32>
    %c0_9 = arith.constant 0 : index
    %c0_10 = arith.constant 0 : index
    %20 = vector.load %arg3[%c0_9, %c0_10] : memref<1x32xf32, #tpu.memory_space<vmem>>, vector<1x32xf32>
    %21 = arith.mulf %17, %20 : vector<1x32xf32>
    %22 = vector.broadcast %21 : vector<1x32xf32> to vector<49x32xf32>
    %23 = arith.mulf %19, %22 : vector<49x32xf32>
    %c0_11 = arith.constant 0 : index
    %c0_12 = arith.constant 0 : index
    %24 = vector.load %arg4[%c0_11, %c0_12] : memref<1x32xf32, #tpu.memory_space<vmem>>, vector<1x32xf32>
    %25 = vector.broadcast %24 : vector<1x32xf32> to vector<49x32xf32>
    %26 = arith.addf %23, %25 : vector<49x32xf32>
    %cst_13 = arith.constant 0.000000e+00 : f32
    %27 = vector.broadcast %cst_13 : f32 to vector<49x32xf32>
    %28 = arith.maximumf %26, %27 : vector<49x32xf32>
    %c0_14 = arith.constant 0 : index
    %c0_15 = arith.constant 0 : index
    %c0_16 = arith.constant 0 : index
    %29 = vector.load %arg5[%c0_14, %c0_15, %c0_16] : memref<1x49x32xf32, #tpu.memory_space<vmem>>, vector<1x49x32xf32>
    %30 = vector.shape_cast %29 : vector<1x49x32xf32> to vector<49x32xf32>
    %31 = vector.shape_cast %28 : vector<49x32xf32> to vector<1x49x32xf32>
    tpu.vector_store %arg5[%c0_14, %c0_15, %c0_16], %31 {strides = array<i32>} : memref<1x49x32xf32, #tpu.memory_space<vmem>>, vector<1x49x32xf32>,
    return
  }
  func.func @transform_0(%arg0: i32) -> (i32, i32, i32) {
    %c0_i32 = arith.constant 0 : i32
    %c0_i32_0 = arith.constant 0 : i32
    %c0_i32_1 = arith.constant 0 : i32
    return %arg0, %c0_i32, %c0_i32_0 : i32, i32, i32
  }
  func.func @transform_1(%arg0: i32) -> (i32, i32) {
    %c0_i32 = arith.constant 0 : i32
    %c0_i32_0 = arith.constant 0 : i32
    %c0_i32_1 = arith.constant 0 : i32
    return %c0_i32, %c0_i32_0 : i32, i32
  }
  func.func @transform_2(%arg0: i32) -> (i32, i32) {
    %c0_i32 = arith.constant 0 : i32
    %c0_i32_0 = arith.constant 0 : i32
    %c0_i32_1 = arith.constant 0 : i32
    return %c0_i32, %c0_i32_0 : i32, i32
  }
  func.func @transform_3(%arg0: i32) -> (i32, i32) {
    %c0_i32 = arith.constant 0 : i32
    %c0_i32_0 = arith.constant 0 : i32
    %c0_i32_1 = arith.constant 0 : i32
    return %c0_i32, %c0_i32_0 : i32, i32
  }
  func.func @transform_4(%arg0: i32) -> (i32, i32, i32) {
    %c0_i32 = arith.constant 0 : i32
    %c0_i32_0 = arith.constant 0 : i32
    %c0_i32_1 = arith.constant 0 : i32
    return %arg0, %c0_i32, %c0_i32_0 : i32, i32, i32
  }
}

module attributes {stable_mosaic.version = 11 : i64} {
  func.func @kernel(%arg0: i32, %arg1: memref<1x49x32xbf16, #tpu.memory_space<vmem>>, %arg2: memref<32x128xbf16, #tpu.memory_space<vmem>>, %arg3: memref<1x128xf32, #tpu.memory_space<vmem>>, %arg4: memref<1x128xf32, #tpu.memory_space<vmem>>, %arg5: memref<1x49x128xf32, #tpu.memory_space<vmem>>) attributes {dimension_semantics = [#tpu.dimension_semantics<parallel>], iteration_bounds = array<i64: 2>, scalar_prefetch = 0 : i64, scratch_operands = 0 : i64, tpu.core_type = #tpu.core_type<tc>, window_params = [{transform_indices = @transform_0, window_bounds = array<i64: 1, 49, 32>}, {pipeline_mode = #tpu.pipeline_mode<synchronous>, transform_indices = @transform_1, window_bounds = array<i64: 32, 128>}, {pipeline_mode = #tpu.pipeline_mode<synchronous>, transform_indices = @transform_2, window_bounds = array<i64: 1, 128>}, {pipeline_mode = #tpu.pipeline_mode<synchronous>, transform_indices = @transform_3, window_bounds = array<i64: 1, 128>}, {transform_indices = @transform_4, window_bounds = array<i64: 1, 49, 128>}]} {
    %c0 = arith.constant 0 : index
    %c0_0 = arith.constant 0 : index
    %c0_1 = arith.constant 0 : index
    %0 = vector.load %arg1[%c0, %c0_0, %c0_1] : memref<1x49x32xbf16, #tpu.memory_space<vmem>>, vector<1x49x32xbf16>
    %1 = vector.shape_cast %0 : vector<1x49x32xbf16> to vector<49x32xbf16>
    %c0_2 = arith.constant 0 : index
    %c0_3 = arith.constant 0 : index
    %2 = vector.load %arg2[%c0_2, %c0_3] : memref<32x128xbf16, #tpu.memory_space<vmem>>, vector<32x128xbf16>
    %cst = arith.constant dense<0.000000e+00> : vector<49x128xf32>
    %3 = tpu.matmul %1, %2, %cst {dimension_numbers = #tpu.dot_dimension_numbers<[1], [0], [0], [1], [0, 0, 1, 1], [], []>} : vector<49x32xbf16>, vector<32x128xbf16>, vector<49x128xf32> -> vector<49x128xf32>
    %cst_4 = arith.constant dense<0.000000e+00> : vector<128xf32>
    %4 = vector.multi_reduction <add>, %3, %cst_4 [0] : vector<49x128xf32> to vector<128xf32>
    %5 = vector.shape_cast %4 : vector<128xf32> to vector<1x128xf32>
    %6 = arith.mulf %3, %3 : vector<49x128xf32>
    %cst_5 = arith.constant dense<0.000000e+00> : vector<128xf32>
    %7 = vector.multi_reduction <add>, %6, %cst_5 [0] : vector<49x128xf32> to vector<128xf32>
    %8 = vector.shape_cast %7 : vector<128xf32> to vector<1x128xf32>
    %cst_6 = arith.constant 0.0204081628 : f32
    %9 = vector.broadcast %cst_6 : f32 to vector<1x128xf32>
    %10 = arith.mulf %5, %9 : vector<1x128xf32>
    %cst_7 = arith.constant 0.0204081628 : f32
    %11 = vector.broadcast %cst_7 : f32 to vector<1x128xf32>
    %12 = arith.mulf %8, %11 : vector<1x128xf32>
    %13 = arith.mulf %10, %10 : vector<1x128xf32>
    %14 = arith.subf %12, %13 : vector<1x128xf32>
    %cst_8 = arith.constant 9.99999974E-6 : f32
    %15 = vector.broadcast %cst_8 : f32 to vector<1x128xf32>
    %16 = arith.addf %14, %15 : vector<1x128xf32>
    %17 = math.rsqrt %16 : vector<1x128xf32>
    %18 = vector.broadcast %10 : vector<1x128xf32> to vector<49x128xf32>
    %19 = arith.subf %3, %18 : vector<49x128xf32>
    %c0_9 = arith.constant 0 : index
    %c0_10 = arith.constant 0 : index
    %20 = vector.load %arg3[%c0_9, %c0_10] : memref<1x128xf32, #tpu.memory_space<vmem>>, vector<1x128xf32>
    %21 = arith.mulf %17, %20 : vector<1x128xf32>
    %22 = vector.broadcast %21 : vector<1x128xf32> to vector<49x128xf32>
    %23 = arith.mulf %19, %22 : vector<49x128xf32>
    %c0_11 = arith.constant 0 : index
    %c0_12 = arith.constant 0 : index
    %24 = vector.load %arg4[%c0_11, %c0_12] : memref<1x128xf32, #tpu.memory_space<vmem>>, vector<1x128xf32>
    %25 = vector.broadcast %24 : vector<1x128xf32> to vector<49x128xf32>
    %26 = arith.addf %23, %25 : vector<49x128xf32>
    %c0_13 = arith.constant 0 : index
    %c0_14 = arith.constant 0 : index
    %c0_15 = arith.constant 0 : index
    %27 = vector.load %arg5[%c0_13, %c0_14, %c0_15] : memref<1x49x128xf32, #tpu.memory_space<vmem>>, vector<1x49x128xf32>
    %28 = vector.shape_cast %27 : vector<1x49x128xf32> to vector<49x128xf32>
    %29 = vector.shape_cast %26 : vector<49x128xf32> to vector<1x49x128xf32>
    tpu.vector_store %arg5[%c0_13, %c0_14, %c0_15], %29 {strides = array<i32>} : memref<1x49x128xf32, #tpu.memory_space<vmem>>, vector<1x49x128xf32>,
    return
  }
  func.func @transform_0(%arg0: i32) -> (i32, i32, i32) {
    %c0_i32 = arith.constant 0 : i32
    %c0_i32_0 = arith.constant 0 : i32
    %c0_i32_1 = arith.constant 0 : i32
    return %arg0, %c0_i32, %c0_i32_0 : i32, i32, i32
  }
  func.func @transform_1(%arg0: i32) -> (i32, i32) {
    %c0_i32 = arith.constant 0 : i32
    %c0_i32_0 = arith.constant 0 : i32
    %c0_i32_1 = arith.constant 0 : i32
    return %c0_i32, %c0_i32_0 : i32, i32
  }
  func.func @transform_2(%arg0: i32) -> (i32, i32) {
    %c0_i32 = arith.constant 0 : i32
    %c0_i32_0 = arith.constant 0 : i32
    %c0_i32_1 = arith.constant 0 : i32
    return %c0_i32, %c0_i32_0 : i32, i32
  }
  func.func @transform_3(%arg0: i32) -> (i32, i32) {
    %c0_i32 = arith.constant 0 : i32
    %c0_i32_0 = arith.constant 0 : i32
    %c0_i32_1 = arith.constant 0 : i32
    return %c0_i32, %c0_i32_0 : i32, i32
  }
  func.func @transform_4(%arg0: i32) -> (i32, i32, i32) {
    %c0_i32 = arith.constant 0 : i32
    %c0_i32_0 = arith.constant 0 : i32
    %c0_i32_1 = arith.constant 0 : i32
    return %arg0, %c0_i32, %c0_i32_0 : i32, i32, i32
  }
}

module attributes {stable_mosaic.version = 11 : i64} {
  func.func @kernel(%arg0: i32, %arg1: memref<1x49x32xbf16, #tpu.memory_space<vmem>>, %arg2: memref<32x128xbf16, #tpu.memory_space<vmem>>, %arg3: memref<1x49x128xf32, #tpu.memory_space<vmem>>, %arg4: memref<128x32xf32, #tpu.memory_space<vmem>>, %arg5: memref<32x128xf32, #tpu.memory_space<vmem>>, %arg6: memref<1x128xf32, #tpu.memory_space<vmem>>, %arg7: memref<1x128xf32, #tpu.memory_space<vmem>>, %arg8: memref<1x49x128xf32, #tpu.memory_space<vmem>>) attributes {dimension_semantics = [#tpu.dimension_semantics<parallel>], iteration_bounds = array<i64: 2>, scalar_prefetch = 0 : i64, scratch_operands = 0 : i64, tpu.core_type = #tpu.core_type<tc>, window_params = [{transform_indices = @transform_0, window_bounds = array<i64: 1, 49, 32>}, {pipeline_mode = #tpu.pipeline_mode<synchronous>, transform_indices = @transform_1, window_bounds = array<i64: 32, 128>}, {transform_indices = @transform_2, window_bounds = array<i64: 1, 49, 128>}, {pipeline_mode = #tpu.pipeline_mode<synchronous>, transform_indices = @transform_3, window_bounds = array<i64: 128, 32>}, {pipeline_mode = #tpu.pipeline_mode<synchronous>, transform_indices = @transform_4, window_bounds = array<i64: 32, 128>}, {pipeline_mode = #tpu.pipeline_mode<synchronous>, transform_indices = @transform_5, window_bounds = array<i64: 1, 128>}, {pipeline_mode = #tpu.pipeline_mode<synchronous>, transform_indices = @transform_6, window_bounds = array<i64: 1, 128>}, {transform_indices = @transform_7, window_bounds = array<i64: 1, 49, 128>}]} {
    %c0 = arith.constant 0 : index
    %c0_0 = arith.constant 0 : index
    %c0_1 = arith.constant 0 : index
    %0 = vector.load %arg1[%c0, %c0_0, %c0_1] : memref<1x49x32xbf16, #tpu.memory_space<vmem>>, vector<1x49x32xbf16>
    %1 = vector.shape_cast %0 : vector<1x49x32xbf16> to vector<49x32xbf16>
    %c0_2 = arith.constant 0 : index
    %c0_3 = arith.constant 0 : index
    %2 = vector.load %arg2[%c0_2, %c0_3] : memref<32x128xbf16, #tpu.memory_space<vmem>>, vector<32x128xbf16>
    %cst = arith.constant dense<0.000000e+00> : vector<49x128xf32>
    %3 = tpu.matmul %1, %2, %cst {dimension_numbers = #tpu.dot_dimension_numbers<[1], [0], [0], [1], [0, 0, 1, 1], [], []>} : vector<49x32xbf16>, vector<32x128xbf16>, vector<49x128xf32> -> vector<49x128xf32>
    %cst_4 = arith.constant dense<0.000000e+00> : vector<128xf32>
    %4 = vector.multi_reduction <add>, %3, %cst_4 [0] : vector<49x128xf32> to vector<128xf32>
    %5 = vector.shape_cast %4 : vector<128xf32> to vector<1x128xf32>
    %6 = arith.mulf %3, %3 : vector<49x128xf32>
    %cst_5 = arith.constant dense<0.000000e+00> : vector<128xf32>
    %7 = vector.multi_reduction <add>, %6, %cst_5 [0] : vector<49x128xf32> to vector<128xf32>
    %8 = vector.shape_cast %7 : vector<128xf32> to vector<1x128xf32>
    %c0_6 = arith.constant 0 : index
    %c0_7 = arith.constant 0 : index
    %9 = vector.load %arg4[%c0_6, %c0_7] : memref<128x32xf32, #tpu.memory_space<vmem>>, vector<128x32xf32>
    %cst_8 = arith.constant dense<0.000000e+00> : vector<1x32xf32>
    %10 = tpu.matmul %5, %9, %cst_8 {dimension_numbers = #tpu.dot_dimension_numbers<[1], [0], [0], [1], [0, 0, 1, 1], [], []>} : vector<1x128xf32>, vector<128x32xf32>, vector<1x32xf32> -> vector<1x32xf32>
    %c0_9 = arith.constant 0 : index
    %c0_10 = arith.constant 0 : index
    %11 = vector.load %arg4[%c0_9, %c0_10] : memref<128x32xf32, #tpu.memory_space<vmem>>, vector<128x32xf32>
    %cst_11 = arith.constant dense<0.000000e+00> : vector<1x32xf32>
    %12 = tpu.matmul %8, %11, %cst_11 {dimension_numbers = #tpu.dot_dimension_numbers<[1], [0], [0], [1], [0, 0, 1, 1], [], []>} : vector<1x128xf32>, vector<128x32xf32>, vector<1x32xf32> -> vector<1x32xf32>
    %c0_12 = arith.constant 0 : index
    %c0_13 = arith.constant 0 : index
    %13 = vector.load %arg5[%c0_12, %c0_13] : memref<32x128xf32, #tpu.memory_space<vmem>>, vector<32x128xf32>
    %cst_14 = arith.constant dense<0.000000e+00> : vector<1x128xf32>
    %14 = tpu.matmul %10, %13, %cst_14 {dimension_numbers = #tpu.dot_dimension_numbers<[1], [0], [0], [1], [0, 0, 1, 1], [], []>} : vector<1x32xf32>, vector<32x128xf32>, vector<1x128xf32> -> vector<1x128xf32>
    %cst_15 = arith.constant 0.00510204071 : f32
    %15 = vector.broadcast %cst_15 : f32 to vector<1x128xf32>
    %16 = arith.mulf %14, %15 : vector<1x128xf32>
    %c0_16 = arith.constant 0 : index
    %c0_17 = arith.constant 0 : index
    %17 = vector.load %arg5[%c0_16, %c0_17] : memref<32x128xf32, #tpu.memory_space<vmem>>, vector<32x128xf32>
    %cst_18 = arith.constant dense<0.000000e+00> : vector<1x128xf32>
    %18 = tpu.matmul %12, %17, %cst_18 {dimension_numbers = #tpu.dot_dimension_numbers<[1], [0], [0], [1], [0, 0, 1, 1], [], []>} : vector<1x32xf32>, vector<32x128xf32>, vector<1x128xf32> -> vector<1x128xf32>
    %cst_19 = arith.constant 0.00510204071 : f32
    %19 = vector.broadcast %cst_19 : f32 to vector<1x128xf32>
    %20 = arith.mulf %18, %19 : vector<1x128xf32>
    %21 = arith.mulf %16, %16 : vector<1x128xf32>
    %22 = arith.subf %20, %21 : vector<1x128xf32>
    %cst_20 = arith.constant 9.99999997E-7 : f32
    %23 = vector.broadcast %cst_20 : f32 to vector<1x128xf32>
    %24 = arith.addf %22, %23 : vector<1x128xf32>
    %25 = math.rsqrt %24 : vector<1x128xf32>
    %26 = vector.broadcast %16 : vector<1x128xf32> to vector<49x128xf32>
    %27 = arith.subf %3, %26 : vector<49x128xf32>
    %c0_21 = arith.constant 0 : index
    %c0_22 = arith.constant 0 : index
    %28 = vector.load %arg6[%c0_21, %c0_22] : memref<1x128xf32, #tpu.memory_space<vmem>>, vector<1x128xf32>
    %29 = arith.mulf %25, %28 : vector<1x128xf32>
    %30 = vector.broadcast %29 : vector<1x128xf32> to vector<49x128xf32>
    %31 = arith.mulf %27, %30 : vector<49x128xf32>
    %c0_23 = arith.constant 0 : index
    %c0_24 = arith.constant 0 : index
    %32 = vector.load %arg7[%c0_23, %c0_24] : memref<1x128xf32, #tpu.memory_space<vmem>>, vector<1x128xf32>
    %33 = vector.broadcast %32 : vector<1x128xf32> to vector<49x128xf32>
    %34 = arith.addf %31, %33 : vector<49x128xf32>
    %c0_25 = arith.constant 0 : index
    %c0_26 = arith.constant 0 : index
    %c0_27 = arith.constant 0 : index
    %35 = vector.load %arg3[%c0_25, %c0_26, %c0_27] : memref<1x49x128xf32, #tpu.memory_space<vmem>>, vector<1x49x128xf32>
    %36 = vector.shape_cast %35 : vector<1x49x128xf32> to vector<49x128xf32>
    %37 = arith.addf %34, %36 : vector<49x128xf32>
    %cst_28 = arith.constant 0.000000e+00 : f32
    %38 = vector.broadcast %cst_28 : f32 to vector<49x128xf32>
    %39 = arith.maximumf %37, %38 : vector<49x128xf32>
    %c0_29 = arith.constant 0 : index
    %c0_30 = arith.constant 0 : index
    %c0_31 = arith.constant 0 : index
    %40 = vector.load %arg8[%c0_29, %c0_30, %c0_31] : memref<1x49x128xf32, #tpu.memory_space<vmem>>, vector<1x49x128xf32>
    %41 = vector.shape_cast %40 : vector<1x49x128xf32> to vector<49x128xf32>
    %42 = vector.shape_cast %39 : vector<49x128xf32> to vector<1x49x128xf32>
    tpu.vector_store %arg8[%c0_29, %c0_30, %c0_31], %42 {strides = array<i32>} : memref<1x49x128xf32, #tpu.memory_space<vmem>>, vector<1x49x128xf32>,
    return
  }
  func.func @transform_0(%arg0: i32) -> (i32, i32, i32) {
    %c0_i32 = arith.constant 0 : i32
    %c0_i32_0 = arith.constant 0 : i32
    %c0_i32_1 = arith.constant 0 : i32
    return %arg0, %c0_i32, %c0_i32_0 : i32, i32, i32
  }
  func.func @transform_1(%arg0: i32) -> (i32, i32) {
    %c0_i32 = arith.constant 0 : i32
    %c0_i32_0 = arith.constant 0 : i32
    %c0_i32_1 = arith.constant 0 : i32
    return %c0_i32, %c0_i32_0 : i32, i32
  }
  func.func @transform_2(%arg0: i32) -> (i32, i32, i32) {
    %c0_i32 = arith.constant 0 : i32
    %c0_i32_0 = arith.constant 0 : i32
    %c0_i32_1 = arith.constant 0 : i32
    return %arg0, %c0_i32, %c0_i32_0 : i32, i32, i32
  }
  func.func @transform_3(%arg0: i32) -> (i32, i32) {
    %c0_i32 = arith.constant 0 : i32
    %c0_i32_0 = arith.constant 0 : i32
    %c0_i32_1 = arith.constant 0 : i32
    return %c0_i32, %c0_i32_0 : i32, i32
  }
  func.func @transform_4(%arg0: i32) -> (i32, i32) {
    %c0_i32 = arith.constant 0 : i32
    %c0_i32_0 = arith.constant 0 : i32
    %c0_i32_1 = arith.constant 0 : i32
    return %c0_i32, %c0_i32_0 : i32, i32
  }
  func.func @transform_5(%arg0: i32) -> (i32, i32) {
    %c0_i32 = arith.constant 0 : i32
    %c0_i32_0 = arith.constant 0 : i32
    %c0_i32_1 = arith.constant 0 : i32
    return %c0_i32, %c0_i32_0 : i32, i32
  }
  func.func @transform_6(%arg0: i32) -> (i32, i32) {
    %c0_i32 = arith.constant 0 : i32
    %c0_i32_0 = arith.constant 0 : i32
    %c0_i32_1 = arith.constant 0 : i32
    return %c0_i32, %c0_i32_0 : i32, i32
  }
  func.func @transform_7(%arg0: i32) -> (i32, i32, i32) {
    %c0_i32 = arith.constant 0 : i32
    %c0_i32_0 = arith.constant 0 : i32
    %c0_i32_1 = arith.constant 0 : i32
    return %arg0, %c0_i32, %c0_i32_0 : i32, i32, i32
  }
}

module attributes {stable_mosaic.version = 11 : i64} {
  func.func @kernel(%arg0: i32, %arg1: memref<1x49x128xbf16, #tpu.memory_space<vmem>>, %arg2: memref<128x64xbf16, #tpu.memory_space<vmem>>, %arg3: memref<64x32xf32, #tpu.memory_space<vmem>>, %arg4: memref<32x64xf32, #tpu.memory_space<vmem>>, %arg5: memref<1x64xf32, #tpu.memory_space<vmem>>, %arg6: memref<1x64xf32, #tpu.memory_space<vmem>>, %arg7: memref<1x49x64xf32, #tpu.memory_space<vmem>>) attributes {dimension_semantics = [#tpu.dimension_semantics<parallel>], iteration_bounds = array<i64: 2>, scalar_prefetch = 0 : i64, scratch_operands = 0 : i64, tpu.core_type = #tpu.core_type<tc>, window_params = [{transform_indices = @transform_0, window_bounds = array<i64: 1, 49, 128>}, {pipeline_mode = #tpu.pipeline_mode<synchronous>, transform_indices = @transform_1, window_bounds = array<i64: 128, 64>}, {pipeline_mode = #tpu.pipeline_mode<synchronous>, transform_indices = @transform_2, window_bounds = array<i64: 64, 32>}, {pipeline_mode = #tpu.pipeline_mode<synchronous>, transform_indices = @transform_3, window_bounds = array<i64: 32, 64>}, {pipeline_mode = #tpu.pipeline_mode<synchronous>, transform_indices = @transform_4, window_bounds = array<i64: 1, 64>}, {pipeline_mode = #tpu.pipeline_mode<synchronous>, transform_indices = @transform_5, window_bounds = array<i64: 1, 64>}, {transform_indices = @transform_6, window_bounds = array<i64: 1, 49, 64>}]} {
    %c0 = arith.constant 0 : index
    %c0_0 = arith.constant 0 : index
    %c0_1 = arith.constant 0 : index
    %0 = vector.load %arg1[%c0, %c0_0, %c0_1] : memref<1x49x128xbf16, #tpu.memory_space<vmem>>, vector<1x49x128xbf16>
    %1 = vector.shape_cast %0 : vector<1x49x128xbf16> to vector<49x128xbf16>
    %c0_2 = arith.constant 0 : index
    %c0_3 = arith.constant 0 : index
    %2 = vector.load %arg2[%c0_2, %c0_3] : memref<128x64xbf16, #tpu.memory_space<vmem>>, vector<128x64xbf16>
    %cst = arith.constant dense<0.000000e+00> : vector<49x64xf32>
    %3 = tpu.matmul %1, %2, %cst {dimension_numbers = #tpu.dot_dimension_numbers<[1], [0], [0], [1], [0, 0, 1, 1], [], []>} : vector<49x128xbf16>, vector<128x64xbf16>, vector<49x64xf32> -> vector<49x64xf32>
    %cst_4 = arith.constant dense<0.000000e+00> : vector<64xf32>
    %4 = vector.multi_reduction <add>, %3, %cst_4 [0] : vector<49x64xf32> to vector<64xf32>
    %5 = vector.shape_cast %4 : vector<64xf32> to vector<1x64xf32>
    %6 = arith.mulf %3, %3 : vector<49x64xf32>
    %cst_5 = arith.constant dense<0.000000e+00> : vector<64xf32>
    %7 = vector.multi_reduction <add>, %6, %cst_5 [0] : vector<49x64xf32> to vector<64xf32>
    %8 = vector.shape_cast %7 : vector<64xf32> to vector<1x64xf32>
    %c0_6 = arith.constant 0 : index
    %c0_7 = arith.constant 0 : index
    %9 = vector.load %arg3[%c0_6, %c0_7] : memref<64x32xf32, #tpu.memory_space<vmem>>, vector<64x32xf32>
    %cst_8 = arith.constant dense<0.000000e+00> : vector<1x32xf32>
    %10 = tpu.matmul %5, %9, %cst_8 {dimension_numbers = #tpu.dot_dimension_numbers<[1], [0], [0], [1], [0, 0, 1, 1], [], []>} : vector<1x64xf32>, vector<64x32xf32>, vector<1x32xf32> -> vector<1x32xf32>
    %c0_9 = arith.constant 0 : index
    %c0_10 = arith.constant 0 : index
    %11 = vector.load %arg3[%c0_9, %c0_10] : memref<64x32xf32, #tpu.memory_space<vmem>>, vector<64x32xf32>
    %cst_11 = arith.constant dense<0.000000e+00> : vector<1x32xf32>
    %12 = tpu.matmul %8, %11, %cst_11 {dimension_numbers = #tpu.dot_dimension_numbers<[1], [0], [0], [1], [0, 0, 1, 1], [], []>} : vector<1x64xf32>, vector<64x32xf32>, vector<1x32xf32> -> vector<1x32xf32>
    %c0_12 = arith.constant 0 : index
    %c0_13 = arith.constant 0 : index
    %13 = vector.load %arg4[%c0_12, %c0_13] : memref<32x64xf32, #tpu.memory_space<vmem>>, vector<32x64xf32>
    %cst_14 = arith.constant dense<0.000000e+00> : vector<1x64xf32>
    %14 = tpu.matmul %10, %13, %cst_14 {dimension_numbers = #tpu.dot_dimension_numbers<[1], [0], [0], [1], [0, 0, 1, 1], [], []>} : vector<1x32xf32>, vector<32x64xf32>, vector<1x64xf32> -> vector<1x64xf32>
    %cst_15 = arith.constant 0.0102040814 : f32
    %15 = vector.broadcast %cst_15 : f32 to vector<1x64xf32>
    %16 = arith.mulf %14, %15 : vector<1x64xf32>
    %c0_16 = arith.constant 0 : index
    %c0_17 = arith.constant 0 : index
    %17 = vector.load %arg4[%c0_16, %c0_17] : memref<32x64xf32, #tpu.memory_space<vmem>>, vector<32x64xf32>
    %cst_18 = arith.constant dense<0.000000e+00> : vector<1x64xf32>
    %18 = tpu.matmul %12, %17, %cst_18 {dimension_numbers = #tpu.dot_dimension_numbers<[1], [0], [0], [1], [0, 0, 1, 1], [], []>} : vector<1x32xf32>, vector<32x64xf32>, vector<1x64xf32> -> vector<1x64xf32>
    %cst_19 = arith.constant 0.0102040814 : f32
    %19 = vector.broadcast %cst_19 : f32 to vector<1x64xf32>
    %20 = arith.mulf %18, %19 : vector<1x64xf32>
    %21 = arith.mulf %16, %16 : vector<1x64xf32>
    %22 = arith.subf %20, %21 : vector<1x64xf32>
    %cst_20 = arith.constant 9.99999997E-7 : f32
    %23 = vector.broadcast %cst_20 : f32 to vector<1x64xf32>
    %24 = arith.addf %22, %23 : vector<1x64xf32>
    %25 = math.rsqrt %24 : vector<1x64xf32>
    %26 = vector.broadcast %16 : vector<1x64xf32> to vector<49x64xf32>
    %27 = arith.subf %3, %26 : vector<49x64xf32>
    %c0_21 = arith.constant 0 : index
    %c0_22 = arith.constant 0 : index
    %28 = vector.load %arg5[%c0_21, %c0_22] : memref<1x64xf32, #tpu.memory_space<vmem>>, vector<1x64xf32>
    %29 = arith.mulf %25, %28 : vector<1x64xf32>
    %30 = vector.broadcast %29 : vector<1x64xf32> to vector<49x64xf32>
    %31 = arith.mulf %27, %30 : vector<49x64xf32>
    %c0_23 = arith.constant 0 : index
    %c0_24 = arith.constant 0 : index
    %32 = vector.load %arg6[%c0_23, %c0_24] : memref<1x64xf32, #tpu.memory_space<vmem>>, vector<1x64xf32>
    %33 = vector.broadcast %32 : vector<1x64xf32> to vector<49x64xf32>
    %34 = arith.addf %31, %33 : vector<49x64xf32>
    %cst_25 = arith.constant 0.000000e+00 : f32
    %35 = vector.broadcast %cst_25 : f32 to vector<49x64xf32>
    %36 = arith.maximumf %34, %35 : vector<49x64xf32>
    %c0_26 = arith.constant 0 : index
    %c0_27 = arith.constant 0 : index
    %c0_28 = arith.constant 0 : index
    %37 = vector.load %arg7[%c0_26, %c0_27, %c0_28] : memref<1x49x64xf32, #tpu.memory_space<vmem>>, vector<1x49x64xf32>
    %38 = vector.shape_cast %37 : vector<1x49x64xf32> to vector<49x64xf32>
    %39 = vector.shape_cast %36 : vector<49x64xf32> to vector<1x49x64xf32>
    tpu.vector_store %arg7[%c0_26, %c0_27, %c0_28], %39 {strides = array<i32>} : memref<1x49x64xf32, #tpu.memory_space<vmem>>, vector<1x49x64xf32>,
    return
  }
  func.func @transform_0(%arg0: i32) -> (i32, i32, i32) {
    %c0_i32 = arith.constant 0 : i32
    %c0_i32_0 = arith.constant 0 : i32
    %c0_i32_1 = arith.constant 0 : i32
    return %arg0, %c0_i32, %c0_i32_0 : i32, i32, i32
  }
  func.func @transform_1(%arg0: i32) -> (i32, i32) {
    %c0_i32 = arith.constant 0 : i32
    %c0_i32_0 = arith.constant 0 : i32
    %c0_i32_1 = arith.constant 0 : i32
    return %c0_i32, %c0_i32_0 : i32, i32
  }
  func.func @transform_2(%arg0: i32) -> (i32, i32) {
    %c0_i32 = arith.constant 0 : i32
    %c0_i32_0 = arith.constant 0 : i32
    %c0_i32_1 = arith.constant 0 : i32
    return %c0_i32, %c0_i32_0 : i32, i32
  }
  func.func @transform_3(%arg0: i32) -> (i32, i32) {
    %c0_i32 = arith.constant 0 : i32
    %c0_i32_0 = arith.constant 0 : i32
    %c0_i32_1 = arith.constant 0 : i32
    return %c0_i32, %c0_i32_0 : i32, i32
  }
  func.func @transform_4(%arg0: i32) -> (i32, i32) {
    %c0_i32 = arith.constant 0 : i32
    %c0_i32_0 = arith.constant 0 : i32
    %c0_i32_1 = arith.constant 0 : i32
    return %c0_i32, %c0_i32_0 : i32, i32
  }
  func.func @transform_5(%arg0: i32) -> (i32, i32) {
    %c0_i32 = arith.constant 0 : i32
    %c0_i32_0 = arith.constant 0 : i32
    %c0_i32_1 = arith.constant 0 : i32
    return %c0_i32, %c0_i32_0 : i32, i32
  }
  func.func @transform_6(%arg0: i32) -> (i32, i32, i32) {
    %c0_i32 = arith.constant 0 : i32
    %c0_i32_0 = arith.constant 0 : i32
    %c0_i32_1 = arith.constant 0 : i32
    return %arg0, %c0_i32, %c0_i32_0 : i32, i32, i32
  }
}

module attributes {stable_mosaic.version = 11 : i64} {
  func.func @kernel(%arg0: i32, %arg1: memref<1x16x576xbf16, #tpu.memory_space<vmem>>, %arg2: memref<576x64xbf16, #tpu.memory_space<vmem>>, %arg3: memref<64x32xf32, #tpu.memory_space<vmem>>, %arg4: memref<32x64xf32, #tpu.memory_space<vmem>>, %arg5: memref<1x64xf32, #tpu.memory_space<vmem>>, %arg6: memref<1x64xf32, #tpu.memory_space<vmem>>, %arg7: memref<1x16x64xf32, #tpu.memory_space<vmem>>) attributes {dimension_semantics = [#tpu.dimension_semantics<parallel>], iteration_bounds = array<i64: 2>, scalar_prefetch = 0 : i64, scratch_operands = 0 : i64, tpu.core_type = #tpu.core_type<tc>, window_params = [{transform_indices = @transform_0, window_bounds = array<i64: 1, 16, 576>}, {pipeline_mode = #tpu.pipeline_mode<synchronous>, transform_indices = @transform_1, window_bounds = array<i64: 576, 64>}, {pipeline_mode = #tpu.pipeline_mode<synchronous>, transform_indices = @transform_2, window_bounds = array<i64: 64, 32>}, {pipeline_mode = #tpu.pipeline_mode<synchronous>, transform_indices = @transform_3, window_bounds = array<i64: 32, 64>}, {pipeline_mode = #tpu.pipeline_mode<synchronous>, transform_indices = @transform_4, window_bounds = array<i64: 1, 64>}, {pipeline_mode = #tpu.pipeline_mode<synchronous>, transform_indices = @transform_5, window_bounds = array<i64: 1, 64>}, {transform_indices = @transform_6, window_bounds = array<i64: 1, 16, 64>}]} {
    %c0 = arith.constant 0 : index
    %c0_0 = arith.constant 0 : index
    %c0_1 = arith.constant 0 : index
    %0 = vector.load %arg1[%c0, %c0_0, %c0_1] : memref<1x16x576xbf16, #tpu.memory_space<vmem>>, vector<1x16x576xbf16>
    %1 = vector.shape_cast %0 : vector<1x16x576xbf16> to vector<16x576xbf16>
    %c0_2 = arith.constant 0 : index
    %c0_3 = arith.constant 0 : index
    %2 = vector.load %arg2[%c0_2, %c0_3] : memref<576x64xbf16, #tpu.memory_space<vmem>>, vector<576x64xbf16>
    %cst = arith.constant dense<0.000000e+00> : vector<16x64xf32>
    %3 = tpu.matmul %1, %2, %cst {dimension_numbers = #tpu.dot_dimension_numbers<[1], [0], [0], [1], [0, 0, 1, 1], [], []>} : vector<16x576xbf16>, vector<576x64xbf16>, vector<16x64xf32> -> vector<16x64xf32>
    %cst_4 = arith.constant dense<0.000000e+00> : vector<64xf32>
    %4 = vector.multi_reduction <add>, %3, %cst_4 [0] : vector<16x64xf32> to vector<64xf32>
    %5 = vector.shape_cast %4 : vector<64xf32> to vector<1x64xf32>
    %6 = arith.mulf %3, %3 : vector<16x64xf32>
    %cst_5 = arith.constant dense<0.000000e+00> : vector<64xf32>
    %7 = vector.multi_reduction <add>, %6, %cst_5 [0] : vector<16x64xf32> to vector<64xf32>
    %8 = vector.shape_cast %7 : vector<64xf32> to vector<1x64xf32>
    %c0_6 = arith.constant 0 : index
    %c0_7 = arith.constant 0 : index
    %9 = vector.load %arg3[%c0_6, %c0_7] : memref<64x32xf32, #tpu.memory_space<vmem>>, vector<64x32xf32>
    %cst_8 = arith.constant dense<0.000000e+00> : vector<1x32xf32>
    %10 = tpu.matmul %5, %9, %cst_8 {dimension_numbers = #tpu.dot_dimension_numbers<[1], [0], [0], [1], [0, 0, 1, 1], [], []>} : vector<1x64xf32>, vector<64x32xf32>, vector<1x32xf32> -> vector<1x32xf32>
    %c0_9 = arith.constant 0 : index
    %c0_10 = arith.constant 0 : index
    %11 = vector.load %arg3[%c0_9, %c0_10] : memref<64x32xf32, #tpu.memory_space<vmem>>, vector<64x32xf32>
    %cst_11 = arith.constant dense<0.000000e+00> : vector<1x32xf32>
    %12 = tpu.matmul %8, %11, %cst_11 {dimension_numbers = #tpu.dot_dimension_numbers<[1], [0], [0], [1], [0, 0, 1, 1], [], []>} : vector<1x64xf32>, vector<64x32xf32>, vector<1x32xf32> -> vector<1x32xf32>
    %c0_12 = arith.constant 0 : index
    %c0_13 = arith.constant 0 : index
    %13 = vector.load %arg4[%c0_12, %c0_13] : memref<32x64xf32, #tpu.memory_space<vmem>>, vector<32x64xf32>
    %cst_14 = arith.constant dense<0.000000e+00> : vector<1x64xf32>
    %14 = tpu.matmul %10, %13, %cst_14 {dimension_numbers = #tpu.dot_dimension_numbers<[1], [0], [0], [1], [0, 0, 1, 1], [], []>} : vector<1x32xf32>, vector<32x64xf32>, vector<1x64xf32> -> vector<1x64xf32>
    %cst_15 = arith.constant 3.125000e-02 : f32
    %15 = vector.broadcast %cst_15 : f32 to vector<1x64xf32>
    %16 = arith.mulf %14, %15 : vector<1x64xf32>
    %c0_16 = arith.constant 0 : index
    %c0_17 = arith.constant 0 : index
    %17 = vector.load %arg4[%c0_16, %c0_17] : memref<32x64xf32, #tpu.memory_space<vmem>>, vector<32x64xf32>
    %cst_18 = arith.constant dense<0.000000e+00> : vector<1x64xf32>
    %18 = tpu.matmul %12, %17, %cst_18 {dimension_numbers = #tpu.dot_dimension_numbers<[1], [0], [0], [1], [0, 0, 1, 1], [], []>} : vector<1x32xf32>, vector<32x64xf32>, vector<1x64xf32> -> vector<1x64xf32>
    %cst_19 = arith.constant 3.125000e-02 : f32
    %19 = vector.broadcast %cst_19 : f32 to vector<1x64xf32>
    %20 = arith.mulf %18, %19 : vector<1x64xf32>
    %21 = arith.mulf %16, %16 : vector<1x64xf32>
    %22 = arith.subf %20, %21 : vector<1x64xf32>
    %cst_20 = arith.constant 9.99999997E-7 : f32
    %23 = vector.broadcast %cst_20 : f32 to vector<1x64xf32>
    %24 = arith.addf %22, %23 : vector<1x64xf32>
    %25 = math.rsqrt %24 : vector<1x64xf32>
    %26 = vector.broadcast %16 : vector<1x64xf32> to vector<16x64xf32>
    %27 = arith.subf %3, %26 : vector<16x64xf32>
    %c0_21 = arith.constant 0 : index
    %c0_22 = arith.constant 0 : index
    %28 = vector.load %arg5[%c0_21, %c0_22] : memref<1x64xf32, #tpu.memory_space<vmem>>, vector<1x64xf32>
    %29 = arith.mulf %25, %28 : vector<1x64xf32>
    %30 = vector.broadcast %29 : vector<1x64xf32> to vector<16x64xf32>
    %31 = arith.mulf %27, %30 : vector<16x64xf32>
    %c0_23 = arith.constant 0 : index
    %c0_24 = arith.constant 0 : index
    %32 = vector.load %arg6[%c0_23, %c0_24] : memref<1x64xf32, #tpu.memory_space<vmem>>, vector<1x64xf32>
    %33 = vector.broadcast %32 : vector<1x64xf32> to vector<16x64xf32>
    %34 = arith.addf %31, %33 : vector<16x64xf32>
    %cst_25 = arith.constant 0.000000e+00 : f32
    %35 = vector.broadcast %cst_25 : f32 to vector<16x64xf32>
    %36 = arith.maximumf %34, %35 : vector<16x64xf32>
    %c0_26 = arith.constant 0 : index
    %c0_27 = arith.constant 0 : index
    %c0_28 = arith.constant 0 : index
    %37 = vector.load %arg7[%c0_26, %c0_27, %c0_28] : memref<1x16x64xf32, #tpu.memory_space<vmem>>, vector<1x16x64xf32>
    %38 = vector.shape_cast %37 : vector<1x16x64xf32> to vector<16x64xf32>
    %39 = vector.shape_cast %36 : vector<16x64xf32> to vector<1x16x64xf32>
    tpu.vector_store %arg7[%c0_26, %c0_27, %c0_28], %39 {strides = array<i32>} : memref<1x16x64xf32, #tpu.memory_space<vmem>>, vector<1x16x64xf32>,
    return
  }
  func.func @transform_0(%arg0: i32) -> (i32, i32, i32) {
    %c0_i32 = arith.constant 0 : i32
    %c0_i32_0 = arith.constant 0 : i32
    %c0_i32_1 = arith.constant 0 : i32
    return %arg0, %c0_i32, %c0_i32_0 : i32, i32, i32
  }
  func.func @transform_1(%arg0: i32) -> (i32, i32) {
    %c0_i32 = arith.constant 0 : i32
    %c0_i32_0 = arith.constant 0 : i32
    %c0_i32_1 = arith.constant 0 : i32
    return %c0_i32, %c0_i32_0 : i32, i32
  }
  func.func @transform_2(%arg0: i32) -> (i32, i32) {
    %c0_i32 = arith.constant 0 : i32
    %c0_i32_0 = arith.constant 0 : i32
    %c0_i32_1 = arith.constant 0 : i32
    return %c0_i32, %c0_i32_0 : i32, i32
  }
  func.func @transform_3(%arg0: i32) -> (i32, i32) {
    %c0_i32 = arith.constant 0 : i32
    %c0_i32_0 = arith.constant 0 : i32
    %c0_i32_1 = arith.constant 0 : i32
    return %c0_i32, %c0_i32_0 : i32, i32
  }
  func.func @transform_4(%arg0: i32) -> (i32, i32) {
    %c0_i32 = arith.constant 0 : i32
    %c0_i32_0 = arith.constant 0 : i32
    %c0_i32_1 = arith.constant 0 : i32
    return %c0_i32, %c0_i32_0 : i32, i32
  }
  func.func @transform_5(%arg0: i32) -> (i32, i32) {
    %c0_i32 = arith.constant 0 : i32
    %c0_i32_0 = arith.constant 0 : i32
    %c0_i32_1 = arith.constant 0 : i32
    return %c0_i32, %c0_i32_0 : i32, i32
  }
  func.func @transform_6(%arg0: i32) -> (i32, i32, i32) {
    %c0_i32 = arith.constant 0 : i32
    %c0_i32_0 = arith.constant 0 : i32
    %c0_i32_1 = arith.constant 0 : i32
    return %arg0, %c0_i32, %c0_i32_0 : i32, i32, i32
  }
}

module attributes {stable_mosaic.version = 11 : i64} {
  func.func @kernel(%arg0: i32, %arg1: memref<1x16x128xbf16, #tpu.memory_space<vmem>>, %arg2: memref<128x256xbf16, #tpu.memory_space<vmem>>, %arg3: memref<1x256xf32, #tpu.memory_space<vmem>>, %arg4: memref<1x256xf32, #tpu.memory_space<vmem>>, %arg5: memref<1x16x256xf32, #tpu.memory_space<vmem>>) attributes {dimension_semantics = [#tpu.dimension_semantics<parallel>], iteration_bounds = array<i64: 2>, scalar_prefetch = 0 : i64, scratch_operands = 0 : i64, tpu.core_type = #tpu.core_type<tc>, window_params = [{transform_indices = @transform_0, window_bounds = array<i64: 1, 16, 128>}, {pipeline_mode = #tpu.pipeline_mode<synchronous>, transform_indices = @transform_1, window_bounds = array<i64: 128, 256>}, {pipeline_mode = #tpu.pipeline_mode<synchronous>, transform_indices = @transform_2, window_bounds = array<i64: 1, 256>}, {pipeline_mode = #tpu.pipeline_mode<synchronous>, transform_indices = @transform_3, window_bounds = array<i64: 1, 256>}, {transform_indices = @transform_4, window_bounds = array<i64: 1, 16, 256>}]} {
    %c0 = arith.constant 0 : index
    %c0_0 = arith.constant 0 : index
    %c0_1 = arith.constant 0 : index
    %0 = vector.load %arg1[%c0, %c0_0, %c0_1] : memref<1x16x128xbf16, #tpu.memory_space<vmem>>, vector<1x16x128xbf16>
    %1 = vector.shape_cast %0 : vector<1x16x128xbf16> to vector<16x128xbf16>
    %c0_2 = arith.constant 0 : index
    %c0_3 = arith.constant 0 : index
    %2 = vector.load %arg2[%c0_2, %c0_3] : memref<128x256xbf16, #tpu.memory_space<vmem>>, vector<128x256xbf16>
    %cst = arith.constant dense<0.000000e+00> : vector<16x256xf32>
    %3 = tpu.matmul %1, %2, %cst {dimension_numbers = #tpu.dot_dimension_numbers<[1], [0], [0], [1], [0, 0, 1, 1], [], []>} : vector<16x128xbf16>, vector<128x256xbf16>, vector<16x256xf32> -> vector<16x256xf32>
    %cst_4 = arith.constant dense<0.000000e+00> : vector<256xf32>
    %4 = vector.multi_reduction <add>, %3, %cst_4 [0] : vector<16x256xf32> to vector<256xf32>
    %5 = vector.shape_cast %4 : vector<256xf32> to vector<1x256xf32>
    %6 = arith.mulf %3, %3 : vector<16x256xf32>
    %cst_5 = arith.constant dense<0.000000e+00> : vector<256xf32>
    %7 = vector.multi_reduction <add>, %6, %cst_5 [0] : vector<16x256xf32> to vector<256xf32>
    %8 = vector.shape_cast %7 : vector<256xf32> to vector<1x256xf32>
    %cst_6 = arith.constant 6.250000e-02 : f32
    %9 = vector.broadcast %cst_6 : f32 to vector<1x256xf32>
    %10 = arith.mulf %5, %9 : vector<1x256xf32>
    %cst_7 = arith.constant 6.250000e-02 : f32
    %11 = vector.broadcast %cst_7 : f32 to vector<1x256xf32>
    %12 = arith.mulf %8, %11 : vector<1x256xf32>
    %13 = arith.mulf %10, %10 : vector<1x256xf32>
    %14 = arith.subf %12, %13 : vector<1x256xf32>
    %cst_8 = arith.constant 9.99999974E-6 : f32
    %15 = vector.broadcast %cst_8 : f32 to vector<1x256xf32>
    %16 = arith.addf %14, %15 : vector<1x256xf32>
    %17 = math.rsqrt %16 : vector<1x256xf32>
    %18 = vector.broadcast %10 : vector<1x256xf32> to vector<16x256xf32>
    %19 = arith.subf %3, %18 : vector<16x256xf32>
    %c0_9 = arith.constant 0 : index
    %c0_10 = arith.constant 0 : index
    %20 = vector.load %arg3[%c0_9, %c0_10] : memref<1x256xf32, #tpu.memory_space<vmem>>, vector<1x256xf32>
    %21 = arith.mulf %17, %20 : vector<1x256xf32>
    %22 = vector.broadcast %21 : vector<1x256xf32> to vector<16x256xf32>
    %23 = arith.mulf %19, %22 : vector<16x256xf32>
    %c0_11 = arith.constant 0 : index
    %c0_12 = arith.constant 0 : index
    %24 = vector.load %arg4[%c0_11, %c0_12] : memref<1x256xf32, #tpu.memory_space<vmem>>, vector<1x256xf32>
    %25 = vector.broadcast %24 : vector<1x256xf32> to vector<16x256xf32>
    %26 = arith.addf %23, %25 : vector<16x256xf32>
    %c0_13 = arith.constant 0 : index
    %c0_14 = arith.constant 0 : index
    %c0_15 = arith.constant 0 : index
    %27 = vector.load %arg5[%c0_13, %c0_14, %c0_15] : memref<1x16x256xf32, #tpu.memory_space<vmem>>, vector<1x16x256xf32>
    %28 = vector.shape_cast %27 : vector<1x16x256xf32> to vector<16x256xf32>
    %29 = vector.shape_cast %26 : vector<16x256xf32> to vector<1x16x256xf32>
    tpu.vector_store %arg5[%c0_13, %c0_14, %c0_15], %29 {strides = array<i32>} : memref<1x16x256xf32, #tpu.memory_space<vmem>>, vector<1x16x256xf32>,
    return
  }
  func.func @transform_0(%arg0: i32) -> (i32, i32, i32) {
    %c0_i32 = arith.constant 0 : i32
    %c0_i32_0 = arith.constant 0 : i32
    %c0_i32_1 = arith.constant 0 : i32
    return %arg0, %c0_i32, %c0_i32_0 : i32, i32, i32
  }
  func.func @transform_1(%arg0: i32) -> (i32, i32) {
    %c0_i32 = arith.constant 0 : i32
    %c0_i32_0 = arith.constant 0 : i32
    %c0_i32_1 = arith.constant 0 : i32
    return %c0_i32, %c0_i32_0 : i32, i32
  }
  func.func @transform_2(%arg0: i32) -> (i32, i32) {
    %c0_i32 = arith.constant 0 : i32
    %c0_i32_0 = arith.constant 0 : i32
    %c0_i32_1 = arith.constant 0 : i32
    return %c0_i32, %c0_i32_0 : i32, i32
  }
  func.func @transform_3(%arg0: i32) -> (i32, i32) {
    %c0_i32 = arith.constant 0 : i32
    %c0_i32_0 = arith.constant 0 : i32
    %c0_i32_1 = arith.constant 0 : i32
    return %c0_i32, %c0_i32_0 : i32, i32
  }
  func.func @transform_4(%arg0: i32) -> (i32, i32, i32) {
    %c0_i32 = arith.constant 0 : i32
    %c0_i32_0 = arith.constant 0 : i32
    %c0_i32_1 = arith.constant 0 : i32
    return %arg0, %c0_i32, %c0_i32_0 : i32, i32, i32
  }
}

module attributes {stable_mosaic.version = 11 : i64} {
  func.func @kernel(%arg0: i32, %arg1: memref<1x16x64xbf16, #tpu.memory_space<vmem>>, %arg2: memref<64x256xbf16, #tpu.memory_space<vmem>>, %arg3: memref<1x16x256xf32, #tpu.memory_space<vmem>>, %arg4: memref<256x32xf32, #tpu.memory_space<vmem>>, %arg5: memref<32x256xf32, #tpu.memory_space<vmem>>, %arg6: memref<1x256xf32, #tpu.memory_space<vmem>>, %arg7: memref<1x256xf32, #tpu.memory_space<vmem>>, %arg8: memref<1x16x256xf32, #tpu.memory_space<vmem>>) attributes {dimension_semantics = [#tpu.dimension_semantics<parallel>], iteration_bounds = array<i64: 2>, scalar_prefetch = 0 : i64, scratch_operands = 0 : i64, tpu.core_type = #tpu.core_type<tc>, window_params = [{transform_indices = @transform_0, window_bounds = array<i64: 1, 16, 64>}, {pipeline_mode = #tpu.pipeline_mode<synchronous>, transform_indices = @transform_1, window_bounds = array<i64: 64, 256>}, {transform_indices = @transform_2, window_bounds = array<i64: 1, 16, 256>}, {pipeline_mode = #tpu.pipeline_mode<synchronous>, transform_indices = @transform_3, window_bounds = array<i64: 256, 32>}, {pipeline_mode = #tpu.pipeline_mode<synchronous>, transform_indices = @transform_4, window_bounds = array<i64: 32, 256>}, {pipeline_mode = #tpu.pipeline_mode<synchronous>, transform_indices = @transform_5, window_bounds = array<i64: 1, 256>}, {pipeline_mode = #tpu.pipeline_mode<synchronous>, transform_indices = @transform_6, window_bounds = array<i64: 1, 256>}, {transform_indices = @transform_7, window_bounds = array<i64: 1, 16, 256>}]} {
    %c0 = arith.constant 0 : index
    %c0_0 = arith.constant 0 : index
    %c0_1 = arith.constant 0 : index
    %0 = vector.load %arg1[%c0, %c0_0, %c0_1] : memref<1x16x64xbf16, #tpu.memory_space<vmem>>, vector<1x16x64xbf16>
    %1 = vector.shape_cast %0 : vector<1x16x64xbf16> to vector<16x64xbf16>
    %c0_2 = arith.constant 0 : index
    %c0_3 = arith.constant 0 : index
    %2 = vector.load %arg2[%c0_2, %c0_3] : memref<64x256xbf16, #tpu.memory_space<vmem>>, vector<64x256xbf16>
    %cst = arith.constant dense<0.000000e+00> : vector<16x256xf32>
    %3 = tpu.matmul %1, %2, %cst {dimension_numbers = #tpu.dot_dimension_numbers<[1], [0], [0], [1], [0, 0, 1, 1], [], []>} : vector<16x64xbf16>, vector<64x256xbf16>, vector<16x256xf32> -> vector<16x256xf32>
    %cst_4 = arith.constant dense<0.000000e+00> : vector<256xf32>
    %4 = vector.multi_reduction <add>, %3, %cst_4 [0] : vector<16x256xf32> to vector<256xf32>
    %5 = vector.shape_cast %4 : vector<256xf32> to vector<1x256xf32>
    %6 = arith.mulf %3, %3 : vector<16x256xf32>
    %cst_5 = arith.constant dense<0.000000e+00> : vector<256xf32>
    %7 = vector.multi_reduction <add>, %6, %cst_5 [0] : vector<16x256xf32> to vector<256xf32>
    %8 = vector.shape_cast %7 : vector<256xf32> to vector<1x256xf32>
    %c0_6 = arith.constant 0 : index
    %c0_7 = arith.constant 0 : index
    %9 = vector.load %arg4[%c0_6, %c0_7] : memref<256x32xf32, #tpu.memory_space<vmem>>, vector<256x32xf32>
    %cst_8 = arith.constant dense<0.000000e+00> : vector<1x32xf32>
    %10 = tpu.matmul %5, %9, %cst_8 {dimension_numbers = #tpu.dot_dimension_numbers<[1], [0], [0], [1], [0, 0, 1, 1], [], []>} : vector<1x256xf32>, vector<256x32xf32>, vector<1x32xf32> -> vector<1x32xf32>
    %c0_9 = arith.constant 0 : index
    %c0_10 = arith.constant 0 : index
    %11 = vector.load %arg4[%c0_9, %c0_10] : memref<256x32xf32, #tpu.memory_space<vmem>>, vector<256x32xf32>
    %cst_11 = arith.constant dense<0.000000e+00> : vector<1x32xf32>
    %12 = tpu.matmul %8, %11, %cst_11 {dimension_numbers = #tpu.dot_dimension_numbers<[1], [0], [0], [1], [0, 0, 1, 1], [], []>} : vector<1x256xf32>, vector<256x32xf32>, vector<1x32xf32> -> vector<1x32xf32>
    %c0_12 = arith.constant 0 : index
    %c0_13 = arith.constant 0 : index
    %13 = vector.load %arg5[%c0_12, %c0_13] : memref<32x256xf32, #tpu.memory_space<vmem>>, vector<32x256xf32>
    %cst_14 = arith.constant dense<0.000000e+00> : vector<1x256xf32>
    %14 = tpu.matmul %10, %13, %cst_14 {dimension_numbers = #tpu.dot_dimension_numbers<[1], [0], [0], [1], [0, 0, 1, 1], [], []>} : vector<1x32xf32>, vector<32x256xf32>, vector<1x256xf32> -> vector<1x256xf32>
    %cst_15 = arith.constant 7.812500e-03 : f32
    %15 = vector.broadcast %cst_15 : f32 to vector<1x256xf32>
    %16 = arith.mulf %14, %15 : vector<1x256xf32>
    %c0_16 = arith.constant 0 : index
    %c0_17 = arith.constant 0 : index
    %17 = vector.load %arg5[%c0_16, %c0_17] : memref<32x256xf32, #tpu.memory_space<vmem>>, vector<32x256xf32>
    %cst_18 = arith.constant dense<0.000000e+00> : vector<1x256xf32>
    %18 = tpu.matmul %12, %17, %cst_18 {dimension_numbers = #tpu.dot_dimension_numbers<[1], [0], [0], [1], [0, 0, 1, 1], [], []>} : vector<1x32xf32>, vector<32x256xf32>, vector<1x256xf32> -> vector<1x256xf32>
    %cst_19 = arith.constant 7.812500e-03 : f32
    %19 = vector.broadcast %cst_19 : f32 to vector<1x256xf32>
    %20 = arith.mulf %18, %19 : vector<1x256xf32>
    %21 = arith.mulf %16, %16 : vector<1x256xf32>
    %22 = arith.subf %20, %21 : vector<1x256xf32>
    %cst_20 = arith.constant 9.99999997E-7 : f32
    %23 = vector.broadcast %cst_20 : f32 to vector<1x256xf32>
    %24 = arith.addf %22, %23 : vector<1x256xf32>
    %25 = math.rsqrt %24 : vector<1x256xf32>
    %26 = vector.broadcast %16 : vector<1x256xf32> to vector<16x256xf32>
    %27 = arith.subf %3, %26 : vector<16x256xf32>
    %c0_21 = arith.constant 0 : index
    %c0_22 = arith.constant 0 : index
    %28 = vector.load %arg6[%c0_21, %c0_22] : memref<1x256xf32, #tpu.memory_space<vmem>>, vector<1x256xf32>
    %29 = arith.mulf %25, %28 : vector<1x256xf32>
    %30 = vector.broadcast %29 : vector<1x256xf32> to vector<16x256xf32>
    %31 = arith.mulf %27, %30 : vector<16x256xf32>
    %c0_23 = arith.constant 0 : index
    %c0_24 = arith.constant 0 : index
    %32 = vector.load %arg7[%c0_23, %c0_24] : memref<1x256xf32, #tpu.memory_space<vmem>>, vector<1x256xf32>
    %33 = vector.broadcast %32 : vector<1x256xf32> to vector<16x256xf32>
    %34 = arith.addf %31, %33 : vector<16x256xf32>
    %c0_25 = arith.constant 0 : index
    %c0_26 = arith.constant 0 : index
    %c0_27 = arith.constant 0 : index
    %35 = vector.load %arg3[%c0_25, %c0_26, %c0_27] : memref<1x16x256xf32, #tpu.memory_space<vmem>>, vector<1x16x256xf32>
    %36 = vector.shape_cast %35 : vector<1x16x256xf32> to vector<16x256xf32>
    %37 = arith.addf %34, %36 : vector<16x256xf32>
    %cst_28 = arith.constant 0.000000e+00 : f32
    %38 = vector.broadcast %cst_28 : f32 to vector<16x256xf32>
    %39 = arith.maximumf %37, %38 : vector<16x256xf32>
    %c0_29 = arith.constant 0 : index
    %c0_30 = arith.constant 0 : index
    %c0_31 = arith.constant 0 : index
    %40 = vector.load %arg8[%c0_29, %c0_30, %c0_31] : memref<1x16x256xf32, #tpu.memory_space<vmem>>, vector<1x16x256xf32>
    %41 = vector.shape_cast %40 : vector<1x16x256xf32> to vector<16x256xf32>
    %42 = vector.shape_cast %39 : vector<16x256xf32> to vector<1x16x256xf32>
    tpu.vector_store %arg8[%c0_29, %c0_30, %c0_31], %42 {strides = array<i32>} : memref<1x16x256xf32, #tpu.memory_space<vmem>>, vector<1x16x256xf32>,
    return
  }
  func.func @transform_0(%arg0: i32) -> (i32, i32, i32) {
    %c0_i32 = arith.constant 0 : i32
    %c0_i32_0 = arith.constant 0 : i32
    %c0_i32_1 = arith.constant 0 : i32
    return %arg0, %c0_i32, %c0_i32_0 : i32, i32, i32
  }
  func.func @transform_1(%arg0: i32) -> (i32, i32) {
    %c0_i32 = arith.constant 0 : i32
    %c0_i32_0 = arith.constant 0 : i32
    %c0_i32_1 = arith.constant 0 : i32
    return %c0_i32, %c0_i32_0 : i32, i32
  }
  func.func @transform_2(%arg0: i32) -> (i32, i32, i32) {
    %c0_i32 = arith.constant 0 : i32
    %c0_i32_0 = arith.constant 0 : i32
    %c0_i32_1 = arith.constant 0 : i32
    return %arg0, %c0_i32, %c0_i32_0 : i32, i32, i32
  }
  func.func @transform_3(%arg0: i32) -> (i32, i32) {
    %c0_i32 = arith.constant 0 : i32
    %c0_i32_0 = arith.constant 0 : i32
    %c0_i32_1 = arith.constant 0 : i32
    return %c0_i32, %c0_i32_0 : i32, i32
  }
  func.func @transform_4(%arg0: i32) -> (i32, i32) {
    %c0_i32 = arith.constant 0 : i32
    %c0_i32_0 = arith.constant 0 : i32
    %c0_i32_1 = arith.constant 0 : i32
    return %c0_i32, %c0_i32_0 : i32, i32
  }
  func.func @transform_5(%arg0: i32) -> (i32, i32) {
    %c0_i32 = arith.constant 0 : i32
    %c0_i32_0 = arith.constant 0 : i32
    %c0_i32_1 = arith.constant 0 : i32
    return %c0_i32, %c0_i32_0 : i32, i32
  }
  func.func @transform_6(%arg0: i32) -> (i32, i32) {
    %c0_i32 = arith.constant 0 : i32
    %c0_i32_0 = arith.constant 0 : i32
    %c0_i32_1 = arith.constant 0 : i32
    return %c0_i32, %c0_i32_0 : i32, i32
  }
  func.func @transform_7(%arg0: i32) -> (i32, i32, i32) {
    %c0_i32 = arith.constant 0 : i32
    %c0_i32_0 = arith.constant 0 : i32
    %c0_i32_1 = arith.constant 0 : i32
    return %arg0, %c0_i32, %c0_i32_0 : i32, i32, i32
  }
}

module attributes {stable_mosaic.version = 11 : i64} {
  func.func @kernel(%arg0: i32, %arg1: memref<1x4x256xbf16, #tpu.memory_space<vmem>>, %arg2: memref<256x512xbf16, #tpu.memory_space<vmem>>, %arg3: memref<1x512xf32, #tpu.memory_space<vmem>>, %arg4: memref<1x512xf32, #tpu.memory_space<vmem>>, %arg5: memref<1x4x512xf32, #tpu.memory_space<vmem>>) attributes {dimension_semantics = [#tpu.dimension_semantics<parallel>], iteration_bounds = array<i64: 2>, scalar_prefetch = 0 : i64, scratch_operands = 0 : i64, tpu.core_type = #tpu.core_type<tc>, window_params = [{transform_indices = @transform_0, window_bounds = array<i64: 1, 4, 256>}, {pipeline_mode = #tpu.pipeline_mode<synchronous>, transform_indices = @transform_1, window_bounds = array<i64: 256, 512>}, {pipeline_mode = #tpu.pipeline_mode<synchronous>, transform_indices = @transform_2, window_bounds = array<i64: 1, 512>}, {pipeline_mode = #tpu.pipeline_mode<synchronous>, transform_indices = @transform_3, window_bounds = array<i64: 1, 512>}, {transform_indices = @transform_4, window_bounds = array<i64: 1, 4, 512>}]} {
    %c0 = arith.constant 0 : index
    %c0_0 = arith.constant 0 : index
    %c0_1 = arith.constant 0 : index
    %0 = vector.load %arg1[%c0, %c0_0, %c0_1] : memref<1x4x256xbf16, #tpu.memory_space<vmem>>, vector<1x4x256xbf16>
    %1 = vector.shape_cast %0 : vector<1x4x256xbf16> to vector<4x256xbf16>
    %c0_2 = arith.constant 0 : index
    %c0_3 = arith.constant 0 : index
    %2 = vector.load %arg2[%c0_2, %c0_3] : memref<256x512xbf16, #tpu.memory_space<vmem>>, vector<256x512xbf16>
    %cst = arith.constant dense<0.000000e+00> : vector<4x512xf32>
    %3 = tpu.matmul %1, %2, %cst {dimension_numbers = #tpu.dot_dimension_numbers<[1], [0], [0], [1], [0, 0, 1, 1], [], []>} : vector<4x256xbf16>, vector<256x512xbf16>, vector<4x512xf32> -> vector<4x512xf32>
    %cst_4 = arith.constant dense<0.000000e+00> : vector<512xf32>
    %4 = vector.multi_reduction <add>, %3, %cst_4 [0] : vector<4x512xf32> to vector<512xf32>
    %5 = vector.shape_cast %4 : vector<512xf32> to vector<1x512xf32>
    %6 = arith.mulf %3, %3 : vector<4x512xf32>
    %cst_5 = arith.constant dense<0.000000e+00> : vector<512xf32>
    %7 = vector.multi_reduction <add>, %6, %cst_5 [0] : vector<4x512xf32> to vector<512xf32>
    %8 = vector.shape_cast %7 : vector<512xf32> to vector<1x512xf32>
    %cst_6 = arith.constant 2.500000e-01 : f32
    %9 = vector.broadcast %cst_6 : f32 to vector<1x512xf32>
    %10 = arith.mulf %5, %9 : vector<1x512xf32>
    %cst_7 = arith.constant 2.500000e-01 : f32
    %11 = vector.broadcast %cst_7 : f32 to vector<1x512xf32>
    %12 = arith.mulf %8, %11 : vector<1x512xf32>
    %13 = arith.mulf %10, %10 : vector<1x512xf32>
    %14 = arith.subf %12, %13 : vector<1x512xf32>
    %cst_8 = arith.constant 9.99999974E-6 : f32
    %15 = vector.broadcast %cst_8 : f32 to vector<1x512xf32>
    %16 = arith.addf %14, %15 : vector<1x512xf32>
    %17 = math.rsqrt %16 : vector<1x512xf32>
    %18 = vector.broadcast %10 : vector<1x512xf32> to vector<4x512xf32>
    %19 = arith.subf %3, %18 : vector<4x512xf32>
    %c0_9 = arith.constant 0 : index
    %c0_10 = arith.constant 0 : index
    %20 = vector.load %arg3[%c0_9, %c0_10] : memref<1x512xf32, #tpu.memory_space<vmem>>, vector<1x512xf32>
    %21 = arith.mulf %17, %20 : vector<1x512xf32>
    %22 = vector.broadcast %21 : vector<1x512xf32> to vector<4x512xf32>
    %23 = arith.mulf %19, %22 : vector<4x512xf32>
    %c0_11 = arith.constant 0 : index
    %c0_12 = arith.constant 0 : index
    %24 = vector.load %arg4[%c0_11, %c0_12] : memref<1x512xf32, #tpu.memory_space<vmem>>, vector<1x512xf32>
    %25 = vector.broadcast %24 : vector<1x512xf32> to vector<4x512xf32>
    %26 = arith.addf %23, %25 : vector<4x512xf32>
    %c0_13 = arith.constant 0 : index
    %c0_14 = arith.constant 0 : index
    %c0_15 = arith.constant 0 : index
    %27 = vector.load %arg5[%c0_13, %c0_14, %c0_15] : memref<1x4x512xf32, #tpu.memory_space<vmem>>, vector<1x4x512xf32>
    %28 = vector.shape_cast %27 : vector<1x4x512xf32> to vector<4x512xf32>
    %29 = vector.shape_cast %26 : vector<4x512xf32> to vector<1x4x512xf32>
    tpu.vector_store %arg5[%c0_13, %c0_14, %c0_15], %29 {strides = array<i32>} : memref<1x4x512xf32, #tpu.memory_space<vmem>>, vector<1x4x512xf32>,
    return
  }
  func.func @transform_0(%arg0: i32) -> (i32, i32, i32) {
    %c0_i32 = arith.constant 0 : i32
    %c0_i32_0 = arith.constant 0 : i32
    %c0_i32_1 = arith.constant 0 : i32
    return %arg0, %c0_i32, %c0_i32_0 : i32, i32, i32
  }
  func.func @transform_1(%arg0: i32) -> (i32, i32) {
    %c0_i32 = arith.constant 0 : i32
    %c0_i32_0 = arith.constant 0 : i32
    %c0_i32_1 = arith.constant 0 : i32
    return %c0_i32, %c0_i32_0 : i32, i32
  }
  func.func @transform_2(%arg0: i32) -> (i32, i32) {
    %c0_i32 = arith.constant 0 : i32
    %c0_i32_0 = arith.constant 0 : i32
    %c0_i32_1 = arith.constant 0 : i32
    return %c0_i32, %c0_i32_0 : i32, i32
  }
  func.func @transform_3(%arg0: i32) -> (i32, i32) {
    %c0_i32 = arith.constant 0 : i32
    %c0_i32_0 = arith.constant 0 : i32
    %c0_i32_1 = arith.constant 0 : i32
    return %c0_i32, %c0_i32_0 : i32, i32
  }
  func.func @transform_4(%arg0: i32) -> (i32, i32, i32) {
    %c0_i32 = arith.constant 0 : i32
    %c0_i32_0 = arith.constant 0 : i32
    %c0_i32_1 = arith.constant 0 : i32
    return %arg0, %c0_i32, %c0_i32_0 : i32, i32, i32
  }
}

module attributes {stable_mosaic.version = 11 : i64} {
  func.func @kernel(%arg0: i32, %arg1: memref<1x16x256xbf16, #tpu.memory_space<vmem>>, %arg2: memref<256x128xbf16, #tpu.memory_space<vmem>>, %arg3: memref<128x32xf32, #tpu.memory_space<vmem>>, %arg4: memref<32x128xf32, #tpu.memory_space<vmem>>, %arg5: memref<1x128xf32, #tpu.memory_space<vmem>>, %arg6: memref<1x128xf32, #tpu.memory_space<vmem>>, %arg7: memref<1x16x128xf32, #tpu.memory_space<vmem>>) attributes {dimension_semantics = [#tpu.dimension_semantics<parallel>], iteration_bounds = array<i64: 2>, scalar_prefetch = 0 : i64, scratch_operands = 0 : i64, tpu.core_type = #tpu.core_type<tc>, window_params = [{transform_indices = @transform_0, window_bounds = array<i64: 1, 16, 256>}, {pipeline_mode = #tpu.pipeline_mode<synchronous>, transform_indices = @transform_1, window_bounds = array<i64: 256, 128>}, {pipeline_mode = #tpu.pipeline_mode<synchronous>, transform_indices = @transform_2, window_bounds = array<i64: 128, 32>}, {pipeline_mode = #tpu.pipeline_mode<synchronous>, transform_indices = @transform_3, window_bounds = array<i64: 32, 128>}, {pipeline_mode = #tpu.pipeline_mode<synchronous>, transform_indices = @transform_4, window_bounds = array<i64: 1, 128>}, {pipeline_mode = #tpu.pipeline_mode<synchronous>, transform_indices = @transform_5, window_bounds = array<i64: 1, 128>}, {transform_indices = @transform_6, window_bounds = array<i64: 1, 16, 128>}]} {
    %c0 = arith.constant 0 : index
    %c0_0 = arith.constant 0 : index
    %c0_1 = arith.constant 0 : index
    %0 = vector.load %arg1[%c0, %c0_0, %c0_1] : memref<1x16x256xbf16, #tpu.memory_space<vmem>>, vector<1x16x256xbf16>
    %1 = vector.shape_cast %0 : vector<1x16x256xbf16> to vector<16x256xbf16>
    %c0_2 = arith.constant 0 : index
    %c0_3 = arith.constant 0 : index
    %2 = vector.load %arg2[%c0_2, %c0_3] : memref<256x128xbf16, #tpu.memory_space<vmem>>, vector<256x128xbf16>
    %cst = arith.constant dense<0.000000e+00> : vector<16x128xf32>
    %3 = tpu.matmul %1, %2, %cst {dimension_numbers = #tpu.dot_dimension_numbers<[1], [0], [0], [1], [0, 0, 1, 1], [], []>} : vector<16x256xbf16>, vector<256x128xbf16>, vector<16x128xf32> -> vector<16x128xf32>
    %cst_4 = arith.constant dense<0.000000e+00> : vector<128xf32>
    %4 = vector.multi_reduction <add>, %3, %cst_4 [0] : vector<16x128xf32> to vector<128xf32>
    %5 = vector.shape_cast %4 : vector<128xf32> to vector<1x128xf32>
    %6 = arith.mulf %3, %3 : vector<16x128xf32>
    %cst_5 = arith.constant dense<0.000000e+00> : vector<128xf32>
    %7 = vector.multi_reduction <add>, %6, %cst_5 [0] : vector<16x128xf32> to vector<128xf32>
    %8 = vector.shape_cast %7 : vector<128xf32> to vector<1x128xf32>
    %c0_6 = arith.constant 0 : index
    %c0_7 = arith.constant 0 : index
    %9 = vector.load %arg3[%c0_6, %c0_7] : memref<128x32xf32, #tpu.memory_space<vmem>>, vector<128x32xf32>
    %cst_8 = arith.constant dense<0.000000e+00> : vector<1x32xf32>
    %10 = tpu.matmul %5, %9, %cst_8 {dimension_numbers = #tpu.dot_dimension_numbers<[1], [0], [0], [1], [0, 0, 1, 1], [], []>} : vector<1x128xf32>, vector<128x32xf32>, vector<1x32xf32> -> vector<1x32xf32>
    %c0_9 = arith.constant 0 : index
    %c0_10 = arith.constant 0 : index
    %11 = vector.load %arg3[%c0_9, %c0_10] : memref<128x32xf32, #tpu.memory_space<vmem>>, vector<128x32xf32>
    %cst_11 = arith.constant dense<0.000000e+00> : vector<1x32xf32>
    %12 = tpu.matmul %8, %11, %cst_11 {dimension_numbers = #tpu.dot_dimension_numbers<[1], [0], [0], [1], [0, 0, 1, 1], [], []>} : vector<1x128xf32>, vector<128x32xf32>, vector<1x32xf32> -> vector<1x32xf32>
    %c0_12 = arith.constant 0 : index
    %c0_13 = arith.constant 0 : index
    %13 = vector.load %arg4[%c0_12, %c0_13] : memref<32x128xf32, #tpu.memory_space<vmem>>, vector<32x128xf32>
    %cst_14 = arith.constant dense<0.000000e+00> : vector<1x128xf32>
    %14 = tpu.matmul %10, %13, %cst_14 {dimension_numbers = #tpu.dot_dimension_numbers<[1], [0], [0], [1], [0, 0, 1, 1], [], []>} : vector<1x32xf32>, vector<32x128xf32>, vector<1x128xf32> -> vector<1x128xf32>
    %cst_15 = arith.constant 1.562500e-02 : f32
    %15 = vector.broadcast %cst_15 : f32 to vector<1x128xf32>
    %16 = arith.mulf %14, %15 : vector<1x128xf32>
    %c0_16 = arith.constant 0 : index
    %c0_17 = arith.constant 0 : index
    %17 = vector.load %arg4[%c0_16, %c0_17] : memref<32x128xf32, #tpu.memory_space<vmem>>, vector<32x128xf32>
    %cst_18 = arith.constant dense<0.000000e+00> : vector<1x128xf32>
    %18 = tpu.matmul %12, %17, %cst_18 {dimension_numbers = #tpu.dot_dimension_numbers<[1], [0], [0], [1], [0, 0, 1, 1], [], []>} : vector<1x32xf32>, vector<32x128xf32>, vector<1x128xf32> -> vector<1x128xf32>
    %cst_19 = arith.constant 1.562500e-02 : f32
    %19 = vector.broadcast %cst_19 : f32 to vector<1x128xf32>
    %20 = arith.mulf %18, %19 : vector<1x128xf32>
    %21 = arith.mulf %16, %16 : vector<1x128xf32>
    %22 = arith.subf %20, %21 : vector<1x128xf32>
    %cst_20 = arith.constant 9.99999997E-7 : f32
    %23 = vector.broadcast %cst_20 : f32 to vector<1x128xf32>
    %24 = arith.addf %22, %23 : vector<1x128xf32>
    %25 = math.rsqrt %24 : vector<1x128xf32>
    %26 = vector.broadcast %16 : vector<1x128xf32> to vector<16x128xf32>
    %27 = arith.subf %3, %26 : vector<16x128xf32>
    %c0_21 = arith.constant 0 : index
    %c0_22 = arith.constant 0 : index
    %28 = vector.load %arg5[%c0_21, %c0_22] : memref<1x128xf32, #tpu.memory_space<vmem>>, vector<1x128xf32>
    %29 = arith.mulf %25, %28 : vector<1x128xf32>
    %30 = vector.broadcast %29 : vector<1x128xf32> to vector<16x128xf32>
    %31 = arith.mulf %27, %30 : vector<16x128xf32>
    %c0_23 = arith.constant 0 : index
    %c0_24 = arith.constant 0 : index
    %32 = vector.load %arg6[%c0_23, %c0_24] : memref<1x128xf32, #tpu.memory_space<vmem>>, vector<1x128xf32>
    %33 = vector.broadcast %32 : vector<1x128xf32> to vector<16x128xf32>
    %34 = arith.addf %31, %33 : vector<16x128xf32>
    %cst_25 = arith.constant 0.000000e+00 : f32
    %35 = vector.broadcast %cst_25 : f32 to vector<16x128xf32>
    %36 = arith.maximumf %34, %35 : vector<16x128xf32>
    %c0_26 = arith.constant 0 : index
    %c0_27 = arith.constant 0 : index
    %c0_28 = arith.constant 0 : index
    %37 = vector.load %arg7[%c0_26, %c0_27, %c0_28] : memref<1x16x128xf32, #tpu.memory_space<vmem>>, vector<1x16x128xf32>
    %38 = vector.shape_cast %37 : vector<1x16x128xf32> to vector<16x128xf32>
    %39 = vector.shape_cast %36 : vector<16x128xf32> to vector<1x16x128xf32>
    tpu.vector_store %arg7[%c0_26, %c0_27, %c0_28], %39 {strides = array<i32>} : memref<1x16x128xf32, #tpu.memory_space<vmem>>, vector<1x16x128xf32>,
    return
  }
  func.func @transform_0(%arg0: i32) -> (i32, i32, i32) {
    %c0_i32 = arith.constant 0 : i32
    %c0_i32_0 = arith.constant 0 : i32
    %c0_i32_1 = arith.constant 0 : i32
    return %arg0, %c0_i32, %c0_i32_0 : i32, i32, i32
  }
  func.func @transform_1(%arg0: i32) -> (i32, i32) {
    %c0_i32 = arith.constant 0 : i32
    %c0_i32_0 = arith.constant 0 : i32
    %c0_i32_1 = arith.constant 0 : i32
    return %c0_i32, %c0_i32_0 : i32, i32
  }
  func.func @transform_2(%arg0: i32) -> (i32, i32) {
    %c0_i32 = arith.constant 0 : i32
    %c0_i32_0 = arith.constant 0 : i32
    %c0_i32_1 = arith.constant 0 : i32
    return %c0_i32, %c0_i32_0 : i32, i32
  }
  func.func @transform_3(%arg0: i32) -> (i32, i32) {
    %c0_i32 = arith.constant 0 : i32
    %c0_i32_0 = arith.constant 0 : i32
    %c0_i32_1 = arith.constant 0 : i32
    return %c0_i32, %c0_i32_0 : i32, i32
  }
  func.func @transform_4(%arg0: i32) -> (i32, i32) {
    %c0_i32 = arith.constant 0 : i32
    %c0_i32_0 = arith.constant 0 : i32
    %c0_i32_1 = arith.constant 0 : i32
    return %c0_i32, %c0_i32_0 : i32, i32
  }
  func.func @transform_5(%arg0: i32) -> (i32, i32) {
    %c0_i32 = arith.constant 0 : i32
    %c0_i32_0 = arith.constant 0 : i32
    %c0_i32_1 = arith.constant 0 : i32
    return %c0_i32, %c0_i32_0 : i32, i32
  }
  func.func @transform_6(%arg0: i32) -> (i32, i32, i32) {
    %c0_i32 = arith.constant 0 : i32
    %c0_i32_0 = arith.constant 0 : i32
    %c0_i32_1 = arith.constant 0 : i32
    return %arg0, %c0_i32, %c0_i32_0 : i32, i32, i32
  }
}

module attributes {stable_mosaic.version = 11 : i64} {
  func.func @kernel(%arg0: i32, %arg1: memref<1x4x1152xbf16, #tpu.memory_space<vmem>>, %arg2: memref<1152x128xbf16, #tpu.memory_space<vmem>>, %arg3: memref<128x32xf32, #tpu.memory_space<vmem>>, %arg4: memref<32x128xf32, #tpu.memory_space<vmem>>, %arg5: memref<1x128xf32, #tpu.memory_space<vmem>>, %arg6: memref<1x128xf32, #tpu.memory_space<vmem>>, %arg7: memref<1x4x128xf32, #tpu.memory_space<vmem>>) attributes {dimension_semantics = [#tpu.dimension_semantics<parallel>], iteration_bounds = array<i64: 2>, scalar_prefetch = 0 : i64, scratch_operands = 0 : i64, tpu.core_type = #tpu.core_type<tc>, window_params = [{transform_indices = @transform_0, window_bounds = array<i64: 1, 4, 1152>}, {pipeline_mode = #tpu.pipeline_mode<synchronous>, transform_indices = @transform_1, window_bounds = array<i64: 1152, 128>}, {pipeline_mode = #tpu.pipeline_mode<synchronous>, transform_indices = @transform_2, window_bounds = array<i64: 128, 32>}, {pipeline_mode = #tpu.pipeline_mode<synchronous>, transform_indices = @transform_3, window_bounds = array<i64: 32, 128>}, {pipeline_mode = #tpu.pipeline_mode<synchronous>, transform_indices = @transform_4, window_bounds = array<i64: 1, 128>}, {pipeline_mode = #tpu.pipeline_mode<synchronous>, transform_indices = @transform_5, window_bounds = array<i64: 1, 128>}, {transform_indices = @transform_6, window_bounds = array<i64: 1, 4, 128>}]} {
    %c0 = arith.constant 0 : index
    %c0_0 = arith.constant 0 : index
    %c0_1 = arith.constant 0 : index
    %0 = vector.load %arg1[%c0, %c0_0, %c0_1] : memref<1x4x1152xbf16, #tpu.memory_space<vmem>>, vector<1x4x1152xbf16>
    %1 = vector.shape_cast %0 : vector<1x4x1152xbf16> to vector<4x1152xbf16>
    %c0_2 = arith.constant 0 : index
    %c0_3 = arith.constant 0 : index
    %2 = vector.load %arg2[%c0_2, %c0_3] : memref<1152x128xbf16, #tpu.memory_space<vmem>>, vector<1152x128xbf16>
    %cst = arith.constant dense<0.000000e+00> : vector<4x128xf32>
    %3 = tpu.matmul %1, %2, %cst {dimension_numbers = #tpu.dot_dimension_numbers<[1], [0], [0], [1], [0, 0, 1, 1], [], []>} : vector<4x1152xbf16>, vector<1152x128xbf16>, vector<4x128xf32> -> vector<4x128xf32>
    %cst_4 = arith.constant dense<0.000000e+00> : vector<128xf32>
    %4 = vector.multi_reduction <add>, %3, %cst_4 [0] : vector<4x128xf32> to vector<128xf32>
    %5 = vector.shape_cast %4 : vector<128xf32> to vector<1x128xf32>
    %6 = arith.mulf %3, %3 : vector<4x128xf32>
    %cst_5 = arith.constant dense<0.000000e+00> : vector<128xf32>
    %7 = vector.multi_reduction <add>, %6, %cst_5 [0] : vector<4x128xf32> to vector<128xf32>
    %8 = vector.shape_cast %7 : vector<128xf32> to vector<1x128xf32>
    %c0_6 = arith.constant 0 : index
    %c0_7 = arith.constant 0 : index
    %9 = vector.load %arg3[%c0_6, %c0_7] : memref<128x32xf32, #tpu.memory_space<vmem>>, vector<128x32xf32>
    %cst_8 = arith.constant dense<0.000000e+00> : vector<1x32xf32>
    %10 = tpu.matmul %5, %9, %cst_8 {dimension_numbers = #tpu.dot_dimension_numbers<[1], [0], [0], [1], [0, 0, 1, 1], [], []>} : vector<1x128xf32>, vector<128x32xf32>, vector<1x32xf32> -> vector<1x32xf32>
    %c0_9 = arith.constant 0 : index
    %c0_10 = arith.constant 0 : index
    %11 = vector.load %arg3[%c0_9, %c0_10] : memref<128x32xf32, #tpu.memory_space<vmem>>, vector<128x32xf32>
    %cst_11 = arith.constant dense<0.000000e+00> : vector<1x32xf32>
    %12 = tpu.matmul %8, %11, %cst_11 {dimension_numbers = #tpu.dot_dimension_numbers<[1], [0], [0], [1], [0, 0, 1, 1], [], []>} : vector<1x128xf32>, vector<128x32xf32>, vector<1x32xf32> -> vector<1x32xf32>
    %c0_12 = arith.constant 0 : index
    %c0_13 = arith.constant 0 : index
    %13 = vector.load %arg4[%c0_12, %c0_13] : memref<32x128xf32, #tpu.memory_space<vmem>>, vector<32x128xf32>
    %cst_14 = arith.constant dense<0.000000e+00> : vector<1x128xf32>
    %14 = tpu.matmul %10, %13, %cst_14 {dimension_numbers = #tpu.dot_dimension_numbers<[1], [0], [0], [1], [0, 0, 1, 1], [], []>} : vector<1x32xf32>, vector<32x128xf32>, vector<1x128xf32> -> vector<1x128xf32>
    %cst_15 = arith.constant 6.250000e-02 : f32
    %15 = vector.broadcast %cst_15 : f32 to vector<1x128xf32>
    %16 = arith.mulf %14, %15 : vector<1x128xf32>
    %c0_16 = arith.constant 0 : index
    %c0_17 = arith.constant 0 : index
    %17 = vector.load %arg4[%c0_16, %c0_17] : memref<32x128xf32, #tpu.memory_space<vmem>>, vector<32x128xf32>
    %cst_18 = arith.constant dense<0.000000e+00> : vector<1x128xf32>
    %18 = tpu.matmul %12, %17, %cst_18 {dimension_numbers = #tpu.dot_dimension_numbers<[1], [0], [0], [1], [0, 0, 1, 1], [], []>} : vector<1x32xf32>, vector<32x128xf32>, vector<1x128xf32> -> vector<1x128xf32>
    %cst_19 = arith.constant 6.250000e-02 : f32
    %19 = vector.broadcast %cst_19 : f32 to vector<1x128xf32>
    %20 = arith.mulf %18, %19 : vector<1x128xf32>
    %21 = arith.mulf %16, %16 : vector<1x128xf32>
    %22 = arith.subf %20, %21 : vector<1x128xf32>
    %cst_20 = arith.constant 9.99999997E-7 : f32
    %23 = vector.broadcast %cst_20 : f32 to vector<1x128xf32>
    %24 = arith.addf %22, %23 : vector<1x128xf32>
    %25 = math.rsqrt %24 : vector<1x128xf32>
    %26 = vector.broadcast %16 : vector<1x128xf32> to vector<4x128xf32>
    %27 = arith.subf %3, %26 : vector<4x128xf32>
    %c0_21 = arith.constant 0 : index
    %c0_22 = arith.constant 0 : index
    %28 = vector.load %arg5[%c0_21, %c0_22] : memref<1x128xf32, #tpu.memory_space<vmem>>, vector<1x128xf32>
    %29 = arith.mulf %25, %28 : vector<1x128xf32>
    %30 = vector.broadcast %29 : vector<1x128xf32> to vector<4x128xf32>
    %31 = arith.mulf %27, %30 : vector<4x128xf32>
    %c0_23 = arith.constant 0 : index
    %c0_24 = arith.constant 0 : index
    %32 = vector.load %arg6[%c0_23, %c0_24] : memref<1x128xf32, #tpu.memory_space<vmem>>, vector<1x128xf32>
    %33 = vector.broadcast %32 : vector<1x128xf32> to vector<4x128xf32>
    %34 = arith.addf %31, %33 : vector<4x128xf32>
    %cst_25 = arith.constant 0.000000e+00 : f32
    %35 = vector.broadcast %cst_25 : f32 to vector<4x128xf32>
    %36 = arith.maximumf %34, %35 : vector<4x128xf32>
    %c0_26 = arith.constant 0 : index
    %c0_27 = arith.constant 0 : index
    %c0_28 = arith.constant 0 : index
    %37 = vector.load %arg7[%c0_26, %c0_27, %c0_28] : memref<1x4x128xf32, #tpu.memory_space<vmem>>, vector<1x4x128xf32>
    %38 = vector.shape_cast %37 : vector<1x4x128xf32> to vector<4x128xf32>
    %39 = vector.shape_cast %36 : vector<4x128xf32> to vector<1x4x128xf32>
    tpu.vector_store %arg7[%c0_26, %c0_27, %c0_28], %39 {strides = array<i32>} : memref<1x4x128xf32, #tpu.memory_space<vmem>>, vector<1x4x128xf32>,
    return
  }
  func.func @transform_0(%arg0: i32) -> (i32, i32, i32) {
    %c0_i32 = arith.constant 0 : i32
    %c0_i32_0 = arith.constant 0 : i32
    %c0_i32_1 = arith.constant 0 : i32
    return %arg0, %c0_i32, %c0_i32_0 : i32, i32, i32
  }
  func.func @transform_1(%arg0: i32) -> (i32, i32) {
    %c0_i32 = arith.constant 0 : i32
    %c0_i32_0 = arith.constant 0 : i32
    %c0_i32_1 = arith.constant 0 : i32
    return %c0_i32, %c0_i32_0 : i32, i32
  }
  func.func @transform_2(%arg0: i32) -> (i32, i32) {
    %c0_i32 = arith.constant 0 : i32
    %c0_i32_0 = arith.constant 0 : i32
    %c0_i32_1 = arith.constant 0 : i32
    return %c0_i32, %c0_i32_0 : i32, i32
  }
  func.func @transform_3(%arg0: i32) -> (i32, i32) {
    %c0_i32 = arith.constant 0 : i32
    %c0_i32_0 = arith.constant 0 : i32
    %c0_i32_1 = arith.constant 0 : i32
    return %c0_i32, %c0_i32_0 : i32, i32
  }
  func.func @transform_4(%arg0: i32) -> (i32, i32) {
    %c0_i32 = arith.constant 0 : i32
    %c0_i32_0 = arith.constant 0 : i32
    %c0_i32_1 = arith.constant 0 : i32
    return %c0_i32, %c0_i32_0 : i32, i32
  }
  func.func @transform_5(%arg0: i32) -> (i32, i32) {
    %c0_i32 = arith.constant 0 : i32
    %c0_i32_0 = arith.constant 0 : i32
    %c0_i32_1 = arith.constant 0 : i32
    return %c0_i32, %c0_i32_0 : i32, i32
  }
  func.func @transform_6(%arg0: i32) -> (i32, i32, i32) {
    %c0_i32 = arith.constant 0 : i32
    %c0_i32_0 = arith.constant 0 : i32
    %c0_i32_1 = arith.constant 0 : i32
    return %arg0, %c0_i32, %c0_i32_0 : i32, i32, i32
  }
}

module attributes {stable_mosaic.version = 11 : i64} {
  func.func @kernel(%arg0: i32, %arg1: memref<1x4x128xbf16, #tpu.memory_space<vmem>>, %arg2: memref<128x512xbf16, #tpu.memory_space<vmem>>, %arg3: memref<1x4x512xf32, #tpu.memory_space<vmem>>, %arg4: memref<512x32xf32, #tpu.memory_space<vmem>>, %arg5: memref<32x512xf32, #tpu.memory_space<vmem>>, %arg6: memref<1x512xf32, #tpu.memory_space<vmem>>, %arg7: memref<1x512xf32, #tpu.memory_space<vmem>>, %arg8: memref<1x4x512xf32, #tpu.memory_space<vmem>>) attributes {dimension_semantics = [#tpu.dimension_semantics<parallel>], iteration_bounds = array<i64: 2>, scalar_prefetch = 0 : i64, scratch_operands = 0 : i64, tpu.core_type = #tpu.core_type<tc>, window_params = [{transform_indices = @transform_0, window_bounds = array<i64: 1, 4, 128>}, {pipeline_mode = #tpu.pipeline_mode<synchronous>, transform_indices = @transform_1, window_bounds = array<i64: 128, 512>}, {transform_indices = @transform_2, window_bounds = array<i64: 1, 4, 512>}, {pipeline_mode = #tpu.pipeline_mode<synchronous>, transform_indices = @transform_3, window_bounds = array<i64: 512, 32>}, {pipeline_mode = #tpu.pipeline_mode<synchronous>, transform_indices = @transform_4, window_bounds = array<i64: 32, 512>}, {pipeline_mode = #tpu.pipeline_mode<synchronous>, transform_indices = @transform_5, window_bounds = array<i64: 1, 512>}, {pipeline_mode = #tpu.pipeline_mode<synchronous>, transform_indices = @transform_6, window_bounds = array<i64: 1, 512>}, {transform_indices = @transform_7, window_bounds = array<i64: 1, 4, 512>}]} {
    %c0 = arith.constant 0 : index
    %c0_0 = arith.constant 0 : index
    %c0_1 = arith.constant 0 : index
    %0 = vector.load %arg1[%c0, %c0_0, %c0_1] : memref<1x4x128xbf16, #tpu.memory_space<vmem>>, vector<1x4x128xbf16>
    %1 = vector.shape_cast %0 : vector<1x4x128xbf16> to vector<4x128xbf16>
    %c0_2 = arith.constant 0 : index
    %c0_3 = arith.constant 0 : index
    %2 = vector.load %arg2[%c0_2, %c0_3] : memref<128x512xbf16, #tpu.memory_space<vmem>>, vector<128x512xbf16>
    %cst = arith.constant dense<0.000000e+00> : vector<4x512xf32>
    %3 = tpu.matmul %1, %2, %cst {dimension_numbers = #tpu.dot_dimension_numbers<[1], [0], [0], [1], [0, 0, 1, 1], [], []>} : vector<4x128xbf16>, vector<128x512xbf16>, vector<4x512xf32> -> vector<4x512xf32>
    %cst_4 = arith.constant dense<0.000000e+00> : vector<512xf32>
    %4 = vector.multi_reduction <add>, %3, %cst_4 [0] : vector<4x512xf32> to vector<512xf32>
    %5 = vector.shape_cast %4 : vector<512xf32> to vector<1x512xf32>
    %6 = arith.mulf %3, %3 : vector<4x512xf32>
    %cst_5 = arith.constant dense<0.000000e+00> : vector<512xf32>
    %7 = vector.multi_reduction <add>, %6, %cst_5 [0] : vector<4x512xf32> to vector<512xf32>
    %8 = vector.shape_cast %7 : vector<512xf32> to vector<1x512xf32>
    %c0_6 = arith.constant 0 : index
    %c0_7 = arith.constant 0 : index
    %9 = vector.load %arg4[%c0_6, %c0_7] : memref<512x32xf32, #tpu.memory_space<vmem>>, vector<512x32xf32>
    %cst_8 = arith.constant dense<0.000000e+00> : vector<1x32xf32>
    %10 = tpu.matmul %5, %9, %cst_8 {dimension_numbers = #tpu.dot_dimension_numbers<[1], [0], [0], [1], [0, 0, 1, 1], [], []>} : vector<1x512xf32>, vector<512x32xf32>, vector<1x32xf32> -> vector<1x32xf32>
    %c0_9 = arith.constant 0 : index
    %c0_10 = arith.constant 0 : index
    %11 = vector.load %arg4[%c0_9, %c0_10] : memref<512x32xf32, #tpu.memory_space<vmem>>, vector<512x32xf32>
    %cst_11 = arith.constant dense<0.000000e+00> : vector<1x32xf32>
    %12 = tpu.matmul %8, %11, %cst_11 {dimension_numbers = #tpu.dot_dimension_numbers<[1], [0], [0], [1], [0, 0, 1, 1], [], []>} : vector<1x512xf32>, vector<512x32xf32>, vector<1x32xf32> -> vector<1x32xf32>
    %c0_12 = arith.constant 0 : index
    %c0_13 = arith.constant 0 : index
    %13 = vector.load %arg5[%c0_12, %c0_13] : memref<32x512xf32, #tpu.memory_space<vmem>>, vector<32x512xf32>
    %cst_14 = arith.constant dense<0.000000e+00> : vector<1x512xf32>
    %14 = tpu.matmul %10, %13, %cst_14 {dimension_numbers = #tpu.dot_dimension_numbers<[1], [0], [0], [1], [0, 0, 1, 1], [], []>} : vector<1x32xf32>, vector<32x512xf32>, vector<1x512xf32> -> vector<1x512xf32>
    %cst_15 = arith.constant 1.562500e-02 : f32
    %15 = vector.broadcast %cst_15 : f32 to vector<1x512xf32>
    %16 = arith.mulf %14, %15 : vector<1x512xf32>
    %c0_16 = arith.constant 0 : index
    %c0_17 = arith.constant 0 : index
    %17 = vector.load %arg5[%c0_16, %c0_17] : memref<32x512xf32, #tpu.memory_space<vmem>>, vector<32x512xf32>
    %cst_18 = arith.constant dense<0.000000e+00> : vector<1x512xf32>
    %18 = tpu.matmul %12, %17, %cst_18 {dimension_numbers = #tpu.dot_dimension_numbers<[1], [0], [0], [1], [0, 0, 1, 1], [], []>} : vector<1x32xf32>, vector<32x512xf32>, vector<1x512xf32> -> vector<1x512xf32>
    %cst_19 = arith.constant 1.562500e-02 : f32
    %19 = vector.broadcast %cst_19 : f32 to vector<1x512xf32>
    %20 = arith.mulf %18, %19 : vector<1x512xf32>
    %21 = arith.mulf %16, %16 : vector<1x512xf32>
    %22 = arith.subf %20, %21 : vector<1x512xf32>
    %cst_20 = arith.constant 9.99999997E-7 : f32
    %23 = vector.broadcast %cst_20 : f32 to vector<1x512xf32>
    %24 = arith.addf %22, %23 : vector<1x512xf32>
    %25 = math.rsqrt %24 : vector<1x512xf32>
    %26 = vector.broadcast %16 : vector<1x512xf32> to vector<4x512xf32>
    %27 = arith.subf %3, %26 : vector<4x512xf32>
    %c0_21 = arith.constant 0 : index
    %c0_22 = arith.constant 0 : index
    %28 = vector.load %arg6[%c0_21, %c0_22] : memref<1x512xf32, #tpu.memory_space<vmem>>, vector<1x512xf32>
    %29 = arith.mulf %25, %28 : vector<1x512xf32>
    %30 = vector.broadcast %29 : vector<1x512xf32> to vector<4x512xf32>
    %31 = arith.mulf %27, %30 : vector<4x512xf32>
    %c0_23 = arith.constant 0 : index
    %c0_24 = arith.constant 0 : index
    %32 = vector.load %arg7[%c0_23, %c0_24] : memref<1x512xf32, #tpu.memory_space<vmem>>, vector<1x512xf32>
    %33 = vector.broadcast %32 : vector<1x512xf32> to vector<4x512xf32>
    %34 = arith.addf %31, %33 : vector<4x512xf32>
    %c0_25 = arith.constant 0 : index
    %c0_26 = arith.constant 0 : index
    %c0_27 = arith.constant 0 : index
    %35 = vector.load %arg3[%c0_25, %c0_26, %c0_27] : memref<1x4x512xf32, #tpu.memory_space<vmem>>, vector<1x4x512xf32>
    %36 = vector.shape_cast %35 : vector<1x4x512xf32> to vector<4x512xf32>
    %37 = arith.addf %34, %36 : vector<4x512xf32>
    %cst_28 = arith.constant 0.000000e+00 : f32
    %38 = vector.broadcast %cst_28 : f32 to vector<4x512xf32>
    %39 = arith.maximumf %37, %38 : vector<4x512xf32>
    %c0_29 = arith.constant 0 : index
    %c0_30 = arith.constant 0 : index
    %c0_31 = arith.constant 0 : index
    %40 = vector.load %arg8[%c0_29, %c0_30, %c0_31] : memref<1x4x512xf32, #tpu.memory_space<vmem>>, vector<1x4x512xf32>
    %41 = vector.shape_cast %40 : vector<1x4x512xf32> to vector<4x512xf32>
    %42 = vector.shape_cast %39 : vector<4x512xf32> to vector<1x4x512xf32>
    tpu.vector_store %arg8[%c0_29, %c0_30, %c0_31], %42 {strides = array<i32>} : memref<1x4x512xf32, #tpu.memory_space<vmem>>, vector<1x4x512xf32>,
    return
  }
  func.func @transform_0(%arg0: i32) -> (i32, i32, i32) {
    %c0_i32 = arith.constant 0 : i32
    %c0_i32_0 = arith.constant 0 : i32
    %c0_i32_1 = arith.constant 0 : i32
    return %arg0, %c0_i32, %c0_i32_0 : i32, i32, i32
  }
  func.func @transform_1(%arg0: i32) -> (i32, i32) {
    %c0_i32 = arith.constant 0 : i32
    %c0_i32_0 = arith.constant 0 : i32
    %c0_i32_1 = arith.constant 0 : i32
    return %c0_i32, %c0_i32_0 : i32, i32
  }
  func.func @transform_2(%arg0: i32) -> (i32, i32, i32) {
    %c0_i32 = arith.constant 0 : i32
    %c0_i32_0 = arith.constant 0 : i32
    %c0_i32_1 = arith.constant 0 : i32
    return %arg0, %c0_i32, %c0_i32_0 : i32, i32, i32
  }
  func.func @transform_3(%arg0: i32) -> (i32, i32) {
    %c0_i32 = arith.constant 0 : i32
    %c0_i32_0 = arith.constant 0 : i32
    %c0_i32_1 = arith.constant 0 : i32
    return %c0_i32, %c0_i32_0 : i32, i32
  }
  func.func @transform_4(%arg0: i32) -> (i32, i32) {
    %c0_i32 = arith.constant 0 : i32
    %c0_i32_0 = arith.constant 0 : i32
    %c0_i32_1 = arith.constant 0 : i32
    return %c0_i32, %c0_i32_0 : i32, i32
  }
  func.func @transform_5(%arg0: i32) -> (i32, i32) {
    %c0_i32 = arith.constant 0 : i32
    %c0_i32_0 = arith.constant 0 : i32
    %c0_i32_1 = arith.constant 0 : i32
    return %c0_i32, %c0_i32_0 : i32, i32
  }
  func.func @transform_6(%arg0: i32) -> (i32, i32) {
    %c0_i32 = arith.constant 0 : i32
    %c0_i32_0 = arith.constant 0 : i32
    %c0_i32_1 = arith.constant 0 : i32
    return %c0_i32, %c0_i32_0 : i32, i32
  }
  func.func @transform_7(%arg0: i32) -> (i32, i32, i32) {
    %c0_i32 = arith.constant 0 : i32
    %c0_i32_0 = arith.constant 0 : i32
    %c0_i32_1 = arith.constant 0 : i32
    return %arg0, %c0_i32, %c0_i32_0 : i32, i32, i32
  }
}

</mosaic_0001>

<bundles_post_ra>
// kernel: resnetv2_forward.15
= control target key start
LH: loop header
LB: loop body
LE: loop exit
PB: predicated region body
PF: predicated region fallthrough
CT: control target
= control target key end

     0   :  { %s401_s6 = smov 0   ;;  %s502_s0 = inlined_call_operand.vmem [shape: f32[2,9,49,32], index: 0, kind: input, shape index: {}]   ;;  %s503_s1 = inlined_call_operand.vmem [shape: f32[2,49,32], index: 1, kind: output, shape index: {}]  }
   0x1 LB: > { %s308_s7 = sadd.s32 4294967295, %s389_s6   ;;  %p312_p0 = scmp.ge.s32.totalorder %s389_s6, 1  ;;  %s389_s6 = sphi %s401_s6, %s11_s6  }
   0x2   : > { %p87_p1 = scmp.lt.s32.totalorder %s389_s6, 3 }
   0x4   : > { %p88_p2 = pnand %p312_p0, %p87_p1 }
   0x5   : > { %p107_p3 = scmp.lt.s32.totalorder (!%p88_p2), %s308_s7, 1 }
   0x6   : > { %91 = sbr.rel (%p88_p2) target bundleno = 48 (0x30), region = 24 }
   0xb   : > { %s505_s7 = smov (!%p107_p3, %s308_s7), 1  ;;  %vm244_vm0 = vcmask 261120   ;;  %vm251_vm1 = vcmask 253952  }
   0xc   : > { %s373_s8 = smul.u32 504, %s505_s7 }
   0xd   : > { %s374_s12 = smul.u32 56, %s505_s7 }
   0xe   : > { %s415_s11 = scalar_lea.vmem %s502_s0, %s373_s8 }
   0xf   : > { %v117_v0 = vld [vmem:[%s415_s11] sm:$0xff]  ;;  %v315_v1 = vld [vmem:[%s415_s11 + $0x38] sm:$0xff]  ;;  %v322_v2 = vld [vmem:[%s415_s11 + $0x70] sm:$0xff]  ;;  %s453_s15 = scalar_lea.vmem %s503_s1, %s374_s12 }
  0x10   : > { %v132_v3 = vmax.f32 %v117_v0, %v315_v1  ;;  %v329_v4 = vld [vmem:[%s415_s11 + $0xa8] sm:$0xff]  ;;  %v316_v7 = vld [vmem:[%s415_s11 + $0x40] sm:$0xff]  ;;  %v323_v8 = vld [vmem:[%s415_s11 + $0x78] sm:$0xff] }
  0x11   : > { %v118_v6 = vld [vmem:[%s415_s11 + $0x8] sm:$0xff]  ;;  %v336_v9 = vld [vmem:[%s415_s11 + $0xe0] sm:$0xff]  ;;  %v343_v12 = vld [vmem:[%s415_s11 + $0x118] sm:$0xff] }
  0x12   : > { %v147_v5 = vmax.f32 %v132_v3, %v322_v2  ;;  %v133_v10 = vmax.f32 %v118_v6, %v316_v7  ;;  %v330_v13 = vld [vmem:[%s415_s11 + $0xb0] sm:$0xff]  ;;  %v317_v16 = vld [vmem:[%s415_s11 + $0x48] sm:$0xff]  ;;  %v324_v17 = vld [vmem:[%s415_s11 + $0x80] sm:$0xff] }
  0x13   : > { %v119_v15 = vld [vmem:[%s415_s11 + $0x10] sm:$0xff]  ;;  %v337_v19 = vld [vmem:[%s415_s11 + $0xe8] sm:$0xff]  ;;  %v344_v23 = vld [vmem:[%s415_s11 + $0x120] sm:$0xff] }
  0x14   : > { %v162_v11 = vmax.f32 %v147_v5, %v329_v4  ;;  %v148_v14 = vmax.f32 %v133_v10, %v323_v8  ;;  %v134_v20 = vmax.f32 %v119_v15, %v317_v16  ;;  %v350_v21 = vld [vmem:[%s415_s11 + $0x150] sm:$0xff]  ;;  %v331_v24 = vld [vmem:[%s415_s11 + $0xb8] sm:$0xff]  ;;  %v325_v29 = vld [vmem:[%s415_s11 + $0x88] sm:$0xff] }
  0x15   : > { %v120_v27 = vld [vmem:[%s415_s11 + $0x18] sm:$0xff]  ;;  %v318_v28 = vld [vmem:[%s415_s11 + $0x50] sm:$0xff]  ;;  %v357_v30 = vld [vmem:[%s415_s11 + $0x188] sm:$0xff] }
  0x16   : > { %v177_v18 = vmax.f32 %v162_v11, %v336_v9  ;;  %v163_v22 = vmax.f32 %v148_v14, %v330_v13  ;;  %v149_v26 = vmax.f32 %v134_v20, %v324_v17  ;;  %v364_v31 = vld [vmem:[%s415_s11 + $0x1c0] sm:$0xff]  ;;  %v338_v33 = vld [vmem:[%s415_s11 + $0xf0] sm:$0xff]  ;;  %v135_v34 = vmax.f32 %v120_v27, %v318_v28  ;;  %v351_v36 = vld [vmem:[%s415_s11 + $0x158] sm:$0xff] }
  0x17   : > { %v345_v38 = vld [vmem:[%s415_s11 + $0x128] sm:$0xff]  ;;  %v332_v39 = vld [vmem:[%s415_s11 + $0xc0] sm:$0xff]  ;;  %v319_v43 = vld [vmem:[%s415_s11 + $0x58] sm:$0xff] }
  0x18   : > { %v192_v25 = vmax.f32 %v177_v18, %v343_v12  ;;  %v178_v32 = vmax.f32 %v163_v22, %v337_v19  ;;  %v164_v37 = vmax.f32 %v149_v26, %v331_v24  ;;  %v150_v41 = vmax.f32 %v135_v34, %v325_v29  ;;  %v121_v42 = vld [vmem:[%s415_s11 + $0x20] sm:$0xff]  ;;  %v326_v44 = vld [vmem:[%s415_s11 + $0x90] sm:$0xff]  ;;  %v365_v47 = vld [vmem:[%s415_s11 + $0x1c8] sm:$0xff] }
  0x19   : > { %v358_v46 = vld [vmem:[%s415_s11 + $0x190] sm:$0xff]  ;;  %v339_v49 = vld [vmem:[%s415_s11 + $0xf8] sm:$0xff]  ;;  %v136_v50 = vmax.f32 %v121_v42, %v319_v43  ;;  %v352_v52 = vld [vmem:[%s415_s11 + $0x160] sm:$0xff] }
  0x1a   : > { %v207_v35 = vmax.f32 %v192_v25, %v350_v21  ;;  %v193_v40 = vmax.f32 %v178_v32, %v344_v23  ;;  %v179_v48 = vmax.f32 %v164_v37, %v338_v33  ;;  %v165_v53 = vmax.f32 %v150_v41, %v332_v39  ;;  %v346_v54 = vld [vmem:[%s415_s11 + $0x130] sm:$0xff]  ;;  %v333_v55 = vld [vmem:[%s415_s11 + $0xc8] sm:$0xff]  ;;  %v320_v60 = vld [vmem:[%s415_s11 + $0x60] sm:$0xff] }
  0x1b   : > { %v151_v58 = vmax.f32 %v136_v50, %v326_v44  ;;  %v122_v59 = vld [vmem:[%s415_s11 + $0x28] sm:$0xff]  ;;  %v327_v61 = vld [vmem:[%s415_s11 + $0x98] sm:$0xff]  ;;  %v366_v0 = vld [vmem:[%s415_s11 + $0x1d0] sm:$0xff] }
  0x1c   : > { %v222_v45 = vmax.f32 %v207_v35, %v357_v30  ;;  %v208_v51 = vmax.f32 %v193_v40, %v351_v36  ;;  %v194_v57 = vmax.f32 %v179_v48, %v345_v38  ;;  %v359_v63 = vld [vmem:[%s415_s11 + $0x198] sm:$0xff]  ;;  %v180_v1 = vmax.f32 %v165_v53, %v339_v49  ;;  %v340_v2 = vld [vmem:[%s415_s11 + $0x100] sm:$0xff]  ;;  %v353_v5 = vld [vmem:[%s415_s11 + $0x168] sm:$0xff] }
  0x1d   : > { %v137_v3 = vmax.f32 %v122_v59, %v320_v60  ;;  %v166_v6 = vmax.f32 %v151_v58, %v333_v55  ;;  %v347_v7 = vld [vmem:[%s415_s11 + $0x138] sm:$0xff]  ;;  %v334_v8 = vld [vmem:[%s415_s11 + $0xd0] sm:$0xff]  ;;  %v321_v13 = vld [vmem:[%s415_s11 + $0x68] sm:$0x1] }
  0x1e   : > { %v237_v56 = vmax.f32 %v222_v45, %v364_v31  ;;  %v223_v62 = vmax.f32 %v208_v51, %v358_v46  ;;  %v209_v4 = vmax.f32 %v194_v57, %v352_v52  ;;  %v195_v10 = vmax.f32 %v180_v1, %v346_v54  ;;  %v123_v12 = vld [vmem:[%s415_s11 + $0x30] sm:$0x1]  ;;  %v328_v14 = vld [vmem:[%s415_s11 + $0xa0] sm:$0x1]  ;;  %v341_v18 = vld [vmem:[%s415_s11 + $0x108] sm:$0xff] }
  0x1f   : > { %v152_v11 = vmax.f32 %v137_v3, %v327_v61  ;;  %v360_v16 = vld [vmem:[%s415_s11 + $0x1a0] sm:$0xff]  ;;  %v181_v17 = vmax.f32 %v166_v6, %v340_v2  ;;  %v138_v19 = vmax.f32 %v123_v12, %v321_v13  ;;  %v354_v21 = vld [vmem:[%s415_s11 + $0x170] sm:$0xff]  ;;  %v335_v23 = vld [vmem:[%s415_s11 + $0xd8] sm:$0x1] }
  0x20   : > { %245 = vst.msk [vmem:[%s453_s15] sm:$0xff] %vm244_vm0, %v237_v56  ;;  %v238_v9 = vmax.f32 %v223_v62, %v365_v47  ;;  %v224_v15 = vmax.f32 %v209_v4, %v359_v63  ;;  %v210_v20 = vmax.f32 %v195_v10, %v353_v5  ;;  %v367_v25 = vld [vmem:[%s415_s11 + $0x1d8] sm:$0xff]  ;;  %v348_v27 = vld [vmem:[%s415_s11 + $0x140] sm:$0xff]  ;;  %v361_v30 = vld [vmem:[%s415_s11 + $0x1a8] sm:$0xff] }
  0x21   : > { %v167_v22 = vmax.f32 %v152_v11, %v334_v8  ;;  %v196_v26 = vmax.f32 %v181_v17, %v347_v7  ;;  %v153_v28 = vmax.f32 %v138_v19, %v328_v14  ;;  %v342_v32 = vld [vmem:[%s415_s11 + $0x110] sm:$0x1]  ;;  %v355_v34 = vld [vmem:[%s415_s11 + $0x178] sm:$0xff]  ;;  %v368_v37 = vld [vmem:[%s415_s11 + $0x1e0] sm:$0xff] }
  0x22   : > { %246 = vst.msk [vmem:[%s453_s15 + $0x8] sm:$0xff] %vm244_vm0, %v238_v9  ;;  %v239_v24 = vmax.f32 %v224_v15, %v366_v0  ;;  %v225_v29 = vmax.f32 %v210_v20, %v360_v16  ;;  %v349_v39 = vld [vmem:[%s415_s11 + $0x148] sm:$0x1]  ;;  %v362_v41 = vld [vmem:[%s415_s11 + $0x1b0] sm:$0xff]  ;;  %v356_v44 = vld [vmem:[%s415_s11 + $0x180] sm:$0x1] }
  0x23   : > { %v182_v31 = vmax.f32 %v167_v22, %v341_v18  ;;  %v211_v33 = vmax.f32 %v196_v26, %v354_v21  ;;  %v168_v35 = vmax.f32 %v153_v28, %v335_v23  ;;  %v369_v46 = vld [vmem:[%s415_s11 + $0x1e8] sm:$0xff]  ;;  %v363_v49 = vld [vmem:[%s415_s11 + $0x1b8] sm:$0x1]  ;;  %v370_v52 = vld [vmem:[%s415_s11 + $0x1f0] sm:$0x1] }
  0x24   : > { %247 = vst.msk [vmem:[%s453_s15 + $0x10] sm:$0xff] %vm244_vm0, %v239_v24  ;;  %v240_v36 = vmax.f32 %v225_v29, %v367_v25 }
  0x25   : > { %v197_v38 = vmax.f32 %v182_v31, %v348_v27  ;;  %v226_v40 = vmax.f32 %v211_v33, %v361_v30  ;;  %v183_v42 = vmax.f32 %v168_v35, %v342_v32 }
  0x26   : > { %248 = vst.msk [vmem:[%s453_s15 + $0x18] sm:$0xff] %vm244_vm0, %v240_v36 }
  0x27   : > { %v212_v43 = vmax.f32 %v197_v38, %v355_v34  ;;  %v241_v45 = vmax.f32 %v226_v40, %v368_v37  ;;  %v198_v47 = vmax.f32 %v183_v42, %v349_v39 }
  0x29   : > { %v227_v48 = vmax.f32 %v212_v43, %v362_v41  ;;  %249 = vst.msk [vmem:[%s453_s15 + $0x20] sm:$0xff] %vm244_vm0, %v241_v45  ;;  %v213_v50 = vmax.f32 %v198_v47, %v356_v44 }
  0x2b   : > { %v242_v51 = vmax.f32 %v227_v48, %v369_v46  ;;  %v228_v53 = vmax.f32 %v213_v50, %v363_v49 }
  0x2d   : > { %250 = vst.msk [vmem:[%s453_s15 + $0x28] sm:$0xff] %vm244_vm0, %v242_v51  ;;  %v243_v54 = vmax.f32 %v228_v53, %v370_v52 }
  0x2f   : > { %252 = vst.msk [vmem:[%s453_s15 + $0x30] sm:$0x1] %vm251_vm1, %v243_v54 }
  0x30 PF: > { %s11_s6 = sadd.s32 1, %s389_s6  }
  0x31   : > { %p8_p4 = scmp.ge.s32.totalorder %s11_s6, 4  }
  0x33   :  { %10 = sbr.rel (!%p8_p4) target bundleno = 1 (0x1), region = 62 }

// kernel: resnetv2_forward.14
= control target key start
LH: loop header
LB: loop body
LE: loop exit
PB: predicated region body
PF: predicated region fallthrough
CT: control target
= control target key end

     0   :  { %s1420_s15 = smov 0   ;;  %s2054_s0 = inlined_call_operand.vmem [shape: bf16[2,256,196], index: 0, kind: input, shape index: {}]   ;;  %s2055_s1 = inlined_call_operand.vmem [shape: bf16[196,32], index: 1, kind: input, shape index: {}]   ;;  %s2056_s2 = inlined_call_operand.vmem [shape: f32[1,32], index: 2, kind: input, shape index: {}]   ;;  %s2057_s3 = inlined_call_operand.vmem [shape: f32[1,32], index: 3, kind: input, shape index: {}]   ;;  %s2058_s4 = inlined_call_operand.vmem [shape: f32[2,256,32], index: 4, kind: output, shape index: {}]  }
   0x1 LB: > { %s1114_s16 = sadd.s32 4294967295, %s1393_s15   ;;  %p1118_p0 = scmp.ge.s32.totalorder %s1393_s15, 1  ;;  %s1393_s15 = sphi %s1420_s15, %s14_s15  }
   0x2   : > { %p162_p1 = scmp.lt.s32.totalorder %s1393_s15, 3 }
   0x4   : > { %p163_p2 = pnand %p1118_p0, %p162_p1 }
   0x5   : > { %p188_p3 = scmp.lt.s32.totalorder (!%p163_p2), %s1114_s16, 1 }
   0x6   : > { %166 = sbr.rel (%p163_p2) target bundleno = 411 (0x19b), region = 36 }
   0xb   : > { %v1358_v0 = vld [vmem:[%s2055_s1 + $0x38] sm:$0xff]  ;;  %v255_v1 = vld [vmem:[%s2055_s1 + $0x60] sm:$0x3]  ;;  %vm524_vm0 = vcmask 1041408   ;;  %v1357_v3 = vld [vmem:[%s2055_s1 + $0x30] sm:$0xff]  ;;  %s2060_s16 = smov (!%p188_p3, %s1114_s16), 1 }
   0xc   : > { %v449_v2 = vunpack.c.l.b16 %v255_v1  ;;  %528 = vmatpush.bf16.msra.mxu0 %v1358_v0  ;;  %1363 = vmatpush.bf16.msra.mxu2 %v1358_v0  ;;  %v1362_v6 = vld [vmem:[%s2055_s1 + $0x58] sm:$0xff]  ;;  %v1356_v7 = vld [vmem:[%s2055_s1 + $0x28] sm:$0xff]  ;;  %v1361_v8 = vld [vmem:[%s2055_s1 + $0x50] sm:$0xff]  ;;  %s1317_s5 = sshll.u32 %s2060_s16, 8  ;;  %vm475_vm1 = vcmask 556032   ;;  %vm706_vm2 = vcmask 261120  }
   0xd   : > { %v1355_v9 = vld [vmem:[%s2055_s1 + $0x20] sm:$0xff]  ;;  %v1360_v10 = vld [vmem:[%s2055_s1 + $0x48] sm:$0xff]  ;;  %v1354_v11 = vld [vmem:[%s2055_s1 + $0x18] sm:$0xff]  ;;  %s1463_s12 = scalar_lea.vmem %s2054_s0, %s1317_s5  ;;  %s1895_s29 = scalar_lea.vmem %s2058_s4, %s1317_s5 }
   0xe   : > { %v462_v4 = vpack.c.b16 %v449_v2, %v449_v2  ;;  %v1359_v12 = vld [vmem:[%s2055_s1 + $0x40] sm:$0xff]  ;;  %v1353_v13 = vld [vmem:[%s2055_s1 + $0x10] sm:$0xff]  ;;  %v1127_v15 = vld [vmem:[%s1463_s12 + $0x8] sm:$0xf0] }
   0xf   : > { %v1319_v14 = vld [vmem:[%s1463_s12 + $0x4] sm:$0xf]  ;;  %v1352_v17 = vld [vmem:[%s2055_s1 + $0x8] sm:$0xff]  ;;  %v1125_v19 = vld [vmem:[%s1463_s12] sm:$0xf] }
  0x10   : > { %v526_v5 = vsel %vm524_vm0, %v462_v4, 0  ;;  %529 = vmatpush.bf16.msra.mxu0 %v1357_v3  ;;  %1364 = vmatpush.bf16.msra.mxu2 %v1357_v3  ;;  %v1130_v16 = vor.u32 %v1319_v14, %v1127_v15  ;;  %v1351_v18 = vld [vmem:[%s2055_s1] sm:$0xff]  ;;  %v1320_v20 = vld [vmem:[%s1463_s12 + $0x4] sm:$0xf0]  ;;  %v1337_v25 = vld [vmem:[%s1463_s12 + $0x94] sm:$0xf] }
  0x11   : > { %620 = vmatpush.bf16.msra.mxu1 %v526_v5  ;;  %1371 = vmatpush.bf16.msra.mxu3 %v526_v5  ;;  %v1189_v21 = vld [vmem:[%s1463_s12 + $0x80] sm:$0xf]  ;;  %v1336_v22 = vld [vmem:[%s1463_s12 + $0x84] sm:$0xf0]  ;;  %v1126_v23 = vor.u32 %v1320_v20, %v1125_v19  ;;  %v1321_v26 = vld [vmem:[%s1463_s12 + $0x14] sm:$0xf] }
  0x12   : > { %v1190_v24 = vor.u32 %v1336_v22, %v1189_v21  ;;  %v1135_v27 = vld [vmem:[%s1463_s12 + $0x18] sm:$0xf0]  ;;  %v1133_v31 = vld [vmem:[%s1463_s12 + $0x10] sm:$0xf]  ;;  %v1322_v32 = vld [vmem:[%s1463_s12 + $0x14] sm:$0xf0] }
  0x13   : > { %v1199_v28 = vld [vmem:[%s1463_s12 + $0x98] sm:$0xf0]  ;;  %v1138_v30 = vor.u32 %v1321_v26, %v1135_v27  ;;  %v1197_v33 = vld [vmem:[%s1463_s12 + $0x90] sm:$0xf]  ;;  %v1338_v34 = vld [vmem:[%s1463_s12 + $0x94] sm:$0xf0]  ;;  %v1134_v35 = vor.u32 %v1322_v32, %v1133_v31 }
  0x14   : > { %530 = vmatpush.bf16.msra.mxu0 %v1356_v7  ;;  %1365 = vmatpush.bf16.msra.mxu2 %v1356_v7  ;;  %v1202_v29 = vor.u32 %v1337_v25, %v1199_v28  ;;  %v1198_v36 = vor.u32 %v1338_v34, %v1197_v33  ;;  %v1339_v37 = vld [vmem:[%s1463_s12 + $0xa4] sm:$0xf]  ;;  %v1143_v39 = vld [vmem:[%s1463_s12 + $0x28] sm:$0xf0]  ;;  %v1141_v43 = vld [vmem:[%s1463_s12 + $0x20] sm:$0xf] }
  0x15   : > { %621 = vmatpush.bf16.msra.mxu1 %v1362_v6  ;;  %1372 = vmatpush.bf16.msra.mxu3 %v1362_v6  ;;  %v1323_v38 = vld [vmem:[%s1463_s12 + $0x24] sm:$0xf]  ;;  %v1207_v40 = vld [vmem:[%s1463_s12 + $0xa8] sm:$0xf0]  ;;  %v1324_v44 = vld [vmem:[%s1463_s12 + $0x24] sm:$0xf0] }
  0x16   : > { %v1210_v41 = vor.u32 %v1339_v37, %v1207_v40  ;;  %v1146_v42 = vor.u32 %v1323_v38, %v1143_v39  ;;  %v1205_v45 = vld [vmem:[%s1463_s12 + $0xa0] sm:$0xf]  ;;  %v1340_v46 = vld [vmem:[%s1463_s12 + $0xa4] sm:$0xf0]  ;;  %v1142_v47 = vor.u32 %v1324_v44, %v1141_v43  ;;  %v1341_v49 = vld [vmem:[%s1463_s12 + $0xb4] sm:$0xf] }
  0x17   : > { %v1206_v48 = vor.u32 %v1340_v46, %v1205_v45  ;;  %v1325_v50 = vld [vmem:[%s1463_s12 + $0x34] sm:$0xf]  ;;  %v1151_v51 = vld [vmem:[%s1463_s12 + $0x38] sm:$0xf0]  ;;  %v1149_v55 = vld [vmem:[%s1463_s12 + $0x30] sm:$0xf] }
  0x18   : > { %531 = vmatpush.bf16.msra.mxu0 %v1355_v9  ;;  %1366 = vmatpush.bf16.msra.mxu2 %v1355_v9  ;;  %v1215_v52 = vld [vmem:[%s1463_s12 + $0xb8] sm:$0xf0]  ;;  %v1154_v54 = vor.u32 %v1325_v50, %v1151_v51  ;;  %v1326_v56 = vld [vmem:[%s1463_s12 + $0x34] sm:$0xf0]  ;;  %v1213_v57 = vld [vmem:[%s1463_s12 + $0xb0] sm:$0xf] }
  0x19   : > { %622 = vmatpush.bf16.msra.mxu1 %v1361_v8  ;;  %1373 = vmatpush.bf16.msra.mxu3 %v1361_v8  ;;  %v1218_v53 = vor.u32 %v1341_v49, %v1215_v52  ;;  %v1342_v58 = vld [vmem:[%s1463_s12 + $0xb4] sm:$0xf0]  ;;  %v1150_v59 = vor.u32 %v1326_v56, %v1149_v55  ;;  %v1343_v61 = vld [vmem:[%s1463_s12 + $0xc4] sm:$0xf]  ;;  %v1159_v63 = vld [vmem:[%s1463_s12 + $0x48] sm:$0xf0] }
  0x1a   : > { %v1214_v60 = vor.u32 %v1342_v58, %v1213_v57  ;;  %v1327_v62 = vld [vmem:[%s1463_s12 + $0x44] sm:$0xf]  ;;  %v1223_v0 = vld [vmem:[%s1463_s12 + $0xc8] sm:$0xf0]  ;;  %v1157_v3 = vld [vmem:[%s1463_s12 + $0x40] sm:$0xf] }
  0x1b   : > { %v1226_v1 = vor.u32 %v1343_v61, %v1223_v0  ;;  %v1162_v2 = vor.u32 %v1327_v62, %v1159_v63  ;;  %v1328_v4 = vld [vmem:[%s1463_s12 + $0x44] sm:$0xf0]  ;;  %v1221_v5 = vld [vmem:[%s1463_s12 + $0xc0] sm:$0xf]  ;;  %v1345_v9 = vld [vmem:[%s1463_s12 + $0xd4] sm:$0xf] }
  0x1c   : > { %532 = vmatpush.bf16.msra.mxu0 %v1354_v11  ;;  %1367 = vmatpush.bf16.msra.mxu2 %v1354_v11  ;;  %v1344_v6 = vld [vmem:[%s1463_s12 + $0xc4] sm:$0xf0]  ;;  %v1158_v7 = vor.u32 %v1328_v4, %v1157_v3  ;;  %v1167_v11 = vld [vmem:[%s1463_s12 + $0x58] sm:$0xf0]  ;;  %v1165_v15 = vld [vmem:[%s1463_s12 + $0x50] sm:$0xf] }
  0x1d   : > { %623 = vmatpush.bf16.msra.mxu1 %v1360_v10  ;;  %1374 = vmatpush.bf16.msra.mxu3 %v1360_v10  ;;  %v1222_v8 = vor.u32 %v1344_v6, %v1221_v5  ;;  %v1329_v10 = vld [vmem:[%s1463_s12 + $0x54] sm:$0xf]  ;;  %v1331_v21 = vld [vmem:[%s1463_s12 + $0x64] sm:$0xf]  ;;  %v1175_v22 = vld [vmem:[%s1463_s12 + $0x68] sm:$0xf0] }
  0x1e   : > { %v1170_v14 = vor.u32 %v1329_v10, %v1167_v11  ;;  %v1239_v25 = vld [vmem:[%s1463_s12 + $0xe8] sm:$0xf0]  ;;  %v1173_v27 = vld [vmem:[%s1463_s12 + $0x60] sm:$0xf]  ;;  %v1332_v28 = vld [vmem:[%s1463_s12 + $0x64] sm:$0xf0] }
  0x1f   : > { %v1174_v31 = vor.u32 %v1332_v28, %v1173_v27  ;;  %v1333_v33 = vld [vmem:[%s1463_s12 + $0x74] sm:$0xf]  ;;  %v1183_v34 = vld [vmem:[%s1463_s12 + $0x78] sm:$0xf0]  ;;  %v1181_v39 = vld [vmem:[%s1463_s12 + $0x70] sm:$0xf] }
  0x20   : > { %533 = vmatpush.bf16.msra.mxu0 %v1353_v13  ;;  %1368 = vmatpush.bf16.msra.mxu2 %v1353_v13  ;;  %v1247_v37 = vld [vmem:[%s1463_s12 + $0xf8] sm:$0xf0]  ;;  %v1334_v40 = vld [vmem:[%s1463_s12 + $0x74] sm:$0xf0]  ;;  %v1335_v45 = vld [vmem:[%s1463_s12 + $0x84] sm:$0xf] }
  0x21   : > { %624 = vmatpush.bf16.msra.mxu1 %v1359_v12  ;;  %1375 = vmatpush.bf16.msra.mxu3 %v1359_v12  ;;  %v1231_v12 = vld [vmem:[%s1463_s12 + $0xd8] sm:$0xf0]  ;;  %v1182_v43 = vor.u32 %v1334_v40, %v1181_v39  ;;  %v1191_v46 = vld [vmem:[%s1463_s12 + $0x88] sm:$0xf0] }
  0x22   : > { %v1234_v13 = vor.u32 %v1345_v9, %v1231_v12 }
  0x24   : > { %1299 = vmatmul.msk.bf16.vlgmr.msra.gmra.mxu1 %vm475_vm1, %v1130_v16  ;;  %534 = vmatpush.bf16.msra.mxu0 %v1352_v17  ;;  %v1330_v16 = vld [vmem:[%s1463_s12 + $0x54] sm:$0xf0] }
  0x25   : > { %1369 = vmatpush.bf16.msra.mxu2 %v1352_v17  ;;  %1308 = vmatmul.msk.bf16.vlgmr.msra.gmra.mxu3 %vm475_vm1, %v1202_v29  ;;  %v1229_v17 = vld [vmem:[%s1463_s12 + $0xd0] sm:$0xf]  ;;  %v1166_v19 = vor.u32 %v1330_v16, %v1165_v15  ;;  %v1237_v29 = vld [vmem:[%s1463_s12 + $0xe0] sm:$0xf] }
  0x28   : > { %535 = vmatpush.bf16.msra.mxu0 %v1351_v18 }
  0x29   : > { %1370 = vmatpush.bf16.msra.mxu2 %v1351_v18  ;;  %v1346_v18 = vld [vmem:[%s1463_s12 + $0xd4] sm:$0xf0] }
  0x2a   : > { %v1230_v20 = vor.u32 %v1346_v18, %v1229_v17 }
  0x2b   : > { %536 = vmatmul.bf16.vlgmr.msra.gmra.mxu0 %v1126_v23  ;;  %v1347_v23 = vld [vmem:[%s1463_s12 + $0xe4] sm:$0xf] }
  0x2c   : > { %576 = vmatmul.bf16.vlgmr.msra.gmra.mxu2 %v1190_v24  ;;  %v1178_v24 = vor.u32 %v1331_v21, %v1175_v22  ;;  %v1242_v26 = vor.u32 %v1347_v23, %v1239_v25 }
  0x34   : > { %1300 = vmatmul.msk.bf16.gmra.mxu1 %vm475_vm1, %v1138_v30  ;;  %v1348_v30 = vld [vmem:[%s1463_s12 + $0xe4] sm:$0xf0] }
  0x35   : > { %1309 = vmatmul.msk.bf16.gmra.mxu3 %vm475_vm1, %v1210_v41  ;;  %v1238_v32 = vor.u32 %v1348_v30, %v1237_v29  ;;  %v1245_v41 = vld [vmem:[%s1463_s12 + $0xf0] sm:$0xf] }
  0x3b   : > { %541 = vmatmul.bf16.gmra.mxu0 %v1134_v35  ;;  %v1349_v35 = vld [vmem:[%s1463_s12 + $0xf4] sm:$0xf] }
  0x3c   : > { %581 = vmatmul.bf16.gmra.mxu2 %v1198_v36  ;;  %v1186_v36 = vor.u32 %v1333_v33, %v1183_v34  ;;  %v1250_v38 = vor.u32 %v1349_v35, %v1247_v37 }
  0x44   : > { %1301 = vmatmul.msk.bf16.gmra.mxu1 %vm475_vm1, %v1146_v42  ;;  %v1350_v42 = vld [vmem:[%s1463_s12 + $0xf4] sm:$0xf0] }
  0x45   : > { %1310 = vmatmul.msk.bf16.gmra.mxu3 %vm475_vm1, %v1218_v53  ;;  %v1246_v44 = vor.u32 %v1350_v42, %v1245_v41 }
  0x4b   : > { %546 = vmatmul.bf16.gmra.mxu0 %v1142_v47  ;;  %v1194_v47 = vor.u32 %v1335_v45, %v1191_v46 }
  0x4c   : > { %586 = vmatmul.bf16.gmra.mxu2 %v1206_v48 }
  0x54   : > { %1302 = vmatmul.msk.bf16.gmra.mxu1 %vm475_vm1, %v1154_v54 }
  0x55   : > { %1311 = vmatmul.msk.bf16.gmra.mxu3 %vm475_vm1, %v1226_v1 }
  0x5b   : > { %551 = vmatmul.bf16.gmra.mxu0 %v1150_v59 }
  0x5c   : > { %591 = vmatmul.bf16.gmra.mxu2 %v1214_v60 }
  0x64   : > { %1303 = vmatmul.msk.bf16.gmra.mxu1 %vm475_vm1, %v1162_v2 }
  0x65   : > { %1312 = vmatmul.msk.bf16.gmra.mxu3 %vm475_vm1, %v1234_v13 }
  0x6b   : > { %556 = vmatmul.bf16.gmra.mxu0 %v1158_v7 }
  0x6c   : > { %596 = vmatmul.bf16.gmra.mxu2 %v1222_v8 }
  0x74   : > { %1304 = vmatmul.msk.bf16.gmra.mxu1 %vm475_vm1, %v1170_v14 }
  0x75   : > { %1313 = vmatmul.msk.bf16.gmra.mxu3 %vm475_vm1, %v1242_v26 }
  0x7b   : > { %561 = vmatmul.bf16.gmra.mxu0 %v1166_v19 }
  0x7c   : > { %601 = vmatmul.bf16.gmra.mxu2 %v1230_v20 }
  0x84   : > { %1305 = vmatmul.msk.bf16.gmra.mxu1 %vm475_vm1, %v1178_v24 }
  0x85   : > { %1314 = vmatmul.msk.bf16.gmra.mxu3 %vm475_vm1, %v1250_v38 }
  0x8b   : > { %566 = vmatmul.bf16.gmra.mxu0 %v1174_v31 }
  0x8c   : > { %606 = vmatmul.bf16.gmra.mxu2 %v1238_v32 }
  0x94   : > { %1306 = vmatmul.msk.bf16.gmra.mxu1 %vm475_vm1, %v1186_v36 }
  0x9b   : > { %571 = vmatmul.bf16.gmra.mxu0 %v1182_v43 }
  0x9c   : > { %611 = vmatmul.bf16.gmra.mxu2 %v1246_v44 }
  0xa1   : > { %v626_v48 = vpop.f32.mrf.mxu1 }
  0xa4   : > { %1307 = vmatmul.msk.bf16.gmra.mxu1 %vm475_vm1, %v1194_v47 }
  0xa8   : > { %v537_v50 = vpop.f32.mrf.mxu0  ;;  %v671_v60 = vpop.f32.mrf.mxu3 }
  0xa9   : > { %v628_v49 = vpop.f32.mrf.mxu1  ;;  %v1557_v51 = vadd.f32 %v626_v48, %v537_v50 }
  0xab   : > { %v776_v36 = vmul.f32 %v1557_v51, %v1557_v51  ;;  %v707_v39 = vsel %vm706_vm2, %v1557_v51, 0.0 }
  0xad   : > { %v808_v46 = vsel %vm706_vm2, %v776_v36, 0.0 }
  0xaf   : > { %v1559_v52 = vpop.f32.mrf.mxu2 }
  0xb0   : > { %v539_v54 = vpop.f32.mrf.mxu0  ;;  %v673_v2 = vpop.f32.mrf.mxu3 }
  0xb1   : > { %v631_v53 = vpop.f32.mrf.mxu1  ;;  %v1561_v55 = vadd.f32 %v628_v49, %v539_v54 }
  0xb3   : > { %v777_v35 = vmul.f32 %v1561_v55, %v1561_v55  ;;  %v708_v37 = vsel %vm706_vm2, %v1561_v55, 0.0 }
  0xb4   : > { %v709_v47 = vadd.f32 %v708_v37, %v707_v39 }
  0xb5   : > { %v809_v42 = vsel %vm706_vm2, %v777_v35, 0.0 }
  0xb7   : > { %v1563_v56 = vpop.f32.mrf.mxu2 }
  0xb8   : > { %v542_v58 = vpop.f32.mrf.mxu0  ;;  %v676_v9 = vpop.f32.mrf.mxu3 }
  0xb9   : > { %v633_v57 = vpop.f32.mrf.mxu1  ;;  %v1565_v59 = vadd.f32 %v631_v53, %v542_v58  ;;  %v810_v58 = vadd.f32 %v809_v42, %v808_v46 }
  0xbb   : > { %v778_v38 = vmul.f32 %v1565_v59, %v1565_v59  ;;  %v710_v43 = vsel %vm706_vm2, %v1565_v59, 0.0 }
  0xbd   : > { %v811_v48 = vsel %vm706_vm2, %v778_v38, 0.0 }
  0xbf   : > { %v582_v61 = vpop.f32.mrf.mxu2 }
  0xc0   : > { %v544_v63 = vpop.f32.mrf.mxu0  ;;  %v1567_v0 = vadd.f32 %v671_v60, %v582_v61  ;;  %v1579_v16 = vpop.f32.mrf.mxu3  ;;  %v711_v60 = vadd.f32 %v710_v43, %v709_v47 }
  0xc1   : > { %v636_v62 = vpop.f32.mrf.mxu1  ;;  %v1569_v1 = vadd.f32 %v633_v57, %v544_v63 }
  0xc3   : > { %v779_v44 = vmul.f32 %v1569_v1, %v1569_v1  ;;  %v712_v49 = vsel %vm706_vm2, %v1569_v1, 0.0 }
  0xc5   : > { %v813_v61 = vsel %vm706_vm2, %v779_v44, 0.0 }
  0xc7   : > { %v584_v3 = vpop.f32.mrf.mxu2 }
  0xc8   : > { %v547_v5 = vpop.f32.mrf.mxu0  ;;  %v1571_v6 = vadd.f32 %v673_v2, %v584_v3  ;;  %v1583_v20 = vpop.f32.mrf.mxu3  ;;  %v812_v3 = vadd.f32 %v811_v48, %v810_v58 }
  0xc9   : > { %v638_v4 = vpop.f32.mrf.mxu1  ;;  %v1573_v7 = vadd.f32 %v636_v62, %v547_v5 }
  0xcb   : > { %v780_v50 = vmul.f32 %v1573_v7, %v1573_v7  ;;  %v714_v62 = vsel %vm706_vm2, %v1573_v7, 0.0 }
  0xcd   : > { %v815_v5 = vsel %vm706_vm2, %v780_v50, 0.0 }
  0xcf   : > { %v587_v8 = vpop.f32.mrf.mxu2 }
  0xd0   : > { %v549_v11 = vpop.f32.mrf.mxu0  ;;  %v1575_v12 = vadd.f32 %v676_v9, %v587_v8  ;;  %v1587_v24 = vpop.f32.mrf.mxu3 }
  0xd1   : > { %v641_v10 = vpop.f32.mrf.mxu1  ;;  %v1614_v45 = vadd.f32 %v638_v4, %v549_v11  ;;  %v713_v4 = vadd.f32 %v712_v49, %v711_v60  ;;  %v814_v11 = vadd.f32 %v813_v61, %v812_v3 }
  0xd3   : > { %v781_v63 = vmul.f32 %v1614_v45, %v1614_v45  ;;  %v716_v8 = vsel %vm706_vm2, %v1614_v45, 0.0  ;;  %v816_v39 = vadd.f32 %v815_v5, %v814_v11 }
  0xd5   : > { %v817_v37 = vsel %vm706_vm2, %v781_v63, 0.0 }
  0xd6   : > { %v818_v46 = vadd.f32 %v817_v37, %v816_v39 }
  0xd7   : > { %v1577_v15 = vpop.f32.mrf.mxu2 }
  0xd8   : > { %v552_v14 = vpop.f32.mrf.mxu0  ;;  %v1591_v28 = vpop.f32.mrf.mxu3 }
  0xd9   : > { %v643_v13 = vpop.f32.mrf.mxu1  ;;  %v1622_v53 = vadd.f32 %v641_v10, %v552_v14  ;;  %v715_v14 = vadd.f32 %v714_v62, %v713_v4 }
  0xdb   : > { %v782_v9 = vmul.f32 %v1622_v53, %v1622_v53  ;;  %v717_v42 = vadd.f32 %v716_v8, %v715_v14 }
  0xdd   : > { %v819_v43 = vsel %vm706_vm2, %v782_v9, 0.0 }
  0xde   : > { %v820_v60 = vadd.f32 %v819_v43, %v818_v46 }
  0xdf   : > { %v1581_v19 = vpop.f32.mrf.mxu2 }
  0xe0   : > { %v554_v18 = vpop.f32.mrf.mxu0  ;;  %v1597_v34 = vpop.f32.mrf.mxu3 }
  0xe1   : > { %v646_v17 = vpop.f32.mrf.mxu1  ;;  %v1633_v2 = vadd.f32 %v643_v13, %v554_v18  ;;  %v718_v13 = vsel %vm706_vm2, %v1622_v53, 0.0 }
  0xe2   : > { %v719_v47 = vadd.f32 %v718_v13, %v717_v42 }
  0xe3   : > { %v783_v18 = vmul.f32 %v1633_v2, %v1633_v2 }
  0xe5   : > { %v821_v48 = vsel %vm706_vm2, %v783_v18, 0.0 }
  0xe6   : > { %v822_v3 = vadd.f32 %v821_v48, %v820_v60 }
  0xe7   : > { %v1585_v23 = vpop.f32.mrf.mxu2 }
  0xe8   : > { %v557_v22 = vpop.f32.mrf.mxu0  ;;  %v1626_v57 = vpop.f32.mrf.mxu3 }
  0xe9   : > { %v648_v21 = vpop.f32.mrf.mxu1  ;;  %v1640_v10 = vadd.f32 %v646_v17, %v557_v22  ;;  %v720_v17 = vsel %vm706_vm2, %v1633_v2, 0.0 }
  0xea   : > { %v721_v61 = vadd.f32 %v720_v17, %v719_v47 }
  0xeb   : > { %v784_v22 = vmul.f32 %v1640_v10, %v1640_v10 }
  0xef   : > { %v1589_v27 = vpop.f32.mrf.mxu2 }
  0xf0   : > { %v559_v26 = vpop.f32.mrf.mxu0  ;;  %v1665_v58 = vpop.f32.mrf.mxu3 }
  0xf1   : > { %v651_v25 = vpop.f32.mrf.mxu1  ;;  %v1647_v38 = vadd.f32 %v648_v21, %v559_v26  ;;  %v722_v21 = vsel %vm706_vm2, %v1640_v10, 0.0 }
  0xf3   : > { %v785_v26 = vmul.f32 %v1647_v38, %v1647_v38 }
  0xf5   : > { %v825_v5 = vsel %vm706_vm2, %v785_v26, 0.0 }
  0xf7   : > { %v1595_v33 = vpop.f32.mrf.mxu2 }
  0xf8   : > { %v562_v30 = vpop.f32.mrf.mxu0 }
  0xf9   : > { %v653_v29 = vpop.f32.mrf.mxu1  ;;  %v1654_v44 = vadd.f32 %v651_v25, %v562_v30  ;;  %v823_v25 = vsel %vm706_vm2, %v784_v22, 0.0  ;;  %v724_v30 = vsel %vm706_vm2, %v1647_v38, 0.0 }
  0xfa   : > { %v824_v14 = vadd.f32 %v823_v25, %v822_v3 }
  0xfb   : > { %v786_v62 = vmul.f32 %v1654_v44, %v1654_v44  ;;  %v726_v8 = vsel %vm706_vm2, %v1654_v44, 0.0 }
  0xfc   : > { %v826_v39 = vadd.f32 %v825_v5, %v824_v14 }
  0xfd   : > { %v827_v13 = vsel %vm706_vm2, %v786_v62, 0.0 }
  0xfe   : > { %v828_v17 = vadd.f32 %v827_v13, %v826_v39 }
  0xff   : > { %v1624_v54 = vpop.f32.mrf.mxu2 }
 0x100   : > { %v564_v32 = vpop.f32.mrf.mxu0 }
 0x101   : > { %v1593_v31 = vpop.f32.mrf.mxu1  ;;  %v1661_v49 = vadd.f32 %v653_v29, %v564_v32  ;;  %v723_v29 = vadd.f32 %v722_v21, %v721_v61  ;;  %v1701_v21 = vpop.f32.mrf.mxu3 }
 0x103   : > { %v787_v9 = vmul.f32 %v1661_v49, %v1661_v49  ;;  %v725_v37 = vadd.f32 %v724_v30, %v723_v29 }
 0x105   : > { %v727_v42 = vadd.f32 %v726_v8, %v725_v37  ;;  %v829_v43 = vsel %vm706_vm2, %v787_v9, 0.0 }
 0x106   : > { %v830_v26 = vadd.f32 %v829_v43, %v828_v17 }
 0x107   : > { %v1663_v50 = vpop.f32.mrf.mxu2 }
 0x108   : > { %v567_v41 = vpop.f32.mrf.mxu0 }
 0x109   : > { %v658_v40 = vpop.f32.mrf.mxu1  ;;  %v1673_v63 = vadd.f32 %v1593_v31, %v567_v41  ;;  %v728_v31 = vsel %vm706_vm2, %v1661_v49, 0.0 }
 0x10a   : > { %v729_v22 = vadd.f32 %v728_v31, %v727_v42 }
 0x10b   : > { %v788_v41 = vmul.f32 %v1673_v63, %v1673_v63 }
 0x10d   : > { %v831_v46 = vsel %vm706_vm2, %v788_v41, 0.0 }
 0x10e   : > { %v832_v29 = vadd.f32 %v831_v46, %v830_v26  ;;  %v794_v46 = vmul.f32 %v1567_v0, %v1567_v0 }
 0x10f   : > { %v1699_v48 = vpop.f32.mrf.mxu2 }
 0x110   : > { %v569_v36 = vpop.f32.mrf.mxu0 }
 0x111   : > { %v661_v35 = vpop.f32.mrf.mxu1  ;;  %v1680_v11 = vadd.f32 %v658_v40, %v569_v36  ;;  %v730_v40 = vsel %vm706_vm2, %v1673_v63, 0.0 }
 0x112   : > { %v731_v60 = vadd.f32 %v730_v40, %v729_v22  ;;  %v698_v22 = vpop.f32.mrf.mxu3 }
 0x113   : > { %v789_v36 = vmul.f32 %v1680_v11, %v1680_v11  ;;  %v732_v47 = vsel %vm706_vm2, %v1680_v11, 0.0 }
 0x115   : > { %v833_v30 = vsel %vm706_vm2, %v789_v36, 0.0 }
 0x116   : > { %v834_v37 = vadd.f32 %v833_v30, %v832_v29  ;;  %v1737_v30 = vadd.f32 %v1579_v16, %v1577_v15  ;;  %v746_v16 = vsel %vm706_vm2, %v1575_v12, 0.0 }
 0x117   : > { %v609_v17 = vpop.f32.mrf.mxu2 }
 0x118   : > { %v572_v4 = vpop.f32.mrf.mxu0 }
 0x119   : > { %v663_v32 = vpop.f32.mrf.mxu1  ;;  %v1687_v18 = vadd.f32 %v661_v35, %v572_v4  ;;  %v733_v4 = vadd.f32 %v732_v47, %v731_v60 }
 0x11b   : > { %v790_v35 = vmul.f32 %v1687_v18, %v1687_v18  ;;  %v734_v62 = vsel %vm706_vm2, %v1687_v18, 0.0 }
 0x11c   : > { %v735_v13 = vadd.f32 %v734_v62, %v733_v4 }
 0x11d   : > { %v835_v5 = vsel %vm706_vm2, %v790_v35, 0.0 }
 0x11e   : > { %v836_v41 = vadd.f32 %v835_v5, %v834_v37  ;;  %v843_v5 = vsel %vm706_vm2, %v794_v46, 0.0  ;;  %v1747_v37 = vadd.f32 %v1583_v20, %v1581_v19  ;;  %v748_v19 = vsel %vm706_vm2, %v1737_v30, 0.0 }
 0x120   : > { %v574_v25 = vpop.f32.mrf.mxu0  ;;  %v798_v20 = vmul.f32 %v1747_v37, %v1747_v37 }
 0x121   : > { %v666_v61 = vpop.f32.mrf.mxu1  ;;  %v1706_v3 = vadd.f32 %v663_v32, %v574_v25  ;;  %v795_v25 = vmul.f32 %v1571_v6, %v1571_v6 }
 0x122   : > { %v1710_v8 = vadd.f32 %v666_v61, %v1559_v52 }
 0x123   : > { %v736_v9 = vsel %vm706_vm2, %v1706_v3, 0.0  ;;  %v791_v14 = vmul.f32 %v1706_v3, %v1706_v3  ;;  %v845_v15 = vsel %vm706_vm2, %v795_v25, 0.0 }
 0x124   : > { %v737_v32 = vadd.f32 %v736_v9, %v735_v13  ;;  %v792_v39 = vmul.f32 %v1710_v8, %v1710_v8  ;;  %v738_v52 = vsel %vm706_vm2, %v1710_v8, 0.0  ;;  %v744_v9 = vsel %vm706_vm2, %v1571_v6, 0.0 }
 0x125   : > { %v837_v31 = vsel %vm706_vm2, %v791_v14, 0.0  ;;  %v796_v14 = vmul.f32 %v1575_v12, %v1575_v12 }
 0x126   : > { %v838_v42 = vadd.f32 %v837_v31, %v836_v41  ;;  %v739_v36 = vadd.f32 %v738_v52, %v737_v32  ;;  %v839_v47 = vsel %vm706_vm2, %v792_v39, 0.0  ;;  %v797_v41 = vmul.f32 %v1737_v30, %v1737_v30 }
 0x127   : > { %v1756_v32 = vadd.f32 %v1587_v24, %v1585_v23  ;;  %v1765_v52 = vadd.f32 %v1591_v28, %v1589_v27  ;;  %v750_v24 = vsel %vm706_vm2, %v1747_v37, 0.0  ;;  %v851_v27 = vsel %vm706_vm2, %v798_v20, 0.0 }
 0x128   : > { %v840_v61 = vadd.f32 %v839_v47, %v838_v42  ;;  %v612_v47 = vpop.f32.mrf.mxu2  ;;  %v849_v23 = vsel %vm706_vm2, %v797_v41, 0.0 }
 0x129   : > { %v668_v43 = vpop.f32.mrf.mxu1  ;;  %v752_v28 = vsel %vm706_vm2, %v1756_v32, 0.0  ;;  %v800_v25 = vmul.f32 %v1765_v52, %v1765_v52 }
 0x12a   : > { %v1722_v40 = vadd.f32 %v668_v43, %v1563_v56  ;;  %v742_v56 = vsel %vm706_vm2, %v1567_v0, 0.0  ;;  %v847_v43 = vsel %vm706_vm2, %v796_v14, 0.0 }
 0x12c   : > { %v740_v35 = vsel %vm706_vm2, %v1722_v40, 0.0  ;;  %v793_v26 = vmul.f32 %v1722_v40, %v1722_v40 }
 0x12d   : > { %v741_v60 = vadd.f32 %v740_v35, %v739_v36  ;;  %v701_v35 = vpop.f32.mrf.mxu3 }
 0x12e   : > { %v841_v62 = vsel %vm706_vm2, %v793_v26, 0.0  ;;  %v799_v26 = vmul.f32 %v1756_v32, %v1756_v32 }
 0x12f   : > { %v743_v29 = vadd.f32 %v742_v56, %v741_v60  ;;  %v842_v4 = vadd.f32 %v841_v62, %v840_v61  ;;  %v1774_v60 = vadd.f32 %v1597_v34, %v1595_v33  ;;  %v1783_v62 = vadd.f32 %v1626_v57, %v1624_v54 }
 0x130   : > { %v754_v33 = vsel %vm706_vm2, %v1765_v52, 0.0  ;;  %v614_v20 = vpop.f32.mrf.mxu2 }
 0x131   : > { %v745_v13 = vadd.f32 %v744_v9, %v743_v29  ;;  %v844_v31 = vadd.f32 %v843_v5, %v842_v4  ;;  %v853_v5 = vsel %vm706_vm2, %v799_v26, 0.0  ;;  %v801_v34 = vmul.f32 %v1774_v60, %v1774_v60 }
 0x132   : > { %v1792_v9 = vadd.f32 %v1665_v58, %v1663_v50  ;;  %v756_v54 = vsel %vm706_vm2, %v1774_v60, 0.0  ;;  %v802_v57 = vmul.f32 %v1783_v62, %v1783_v62  ;;  %v758_v50 = vsel %vm706_vm2, %v1783_v62, 0.0 }
 0x133   : > { %v747_v39 = vadd.f32 %v746_v16, %v745_v13  ;;  %v846_v42 = vadd.f32 %v845_v15, %v844_v31  ;;  %v855_v31 = vsel %vm706_vm2, %v800_v25, 0.0  ;;  %v1801_v15 = vadd.f32 %v1701_v21, %v1699_v48 }
 0x134   : > { %v803_v58 = vmul.f32 %v1792_v9, %v1792_v9  ;;  %v760_v48 = vsel %vm706_vm2, %v1792_v9, 0.0 }
 0x135   : > { %v749_v36 = vadd.f32 %v748_v19, %v747_v39  ;;  %v848_v46 = vadd.f32 %v847_v43, %v846_v42  ;;  %v857_v39 = vsel %vm706_vm2, %v801_v34, 0.0  ;;  %v1808_v42 = vadd.f32 %v698_v22, %v609_v17 }
 0x136   : > { %v804_v21 = vmul.f32 %v1801_v15, %v1801_v15  ;;  %v762_v17 = vsel %vm706_vm2, %v1801_v15, 0.0 }
 0x137   : > { %v751_v61 = vadd.f32 %v750_v24, %v749_v36  ;;  %v850_v56 = vadd.f32 %v849_v23, %v848_v46  ;;  %v703_v36 = vpop.f32.mrf.mxu3  ;;  %v859_v46 = vsel %vm706_vm2, %v802_v57, 0.0  ;;  %v1815_v23 = vadd.f32 %v701_v35, %v612_v47 }
 0x138   : > { %v805_v22 = vmul.f32 %v1808_v42, %v1808_v42  ;;  %v863_v25 = vsel %vm706_vm2, %v804_v21, 0.0  ;;  %v764_v47 = vsel %vm706_vm2, %v1808_v42, 0.0 }
 0x139   : > { %v852_v29 = vadd.f32 %v851_v27, %v850_v56  ;;  %v753_v4 = vadd.f32 %v752_v28, %v751_v61  ;;  %v861_v61 = vsel %vm706_vm2, %v803_v58, 0.0  ;;  %v1822_v56 = vadd.f32 %v703_v36, %v614_v20 }
 0x13a   : > { %v806_v35 = vmul.f32 %v1815_v23, %v1815_v23 }
 0x13b   : > { %v755_v14 = vadd.f32 %v754_v33, %v753_v4  ;;  %v854_v13 = vadd.f32 %v853_v5, %v852_v29  ;;  %v865_v5 = vsel %vm706_vm2, %v805_v22, 0.0  ;;  %v766_v33 = vsel %vm706_vm2, %v1815_v23, 0.0 }
 0x13c   : > { %v807_v34 = vmul.f32 %v1822_v56, %v1822_v56 }
 0x13d   : > { %v757_v16 = vadd.f32 %v756_v54, %v755_v14  ;;  %v856_v41 = vadd.f32 %v855_v31, %v854_v13  ;;  %v867_v31 = vsel %vm706_vm2, %v806_v35, 0.0  ;;  %v768_v54 = vsel %vm706_vm2, %v1822_v56, 0.0 }
 0x13f   : > { %v759_v43 = vadd.f32 %v758_v50, %v757_v16  ;;  %v858_v19 = vadd.f32 %v857_v39, %v856_v41  ;;  %v869_v41 = vsel %vm706_vm2, %v807_v34, 0.0 }
 0x141   : > { %v761_v24 = vadd.f32 %v760_v48, %v759_v43  ;;  %v860_v26 = vadd.f32 %v859_v46, %v858_v19 }
 0x143   : > { %v763_v27 = vadd.f32 %v762_v17, %v761_v24  ;;  %v862_v28 = vadd.f32 %v861_v61, %v860_v26 }
 0x145   : > { %v765_v29 = vadd.f32 %v764_v47, %v763_v27  ;;  %v864_v4 = vadd.f32 %v863_v25, %v862_v28 }
 0x147   : > { %v866_v14 = vadd.f32 %v865_v5, %v864_v4  ;;  %v767_v13 = vadd.f32 %v766_v33, %v765_v29 }
 0x149   : > { %v868_v57 = vadd.f32 %v867_v31, %v866_v14  ;;  %v769_v16 = vadd.f32 %v768_v54, %v767_v13  ;;  %v924_v14 = vld [vmem:[%s2056_s2] sm:$0x1] }
 0x14b   : > { %v770_v39 = vrot.slane %v769_v16, 4  ;;  %v870_v50 = vadd.f32 %v869_v41, %v868_v57 }
 0x14d   : > { %v771_v58 = vadd.f32 %v770_v39, %v769_v16  ;;  %v871_v43 = vrot.slane %v870_v50, 4 }
 0x14f   : > { %v772_v19 = vrot.slane %v771_v58, 2  ;;  %v872_v20 = vadd.f32 %v871_v43, %v870_v50 }
 0x151   : > { %v773_v36 = vadd.f32 %v772_v19, %v771_v58  ;;  %v873_v46 = vrot.slane %v872_v20, 2 }
 0x153   : > { %v774_v48 = vrot.slane %v773_v36, 1  ;;  %v874_v21 = vadd.f32 %v873_v46, %v872_v20 }
 0x155   : > { %v775_v24 = vadd.f32 %v774_v48, %v773_v36  ;;  %v875_v26 = vrot.slane %v874_v21, 1 }
 0x157   : > { %v876_v61 = vadd.f32 %v875_v26, %v874_v21  ;;  %v1838_v17 = vmul.f32 0.00390625, %v775_v24 }
 0x159   : > { %v878_v22 = vmul.f32 0.00390625, %v876_v61  ;;  %v879_v27 = vmul.f32 %v1838_v17, %v1838_v17  ;;  %v892_v54 = vsub.f32 %v1557_v51, %v1838_v17  ;;  %v893_v57 = vsub.f32 %v1561_v55, %v1838_v17  ;;  %v1863_v51 = vld [vmem:[%s2057_s3] ss:$0 sm:$0xff] }
 0x15a   : > { %v894_v16 = vsub.f32 %v1565_v59, %v1838_v17  ;;  %v895_v41 = vsub.f32 %v1569_v1, %v1838_v17  ;;  %v896_v39 = vsub.f32 %v1573_v7, %v1838_v17  ;;  %v897_v55 = vsub.f32 %v1614_v45, %v1838_v17 }
 0x15b   : > { %v880_v28 = vsub.f32 %v878_v22, %v879_v27  ;;  %v898_v1 = vsub.f32 %v1622_v53, %v1838_v17  ;;  %v899_v19 = vsub.f32 %v1633_v2, %v1838_v17  ;;  %v900_v20 = vsub.f32 %v1640_v10, %v1838_v17 }
 0x15c   : > { %v901_v53 = vsub.f32 %v1647_v38, %v1838_v17  ;;  %v902_v24 = vsub.f32 %v1654_v44, %v1838_v17  ;;  %v903_v26 = vsub.f32 %v1661_v49, %v1838_v17  ;;  %v904_v38 = vsub.f32 %v1673_v63, %v1838_v17 }
 0x15d   : > { %v881_v25 = vadd.f32 1e-06, %v880_v28 }
 0x15f   : > { %1385 = vrsqrt.f32 %v881_v25  ;;  %vm888_vm4 = vweird.f32 %v881_v25 }
 0x165   : > { %v1386_v47 = vpop.eup %1385 }
 0x166   : > { %v883_v35 = vmul.f32 %v1386_v47, %v881_v25  ;;  %vm889_vm3 = vweird.f32 %v1386_v47 }
 0x167   : > { %vm890_vm5 = vmor %vm888_vm4, %vm889_vm3 }
 0x168   : > { %v884_v29 = vmul.f32 %v1386_v47, %v883_v35 }
 0x16a   : > { %v885_v4 = vmul.f32 0.5, %v884_v29  ;;  %v905_v29 = vsub.f32 %v1680_v11, %v1838_v17  ;;  %v907_v11 = vsub.f32 %v1706_v3, %v1838_v17  ;;  %v909_v3 = vsub.f32 %v1722_v40, %v1838_v17 }
 0x16b   : > { %v911_v40 = vsub.f32 %v1571_v6, %v1838_v17  ;;  %v913_v6 = vsub.f32 %v1737_v30, %v1838_v17  ;;  %v915_v30 = vsub.f32 %v1756_v32, %v1838_v17  ;;  %v917_v32 = vsub.f32 %v1774_v60, %v1838_v17 }
 0x16c   : > { %v886_v5 = vsub.f32 1.5, %v885_v4  ;;  %v919_v60 = vsub.f32 %v1792_v9, %v1838_v17  ;;  %v921_v9 = vsub.f32 %v1808_v42, %v1838_v17  ;;  %v923_v42 = vsub.f32 %v1822_v56, %v1838_v17 }
 0x16e   : > { %v887_v33 = vmul.f32 %v1386_v47, %v886_v5 }
 0x170   : > { %v891_v34 = vsel %vm890_vm5, %v1386_v47, %v887_v33  ;;  %v906_v33 = vsub.f32 %v1687_v18, %v1838_v17  ;;  %v908_v18 = vsub.f32 %v1710_v8, %v1838_v17  ;;  %v910_v8 = vsub.f32 %v1567_v0, %v1838_v17 }
 0x171   : > { %v925_v13 = vmul.f32 %v924_v14, %v891_v34  ;;  %v912_v0 = vsub.f32 %v1575_v12, %v1838_v17  ;;  %v914_v12 = vsub.f32 %v1747_v37, %v1838_v17  ;;  %v916_v37 = vsub.f32 %v1765_v52, %v1838_v17 }
 0x172   : > { %v918_v52 = vsub.f32 %v1783_v62, %v1838_v17  ;;  %v920_v62 = vsub.f32 %v1801_v15, %v1838_v17  ;;  %v922_v15 = vsub.f32 %v1815_v23, %v1838_v17 }
 0x173   : > { %v1845_v31 = vperm.slane %v925_v13, 0 }
 0x175   : > { %v927_v50 = vmul.f32 %v1845_v31, %v892_v54  ;;  %v928_v58 = vmul.f32 %v1845_v31, %v893_v57  ;;  %v929_v43 = vmul.f32 %v1845_v31, %v894_v16  ;;  %v930_v59 = vmul.f32 %v1845_v31, %v895_v41 }
 0x176   : > { %v931_v7 = vmul.f32 %v1845_v31, %v896_v39  ;;  %v932_v36 = vmul.f32 %v1845_v31, %v897_v55  ;;  %v933_v46 = vmul.f32 %v1845_v31, %v898_v1  ;;  %v934_v2 = vmul.f32 %v1845_v31, %v899_v19 }
 0x177   : > { %v963_v45 = vadd.f32 %v1863_v51, %v927_v50  ;;  %v964_v48 = vadd.f32 %v1863_v51, %v928_v58  ;;  %v965_v21 = vadd.f32 %v1863_v51, %v929_v43  ;;  %v966_v10 = vadd.f32 %v1863_v51, %v930_v59 }
 0x178   : > { %v935_v61 = vmul.f32 %v1845_v31, %v900_v20  ;;  %v967_v22 = vadd.f32 %v1863_v51, %v931_v7  ;;  %v936_v44 = vmul.f32 %v1845_v31, %v901_v53  ;;  %v937_v27 = vmul.f32 %v1845_v31, %v902_v24 }
 0x179   : > { %v968_v49 = vadd.f32 %v1863_v51, %v932_v36  ;;  %v969_v28 = vadd.f32 %v1863_v51, %v933_v46  ;;  %v995_v25 = vmax.f32 %v963_v45, 0.0  ;;  %v996_v47 = vmax.f32 %v964_v48, 0.0 }
 0x17a   : > { %v997_v35 = vmax.f32 %v965_v21, 0.0  ;;  %v938_v4 = vmul.f32 %v1845_v31, %v903_v26  ;;  %v970_v63 = vadd.f32 %v1863_v51, %v934_v2  ;;  %v998_v5 = vmax.f32 %v966_v10, 0.0 }
 0x17b   : > { %v939_v34 = vmul.f32 %v1845_v31, %v904_v38  ;;  %v971_v14 = vadd.f32 %v1863_v51, %v935_v61  ;;  %v999_v13 = vmax.f32 %v967_v22, 0.0  ;;  %1027 = vst.msk [vmem:[%s1895_s29] sm:$0xff] %vm706_vm2, %v995_v25  ;;  %v940_v54 = vmul.f32 %v1845_v31, %v905_v29 }
 0x17c   : > { %v972_v57 = vadd.f32 %v1863_v51, %v936_v44  ;;  %v1000_v16 = vmax.f32 %v968_v49, 0.0  ;;  %1028 = vst.msk [vmem:[%s1895_s29 + $0x8] sm:$0xff] %vm706_vm2, %v996_v47  ;;  %v941_v41 = vmul.f32 %v1845_v31, %v906_v33  ;;  %v973_v39 = vadd.f32 %v1863_v51, %v937_v27 }
 0x17d   : > { %v1001_v50 = vmax.f32 %v969_v28, 0.0  ;;  %1029 = vst.msk [vmem:[%s1895_s29 + $0x10] sm:$0xff] %vm706_vm2, %v997_v35  ;;  %v942_v58 = vmul.f32 %v1845_v31, %v907_v11  ;;  %v974_v43 = vadd.f32 %v1863_v51, %v938_v4  ;;  %v1002_v55 = vmax.f32 %v970_v63, 0.0 }
 0x17e   : > { %1030 = vst.msk [vmem:[%s1895_s29 + $0x18] sm:$0xff] %vm706_vm2, %v998_v5  ;;  %v943_v59 = vmul.f32 %v1845_v31, %v908_v18  ;;  %v975_v1 = vadd.f32 %v1863_v51, %v939_v34  ;;  %v1003_v7 = vmax.f32 %v971_v14, 0.0  ;;  %v944_v19 = vmul.f32 %v1845_v31, %v909_v3 }
 0x17f   : > { %1031 = vst.msk [vmem:[%s1895_s29 + $0x20] sm:$0xff] %vm706_vm2, %v999_v13  ;;  %v976_v20 = vadd.f32 %v1863_v51, %v940_v54  ;;  %v1004_v36 = vmax.f32 %v972_v57, 0.0  ;;  %v945_v46 = vmul.f32 %v1845_v31, %v910_v8  ;;  %v977_v45 = vadd.f32 %v1863_v51, %v941_v41 }
 0x180   : > { %1032 = vst.msk [vmem:[%s1895_s29 + $0x28] sm:$0xff] %vm706_vm2, %v1000_v16  ;;  %v1005_v48 = vmax.f32 %v973_v39, 0.0  ;;  %v946_v21 = vmul.f32 %v1845_v31, %v911_v40  ;;  %v978_v53 = vadd.f32 %v1863_v51, %v942_v58  ;;  %v1006_v24 = vmax.f32 %v974_v43, 0.0 }
 0x181   : > { %1033 = vst.msk [vmem:[%s1895_s29 + $0x30] sm:$0xff] %vm706_vm2, %v1001_v50  ;;  %v947_v2 = vmul.f32 %v1845_v31, %v912_v0  ;;  %v979_v10 = vadd.f32 %v1863_v51, %v943_v59  ;;  %v1007_v26 = vmax.f32 %v975_v1, 0.0  ;;  %v948_v61 = vmul.f32 %v1845_v31, %v913_v6 }
 0x182   : > { %1034 = vst.msk [vmem:[%s1895_s29 + $0x38] sm:$0xff] %vm706_vm2, %v1002_v55  ;;  %v980_v22 = vadd.f32 %v1863_v51, %v944_v19  ;;  %v1008_v38 = vmax.f32 %v976_v20, 0.0  ;;  %v949_v44 = vmul.f32 %v1845_v31, %v914_v12  ;;  %v981_v27 = vadd.f32 %v1863_v51, %v945_v46 }
 0x183   : > { %1035 = vst.msk [vmem:[%s1895_s29 + $0x40] sm:$0xff] %vm706_vm2, %v1003_v7  ;;  %v1009_v49 = vmax.f32 %v977_v45, 0.0  ;;  %v950_v28 = vmul.f32 %v1845_v31, %v915_v30  ;;  %v982_v25 = vadd.f32 %v1863_v51, %v946_v21  ;;  %v1010_v47 = vmax.f32 %v978_v53, 0.0 }
 0x184   : > { %1036 = vst.msk [vmem:[%s1895_s29 + $0x48] sm:$0xff] %vm706_vm2, %v1004_v36  ;;  %v951_v35 = vmul.f32 %v1845_v31, %v916_v37  ;;  %v983_v29 = vadd.f32 %v1863_v51, %v947_v2  ;;  %v1011_v4 = vmax.f32 %v979_v10, 0.0  ;;  %v952_v63 = vmul.f32 %v1845_v31, %v917_v32 }
 0x185   : > { %1037 = vst.msk [vmem:[%s1895_s29 + $0x50] sm:$0xff] %vm706_vm2, %v1005_v48  ;;  %v984_v5 = vadd.f32 %v1863_v51, %v948_v61  ;;  %v1012_v33 = vmax.f32 %v980_v22, 0.0  ;;  %v953_v34 = vmul.f32 %v1845_v31, %v918_v52  ;;  %v985_v14 = vadd.f32 %v1863_v51, %v949_v44 }
 0x186   : > { %1038 = vst.msk [vmem:[%s1895_s29 + $0x58] sm:$0xff] %vm706_vm2, %v1006_v24  ;;  %v1013_v13 = vmax.f32 %v981_v27, 0.0  ;;  %v954_v11 = vmul.f32 %v1845_v31, %v919_v60  ;;  %v986_v54 = vadd.f32 %v1863_v51, %v950_v28  ;;  %v1014_v57 = vmax.f32 %v982_v25, 0.0 }
 0x187   : > { %1039 = vst.msk [vmem:[%s1895_s29 + $0x60] sm:$0xff] %vm706_vm2, %v1007_v26  ;;  %v955_v16 = vmul.f32 %v1845_v31, %v920_v62  ;;  %v987_v18 = vadd.f32 %v1863_v51, %v951_v35  ;;  %v1015_v41 = vmax.f32 %v983_v29, 0.0  ;;  %v956_v39 = vmul.f32 %v1845_v31, %v921_v9 }
 0x188   : > { %1040 = vst.msk [vmem:[%s1895_s29 + $0x68] sm:$0xff] %vm706_vm2, %v1008_v38  ;;  %v988_v50 = vadd.f32 %v1863_v51, %v952_v63  ;;  %v1016_v3 = vmax.f32 %v984_v5, 0.0  ;;  %v957_v23 = vmul.f32 %v1845_v31, %v922_v15  ;;  %v989_v58 = vadd.f32 %v1863_v51, %v953_v34 }
 0x189   : > { %1041 = vst.msk [vmem:[%s1895_s29 + $0x70] sm:$0xff] %vm706_vm2, %v1009_v49  ;;  %v1017_v43 = vmax.f32 %v985_v14, 0.0  ;;  %v958_v55 = vmul.f32 %v1845_v31, %v923_v42  ;;  %v990_v56 = vadd.f32 %v1863_v51, %v954_v11  ;;  %v1018_v17 = vmax.f32 %v986_v54, 0.0 }
 0x18a   : > { %1042 = vst.msk [vmem:[%s1895_s29 + $0x78] sm:$0xff] %vm706_vm2, %v1010_v47  ;;  %v991_v8 = vadd.f32 %v1863_v51, %v955_v16  ;;  %v1019_v59 = vmax.f32 %v987_v18, 0.0  ;;  %v992_v1 = vadd.f32 %v1863_v51, %v956_v39  ;;  %v1020_v7 = vmax.f32 %v988_v50, 0.0 }
 0x18b   : > { %1043 = vst.msk [vmem:[%s1895_s29 + $0x80] sm:$0xff] %vm706_vm2, %v1011_v4  ;;  %v993_v31 = vadd.f32 %v1863_v51, %v957_v23  ;;  %v1021_v40 = vmax.f32 %v989_v58, 0.0  ;;  %v994_v19 = vadd.f32 %v1863_v51, %v958_v55  ;;  %v1022_v20 = vmax.f32 %v990_v56, 0.0 }
 0x18c   : > { %1044 = vst.msk [vmem:[%s1895_s29 + $0x88] sm:$0xff] %vm706_vm2, %v1012_v33  ;;  %v1023_v36 = vmax.f32 %v991_v8, 0.0  ;;  %v1024_v0 = vmax.f32 %v992_v1, 0.0 }
 0x18d   : > { %1045 = vst.msk [vmem:[%s1895_s29 + $0x90] sm:$0xff] %vm706_vm2, %v1013_v13  ;;  %v1025_v46 = vmax.f32 %v993_v31, 0.0  ;;  %v1026_v45 = vmax.f32 %v994_v19, 0.0 }
 0x18e   : > { %1046 = vst.msk [vmem:[%s1895_s29 + $0x98] sm:$0xff] %vm706_vm2, %v1014_v57 }
 0x18f   : > { %1047 = vst.msk [vmem:[%s1895_s29 + $0xa0] sm:$0xff] %vm706_vm2, %v1015_v41 }
 0x190   : > { %1048 = vst.msk [vmem:[%s1895_s29 + $0xa8] sm:$0xff] %vm706_vm2, %v1016_v3 }
 0x191   : > { %1049 = vst.msk [vmem:[%s1895_s29 + $0xb0] sm:$0xff] %vm706_vm2, %v1017_v43 }
 0x192   : > { %1050 = vst.msk [vmem:[%s1895_s29 + $0xb8] sm:$0xff] %vm706_vm2, %v1018_v17 }
 0x193   : > { %1051 = vst.msk [vmem:[%s1895_s29 + $0xc0] sm:$0xff] %vm706_vm2, %v1019_v59 }
 0x194   : > { %1052 = vst.msk [vmem:[%s1895_s29 + $0xc8] sm:$0xff] %vm706_vm2, %v1020_v7 }
 0x195   : > { %1053 = vst.msk [vmem:[%s1895_s29 + $0xd0] sm:$0xff] %vm706_vm2, %v1021_v40 }
 0x196   : > { %1054 = vst.msk [vmem:[%s1895_s29 + $0xd8] sm:$0xff] %vm706_vm2, %v1022_v20 }
 0x197   : > { %1055 = vst.msk [vmem:[%s1895_s29 + $0xe0] sm:$0xff] %vm706_vm2, %v1023_v36 }
 0x198   : > { %1056 = vst.msk [vmem:[%s1895_s29 + $0xe8] sm:$0xff] %vm706_vm2, %v1024_v0 }
 0x199   : > { %1057 = vst.msk [vmem:[%s1895_s29 + $0xf0] sm:$0xff] %vm706_vm2, %v1025_v46 }
 0x19a   : > { %1058 = vst.msk [vmem:[%s1895_s29 + $0xf8] sm:$0xff] %vm706_vm2, %v1026_v45 }
 0x19b PF: > { %s14_s15 = sadd.s32 1, %s1393_s15  }
 0x19c   : > { %p11_p4 = scmp.ge.s32.totalorder %s14_s15, 4  }
 0x19e   :  { %13 = sbr.rel (!%p11_p4) target bundleno = 1 (0x1), region = 66 }

// kernel: resnetv2_forward.17
= control target key start
LH: loop header
LB: loop body
LE: loop exit
PB: predicated region body
PF: predicated region fallthrough
CT: control target
= control target key end

     0   :  { %s529_s15 = smov 0   ;;  %s623_s0 = inlined_call_operand.vmem [shape: bf16[2,49,32], index: 0, kind: input, shape index: {}]   ;;  %s624_s1 = inlined_call_operand.vmem [shape: bf16[32,32], index: 1, kind: input, shape index: {}]   ;;  %s625_s2 = inlined_call_operand.vmem [shape: f32[1,32], index: 2, kind: input, shape index: {}]   ;;  %s626_s3 = inlined_call_operand.vmem [shape: f32[1,32], index: 3, kind: input, shape index: {}]   ;;  %s627_s4 = inlined_call_operand.vmem [shape: f32[2,49,32], index: 4, kind: output, shape index: {}]  }
   0x1 LB: > { %s439_s16 = sadd.s32 4294967295, %s502_s15   ;;  %p443_p0 = scmp.ge.s32.totalorder %s502_s15, 1  ;;  %s502_s15 = sphi %s529_s15, %s14_s15  }
   0x2   : > { %p162_p1 = scmp.lt.s32.totalorder %s502_s15, 3 }
   0x4   : > { %p163_p2 = pnand %p443_p0, %p162_p1 }
   0x5   : > { %p188_p3 = scmp.lt.s32.totalorder (!%p163_p2), %s439_s16, 1 }
   0x6   : > { %166 = sbr.rel (%p163_p2) target bundleno = 221 (0xdd), region = 36 }
   0xb   : > { %v476_v0 = vld [vmem:[%s624_s1 + $0x8] sm:$0xff]  ;;  %v475_v1 = vld [vmem:[%s624_s1] sm:$0xff]  ;;  %s629_s16 = smov (!%p188_p3, %s439_s16), 1  ;;  %vm240_vm0 = vcmask 261120   ;;  %vm292_vm1 = vcmask 253952  }
   0xc   : > { %259 = vmatpush.bf16.msra.mxu0 %v476_v0  ;;  %477 = vmatpush.bf16.msra.mxu1 %v476_v0  ;;  %s483_s21 = smul.u32 28, %s629_s16 }
   0xd   : > { %478 = vmatpush.bf16.msra.mxu2 %v476_v0  ;;  %479 = vmatpush.bf16.msra.mxu3 %v476_v0  ;;  %s484_s29 = smul.u32 56, %s629_s16 }
   0xe   : > { %s192_s24 = scalar_lea.vmem %s623_s0, %s483_s21 }
   0xf   : > { %v472_v2 = vld [vmem:[%s192_s24] sm:$0xff]  ;;  %v473_v3 = vld [vmem:[%s192_s24 + $0x8] sm:$0xff]  ;;  %v474_v4 = vld [vmem:[%s192_s24 + $0x10] sm:$0xff]  ;;  %s197_s6 = scalar_lea.vmem %s627_s4, %s484_s29 }
  0x10   : > { %260 = vmatpush.bf16.msra.mxu0 %v475_v1  ;;  %480 = vmatpush.bf16.msra.mxu1 %v475_v1  ;;  %v205_v5 = vld [vmem:[%s192_s24 + $0x18] sm:$0x1] }
  0x11   : > { %481 = vmatpush.bf16.msra.mxu2 %v475_v1  ;;  %482 = vmatpush.bf16.msra.mxu3 %v475_v1  ;;  %v223_v6 = vunpack.c.l.b16 %v205_v5 }
  0x13   : > { %466 = vmatmul.msk.bf16.vlgmr.msra.gmra.mxu0 %vm240_vm0, %v472_v2  ;;  %467 = vmatmul.msk.bf16.vlgmr.msra.gmra.mxu1 %vm240_vm0, %v473_v3  ;;  %v227_v7 = vpack.c.b16 %v223_v6, %v223_v6 }
  0x14   : > { %468 = vmatmul.msk.bf16.vlgmr.msra.gmra.mxu2 %vm240_vm0, %v474_v4 }
  0x15   : > { %469 = vmatmul.msk.bf16.vlgmr.msra.gmra.mxu3 %vm240_vm0, %v227_v7 }
  0x90   : > { %v553_v8 = vpop.f32.mrf.mxu0  ;;  %v555_v9 = vpop.f32.mrf.mxu1 }
  0x91   : > { %v301_v10 = vmul.f32 %v553_v8, %v553_v8  ;;  %v281_v14 = vsel %vm240_vm0, %v553_v8, 0.0  ;;  %v303_v15 = vmul.f32 %v555_v9, %v555_v9  ;;  %v284_v21 = vsel %vm240_vm0, %v555_v9, 0.0 }
  0x93   : > { %v308_v20 = vsel %vm240_vm0, %v301_v10, 0.0  ;;  %v311_v26 = vsel %vm240_vm0, %v303_v15, 0.0  ;;  %v349_v10 = vld [vmem:[%s625_s2] sm:$0x1] }
  0x97   : > { %v559_v11 = vpop.f32.mrf.mxu2 }
  0x98   : > { %v561_v12 = vpop.f32.mrf.mxu0  ;;  %v563_v13 = vpop.f32.mrf.mxu1  ;;  %v305_v27 = vmul.f32 %v559_v11, %v559_v11  ;;  %v288_v31 = vsel %vm240_vm0, %v559_v11, 0.0 }
  0x99   : > { %v282_v16 = vsel %vm240_vm0, %v561_v12, 0.0  ;;  %v302_v17 = vmul.f32 %v561_v12, %v561_v12  ;;  %v573_v19 = vpop.f32.mrf.mxu3  ;;  %v304_v23 = vmul.f32 %v563_v13, %v563_v13  ;;  %v286_v28 = vsel %vm240_vm0, %v563_v13, 0.0 }
  0x9a   : > { %v283_v18 = vadd.f32 %v282_v16, %v281_v14  ;;  %v307_v33 = vmul.f32 %v573_v19, %v573_v19  ;;  %v315_v38 = vsel %vm240_vm0, %v305_v27, 0.0  ;;  %v293_v39 = vsel %vm292_vm1, %v573_v19, 0.0 }
  0x9b   : > { %v309_v22 = vsel %vm240_vm0, %v302_v17, 0.0  ;;  %v313_v32 = vsel %vm240_vm0, %v304_v23, 0.0 }
  0x9c   : > { %v310_v24 = vadd.f32 %v309_v22, %v308_v20  ;;  %v285_v25 = vadd.f32 %v284_v21, %v283_v18  ;;  %v319_v44 = vsel %vm292_vm1, %v307_v33, 0.0  ;;  %v493_v22 = vld [vmem:[%s626_s3] ss:$0 sm:$0xff] }
  0x9e   : > { %v287_v29 = vadd.f32 %v286_v28, %v285_v25  ;;  %v312_v30 = vadd.f32 %v311_v26, %v310_v24 }
  0x9f   : > { %v274_v34 = vpop.f32.mrf.mxu2 }
  0xa0   : > { %v314_v35 = vadd.f32 %v313_v32, %v312_v30  ;;  %v289_v36 = vadd.f32 %v288_v31, %v287_v29  ;;  %v306_v37 = vmul.f32 %v274_v34, %v274_v34  ;;  %v290_v40 = vsel %vm240_vm0, %v274_v34, 0.0 }
  0xa1   : > { %v279_v43 = vpop.f32.mrf.mxu3 }
  0xa2   : > { %v291_v41 = vadd.f32 %v290_v40, %v289_v36  ;;  %v316_v42 = vadd.f32 %v315_v38, %v314_v35  ;;  %v317_v45 = vsel %vm240_vm0, %v306_v37, 0.0 }
  0xa4   : > { %v294_v46 = vadd.f32 %v293_v39, %v291_v41  ;;  %v318_v47 = vadd.f32 %v317_v45, %v316_v42 }
  0xa6   : > { %v295_v48 = vrot.slane %v294_v46, 4  ;;  %v320_v49 = vadd.f32 %v319_v44, %v318_v47 }
  0xa8   : > { %v296_v50 = vadd.f32 %v295_v48, %v294_v46  ;;  %v321_v51 = vrot.slane %v320_v49, 4 }
  0xaa   : > { %v297_v52 = vrot.slane %v296_v50, 2  ;;  %v322_v53 = vadd.f32 %v321_v51, %v320_v49 }
  0xac   : > { %v298_v54 = vadd.f32 %v297_v52, %v296_v50  ;;  %v323_v55 = vrot.slane %v322_v53, 2 }
  0xae   : > { %v299_v56 = vrot.slane %v298_v54, 1  ;;  %v324_v57 = vadd.f32 %v323_v55, %v322_v53 }
  0xb0   : > { %v300_v58 = vadd.f32 %v299_v56, %v298_v54  ;;  %v325_v59 = vrot.slane %v324_v57, 1 }
  0xb2   : > { %v326_v60 = vadd.f32 %v325_v59, %v324_v57  ;;  %v327_v61 = vmul.f32 0.020408163, %v300_v58 }
  0xb4   : > { %v328_v62 = vmul.f32 0.020408163, %v326_v60  ;;  %v329_v63 = vmul.f32 %v327_v61, %v327_v61  ;;  %v342_v16 = vsub.f32 %v553_v8, %v327_v61  ;;  %v343_v17 = vsub.f32 %v561_v12, %v327_v61 }
  0xb5   : > { %v344_v18 = vsub.f32 %v555_v9, %v327_v61  ;;  %v345_v20 = vsub.f32 %v563_v13, %v327_v61  ;;  %v346_v23 = vsub.f32 %v559_v11, %v327_v61  ;;  %v347_v24 = vsub.f32 %v274_v34, %v327_v61 }
  0xb6   : > { %v330_v0 = vsub.f32 %v328_v62, %v329_v63  ;;  %v348_v25 = vsub.f32 %v573_v19, %v327_v61 }
  0xb8   : > { %v331_v1 = vadd.f32 1e-06, %v330_v0 }
  0xba   : > { %494 = vrsqrt.f32 %v331_v1  ;;  %vm338_vm3 = vweird.f32 %v331_v1 }
  0xc0   : > { %v495_v2 = vpop.eup %494 }
  0xc1   : > { %v333_v3 = vmul.f32 %v495_v2, %v331_v1  ;;  %vm339_vm2 = vweird.f32 %v495_v2 }
  0xc2   : > { %vm340_vm4 = vmor %vm338_vm3, %vm339_vm2 }
  0xc3   : > { %v334_v4 = vmul.f32 %v495_v2, %v333_v3 }
  0xc5   : > { %v335_v5 = vmul.f32 0.5, %v334_v4 }
  0xc7   : > { %v336_v6 = vsub.f32 1.5, %v335_v5 }
  0xc9   : > { %v337_v7 = vmul.f32 %v495_v2, %v336_v6 }
  0xcb   : > { %v341_v14 = vsel %vm340_vm4, %v495_v2, %v337_v7 }
  0xcc   : > { %v350_v15 = vmul.f32 %v349_v10, %v341_v14 }
  0xce   : > { %v351_v21 = vperm.slane %v350_v15, 0 }
  0xd0   : > { %v352_v26 = vmul.f32 %v351_v21, %v342_v16  ;;  %v353_v27 = vmul.f32 %v351_v21, %v343_v17  ;;  %v354_v8 = vmul.f32 %v351_v21, %v344_v18  ;;  %v355_v28 = vmul.f32 %v351_v21, %v345_v20 }
  0xd1   : > { %v356_v12 = vmul.f32 %v351_v21, %v346_v23  ;;  %v357_v29 = vmul.f32 %v351_v21, %v347_v24  ;;  %v358_v9 = vmul.f32 %v351_v21, %v348_v25 }
  0xd2   : > { %v363_v30 = vadd.f32 %v493_v22, %v352_v26  ;;  %v364_v13 = vadd.f32 %v493_v22, %v353_v27  ;;  %v365_v31 = vadd.f32 %v493_v22, %v354_v8  ;;  %v366_v32 = vadd.f32 %v493_v22, %v355_v28 }
  0xd3   : > { %v367_v33 = vadd.f32 %v493_v22, %v356_v12  ;;  %v368_v11 = vadd.f32 %v493_v22, %v357_v29  ;;  %v369_v34 = vadd.f32 %v493_v22, %v358_v9 }
  0xd4   : > { %v370_v35 = vmax.f32 %v363_v30, 0.0  ;;  %v371_v19 = vmax.f32 %v364_v13, 0.0  ;;  %v372_v36 = vmax.f32 %v365_v31, 0.0  ;;  %v373_v37 = vmax.f32 %v366_v32, 0.0 }
  0xd5   : > { %v374_v38 = vmax.f32 %v367_v33, 0.0  ;;  %v375_v39 = vmax.f32 %v368_v11, 0.0  ;;  %v376_v40 = vmax.f32 %v369_v34, 0.0 }
  0xd6   : > { %377 = vst.msk [vmem:[%s197_s6] sm:$0xff] %vm240_vm0, %v370_v35 }
  0xd7   : > { %378 = vst.msk [vmem:[%s197_s6 + $0x8] sm:$0xff] %vm240_vm0, %v371_v19 }
  0xd8   : > { %379 = vst.msk [vmem:[%s197_s6 + $0x10] sm:$0xff] %vm240_vm0, %v372_v36 }
  0xd9   : > { %380 = vst.msk [vmem:[%s197_s6 + $0x18] sm:$0xff] %vm240_vm0, %v373_v37 }
  0xda   : > { %381 = vst.msk [vmem:[%s197_s6 + $0x20] sm:$0xff] %vm240_vm0, %v374_v38 }
  0xdb   : > { %382 = vst.msk [vmem:[%s197_s6 + $0x28] sm:$0xff] %vm240_vm0, %v375_v39 }
  0xdc   : > { %383 = vst.msk [vmem:[%s197_s6 + $0x30] sm:$0x1] %vm292_vm1, %v376_v40 }
  0xdd PF: > { %s14_s15 = sadd.s32 1, %s502_s15  }
  0xde   : > { %p11_p4 = scmp.ge.s32.totalorder %s14_s15, 4  }
  0xe0   :  { %13 = sbr.rel (!%p11_p4) target bundleno = 1 (0x1), region = 66 }

// kernel: resnetv2_forward.18
= control target key start
LH: loop header
LB: loop body
LE: loop exit
PB: predicated region body
PF: predicated region fallthrough
CT: control target
= control target key end

     0   :  { %s877_s15 = smov 0   ;;  %s1051_s0 = inlined_call_operand.vmem [shape: bf16[2,49,288], index: 0, kind: input, shape index: {}]   ;;  %s1052_s1 = inlined_call_operand.vmem [shape: bf16[288,32], index: 1, kind: input, shape index: {}]   ;;  %s1053_s2 = inlined_call_operand.vmem [shape: f32[1,32], index: 2, kind: input, shape index: {}]   ;;  %s1054_s3 = inlined_call_operand.vmem [shape: f32[1,32], index: 3, kind: input, shape index: {}]   ;;  %s1055_s4 = inlined_call_operand.vmem [shape: f32[2,49,32], index: 4, kind: output, shape index: {}]  }
   0x1 LB: > { %s667_s16 = sadd.s32 4294967295, %s850_s15   ;;  %p671_p0 = scmp.ge.s32.totalorder %s850_s15, 1  ;;  %s850_s15 = sphi %s877_s15, %s14_s15  }
   0x2   : > { %p162_p1 = scmp.lt.s32.totalorder %s850_s15, 3 }
   0x4   : > { %p163_p2 = pnand %p671_p0, %p162_p1 }
   0x5   : > { %p188_p3 = scmp.lt.s32.totalorder (!%p163_p2), %s667_s16, 1 }
   0x6   : > { %166 = sbr.rel (%p163_p2) target bundleno = 281 (0x119), region = 36 }
   0xb   : > { %v804_v0 = vld [vmem:[%s1052_s1 + $0x38] sm:$0xff]  ;;  %v814_v2 = vld [vmem:[%s1052_s1 + $0x88] sm:$0xff]  ;;  %v803_v3 = vld [vmem:[%s1052_s1 + $0x30] sm:$0xff]  ;;  %s1057_s16 = smov (!%p188_p3, %s667_s16), 1  ;;  %vm412_vm0 = vcmask 261120   ;;  %vm520_vm1 = vcmask 253952  }
   0xc   : > { %v891_v1 = vld [vmem:[%s1052_s1 + $0x78] sm:$0xff]  ;;  %425 = vmatpush.bf16.msra.mxu0 %v804_v0  ;;  %815 = vmatpush.bf16.msra.mxu3 %v804_v0  ;;  %v811_v4 = vld [vmem:[%s1052_s1 + $0x70] sm:$0xff]  ;;  %v813_v5 = vld [vmem:[%s1052_s1 + $0x80] sm:$0xff]  ;;  %s831_s29 = smul.u32 84, %s1057_s16 }
   0xd   : > { %823 = vmatpush.bf16.msra.mxu1 %v891_v1  ;;  %487 = vmatpush.bf16.msra.mxu2 %v814_v2  ;;  %v802_v6 = vld [vmem:[%s1052_s1 + $0x28] sm:$0xff]  ;;  %v801_v11 = vld [vmem:[%s1052_s1 + $0x20] sm:$0xff]  ;;  %v800_v13 = vld [vmem:[%s1052_s1 + $0x18] sm:$0xff]  ;;  %s832_s11 = smul.u32 56, %s1057_s16 }
   0xe   : > { %s915_s8 = scalar_lea.vmem %s1051_s0, %s831_s29  ;;  %v810_v7 = vld [vmem:[%s1052_s1 + $0x68] sm:$0xff]  ;;  %v809_v12 = vld [vmem:[%s1052_s1 + $0x60] sm:$0xff]  ;;  %v808_v14 = vld [vmem:[%s1052_s1 + $0x58] sm:$0xff] }
   0xf   : > { %v684_v8 = vld [vmem:[%s915_s8 + $0x8] sm:$0xf]  ;;  %v790_v9 = vld [vmem:[%s915_s8 + $0x10] sm:$0xf0]  ;;  %v696_v17 = vld [vmem:[%s915_s8 + $0x20] sm:$0xf]  ;;  %s197_s16 = scalar_lea.vmem %s1055_s4, %s832_s11 }
  0x10   : > { %426 = vmatpush.bf16.msra.mxu0 %v803_v3  ;;  %816 = vmatpush.bf16.msra.mxu3 %v803_v3  ;;  %v685_v10 = vor.u32 %v790_v9, %v684_v8  ;;  %v799_v15 = vld [vmem:[%s1052_s1 + $0x10] sm:$0xff]  ;;  %v793_v18 = vld [vmem:[%s915_s8 + $0x28] sm:$0xf0]  ;;  %v797_v22 = vld [vmem:[%s1052_s1] sm:$0xff] }
  0x11   : > { %824 = vmatpush.bf16.msra.mxu1 %v811_v4  ;;  %488 = vmatpush.bf16.msra.mxu2 %v813_v5  ;;  %v807_v16 = vld [vmem:[%s1052_s1 + $0x50] sm:$0xff]  ;;  %v798_v19 = vld [vmem:[%s1052_s1 + $0x8] sm:$0xff]  ;;  %v697_v21 = vor.u32 %v793_v18, %v696_v17  ;;  %v688_v23 = vld [vmem:[%s915_s8 + $0x18] sm:$0xf] }
  0x12   : > { %v806_v20 = vld [vmem:[%s1052_s1 + $0x48] sm:$0xff]  ;;  %v792_v24 = vld [vmem:[%s915_s8 + $0x20] sm:$0xf0]  ;;  %v676_v25 = vld [vmem:[%s915_s8] sm:$0xf] }
  0x13   : > { %v789_v26 = vld [vmem:[%s915_s8 + $0x8] sm:$0xf0]  ;;  %v805_v27 = vld [vmem:[%s1052_s1 + $0x40] sm:$0xff]  ;;  %v791_v28 = vld [vmem:[%s915_s8 + $0x1c] sm:$0xf]  ;;  %v689_v30 = vor.u32 %v792_v24, %v688_v23 }
  0x14   : > { %427 = vmatpush.bf16.msra.mxu0 %v802_v6  ;;  %817 = vmatpush.bf16.msra.mxu3 %v802_v6  ;;  %v690_v29 = vld [vmem:[%s915_s8 + $0x24] sm:$0xf0]  ;;  %v677_v31 = vor.u32 %v789_v26, %v676_v25  ;;  %v708_v33 = vld [vmem:[%s915_s8 + $0x38] sm:$0xf]  ;;  %v796_v34 = vld [vmem:[%s915_s8 + $0x40] sm:$0xf0] }
  0x15   : > { %825 = vmatpush.bf16.msra.mxu1 %v810_v7  ;;  %782 = vmatmul.msk.bf16.vlgmr.msra.gmra.mxu2 %vm412_vm0, %v685_v10  ;;  %v693_v32 = vor.u32 %v791_v28, %v690_v29  ;;  %v709_v35 = vor.u32 %v796_v34, %v708_v33  ;;  %v700_v36 = vld [vmem:[%s915_s8 + $0x30] sm:$0xf]  ;;  %v795_v37 = vld [vmem:[%s915_s8 + $0x38] sm:$0xf0]  ;;  %v794_v38 = vld [vmem:[%s915_s8 + $0x34] sm:$0xf] }
  0x16   : > { %v702_v39 = vld [vmem:[%s915_s8 + $0x3c] sm:$0xf0]  ;;  %v701_v40 = vor.u32 %v795_v37, %v700_v36  ;;  %v212_v42 = vld [vmem:[%s915_s8 + $0x50] sm:$0x1]  ;;  %v211_v44 = vld [vmem:[%s915_s8 + $0x48] sm:$0x11] }
  0x17   : > { %v705_v41 = vor.u32 %v794_v38, %v702_v39  ;;  %v283_v43 = vunpack.c.l.b16 %v212_v42  ;;  %v788_v45 = vld [vmem:[%s915_s8 + $0x4] sm:$0xf]  ;;  %v678_v46 = vld [vmem:[%s915_s8 + $0xc] sm:$0xf0]  ;;  %v281_v48 = vunpack.c.l.b16 %v211_v44  ;;  %v282_v50 = vunpack.c.h.b16 %v211_v44 }
  0x18   : > { %428 = vmatpush.bf16.msra.mxu0 %v801_v11  ;;  %818 = vmatpush.bf16.msra.mxu3 %v801_v11  ;;  %v681_v49 = vor.u32 %v788_v45, %v678_v46 }
  0x19   : > { %826 = vmatpush.bf16.msra.mxu1 %v809_v12  ;;  %v295_v47 = vpack.c.b16 %v283_v43, %v283_v43  ;;  %v293_v51 = vpack.c.b16 %v281_v48, %v281_v48  ;;  %v294_v52 = vpack.c.b16 %v282_v50, %v282_v50 }
  0x1c   : > { %429 = vmatpush.bf16.msra.mxu0 %v800_v13  ;;  %819 = vmatpush.bf16.msra.mxu3 %v800_v13 }
  0x1d   : > { %827 = vmatpush.bf16.msra.mxu1 %v808_v14 }
  0x20   : > { %430 = vmatpush.bf16.msra.mxu0 %v799_v15  ;;  %820 = vmatpush.bf16.msra.mxu3 %v799_v15 }
  0x21   : > { %828 = vmatpush.bf16.msra.mxu1 %v807_v16 }
  0x24   : > { %431 = vmatpush.bf16.msra.mxu0 %v798_v19  ;;  %821 = vmatpush.bf16.msra.mxu3 %v798_v19 }
  0x25   : > { %829 = vmatpush.bf16.msra.mxu1 %v806_v20  ;;  %783 = vmatmul.msk.bf16.gmra.mxu2 %vm412_vm0, %v697_v21 }
  0x28   : > { %432 = vmatpush.bf16.msra.mxu0 %v797_v22  ;;  %822 = vmatpush.bf16.msra.mxu3 %v797_v22 }
  0x29   : > { %830 = vmatpush.bf16.msra.mxu1 %v805_v27 }
  0x2b   : > { %438 = vmatmul.bf16.vlgmr.msra.gmra.mxu3 %v689_v30  ;;  %433 = vmatmul.bf16.vlgmr.msra.gmra.mxu0 %v677_v31 }
  0x2c   : > { %453 = vmatpush.bf16.msrb.mxu0 %v891_v1  ;;  %466 = vmatmul.bf16.vlgmr.msra.gmra.mxu1 %v693_v32 }
  0x30   : > { %454 = vmatpush.bf16.msrb.mxu0 %v811_v4 }
  0x34   : > { %455 = vmatpush.bf16.msrb.mxu0 %v810_v7 }
  0x35   : > { %784 = vmatmul.msk.bf16.gmra.mxu2 %vm412_vm0, %v709_v35 }
  0x38   : > { %456 = vmatpush.bf16.msrb.mxu0 %v809_v12 }
  0x3b   : > { %443 = vmatmul.bf16.gmra.mxu3 %v701_v40 }
  0x3c   : > { %457 = vmatpush.bf16.msrb.mxu0 %v808_v14  ;;  %471 = vmatmul.bf16.gmra.mxu1 %v705_v41 }
  0x40   : > { %458 = vmatpush.bf16.msrb.mxu0 %v807_v16 }
  0x44   : > { %459 = vmatpush.bf16.msrb.mxu0 %v806_v20 }
  0x45   : > { %785 = vmatmul.msk.bf16.gmra.mxu2 %vm412_vm0, %v295_v47 }
  0x48   : > { %460 = vmatpush.bf16.msrb.mxu0 %v805_v27 }
  0x4b   : > { %461 = vmatmul.bf16.vlgmr.msrb.gmra.mxu0 %v681_v49  ;;  %448 = vmatmul.bf16.gmra.mxu3 %v293_v51 }
  0x4c   : > { %476 = vmatmul.bf16.gmra.mxu1 %v294_v52 }
  0x98   : > { %v490_v53 = vpop.f32.mrf.mxu2 }
  0xa0   : > { %v492_v54 = vpop.f32.mrf.mxu2 }
  0xa8   : > { %v495_v55 = vpop.f32.mrf.mxu2  ;;  %v434_v60 = vpop.f32.mrf.mxu0 }
  0xa9   : > { %v467_v56 = vpop.f32.mrf.mxu1 }
  0xae   : > { %v439_v57 = vpop.f32.mrf.mxu3 }
  0xaf   : > { %v468_v8 = vadd.f32 %v467_v56, %v439_v57 }
  0xb0   : > { %v497_v58 = vpop.f32.mrf.mxu2  ;;  %v436_v0 = vpop.f32.mrf.mxu0 }
  0xb1   : > { %v469_v59 = vpop.f32.mrf.mxu1  ;;  %v977_v12 = vadd.f32 %v495_v55, %v468_v8 }
  0xb3   : > { %v531_v23 = vmul.f32 %v977_v12, %v977_v12  ;;  %v512_v29 = vsel %vm412_vm0, %v977_v12, 0.0 }
  0xb5   : > { %v539_v38 = vsel %vm412_vm0, %v531_v23, 0.0  ;;  %v577_v23 = vld [vmem:[%s1053_s2] sm:$0x1] }
  0xb6   : > { %v441_v61 = vpop.f32.mrf.mxu3 }
  0xb7   : > { %v470_v10 = vadd.f32 %v469_v59, %v441_v61 }
  0xb8   : > { %v500_v62 = vpop.f32.mrf.mxu2 }
  0xb9   : > { %v472_v63 = vpop.f32.mrf.mxu1  ;;  %v979_v17 = vadd.f32 %v497_v58, %v470_v10 }
  0xbb   : > { %v532_v30 = vmul.f32 %v979_v17, %v979_v17  ;;  %v514_v39 = vsel %vm412_vm0, %v979_v17, 0.0 }
  0xbd   : > { %v541_v44 = vsel %vm412_vm0, %v532_v30, 0.0 }
  0xbe   : > { %v444_v1 = vpop.f32.mrf.mxu3 }
  0xbf   : > { %v473_v14 = vadd.f32 %v472_v63, %v444_v1 }
  0xc0   : > { %v502_v2 = vpop.f32.mrf.mxu2 }
  0xc1   : > { %v474_v3 = vpop.f32.mrf.mxu1  ;;  %v987_v25 = vadd.f32 %v500_v62, %v473_v14 }
  0xc3   : > { %v533_v40 = vmul.f32 %v987_v25, %v987_v25  ;;  %v516_v45 = vsel %vm412_vm0, %v987_v25, 0.0 }
  0xc5   : > { %v543_v50 = vsel %vm412_vm0, %v533_v40, 0.0 }
  0xc6   : > { %v446_v5 = vpop.f32.mrf.mxu3 }
  0xc7   : > { %v475_v19 = vadd.f32 %v474_v3, %v446_v5 }
  0xc8   : > { %v462_v4 = vpop.f32.mrf.mxu0  ;;  %v505_v7 = vpop.f32.mrf.mxu2 }
  0xc9   : > { %v463_v6 = vadd.f32 %v462_v4, %v434_v60  ;;  %v477_v9 = vpop.f32.mrf.mxu1  ;;  %v1000_v33 = vadd.f32 %v502_v2, %v475_v19 }
  0xcb   : > { %v975_v11 = vadd.f32 %v490_v53, %v463_v6  ;;  %v534_v46 = vmul.f32 %v1000_v33, %v1000_v33  ;;  %v518_v51 = vsel %vm412_vm0, %v1000_v33, 0.0 }
  0xcd   : > { %v529_v18 = vmul.f32 %v975_v11, %v975_v11  ;;  %v509_v26 = vsel %vm412_vm0, %v975_v11, 0.0  ;;  %v545_v55 = vsel %vm412_vm0, %v534_v46, 0.0 }
  0xce   : > { %v449_v16 = vpop.f32.mrf.mxu3 }
  0xcf   : > { %v478_v21 = vadd.f32 %v477_v9, %v449_v16  ;;  %v536_v32 = vsel %vm412_vm0, %v529_v18, 0.0 }
  0xd0   : > { %v464_v13 = vpop.f32.mrf.mxu0  ;;  %v507_v22 = vpop.f32.mrf.mxu2 }
  0xd1   : > { %v465_v15 = vadd.f32 %v464_v13, %v436_v0  ;;  %v479_v24 = vpop.f32.mrf.mxu1  ;;  %v1003_v35 = vadd.f32 %v505_v7, %v478_v21 }
  0xd3   : > { %v983_v20 = vadd.f32 %v492_v54, %v465_v15  ;;  %v535_v47 = vmul.f32 %v1003_v35, %v1003_v35  ;;  %v521_v52 = vsel %vm520_vm1, %v1003_v35, 0.0 }
  0xd5   : > { %v510_v27 = vsel %vm412_vm0, %v983_v20, 0.0  ;;  %v530_v28 = vmul.f32 %v983_v20, %v983_v20  ;;  %v547_v56 = vsel %vm520_vm1, %v535_v47, 0.0 }
  0xd6   : > { %v511_v31 = vadd.f32 %v510_v27, %v509_v26  ;;  %v451_v41 = vpop.f32.mrf.mxu3 }
  0xd7   : > { %v537_v34 = vsel %vm412_vm0, %v530_v28, 0.0 }
  0xd8   : > { %v513_v36 = vadd.f32 %v512_v29, %v511_v31  ;;  %v538_v37 = vadd.f32 %v537_v34, %v536_v32  ;;  %v841_v32 = vld [vmem:[%s1054_s3] ss:$0 sm:$0xff] }
  0xda   : > { %v540_v42 = vadd.f32 %v539_v38, %v538_v37  ;;  %v515_v43 = vadd.f32 %v514_v39, %v513_v36 }
  0xdc   : > { %v517_v48 = vadd.f32 %v516_v45, %v515_v43  ;;  %v542_v49 = vadd.f32 %v541_v44, %v540_v42 }
  0xde   : > { %v519_v53 = vadd.f32 %v518_v51, %v517_v48  ;;  %v544_v54 = vadd.f32 %v543_v50, %v542_v49 }
  0xe0   : > { %v522_v57 = vadd.f32 %v521_v52, %v519_v53  ;;  %v546_v58 = vadd.f32 %v545_v55, %v544_v54 }
  0xe2   : > { %v523_v59 = vrot.slane %v522_v57, 4  ;;  %v548_v60 = vadd.f32 %v547_v56, %v546_v58 }
  0xe4   : > { %v524_v61 = vadd.f32 %v523_v59, %v522_v57  ;;  %v549_v62 = vrot.slane %v548_v60, 4 }
  0xe6   : > { %v525_v63 = vrot.slane %v524_v61, 2  ;;  %v550_v0 = vadd.f32 %v549_v62, %v548_v60 }
  0xe8   : > { %v526_v1 = vadd.f32 %v525_v63, %v524_v61  ;;  %v551_v2 = vrot.slane %v550_v0, 2 }
  0xea   : > { %v527_v3 = vrot.slane %v526_v1, 1  ;;  %v552_v4 = vadd.f32 %v551_v2, %v550_v0 }
  0xec   : > { %v528_v5 = vadd.f32 %v527_v3, %v526_v1  ;;  %v553_v6 = vrot.slane %v552_v4, 1 }
  0xee   : > { %v554_v7 = vadd.f32 %v553_v6, %v552_v4  ;;  %v555_v8 = vmul.f32 0.020408163, %v528_v5 }
  0xf0   : > { %v556_v9 = vmul.f32 0.020408163, %v554_v7  ;;  %v557_v10 = vmul.f32 %v555_v8, %v555_v8  ;;  %v570_v27 = vsub.f32 %v975_v11, %v555_v8  ;;  %v571_v28 = vsub.f32 %v983_v20, %v555_v8 }
  0xf1   : > { %v572_v29 = vsub.f32 %v977_v12, %v555_v8  ;;  %v573_v30 = vsub.f32 %v979_v17, %v555_v8  ;;  %v574_v34 = vsub.f32 %v987_v25, %v555_v8  ;;  %v575_v36 = vsub.f32 %v1000_v33, %v555_v8 }
  0xf2   : > { %v558_v13 = vsub.f32 %v556_v9, %v557_v10  ;;  %v576_v37 = vsub.f32 %v1003_v35, %v555_v8 }
  0xf4   : > { %v559_v14 = vadd.f32 1e-06, %v558_v13 }
  0xf6   : > { %842 = vrsqrt.f32 %v559_v14  ;;  %vm566_vm3 = vweird.f32 %v559_v14 }
  0xfc   : > { %v843_v15 = vpop.eup %842 }
  0xfd   : > { %v561_v16 = vmul.f32 %v843_v15, %v559_v14  ;;  %vm567_vm2 = vweird.f32 %v843_v15 }
  0xfe   : > { %vm568_vm4 = vmor %vm566_vm3, %vm567_vm2 }
  0xff   : > { %v562_v18 = vmul.f32 %v843_v15, %v561_v16 }
 0x101   : > { %v563_v19 = vmul.f32 0.5, %v562_v18 }
 0x103   : > { %v564_v21 = vsub.f32 1.5, %v563_v19 }
 0x105   : > { %v565_v22 = vmul.f32 %v843_v15, %v564_v21 }
 0x107   : > { %v569_v24 = vsel %vm568_vm4, %v843_v15, %v565_v22 }
 0x108   : > { %v578_v26 = vmul.f32 %v577_v23, %v569_v24 }
 0x10a   : > { %v579_v31 = vperm.slane %v578_v26, 0 }
 0x10c   : > { %v580_v38 = vmul.f32 %v579_v31, %v570_v27  ;;  %v581_v11 = vmul.f32 %v579_v31, %v571_v28  ;;  %v582_v39 = vmul.f32 %v579_v31, %v572_v29  ;;  %v583_v20 = vmul.f32 %v579_v31, %v573_v30 }
 0x10d   : > { %v584_v40 = vmul.f32 %v579_v31, %v574_v34  ;;  %v585_v12 = vmul.f32 %v579_v31, %v575_v36  ;;  %v586_v41 = vmul.f32 %v579_v31, %v576_v37 }
 0x10e   : > { %v591_v17 = vadd.f32 %v841_v32, %v580_v38  ;;  %v592_v42 = vadd.f32 %v841_v32, %v581_v11  ;;  %v593_v43 = vadd.f32 %v841_v32, %v582_v39  ;;  %v594_v44 = vadd.f32 %v841_v32, %v583_v20 }
 0x10f   : > { %v595_v25 = vadd.f32 %v841_v32, %v584_v40  ;;  %v596_v45 = vadd.f32 %v841_v32, %v585_v12  ;;  %v597_v33 = vadd.f32 %v841_v32, %v586_v41 }
 0x110   : > { %v598_v46 = vmax.f32 %v591_v17, 0.0  ;;  %v599_v35 = vmax.f32 %v592_v42, 0.0  ;;  %v600_v47 = vmax.f32 %v593_v43, 0.0  ;;  %v601_v48 = vmax.f32 %v594_v44, 0.0 }
 0x111   : > { %v602_v49 = vmax.f32 %v595_v25, 0.0  ;;  %v603_v50 = vmax.f32 %v596_v45, 0.0  ;;  %v604_v51 = vmax.f32 %v597_v33, 0.0 }
 0x112   : > { %605 = vst.msk [vmem:[%s197_s16] sm:$0xff] %vm412_vm0, %v598_v46 }
 0x113   : > { %606 = vst.msk [vmem:[%s197_s16 + $0x8] sm:$0xff] %vm412_vm0, %v599_v35 }
 0x114   : > { %607 = vst.msk [vmem:[%s197_s16 + $0x10] sm:$0xff] %vm412_vm0, %v600_v47 }
 0x115   : > { %608 = vst.msk [vmem:[%s197_s16 + $0x18] sm:$0xff] %vm412_vm0, %v601_v48 }
 0x116   : > { %609 = vst.msk [vmem:[%s197_s16 + $0x20] sm:$0xff] %vm412_vm0, %v602_v49 }
 0x117   : > { %610 = vst.msk [vmem:[%s197_s16 + $0x28] sm:$0xff] %vm412_vm0, %v603_v50 }
 0x118   : > { %611 = vst.msk [vmem:[%s197_s16 + $0x30] sm:$0x1] %vm520_vm1, %v604_v51 }
 0x119 PF: > { %s14_s15 = sadd.s32 1, %s850_s15  }
 0x11a   : > { %p11_p4 = scmp.ge.s32.totalorder %s14_s15, 4  }
 0x11c   :  { %13 = sbr.rel (!%p11_p4) target bundleno = 1 (0x1), region = 66 }

// kernel: resnetv2_forward.16
= control target key start
LH: loop header
LB: loop body
LE: loop exit
PB: predicated region body
PF: predicated region fallthrough
CT: control target
= control target key end

     0   :  { %s510_s15 = smov 0   ;;  %s579_s0 = inlined_call_operand.vmem [shape: bf16[2,49,32], index: 0, kind: input, shape index: {}]   ;;  %s580_s1 = inlined_call_operand.vmem [shape: bf16[32,128], index: 1, kind: input, shape index: {}]   ;;  %s581_s2 = inlined_call_operand.vmem [shape: f32[1,128], index: 2, kind: input, shape index: {}]   ;;  %s582_s3 = inlined_call_operand.vmem [shape: f32[1,128], index: 3, kind: input, shape index: {}]   ;;  %s583_s4 = inlined_call_operand.vmem [shape: f32[2,49,128], index: 4, kind: output, shape index: {}]  }
   0x1 LB: > { %s420_s16 = sadd.s32 4294967295, %s483_s15   ;;  %p424_p0 = scmp.ge.s32.totalorder %s483_s15, 1  ;;  %s483_s15 = sphi %s510_s15, %s14_s15  }
   0x2   : > { %p162_p1 = scmp.lt.s32.totalorder %s483_s15, 3 }
   0x4   : > { %p163_p2 = pnand %p424_p0, %p162_p1 }
   0x5   : > { %p188_p3 = scmp.lt.s32.totalorder (!%p163_p2), %s420_s16, 1 }
   0x6   : > { %166 = sbr.rel (%p163_p2) target bundleno = 218 (0xda), region = 36 }
   0xb   : > { %v457_v0 = vld [vmem:[%s580_s1 + $0x8] sm:$0xff]  ;;  %v456_v1 = vld [vmem:[%s580_s1] sm:$0xff]  ;;  %s585_s16 = smov (!%p188_p3, %s420_s16), 1  ;;  %vm240_vm0 = vcmask 261120   ;;  %vm286_vm1 = vcmask 1040384  }
   0xc   : > { %259 = vmatpush.bf16.msra.mxu0 %v457_v0  ;;  %458 = vmatpush.bf16.msra.mxu1 %v457_v0  ;;  %s464_s21 = smul.u32 28, %s585_s16  ;;  %v337_v60 = vld [vmem:[%s581_s2] sm:$0x1] }
   0xd   : > { %459 = vmatpush.bf16.msra.mxu2 %v457_v0  ;;  %460 = vmatpush.bf16.msra.mxu3 %v457_v0  ;;  %s465_s27 = smul.u32 56, %s585_s16 }
   0xe   : > { %s192_s24 = scalar_lea.vmem %s579_s0, %s464_s21 }
   0xf   : > { %v453_v2 = vld [vmem:[%s192_s24] sm:$0xff]  ;;  %v454_v3 = vld [vmem:[%s192_s24 + $0x8] sm:$0xff]  ;;  %v455_v4 = vld [vmem:[%s192_s24 + $0x10] sm:$0xff]  ;;  %s197_s6 = scalar_lea.vmem %s583_s4, %s465_s27 }
  0x10   : > { %260 = vmatpush.bf16.msra.mxu0 %v456_v1  ;;  %461 = vmatpush.bf16.msra.mxu1 %v456_v1  ;;  %v205_v5 = vld [vmem:[%s192_s24 + $0x18] sm:$0x1] }
  0x11   : > { %462 = vmatpush.bf16.msra.mxu2 %v456_v1  ;;  %463 = vmatpush.bf16.msra.mxu3 %v456_v1  ;;  %v223_v6 = vunpack.c.l.b16 %v205_v5 }
  0x13   : > { %447 = vmatmul.msk.bf16.vlgmr.msra.gmra.mxu0 %vm240_vm0, %v453_v2  ;;  %448 = vmatmul.msk.bf16.vlgmr.msra.gmra.mxu1 %vm240_vm0, %v454_v3  ;;  %v227_v7 = vpack.c.b16 %v223_v6, %v223_v6 }
  0x14   : > { %449 = vmatmul.msk.bf16.vlgmr.msra.gmra.mxu2 %vm240_vm0, %v455_v4  ;;  %v474_v4 = vld [vmem:[%s582_s3] ss:$0 sm:$0xff] }
  0x15   : > { %450 = vmatmul.msk.bf16.vlgmr.msra.gmra.mxu3 %vm240_vm0, %v227_v7 }
  0x90   : > { %v530_v8 = vpop.f32.mrf.mxu0  ;;  %v532_v9 = vpop.f32.mrf.mxu1 }
  0x91   : > { %v295_v12 = vmul.f32 %v530_v8, %v530_v8  ;;  %v297_v17 = vmul.f32 %v532_v9, %v532_v9 }
  0x97   : > { %v534_v10 = vpop.f32.mrf.mxu2 }
  0x98   : > { %v536_v11 = vpop.f32.mrf.mxu0  ;;  %v544_v15 = vpop.f32.mrf.mxu1  ;;  %v299_v24 = vmul.f32 %v534_v10, %v534_v10 }
  0x99   : > { %v281_v13 = vadd.f32 %v536_v11, %v530_v8  ;;  %v296_v14 = vmul.f32 %v536_v11, %v536_v11  ;;  %v546_v16 = vpop.f32.mrf.mxu3  ;;  %v298_v21 = vmul.f32 %v544_v15, %v544_v15 }
  0x9a   : > { %v301_v23 = vmul.f32 %v546_v16, %v546_v16  ;;  %v287_v28 = vsel %vm286_vm1, %v546_v16, 0.0 }
  0x9b   : > { %v302_v18 = vadd.f32 %v296_v14, %v295_v12  ;;  %v282_v19 = vadd.f32 %v281_v13, %v532_v9 }
  0x9c   : > { %v307_v32 = vsel %vm286_vm1, %v301_v23, 0.0 }
  0x9d   : > { %v283_v20 = vadd.f32 %v282_v19, %v544_v15  ;;  %v303_v22 = vadd.f32 %v302_v18, %v297_v17 }
  0x9f   : > { %v304_v25 = vadd.f32 %v303_v22, %v298_v21  ;;  %v274_v26 = vpop.f32.mrf.mxu2  ;;  %v284_v27 = vadd.f32 %v283_v20, %v534_v10 }
  0xa0   : > { %v300_v30 = vmul.f32 %v274_v26, %v274_v26 }
  0xa1   : > { %v285_v29 = vadd.f32 %v284_v27, %v274_v26  ;;  %v305_v31 = vadd.f32 %v304_v25, %v299_v24  ;;  %v279_v33 = vpop.f32.mrf.mxu3 }
  0xa3   : > { %v288_v34 = vadd.f32 %v287_v28, %v285_v29  ;;  %v306_v35 = vadd.f32 %v305_v31, %v300_v30 }
  0xa5   : > { %v289_v36 = vrot.slane %v288_v34, 4  ;;  %v308_v37 = vadd.f32 %v307_v32, %v306_v35 }
  0xa7   : > { %v290_v38 = vadd.f32 %v289_v36, %v288_v34  ;;  %v309_v39 = vrot.slane %v308_v37, 4 }
  0xa9   : > { %v291_v40 = vrot.slane %v290_v38, 2  ;;  %v310_v41 = vadd.f32 %v309_v39, %v308_v37 }
  0xab   : > { %v292_v42 = vadd.f32 %v291_v40, %v290_v38  ;;  %v311_v43 = vrot.slane %v310_v41, 2 }
  0xad   : > { %v293_v44 = vrot.slane %v292_v42, 1  ;;  %v312_v45 = vadd.f32 %v311_v43, %v310_v41 }
  0xaf   : > { %v294_v46 = vadd.f32 %v293_v44, %v292_v42  ;;  %v313_v47 = vrot.slane %v312_v45, 1 }
  0xb1   : > { %v314_v48 = vadd.f32 %v313_v47, %v312_v45  ;;  %v315_v49 = vmul.f32 0.020408163, %v294_v46 }
  0xb3   : > { %v316_v50 = vmul.f32 0.020408163, %v314_v48  ;;  %v317_v51 = vmul.f32 %v315_v49, %v315_v49  ;;  %v330_v63 = vsub.f32 %v530_v8, %v315_v49  ;;  %v331_v0 = vsub.f32 %v536_v11, %v315_v49 }
  0xb4   : > { %v332_v1 = vsub.f32 %v532_v9, %v315_v49  ;;  %v333_v2 = vsub.f32 %v544_v15, %v315_v49  ;;  %v334_v5 = vsub.f32 %v534_v10, %v315_v49  ;;  %v335_v6 = vsub.f32 %v274_v26, %v315_v49 }
  0xb5   : > { %v318_v52 = vsub.f32 %v316_v50, %v317_v51  ;;  %v336_v7 = vsub.f32 %v546_v16, %v315_v49 }
  0xb7   : > { %v319_v53 = vadd.f32 1e-05, %v318_v52 }
  0xb9   : > { %475 = vrsqrt.f32 %v319_v53  ;;  %vm326_vm3 = vweird.f32 %v319_v53 }
  0xbf   : > { %v476_v54 = vpop.eup %475 }
  0xc0   : > { %v321_v55 = vmul.f32 %v476_v54, %v319_v53  ;;  %vm327_vm2 = vweird.f32 %v476_v54 }
  0xc1   : > { %vm328_vm4 = vmor %vm326_vm3, %vm327_vm2 }
  0xc2   : > { %v322_v56 = vmul.f32 %v476_v54, %v321_v55 }
  0xc4   : > { %v323_v57 = vmul.f32 0.5, %v322_v56 }
  0xc6   : > { %v324_v58 = vsub.f32 1.5, %v323_v57 }
  0xc8   : > { %v325_v59 = vmul.f32 %v476_v54, %v324_v58 }
  0xca   : > { %v329_v61 = vsel %vm328_vm4, %v476_v54, %v325_v59 }
  0xcb   : > { %v338_v62 = vmul.f32 %v337_v60, %v329_v61 }
  0xcd   : > { %v339_v3 = vperm.slane %v338_v62, 0 }
  0xcf   : > { %v340_v12 = vmul.f32 %v339_v3, %v330_v63  ;;  %v341_v13 = vmul.f32 %v339_v3, %v331_v0  ;;  %v342_v14 = vmul.f32 %v339_v3, %v332_v1  ;;  %v343_v8 = vmul.f32 %v339_v3, %v333_v2 }
  0xd0   : > { %v344_v9 = vmul.f32 %v339_v3, %v334_v5  ;;  %v345_v11 = vmul.f32 %v339_v3, %v335_v6  ;;  %v346_v15 = vmul.f32 %v339_v3, %v336_v7 }
  0xd1   : > { %v351_v17 = vadd.f32 %v474_v4, %v340_v12  ;;  %v352_v18 = vadd.f32 %v474_v4, %v341_v13  ;;  %v353_v19 = vadd.f32 %v474_v4, %v342_v14  ;;  %v354_v20 = vadd.f32 %v474_v4, %v343_v8 }
  0xd2   : > { %v355_v21 = vadd.f32 %v474_v4, %v344_v9  ;;  %v356_v10 = vadd.f32 %v474_v4, %v345_v11  ;;  %v357_v16 = vadd.f32 %v474_v4, %v346_v15 }
  0xd3   : > { %358 = vst [vmem:[%s197_s6] sm:$0xff] %v351_v17 }
  0xd4   : > { %359 = vst [vmem:[%s197_s6 + $0x8] sm:$0xff] %v352_v18 }
  0xd5   : > { %360 = vst [vmem:[%s197_s6 + $0x10] sm:$0xff] %v353_v19 }
  0xd6   : > { %361 = vst [vmem:[%s197_s6 + $0x18] sm:$0xff] %v354_v20 }
  0xd7   : > { %362 = vst [vmem:[%s197_s6 + $0x20] sm:$0xff] %v355_v21 }
  0xd8   : > { %363 = vst [vmem:[%s197_s6 + $0x28] sm:$0xff] %v356_v10 }
  0xd9   : > { %364 = vst [vmem:[%s197_s6 + $0x30] sm:$0x1] %v357_v16 }
  0xda PF: > { %s14_s15 = sadd.s32 1, %s483_s15  }
  0xdb   : > { %p11_p4 = scmp.ge.s32.totalorder %s14_s15, 4  }
  0xdd   :  { %13 = sbr.rel (!%p11_p4) target bundleno = 1 (0x1), region = 66 }

// kernel: resnetv2_forward.19
= control target key start
LH: loop header
LB: loop body
LE: loop exit
PB: predicated region body
PF: predicated region fallthrough
CT: control target
= control target key end

     0   :  { %s767_s24 = smov 0   ;;  %s915_s0 = inlined_call_operand.vmem [shape: bf16[2,49,32], index: 0, kind: input, shape index: {}]   ;;  %s916_s1 = inlined_call_operand.vmem [shape: bf16[32,128], index: 1, kind: input, shape index: {}]   ;;  %s917_s2 = inlined_call_operand.vmem [shape: f32[2,49,128], index: 2, kind: input, shape index: {}]   ;;  %s918_s3 = inlined_call_operand.vmem [shape: f32[128,32], index: 3, kind: input, shape index: {}]   ;;  %s919_s4 = inlined_call_operand.vmem [shape: f32[32,128], index: 4, kind: input, shape index: {}]   ;;  %s920_s5 = inlined_call_operand.vmem [shape: f32[1,128], index: 5, kind: input, shape index: {}]   ;;  %s921_s6 = inlined_call_operand.vmem [shape: f32[1,128], index: 6, kind: input, shape index: {}]   ;;  %s922_s7 = inlined_call_operand.vmem [shape: f32[2,49,128], index: 7, kind: output, shape index: {}]  }
   0x1 LB: > { %s661_s25 = sadd.s32 4294967295, %s725_s24   ;;  %p665_p0 = scmp.ge.s32.totalorder %s725_s24, 1  ;;  %s725_s24 = sphi %s767_s24, %s17_s24  }
   0x2   : > { %p247_p1 = scmp.lt.s32.totalorder %s725_s24, 3 }
   0x4   : > { %p248_p2 = pnand %p665_p0, %p247_p1 }
   0x5   : > { %p284_p3 = scmp.lt.s32.totalorder (!%p248_p2), %s661_s25, 1 }
   0x6   : > { %251 = sbr.rel (%p248_p2) target bundleno = 494 (0x1ee), region = 48 }
   0xb   : > { %v701_v0 = vld [vmem:[%s916_s1 + $0x8] sm:$0xff]  ;;  %v700_v1 = vld [vmem:[%s916_s1] sm:$0xff]  ;;  %s924_s25 = smov (!%p284_p3, %s661_s25), 1  ;;  %vm341_vm0 = vcmask 261120   ;;  %v431_v8 = vld [vmem:[%s918_s3 + $0x78] sm:$0xff]  ;;  %vm387_vm1 = vcmask 1040384  }
   0xc   : > { %360 = vmatpush.bf16.msra.mxu0 %v701_v0  ;;  %702 = vmatpush.bf16.msra.mxu1 %v701_v0  ;;  %s706_s30 = smul.u32 28, %s924_s25  ;;  %v430_v9 = vld [vmem:[%s918_s3 + $0x70] sm:$0xff]  ;;  %v429_v10 = vld [vmem:[%s918_s3 + $0x68] sm:$0xff]  ;;  %v428_v11 = vld [vmem:[%s918_s3 + $0x60] sm:$0xff] }
   0xd   : > { %703 = vmatpush.bf16.msra.mxu3 %v701_v0  ;;  %452 = vmatpush.msra.mxu2 %v431_v8  ;;  %v427_v12 = vld [vmem:[%s918_s3 + $0x58] sm:$0xff]  ;;  %v426_v13 = vld [vmem:[%s918_s3 + $0x50] sm:$0xff]  ;;  %v425_v14 = vld [vmem:[%s918_s3 + $0x48] sm:$0xff]  ;;  %s707_s9 = smul.u32 56, %s924_s25 }
   0xe   : > { %s288_s10 = scalar_lea.vmem %s915_s0, %s706_s30  ;;  %v424_v15 = vld [vmem:[%s918_s3 + $0x40] sm:$0xff]  ;;  %v423_v16 = vld [vmem:[%s918_s3 + $0x38] sm:$0xff]  ;;  %v422_v17 = vld [vmem:[%s918_s3 + $0x30] sm:$0xff] }
   0xf   : > { %v697_v2 = vld [vmem:[%s288_s10] sm:$0xff]  ;;  %v698_v3 = vld [vmem:[%s288_s10 + $0x8] sm:$0xff]  ;;  %v306_v4 = vld [vmem:[%s288_s10 + $0x18] sm:$0x1]  ;;  %453 = vmatpush.msra.mxu2 %v430_v9  ;;  %s293_s14 = scalar_lea.vmem %s917_s2, %s707_s9  ;;  %s298_s19 = scalar_lea.vmem %s922_s7, %s707_s9 }
  0x10   : > { %361 = vmatpush.bf16.msra.mxu0 %v700_v1  ;;  %704 = vmatpush.bf16.msra.mxu1 %v700_v1  ;;  %v324_v5 = vunpack.c.l.b16 %v306_v4  ;;  %v699_v7 = vld [vmem:[%s288_s10 + $0x10] sm:$0xff]  ;;  %v421_v18 = vld [vmem:[%s918_s3 + $0x28] sm:$0xff]  ;;  %v420_v19 = vld [vmem:[%s918_s3 + $0x20] sm:$0xff] }
  0x11   : > { %705 = vmatpush.bf16.msra.mxu3 %v700_v1  ;;  %454 = vmatpush.msra.mxu2 %v429_v10  ;;  %v419_v20 = vld [vmem:[%s918_s3 + $0x18] sm:$0xff]  ;;  %v418_v23 = vld [vmem:[%s918_s3 + $0x10] sm:$0xff]  ;;  %v417_v24 = vld [vmem:[%s918_s3 + $0x8] sm:$0xff] }
  0x12   : > { %v328_v6 = vpack.c.b16 %v324_v5, %v324_v5  ;;  %v416_v25 = vld [vmem:[%s918_s3] sm:$0xff]  ;;  %v475_v31 = vld [vmem:[%s919_s4 + $0x18] sm:$0xff]  ;;  %v474_v32 = vld [vmem:[%s919_s4 + $0x10] sm:$0xff] }
  0x13   : > { %689 = vmatmul.msk.bf16.vlgmr.msra.gmra.mxu0 %vm341_vm0, %v697_v2  ;;  %690 = vmatmul.msk.bf16.vlgmr.msra.gmra.mxu1 %vm341_vm0, %v698_v3  ;;  %v473_v34 = vld [vmem:[%s919_s4 + $0x8] sm:$0xff]  ;;  %v472_v36 = vld [vmem:[%s919_s4] sm:$0xff] }
  0x14   : > { %692 = vmatmul.msk.bf16.vlgmr.msra.gmra.mxu3 %vm341_vm0, %v328_v6  ;;  %432 = vmatpush.msrb.mxu1 %v431_v8 }
  0x15   : > { %455 = vmatpush.msra.mxu2 %v428_v11  ;;  %491 = vmatpush.msrb.mxu3 %v475_v31 }
  0x16   : > { %433 = vmatpush.msrb.mxu1 %v430_v9 }
  0x17   : > { %456 = vmatpush.msra.mxu2 %v427_v12  ;;  %492 = vmatpush.msrb.mxu3 %v474_v32 }
  0x18   : > { %434 = vmatpush.msrb.mxu1 %v429_v10 }
  0x19   : > { %457 = vmatpush.msra.mxu2 %v426_v13  ;;  %493 = vmatpush.msrb.mxu3 %v473_v34 }
  0x1a   : > { %435 = vmatpush.msrb.mxu1 %v428_v11 }
  0x1b   : > { %458 = vmatpush.msra.mxu2 %v425_v14  ;;  %494 = vmatpush.msrb.mxu3 %v472_v36 }
  0x1c   : > { %436 = vmatpush.msrb.mxu1 %v427_v12 }
  0x1d   : > { %459 = vmatpush.msra.mxu2 %v424_v15  ;;  %515 = vmatpush.msra.mxu3 %v475_v31 }
  0x1e   : > { %437 = vmatpush.msrb.mxu1 %v426_v13 }
  0x1f   : > { %460 = vmatpush.msra.mxu2 %v423_v16  ;;  %516 = vmatpush.msra.mxu3 %v474_v32 }
  0x20   : > { %438 = vmatpush.msrb.mxu1 %v425_v14 }
  0x21   : > { %461 = vmatpush.msra.mxu2 %v422_v17  ;;  %517 = vmatpush.msra.mxu3 %v473_v34  ;;  %v716_v34 = vld [vmem:[%s921_s6] ss:$0 sm:$0xff] }
  0x22   : > { %439 = vmatpush.msrb.mxu1 %v424_v15 }
  0x23   : > { %691 = vmatmul.msk.bf16.gmra.mxu1 %vm341_vm0, %v699_v7  ;;  %462 = vmatpush.msra.mxu2 %v421_v18 }
  0x24   : > { %440 = vmatpush.msrb.mxu1 %v423_v16  ;;  %518 = vmatpush.msra.mxu3 %v472_v36 }
  0x25   : > { %463 = vmatpush.msra.mxu2 %v420_v19 }
  0x26   : > { %441 = vmatpush.msrb.mxu1 %v422_v17 }
  0x27   : > { %464 = vmatpush.msra.mxu2 %v419_v20 }
  0x28   : > { %442 = vmatpush.msrb.mxu1 %v421_v18 }
  0x29   : > { %465 = vmatpush.msra.mxu2 %v418_v23 }
  0x2a   : > { %443 = vmatpush.msrb.mxu1 %v420_v19 }
  0x2b   : > { %466 = vmatpush.msra.mxu2 %v417_v24 }
  0x2c   : > { %444 = vmatpush.msrb.mxu1 %v419_v20 }
  0x2d   : > { %467 = vmatpush.msra.mxu2 %v416_v25 }
  0x2e   : > { %445 = vmatpush.msrb.mxu1 %v418_v23  ;;  %v545_v23 = vld [vmem:[%s920_s5] sm:$0x1] }
  0x30   : > { %446 = vmatpush.msrb.mxu1 %v417_v24 }
  0x32   : > { %447 = vmatpush.msrb.mxu1 %v416_v25 }
  0x90   : > { %v830_v21 = vpop.f32.mrf.mxu0  ;;  %v832_v22 = vpop.f32.mrf.mxu1 }
  0x91   : > { %v396_v29 = vmul.f32 %v830_v21, %v830_v21  ;;  %v398_v38 = vmul.f32 %v832_v22, %v832_v22 }
  0x97   : > { %v847_v28 = vpop.f32.mrf.mxu3 }
  0x98   : > { %v843_v26 = vpop.f32.mrf.mxu0  ;;  %v845_v27 = vpop.f32.mrf.mxu1  ;;  %v402_v45 = vmul.f32 %v847_v28, %v847_v28  ;;  %v388_v48 = vsel %vm387_vm1, %v847_v28, 0.0 }
  0x99   : > { %v397_v30 = vmul.f32 %v843_v26, %v843_v26  ;;  %v382_v33 = vadd.f32 %v843_v26, %v830_v21  ;;  %v399_v43 = vmul.f32 %v845_v27, %v845_v27 }
  0x9a   : > { %v408_v53 = vsel %vm387_vm1, %v402_v45, 0.0 }
  0x9b   : > { %v403_v35 = vadd.f32 %v397_v30, %v396_v29  ;;  %v383_v39 = vadd.f32 %v382_v33, %v832_v22 }
  0x9d   : > { %v404_v41 = vadd.f32 %v403_v35, %v398_v38  ;;  %v384_v42 = vadd.f32 %v383_v39, %v845_v27  ;;  %v566_v39 = vld [vmem:[%s293_s14] sm:$0xff] }
  0x9f   : > { %v380_v40 = vpop.f32.mrf.mxu3  ;;  %v405_v46 = vadd.f32 %v404_v41, %v399_v43  ;;  %v569_v43 = vld [vmem:[%s293_s14 + $0x18] sm:$0xff] }
  0xa0   : > { %v867_v37 = vpop.f32.mrf.mxu1 }
  0xa1   : > { %v400_v44 = vmul.f32 %v867_v37, %v867_v37  ;;  %v385_v47 = vadd.f32 %v384_v42, %v867_v37  ;;  %v567_v42 = vld [vmem:[%s293_s14 + $0x8] sm:$0xff] }
  0xa3   : > { %v406_v50 = vadd.f32 %v405_v46, %v400_v44  ;;  %v570_v46 = vld [vmem:[%s293_s14 + $0x20] sm:$0xff] }
  0xa8   : > { %v881_v49 = vpop.f32.mrf.mxu1 }
  0xa9   : > { %v386_v51 = vadd.f32 %v385_v47, %v881_v49  ;;  %v401_v52 = vmul.f32 %v881_v49, %v881_v49  ;;  %v571_v47 = vld [vmem:[%s293_s14 + $0x28] sm:$0xff] }
  0xab   : > { %v389_v54 = vadd.f32 %v388_v48, %v386_v51  ;;  %v407_v55 = vadd.f32 %v406_v50, %v401_v52  ;;  %v572_v51 = vld [vmem:[%s293_s14 + $0x30] sm:$0x1] }
  0xad   : > { %v390_v56 = vrot.slane %v389_v54, 4  ;;  %v409_v57 = vadd.f32 %v408_v53, %v407_v55 }
  0xaf   : > { %v391_v58 = vadd.f32 %v390_v56, %v389_v54  ;;  %v410_v59 = vrot.slane %v409_v57, 4 }
  0xb1   : > { %v392_v60 = vrot.slane %v391_v58, 2  ;;  %v411_v61 = vadd.f32 %v410_v59, %v409_v57 }
  0xb3   : > { %v393_v62 = vadd.f32 %v392_v60, %v391_v58  ;;  %v412_v63 = vrot.slane %v411_v61, 2 }
  0xb5   : > { %v394_v0 = vrot.slane %v393_v62, 1  ;;  %v413_v1 = vadd.f32 %v412_v63, %v411_v61 }
  0xb7   : > { %v395_v2 = vadd.f32 %v394_v0, %v393_v62  ;;  %v414_v3 = vrot.slane %v413_v1, 1 }
  0xb9   : > { %448 = vmatmul.f32.vlgmr.msrb.gmra.mxu1 %v395_v2  ;;  %v415_v4 = vadd.f32 %v414_v3, %v413_v1 }
  0xbb   : > { %468 = vmatmul.f32.vlgmr.msra.gmra.mxu2 %v415_v4 }
 0x136   : > { %v449_v5 = vpop.f32.mrf.mxu1 }
 0x137   : > { %693 = vmatmul.msk.f32.vlgmr.msrb.gmra.mxu3 %vm341_vm0, %v449_v5 }
 0x13e   : > { %v469_v6 = vpop.f32.mrf.mxu2 }
 0x13f   : > { %694 = vmatmul.msk.f32.vlgmr.msra.gmra.mxu3 %vm341_vm0, %v469_v6 }
 0x1ba   : > { %v496_v7 = vpop.f32.mrf.mxu3 }
 0x1bb   : > { %v499_v8 = vmul.f32 0.0051020407, %v496_v7 }
 0x1bd   : > { %v524_v10 = vmul.f32 %v499_v8, %v499_v8  ;;  %v537_v19 = vperm.slane %v499_v8, 0 }
 0x1bf   : > { %v538_v29 = vsub.f32 %v830_v21, %v537_v19  ;;  %v539_v30 = vsub.f32 %v843_v26, %v537_v19  ;;  %v540_v31 = vsub.f32 %v832_v22, %v537_v19  ;;  %v541_v32 = vsub.f32 %v845_v27, %v537_v19  ;;  %v568_v22 = vld [vmem:[%s293_s14 + $0x10] sm:$0xff] }
 0x1c0   : > { %v542_v35 = vsub.f32 %v867_v37, %v537_v19  ;;  %v543_v36 = vsub.f32 %v881_v49, %v537_v19  ;;  %v544_v38 = vsub.f32 %v847_v28, %v537_v19 }
 0x1c2   : > { %v520_v9 = vpop.f32.mrf.mxu3 }
 0x1c3   : > { %v523_v11 = vmul.f32 0.0051020407, %v520_v9 }
 0x1c5   : > { %v525_v12 = vsub.f32 %v523_v11, %v524_v10 }
 0x1c7   : > { %v526_v13 = vadd.f32 1e-06, %v525_v12 }
 0x1c9   : > { %717 = vrsqrt.f32 %v526_v13  ;;  %vm533_vm3 = vweird.f32 %v526_v13 }
 0x1cf   : > { %v718_v14 = vpop.eup %717 }
 0x1d0   : > { %v528_v15 = vmul.f32 %v718_v14, %v526_v13  ;;  %vm534_vm2 = vweird.f32 %v718_v14 }
 0x1d1   : > { %vm535_vm4 = vmor %vm533_vm3, %vm534_vm2 }
 0x1d2   : > { %v529_v16 = vmul.f32 %v718_v14, %v528_v15 }
 0x1d4   : > { %v530_v17 = vmul.f32 0.5, %v529_v16 }
 0x1d6   : > { %v531_v18 = vsub.f32 1.5, %v530_v17 }
 0x1d8   : > { %v532_v20 = vmul.f32 %v718_v14, %v531_v18 }
 0x1da   : > { %v536_v24 = vsel %vm535_vm4, %v718_v14, %v532_v20 }
 0x1db   : > { %v546_v25 = vmul.f32 %v545_v23, %v536_v24 }
 0x1dd   : > { %v547_v33 = vperm.slane %v546_v25, 0 }
 0x1df   : > { %v548_v40 = vmul.f32 %v547_v33, %v538_v29  ;;  %v549_v21 = vmul.f32 %v547_v33, %v539_v30  ;;  %v550_v41 = vmul.f32 %v547_v33, %v540_v31  ;;  %v551_v26 = vmul.f32 %v547_v33, %v541_v32 }
 0x1e0   : > { %v552_v27 = vmul.f32 %v547_v33, %v542_v35  ;;  %v553_v44 = vmul.f32 %v547_v33, %v543_v36  ;;  %v554_v45 = vmul.f32 %v547_v33, %v544_v38 }
 0x1e1   : > { %v559_v48 = vadd.f32 %v716_v34, %v548_v40  ;;  %v560_v37 = vadd.f32 %v716_v34, %v549_v21  ;;  %v561_v50 = vadd.f32 %v716_v34, %v550_v41  ;;  %v562_v49 = vadd.f32 %v716_v34, %v551_v26 }
 0x1e2   : > { %v563_v28 = vadd.f32 %v716_v34, %v552_v27  ;;  %v564_v52 = vadd.f32 %v716_v34, %v553_v44  ;;  %v565_v53 = vadd.f32 %v716_v34, %v554_v45 }
 0x1e3   : > { %v573_v54 = vadd.f32 %v566_v39, %v559_v48  ;;  %v574_v55 = vadd.f32 %v567_v42, %v560_v37  ;;  %v575_v56 = vadd.f32 %v568_v22, %v561_v50  ;;  %v576_v57 = vadd.f32 %v569_v43, %v562_v49 }
 0x1e4   : > { %v577_v58 = vadd.f32 %v570_v46, %v563_v28  ;;  %v578_v59 = vadd.f32 %v571_v47, %v564_v52  ;;  %v579_v60 = vadd.f32 %v572_v51, %v565_v53 }
 0x1e5   : > { %v580_v61 = vmax.f32 %v573_v54, 0.0  ;;  %v581_v62 = vmax.f32 %v574_v55, 0.0  ;;  %v582_v63 = vmax.f32 %v575_v56, 0.0  ;;  %v583_v0 = vmax.f32 %v576_v57, 0.0 }
 0x1e6   : > { %v584_v1 = vmax.f32 %v577_v58, 0.0  ;;  %v585_v2 = vmax.f32 %v578_v59, 0.0  ;;  %v586_v3 = vmax.f32 %v579_v60, 0.0 }
 0x1e7   : > { %587 = vst [vmem:[%s298_s19] sm:$0xff] %v580_v61 }
 0x1e8   : > { %588 = vst [vmem:[%s298_s19 + $0x8] sm:$0xff] %v581_v62 }
 0x1e9   : > { %589 = vst [vmem:[%s298_s19 + $0x10] sm:$0xff] %v582_v63 }
 0x1ea   : > { %590 = vst [vmem:[%s298_s19 + $0x18] sm:$0xff] %v583_v0 }
 0x1eb   : > { %591 = vst [vmem:[%s298_s19 + $0x20] sm:$0xff] %v584_v1 }
 0x1ec   : > { %592 = vst [vmem:[%s298_s19 + $0x28] sm:$0xff] %v585_v2 }
 0x1ed   : > { %593 = vst [vmem:[%s298_s19 + $0x30] sm:$0x1] %v586_v3 }
 0x1ee PF: > { %s17_s24 = sadd.s32 1, %s725_s24  }
 0x1ef   : > { %p14_p4 = scmp.ge.s32.totalorder %s17_s24, 4  }
 0x1f1   :  { %16 = sbr.rel (!%p14_p4) target bundleno = 1 (0x1), region = 81 }

// kernel: resnetv2_forward.21
= control target key start
LH: loop header
LB: loop body
LE: loop exit
PB: predicated region body
PF: predicated region fallthrough
CT: control target
= control target key end

     0   :  { %s786_s21 = smov 0   ;;  %s938_s0 = inlined_call_operand.vmem [shape: bf16[2,49,128], index: 0, kind: input, shape index: {}]   ;;  %s939_s1 = inlined_call_operand.vmem [shape: bf16[128,64], index: 1, kind: input, shape index: {}]   ;;  %s940_s2 = inlined_call_operand.vmem [shape: f32[64,32], index: 2, kind: input, shape index: {}]   ;;  %s941_s3 = inlined_call_operand.vmem [shape: f32[32,64], index: 3, kind: input, shape index: {}]   ;;  %s942_s4 = inlined_call_operand.vmem [shape: f32[1,64], index: 4, kind: input, shape index: {}]   ;;  %s943_s5 = inlined_call_operand.vmem [shape: f32[1,64], index: 5, kind: input, shape index: {}]   ;;  %s944_s6 = inlined_call_operand.vmem [shape: f32[2,49,64], index: 6, kind: output, shape index: {}]  }
   0x1 LB: > { %s638_s22 = sadd.s32 4294967295, %s749_s21   ;;  %p642_p0 = scmp.ge.s32.totalorder %s749_s21, 1  ;;  %s749_s21 = sphi %s786_s21, %s16_s21  }
   0x2   : > { %p212_p1 = scmp.lt.s32.totalorder %s749_s21, 3 }
   0x4   : > { %p213_p2 = pnand %p642_p0, %p212_p1 }
   0x5   : > { %p242_p3 = scmp.lt.s32.totalorder (!%p213_p2), %s638_s22, 1 }
   0x6   : > { %216 = sbr.rel (%p213_p2) target bundleno = 509 (0x1fd), region = 44 }
   0xb   : > { %v705_v0 = vld [vmem:[%s939_s1 + $0x38] sm:$0xff]  ;;  %v704_v1 = vld [vmem:[%s939_s1 + $0x30] sm:$0xff]  ;;  %v703_v2 = vld [vmem:[%s939_s1 + $0x28] sm:$0xff]  ;;  %s946_s22 = smov (!%p242_p3, %s638_s22), 1  ;;  %vm373_vm0 = vcmask 523264   ;;  %vm385_vm1 = vcmask 516096  }
   0xc   : > { %345 = vmatpush.bf16.msra.mxu0 %v705_v0  ;;  %706 = vmatpush.bf16.msra.mxu1 %v705_v0  ;;  %v702_v3 = vld [vmem:[%s939_s1 + $0x20] sm:$0xff]  ;;  %v701_v4 = vld [vmem:[%s939_s1 + $0x18] sm:$0xff]  ;;  %s730_s9 = smul.u32 28, %s946_s22  ;;  %v700_v5 = vld [vmem:[%s939_s1 + $0x10] sm:$0xff]  ;;  %vm478_vm2 = vcmask 261120  }
   0xd   : > { %707 = vmatpush.bf16.msra.mxu2 %v705_v0  ;;  %708 = vmatpush.bf16.msra.mxu3 %v705_v0  ;;  %v699_v6 = vld [vmem:[%s939_s1 + $0x8] sm:$0xff]  ;;  %v698_v8 = vld [vmem:[%s939_s1] sm:$0xff]  ;;  %v427_v14 = vld [vmem:[%s940_s2 + $0x38] sm:$0xff]  ;;  %s731_s27 = smul.u32 56, %s946_s22 }
   0xe   : > { %s246_s14 = scalar_lea.vmem %s938_s0, %s730_s9  ;;  %v426_v15 = vld [vmem:[%s940_s2 + $0x30] sm:$0xff]  ;;  %v425_v16 = vld [vmem:[%s940_s2 + $0x28] sm:$0xff]  ;;  %v424_v17 = vld [vmem:[%s940_s2 + $0x20] sm:$0xff] }
   0xf   : > { %v258_v7 = vld [vmem:[%s246_s14 + $0x18] sm:$0x1]  ;;  %v695_v10 = vld [vmem:[%s246_s14] sm:$0xff]  ;;  %v696_v11 = vld [vmem:[%s246_s14 + $0x8] sm:$0xff]  ;;  %s251_s22 = scalar_lea.vmem %s944_s6, %s731_s27 }
  0x10   : > { %346 = vmatpush.bf16.msra.mxu0 %v704_v1  ;;  %709 = vmatpush.bf16.msra.mxu1 %v704_v1  ;;  %v288_v9 = vunpack.c.l.b16 %v258_v7  ;;  %v697_v12 = vld [vmem:[%s246_s14 + $0x10] sm:$0xff]  ;;  %v423_v18 = vld [vmem:[%s940_s2 + $0x18] sm:$0xff]  ;;  %v421_v20 = vld [vmem:[%s940_s2 + $0x8] sm:$0xff] }
  0x11   : > { %710 = vmatpush.bf16.msra.mxu2 %v704_v1  ;;  %711 = vmatpush.bf16.msra.mxu3 %v704_v1  ;;  %v422_v19 = vld [vmem:[%s940_s2 + $0x10] sm:$0xff]  ;;  %v420_v21 = vld [vmem:[%s940_s2] sm:$0xff]  ;;  %v477_v24 = vld [vmem:[%s941_s3 + $0x18] sm:$0xff] }
  0x12   : > { %v292_v13 = vpack.c.b16 %v288_v9, %v288_v9  ;;  %v476_v25 = vld [vmem:[%s941_s3 + $0x10] sm:$0xff]  ;;  %v475_v26 = vld [vmem:[%s941_s3 + $0x8] sm:$0xff] }
  0x14   : > { %347 = vmatpush.bf16.msra.mxu0 %v703_v2  ;;  %712 = vmatpush.bf16.msra.mxu1 %v703_v2 }
  0x15   : > { %713 = vmatpush.bf16.msra.mxu2 %v703_v2  ;;  %714 = vmatpush.bf16.msra.mxu3 %v703_v2 }
  0x18   : > { %348 = vmatpush.bf16.msra.mxu0 %v702_v3  ;;  %715 = vmatpush.bf16.msra.mxu1 %v702_v3 }
  0x19   : > { %716 = vmatpush.bf16.msra.mxu2 %v702_v3  ;;  %717 = vmatpush.bf16.msra.mxu3 %v702_v3 }
  0x1c   : > { %349 = vmatpush.bf16.msra.mxu0 %v701_v4  ;;  %718 = vmatpush.bf16.msra.mxu1 %v701_v4 }
  0x1d   : > { %719 = vmatpush.bf16.msra.mxu2 %v701_v4  ;;  %720 = vmatpush.bf16.msra.mxu3 %v701_v4 }
  0x20   : > { %350 = vmatpush.bf16.msra.mxu0 %v700_v5  ;;  %721 = vmatpush.bf16.msra.mxu1 %v700_v5 }
  0x21   : > { %722 = vmatpush.bf16.msra.mxu2 %v700_v5  ;;  %723 = vmatpush.bf16.msra.mxu3 %v700_v5 }
  0x24   : > { %351 = vmatpush.bf16.msra.mxu0 %v699_v6  ;;  %724 = vmatpush.bf16.msra.mxu1 %v699_v6 }
  0x25   : > { %725 = vmatpush.bf16.msra.mxu2 %v699_v6  ;;  %726 = vmatpush.bf16.msra.mxu3 %v699_v6 }
  0x28   : > { %352 = vmatpush.bf16.msra.mxu0 %v698_v8  ;;  %727 = vmatpush.bf16.msra.mxu1 %v698_v8 }
  0x29   : > { %728 = vmatpush.bf16.msra.mxu2 %v698_v8  ;;  %729 = vmatpush.bf16.msra.mxu3 %v698_v8 }
  0x2b   : > { %353 = vmatmul.bf16.vlgmr.msra.gmra.mxu0 %v695_v10  ;;  %358 = vmatmul.bf16.vlgmr.msra.gmra.mxu1 %v696_v11 }
  0x2c   : > { %363 = vmatmul.bf16.vlgmr.msra.gmra.mxu2 %v697_v12  ;;  %368 = vmatmul.bf16.vlgmr.msra.gmra.mxu3 %v292_v13 }
  0x2d   : > { %439 = vmatpush.msrb.mxu1 %v427_v14  ;;  %462 = vmatpush.msrb.mxu2 %v427_v14  ;;  %v474_v14 = vld [vmem:[%s941_s3] sm:$0xff] }
  0x2e   : > { %518 = vmatpush.msrb.mxu3 %v477_v24  ;;  %494 = vmatpush.msrb.mxu0 %v477_v24 }
  0x2f   : > { %440 = vmatpush.msrb.mxu1 %v426_v15  ;;  %463 = vmatpush.msrb.mxu2 %v426_v15 }
  0x30   : > { %495 = vmatpush.msrb.mxu0 %v476_v25  ;;  %519 = vmatpush.msrb.mxu3 %v476_v25 }
  0x31   : > { %441 = vmatpush.msrb.mxu1 %v425_v16  ;;  %464 = vmatpush.msrb.mxu2 %v425_v16 }
  0x32   : > { %496 = vmatpush.msrb.mxu0 %v475_v26  ;;  %520 = vmatpush.msrb.mxu3 %v475_v26 }
  0x33   : > { %442 = vmatpush.msrb.mxu1 %v424_v17  ;;  %465 = vmatpush.msrb.mxu2 %v424_v17 }
  0x34   : > { %497 = vmatpush.msrb.mxu0 %v474_v14  ;;  %521 = vmatpush.msrb.mxu3 %v474_v14 }
  0x35   : > { %443 = vmatpush.msrb.mxu1 %v423_v18  ;;  %466 = vmatpush.msrb.mxu2 %v423_v18 }
  0x37   : > { %444 = vmatpush.msrb.mxu1 %v422_v19  ;;  %467 = vmatpush.msrb.mxu2 %v422_v19 }
  0x39   : > { %445 = vmatpush.msrb.mxu1 %v421_v20  ;;  %468 = vmatpush.msrb.mxu2 %v421_v20 }
  0x3b   : > { %446 = vmatpush.msrb.mxu1 %v420_v21  ;;  %469 = vmatpush.msrb.mxu2 %v420_v21 }
  0xa8   : > { %v848_v22 = vpop.f32.mrf.mxu0  ;;  %v850_v23 = vpop.f32.mrf.mxu1 }
  0xa9   : > { %v394_v27 = vmul.f32 %v848_v22, %v848_v22  ;;  %v374_v32 = vsel %vm373_vm0, %v848_v22, 0.0  ;;  %v396_v33 = vmul.f32 %v850_v23, %v850_v23  ;;  %v377_v38 = vsel %vm373_vm0, %v850_v23, 0.0 }
  0xab   : > { %v401_v37 = vsel %vm373_vm0, %v394_v27, 0.0  ;;  %v404_v43 = vsel %vm373_vm0, %v396_v33, 0.0 }
  0xaf   : > { %v863_v28 = vpop.f32.mrf.mxu2  ;;  %v865_v29 = vpop.f32.mrf.mxu3 }
  0xb0   : > { %v867_v30 = vpop.f32.mrf.mxu0  ;;  %v869_v31 = vpop.f32.mrf.mxu1  ;;  %v398_v44 = vmul.f32 %v863_v28, %v863_v28  ;;  %v381_v48 = vsel %vm373_vm0, %v863_v28, 0.0  ;;  %v400_v50 = vmul.f32 %v865_v29, %v865_v29  ;;  %v386_v57 = vsel %vm385_vm1, %v865_v29, 0.0 }
  0xb1   : > { %v375_v34 = vsel %vm373_vm0, %v867_v30, 0.0  ;;  %v395_v35 = vmul.f32 %v867_v30, %v867_v30  ;;  %v397_v40 = vmul.f32 %v869_v31, %v869_v31  ;;  %v379_v45 = vsel %vm373_vm0, %v869_v31, 0.0 }
  0xb2   : > { %v376_v36 = vadd.f32 %v375_v34, %v374_v32  ;;  %v408_v56 = vsel %vm373_vm0, %v398_v44, 0.0  ;;  %v412_v61 = vsel %vm385_vm1, %v400_v50, 0.0 }
  0xb3   : > { %v402_v39 = vsel %vm373_vm0, %v395_v35, 0.0  ;;  %v406_v49 = vsel %vm373_vm0, %v397_v40, 0.0 }
  0xb4   : > { %v403_v41 = vadd.f32 %v402_v39, %v401_v37  ;;  %v378_v42 = vadd.f32 %v377_v38, %v376_v36  ;;  %v548_v37 = vld [vmem:[%s942_s4] sm:$0x1] }
  0xb6   : > { %v380_v46 = vadd.f32 %v379_v45, %v378_v42  ;;  %v405_v47 = vadd.f32 %v404_v43, %v403_v41  ;;  %v740_v45 = vld [vmem:[%s943_s5] ss:$0 sm:$0xff] }
  0xb7   : > { %v895_v51 = vpop.f32.mrf.mxu2  ;;  %v371_v52 = vpop.f32.mrf.mxu3 }
  0xb8   : > { %v407_v53 = vadd.f32 %v406_v49, %v405_v47  ;;  %v382_v54 = vadd.f32 %v381_v48, %v380_v46  ;;  %v399_v55 = vmul.f32 %v895_v51, %v895_v51  ;;  %v383_v58 = vsel %vm373_vm0, %v895_v51, 0.0 }
  0xba   : > { %v384_v59 = vadd.f32 %v383_v58, %v382_v54  ;;  %v409_v60 = vadd.f32 %v408_v56, %v407_v53  ;;  %v410_v62 = vsel %vm373_vm0, %v399_v55, 0.0 }
  0xbc   : > { %v387_v63 = vadd.f32 %v386_v57, %v384_v59  ;;  %v411_v0 = vadd.f32 %v410_v62, %v409_v60 }
  0xbe   : > { %v388_v1 = vrot.slane %v387_v63, 4  ;;  %v413_v2 = vadd.f32 %v412_v61, %v411_v0 }
  0xc0   : > { %v389_v3 = vadd.f32 %v388_v1, %v387_v63  ;;  %v414_v4 = vrot.slane %v413_v2, 4 }
  0xc2   : > { %v390_v5 = vrot.slane %v389_v3, 2  ;;  %v415_v6 = vadd.f32 %v414_v4, %v413_v2 }
  0xc4   : > { %v391_v7 = vadd.f32 %v390_v5, %v389_v3  ;;  %v416_v8 = vrot.slane %v415_v6, 2 }
  0xc6   : > { %v392_v9 = vrot.slane %v391_v7, 1  ;;  %v417_v10 = vadd.f32 %v416_v8, %v415_v6 }
  0xc8   : > { %v393_v11 = vadd.f32 %v392_v9, %v391_v7  ;;  %v418_v12 = vrot.slane %v417_v10, 1 }
  0xca   : > { %689 = vmatmul.msk.f32.vlgmr.msrb.gmra.mxu1 %vm373_vm0, %v393_v11  ;;  %v419_v13 = vadd.f32 %v418_v12, %v417_v10 }
  0xcc   : > { %690 = vmatmul.msk.f32.vlgmr.msrb.gmra.mxu2 %vm373_vm0, %v419_v13 }
 0x147   : > { %v448_v15 = vpop.f32.mrf.mxu1 }
 0x148   : > { %691 = vmatmul.msk.f32.vlgmr.msrb.gmra.mxu0 %vm478_vm2, %v448_v15 }
 0x14f   : > { %v471_v16 = vpop.f32.mrf.mxu2 }
 0x150   : > { %692 = vmatmul.msk.f32.vlgmr.msrb.gmra.mxu3 %vm478_vm2, %v471_v16 }
 0x1c5   : > { %v499_v17 = vpop.f32.mrf.mxu0 }
 0x1c6   : > { %v502_v18 = vmul.f32 0.010204081, %v499_v17 }
 0x1c8   : > { %v527_v20 = vmul.f32 %v502_v18, %v502_v18  ;;  %v540_v35 = vperm.slane %v502_v18, 0 }
 0x1ca   : > { %v541_v40 = vsub.f32 %v848_v22, %v540_v35  ;;  %v542_v41 = vsub.f32 %v867_v30, %v540_v35  ;;  %v543_v42 = vsub.f32 %v850_v23, %v540_v35  ;;  %v544_v43 = vsub.f32 %v869_v31, %v540_v35 }
 0x1cb   : > { %v545_v46 = vsub.f32 %v863_v28, %v540_v35  ;;  %v546_v47 = vsub.f32 %v895_v51, %v540_v35  ;;  %v547_v48 = vsub.f32 %v865_v29, %v540_v35 }
 0x1d3   : > { %v523_v19 = vpop.f32.mrf.mxu3 }
 0x1d4   : > { %v526_v21 = vmul.f32 0.010204081, %v523_v19 }
 0x1d6   : > { %v528_v24 = vsub.f32 %v526_v21, %v527_v20 }
 0x1d8   : > { %v529_v25 = vadd.f32 1e-06, %v528_v24 }
 0x1da   : > { %741 = vrsqrt.f32 %v529_v25  ;;  %vm536_vm4 = vweird.f32 %v529_v25 }
 0x1e0   : > { %v742_v26 = vpop.eup %741 }
 0x1e1   : > { %v531_v27 = vmul.f32 %v742_v26, %v529_v25  ;;  %vm537_vm3 = vweird.f32 %v742_v26 }
 0x1e2   : > { %vm538_vm5 = vmor %vm536_vm4, %vm537_vm3 }
 0x1e3   : > { %v532_v32 = vmul.f32 %v742_v26, %v531_v27 }
 0x1e5   : > { %v533_v33 = vmul.f32 0.5, %v532_v32 }
 0x1e7   : > { %v534_v34 = vsub.f32 1.5, %v533_v33 }
 0x1e9   : > { %v535_v36 = vmul.f32 %v742_v26, %v534_v34 }
 0x1eb   : > { %v539_v38 = vsel %vm538_vm5, %v742_v26, %v535_v36 }
 0x1ec   : > { %v549_v39 = vmul.f32 %v548_v37, %v539_v38 }
 0x1ee   : > { %v550_v44 = vperm.slane %v549_v39, 0 }
 0x1f0   : > { %v551_v49 = vmul.f32 %v550_v44, %v541_v40  ;;  %v552_v22 = vmul.f32 %v550_v44, %v542_v41  ;;  %v553_v50 = vmul.f32 %v550_v44, %v543_v42  ;;  %v554_v30 = vmul.f32 %v550_v44, %v544_v43 }
 0x1f1   : > { %v555_v52 = vmul.f32 %v550_v44, %v545_v46  ;;  %v556_v23 = vmul.f32 %v550_v44, %v546_v47  ;;  %v557_v53 = vmul.f32 %v550_v44, %v547_v48 }
 0x1f2   : > { %v562_v31 = vadd.f32 %v740_v45, %v551_v49  ;;  %v563_v54 = vadd.f32 %v740_v45, %v552_v22  ;;  %v564_v55 = vadd.f32 %v740_v45, %v553_v50  ;;  %v565_v56 = vadd.f32 %v740_v45, %v554_v30 }
 0x1f3   : > { %v566_v28 = vadd.f32 %v740_v45, %v555_v52  ;;  %v567_v57 = vadd.f32 %v740_v45, %v556_v23  ;;  %v568_v51 = vadd.f32 %v740_v45, %v557_v53 }
 0x1f4   : > { %v569_v58 = vmax.f32 %v562_v31, 0.0  ;;  %v570_v29 = vmax.f32 %v563_v54, 0.0  ;;  %v571_v59 = vmax.f32 %v564_v55, 0.0  ;;  %v572_v60 = vmax.f32 %v565_v56, 0.0 }
 0x1f5   : > { %v573_v61 = vmax.f32 %v566_v28, 0.0  ;;  %v574_v62 = vmax.f32 %v567_v57, 0.0  ;;  %v575_v63 = vmax.f32 %v568_v51, 0.0 }
 0x1f6   : > { %576 = vst.msk [vmem:[%s251_s22] sm:$0xff] %vm373_vm0, %v569_v58 }
 0x1f7   : > { %577 = vst.msk [vmem:[%s251_s22 + $0x8] sm:$0xff] %vm373_vm0, %v570_v29 }
 0x1f8   : > { %578 = vst.msk [vmem:[%s251_s22 + $0x10] sm:$0xff] %vm373_vm0, %v571_v59 }
 0x1f9   : > { %579 = vst.msk [vmem:[%s251_s22 + $0x18] sm:$0xff] %vm373_vm0, %v572_v60 }
 0x1fa   : > { %580 = vst.msk [vmem:[%s251_s22 + $0x20] sm:$0xff] %vm373_vm0, %v573_v61 }
 0x1fb   : > { %581 = vst.msk [vmem:[%s251_s22 + $0x28] sm:$0xff] %vm373_vm0, %v574_v62 }
 0x1fc   : > { %582 = vst.msk [vmem:[%s251_s22 + $0x30] sm:$0x1] %vm385_vm1, %v575_v63 }
 0x1fd PF: > { %s16_s21 = sadd.s32 1, %s749_s21  }
 0x1fe   : > { %p13_p4 = scmp.ge.s32.totalorder %s16_s21, 4  }
 0x200   :  { %15 = sbr.rel (!%p13_p4) target bundleno = 1 (0x1), region = 74 }

// kernel: resnetv2_forward.22
= control target key start
LH: loop header
LB: loop body
LE: loop exit
PB: predicated region body
PF: predicated region fallthrough
CT: control target
= control target key end

     0   :  { %s1135_s21 = smov 0   ;;  %s1331_s0 = inlined_call_operand.vmem [shape: bf16[2,16,576], index: 0, kind: input, shape index: {}]   ;;  %s1332_s1 = inlined_call_operand.vmem [shape: bf16[576,64], index: 1, kind: input, shape index: {}]   ;;  %s1333_s2 = inlined_call_operand.vmem [shape: f32[64,32], index: 2, kind: input, shape index: {}]   ;;  %s1334_s3 = inlined_call_operand.vmem [shape: f32[32,64], index: 3, kind: input, shape index: {}]   ;;  %s1335_s4 = inlined_call_operand.vmem [shape: f32[1,64], index: 4, kind: input, shape index: {}]   ;;  %s1336_s5 = inlined_call_operand.vmem [shape: f32[1,64], index: 5, kind: input, shape index: {}]   ;;  %s1337_s6 = inlined_call_operand.vmem [shape: f32[2,16,64], index: 6, kind: output, shape index: {}]  }
   0x1 LB: > { %s859_s22 = sadd.s32 4294967295, %s1098_s21   ;;  %p863_p0 = scmp.ge.s32.totalorder %s1098_s21, 1  ;;  %s1098_s21 = sphi %s1135_s21, %s16_s21  }
   0x2   : > { %p212_p1 = scmp.lt.s32.totalorder %s1098_s21, 3 }
   0x4   : > { %p213_p2 = pnand %p863_p0, %p212_p1 }
   0x5   : > { %p242_p3 = scmp.lt.s32.totalorder (!%p213_p2), %s859_s22, 1 }
   0x6   : > { %216 = sbr.rel (%p213_p2) target bundleno = 506 (0x1fa), region = 44 }
   0xb   : > { %v1051_v0 = vld [vmem:[%s1332_s1 + $0x38] sm:$0xff]  ;;  %v1050_v4 = vld [vmem:[%s1332_s1 + $0x30] sm:$0xff]  ;;  %v1049_v8 = vld [vmem:[%s1332_s1 + $0x28] sm:$0xff]  ;;  %s1339_s22 = smov (!%p242_p3, %s859_s22), 1  ;;  %vm572_vm0 = vcmask 523264   ;;  %vm724_vm1 = vcmask 261120  }
   0xc   : > { %v1059_v1 = vld [vmem:[%s1332_s1 + $0x78] sm:$0xff]  ;;  %576 = vmatpush.bf16.msra.mxu0 %v1051_v0  ;;  %v1058_v5 = vld [vmem:[%s1332_s1 + $0x70] sm:$0xff]  ;;  %v1057_v9 = vld [vmem:[%s1332_s1 + $0x68] sm:$0xff]  ;;  %s1080_s23 = smul.u32 40, %s1339_s22 }
   0xd   : > { %v1067_v2 = vld [vmem:[%s1332_s1 + $0xb8] sm:$0xff]  ;;  %590 = vmatpush.bf16.msra.mxu1 %v1059_v1  ;;  %v1066_v6 = vld [vmem:[%s1332_s1 + $0xb0] sm:$0xff]  ;;  %v1065_v10 = vld [vmem:[%s1332_s1 + $0xa8] sm:$0xff] }
   0xe   : > { %v1075_v3 = vld [vmem:[%s1332_s1 + $0xf8] sm:$0xff]  ;;  %604 = vmatpush.bf16.msra.mxu2 %v1067_v2  ;;  %v1074_v7 = vld [vmem:[%s1332_s1 + $0xf0] sm:$0xff]  ;;  %v1073_v11 = vld [vmem:[%s1332_s1 + $0xe8] sm:$0xff]  ;;  %s1231_s10 = scalar_lea.vmem %s1331_s0, %s1080_s23 }
   0xf   : > { %618 = vmatpush.bf16.msra.mxu3 %v1075_v3  ;;  %v1048_v12 = vld [vmem:[%s1332_s1 + $0x20] sm:$0xff]  ;;  %v1047_v16 = vld [vmem:[%s1332_s1 + $0x18] sm:$0xff]  ;;  %v1046_v20 = vld [vmem:[%s1332_s1 + $0x10] sm:$0xff] }
  0x10   : > { %577 = vmatpush.bf16.msra.mxu0 %v1050_v4  ;;  %v1056_v13 = vld [vmem:[%s1332_s1 + $0x60] sm:$0xff]  ;;  %v1055_v17 = vld [vmem:[%s1332_s1 + $0x58] sm:$0xff]  ;;  %v1054_v21 = vld [vmem:[%s1332_s1 + $0x50] sm:$0xff] }
  0x11   : > { %591 = vmatpush.bf16.msra.mxu1 %v1058_v5  ;;  %v1064_v14 = vld [vmem:[%s1332_s1 + $0xa0] sm:$0xff]  ;;  %v1063_v18 = vld [vmem:[%s1332_s1 + $0x98] sm:$0xff]  ;;  %v1062_v22 = vld [vmem:[%s1332_s1 + $0x90] sm:$0xff] }
  0x12   : > { %605 = vmatpush.bf16.msra.mxu2 %v1066_v6  ;;  %v1072_v15 = vld [vmem:[%s1332_s1 + $0xe0] sm:$0xff]  ;;  %v1071_v19 = vld [vmem:[%s1332_s1 + $0xd8] sm:$0xff]  ;;  %v1070_v23 = vld [vmem:[%s1332_s1 + $0xd0] sm:$0xff] }
  0x13   : > { %619 = vmatpush.bf16.msra.mxu3 %v1074_v7  ;;  %v1045_v24 = vld [vmem:[%s1332_s1 + $0x8] sm:$0xff]  ;;  %v1044_v28 = vld [vmem:[%s1332_s1] sm:$0xff]  ;;  %v1041_v33 = vld [vmem:[%s1231_s10 + $0x10] sm:$0xf0] }
  0x14   : > { %578 = vmatpush.bf16.msra.mxu0 %v1049_v8  ;;  %v1053_v25 = vld [vmem:[%s1332_s1 + $0x48] sm:$0xff]  ;;  %v1052_v29 = vld [vmem:[%s1332_s1 + $0x40] sm:$0xff]  ;;  %v871_v35 = vld [vmem:[%s1231_s10 + $0x14] sm:$0xf0] }
  0x15   : > { %592 = vmatpush.bf16.msra.mxu1 %v1057_v9  ;;  %v1061_v26 = vld [vmem:[%s1332_s1 + $0x88] sm:$0xff]  ;;  %v1060_v30 = vld [vmem:[%s1332_s1 + $0x80] sm:$0xff]  ;;  %v1042_v37 = vld [vmem:[%s1231_s10 + $0x18] sm:$0xf0] }
  0x16   : > { %606 = vmatpush.bf16.msra.mxu2 %v1065_v10  ;;  %v1069_v27 = vld [vmem:[%s1332_s1 + $0xc8] sm:$0xff]  ;;  %v1068_v31 = vld [vmem:[%s1332_s1 + $0xc0] sm:$0xff]  ;;  %v1079_v40 = vld [vmem:[%s1332_s1 + $0x118] sm:$0xff] }
  0x17   : > { %620 = vmatpush.bf16.msra.mxu3 %v1073_v11  ;;  %v869_v32 = vld [vmem:[%s1231_s10] sm:$0xf]  ;;  %v1039_v34 = vld [vmem:[%s1231_s10 + $0x4] sm:$0xf]  ;;  %v877_v36 = vld [vmem:[%s1231_s10 + $0x8] sm:$0xf] }
  0x18   : > { %579 = vmatpush.bf16.msra.mxu0 %v1048_v12  ;;  %v1040_v38 = vld [vmem:[%s1231_s10 + $0xc] sm:$0xf]  ;;  %v879_v39 = vld [vmem:[%s1231_s10 + $0x1c] sm:$0xf0]  ;;  %v870_v41 = vor.u32 %v1041_v33, %v869_v32  ;;  %v874_v42 = vor.u32 %v1039_v34, %v871_v35  ;;  %v878_v43 = vor.u32 %v1042_v37, %v877_v36  ;;  %v1078_v45 = vld [vmem:[%s1332_s1 + $0x110] sm:$0xff] }
  0x19   : > { %593 = vmatpush.bf16.msra.mxu1 %v1056_v13  ;;  %v882_v44 = vor.u32 %v1040_v38, %v879_v39  ;;  %v1077_v46 = vld [vmem:[%s1332_s1 + $0x108] sm:$0xff]  ;;  %v1076_v47 = vld [vmem:[%s1332_s1 + $0x100] sm:$0xff]  ;;  %v885_v48 = vld [vmem:[%s1231_s10 + $0x10] sm:$0xf] }
  0x1a   : > { %607 = vmatpush.bf16.msra.mxu2 %v1064_v14  ;;  %v1043_v49 = vld [vmem:[%s1231_s10 + $0x20] sm:$0xf0]  ;;  %v673_v51 = vld [vmem:[%s1333_s2 + $0x38] sm:$0xff]  ;;  %v672_v52 = vld [vmem:[%s1333_s2 + $0x30] sm:$0xff]  ;;  %s1038_s10 = sshll.u32 %s1339_s22, 4 }
  0x1b   : > { %621 = vmatpush.bf16.msra.mxu3 %v1072_v15  ;;  %v886_v50 = vor.u32 %v1043_v49, %v885_v48  ;;  %v671_v53 = vld [vmem:[%s1333_s2 + $0x28] sm:$0xff]  ;;  %v670_v55 = vld [vmem:[%s1333_s2 + $0x20] sm:$0xff]  ;;  %v669_v56 = vld [vmem:[%s1333_s2 + $0x18] sm:$0xff]  ;;  %s251_s18 = scalar_lea.vmem %s1337_s6, %s1038_s10 }
  0x1c   : > { %580 = vmatpush.bf16.msra.mxu0 %v1047_v16  ;;  %v668_v57 = vld [vmem:[%s1333_s2 + $0x10] sm:$0xff]  ;;  %v667_v59 = vld [vmem:[%s1333_s2 + $0x8] sm:$0xff]  ;;  %v666_v61 = vld [vmem:[%s1333_s2] sm:$0xff] }
  0x1d   : > { %594 = vmatpush.bf16.msra.mxu1 %v1055_v17  ;;  %v723_v0 = vld [vmem:[%s1334_s3 + $0x18] sm:$0xff]  ;;  %v722_v1 = vld [vmem:[%s1334_s3 + $0x10] sm:$0xff]  ;;  %v721_v4 = vld [vmem:[%s1334_s3 + $0x8] sm:$0xff] }
  0x1e   : > { %608 = vmatpush.bf16.msra.mxu2 %v1063_v18  ;;  %v720_v8 = vld [vmem:[%s1334_s3] sm:$0xff] }
  0x1f   : > { %622 = vmatpush.bf16.msra.mxu3 %v1071_v19 }
  0x20   : > { %581 = vmatpush.bf16.msra.mxu0 %v1046_v20 }
  0x21   : > { %595 = vmatpush.bf16.msra.mxu1 %v1054_v21 }
  0x22   : > { %609 = vmatpush.bf16.msra.mxu2 %v1062_v22 }
  0x23   : > { %623 = vmatpush.bf16.msra.mxu3 %v1070_v23 }
  0x24   : > { %582 = vmatpush.bf16.msra.mxu0 %v1045_v24 }
  0x25   : > { %596 = vmatpush.bf16.msra.mxu1 %v1053_v25 }
  0x26   : > { %610 = vmatpush.bf16.msra.mxu2 %v1061_v26 }
  0x27   : > { %624 = vmatpush.bf16.msra.mxu3 %v1069_v27 }
  0x28   : > { %583 = vmatpush.bf16.msra.mxu0 %v1044_v28 }
  0x29   : > { %597 = vmatpush.bf16.msra.mxu1 %v1052_v29 }
  0x2a   : > { %611 = vmatpush.bf16.msra.mxu2 %v1060_v30 }
  0x2b   : > { %625 = vmatpush.bf16.msra.mxu3 %v1068_v31  ;;  %584 = vmatmul.bf16.vlgmr.msra.gmra.mxu0 %v870_v41 }
  0x2c   : > { %636 = vmatpush.bf16.msrb.mxu0 %v1079_v40  ;;  %598 = vmatmul.bf16.vlgmr.msra.gmra.mxu1 %v874_v42 }
  0x2d   : > { %612 = vmatmul.bf16.vlgmr.msra.gmra.mxu2 %v878_v43  ;;  %685 = vmatpush.msrb.mxu1 %v673_v51 }
  0x2e   : > { %626 = vmatmul.bf16.vlgmr.msra.gmra.mxu3 %v882_v44  ;;  %708 = vmatpush.msrb.mxu2 %v673_v51 }
  0x2f   : > { %686 = vmatpush.msrb.mxu1 %v672_v52  ;;  %740 = vmatpush.msrb.mxu3 %v723_v0 }
  0x30   : > { %637 = vmatpush.bf16.msrb.mxu0 %v1078_v45  ;;  %709 = vmatpush.msrb.mxu2 %v672_v52  ;;  %v789_v52 = vld [vmem:[%s1335_s4] sm:$0x1] }
  0x31   : > { %687 = vmatpush.msrb.mxu1 %v671_v53  ;;  %741 = vmatpush.msrb.mxu3 %v722_v1 }
  0x32   : > { %710 = vmatpush.msrb.mxu2 %v671_v53 }
  0x33   : > { %688 = vmatpush.msrb.mxu1 %v670_v55  ;;  %742 = vmatpush.msrb.mxu3 %v721_v4 }
  0x34   : > { %638 = vmatpush.bf16.msrb.mxu0 %v1077_v46  ;;  %711 = vmatpush.msrb.mxu2 %v670_v55 }
  0x35   : > { %689 = vmatpush.msrb.mxu1 %v669_v56  ;;  %743 = vmatpush.msrb.mxu3 %v720_v8 }
  0x36   : > { %712 = vmatpush.msrb.mxu2 %v669_v56 }
  0x37   : > { %690 = vmatpush.msrb.mxu1 %v668_v57 }
  0x38   : > { %639 = vmatpush.bf16.msrb.mxu0 %v1076_v47  ;;  %713 = vmatpush.msrb.mxu2 %v668_v57 }
  0x39   : > { %691 = vmatpush.msrb.mxu1 %v667_v59 }
  0x3a   : > { %714 = vmatpush.msrb.mxu2 %v667_v59  ;;  %v1089_v59 = vld [vmem:[%s1336_s5] ss:$0 sm:$0xff] }
  0x3b   : > { %1031 = vmatmul.msk.bf16.vlgmr.msrb.gmra.mxu0 %vm572_vm0, %v886_v50  ;;  %692 = vmatpush.msrb.mxu1 %v666_v61 }
  0x3c   : > { %715 = vmatpush.msrb.mxu2 %v666_v61 }
  0x3d   : > { %764 = vmatpush.msra.mxu1 %v723_v0 }
  0x3f   : > { %765 = vmatpush.msra.mxu1 %v722_v1 }
  0x41   : > { %766 = vmatpush.msra.mxu1 %v721_v4 }
  0x43   : > { %767 = vmatpush.msra.mxu1 %v720_v8 }
  0xa8   : > { %v585_v54 = vpop.f32.mrf.mxu0 }
  0xa9   : > { %v599_v58 = vpop.f32.mrf.mxu1 }
  0xaa   : > { %v600_v2 = vadd.f32 %v599_v58, %v585_v54 }
  0xb0   : > { %v613_v60 = vpop.f32.mrf.mxu2  ;;  %v587_v62 = vpop.f32.mrf.mxu0 }
  0xb1   : > { %v627_v63 = vpop.f32.mrf.mxu3  ;;  %v601_v3 = vpop.f32.mrf.mxu1  ;;  %v614_v5 = vadd.f32 %v613_v60, %v600_v2 }
  0xb2   : > { %v602_v9 = vadd.f32 %v601_v3, %v587_v62 }
  0xb3   : > { %v628_v10 = vadd.f32 %v627_v63, %v614_v5 }
  0xb8   : > { %v615_v6 = vpop.f32.mrf.mxu2  ;;  %v641_v7 = vpop.f32.mrf.mxu0 }
  0xb9   : > { %v616_v11 = vadd.f32 %v615_v6, %v602_v9  ;;  %v642_v12 = vadd.f32 %v641_v7, %v628_v10  ;;  %v629_v13 = vpop.f32.mrf.mxu3 }
  0xbb   : > { %v630_v14 = vadd.f32 %v629_v13, %v616_v11  ;;  %v655_v16 = vmul.f32 %v642_v12, %v642_v12  ;;  %v646_v18 = vsel %vm572_vm0, %v642_v12, 0.0 }
  0xbd   : > { %v657_v22 = vsel %vm572_vm0, %v655_v16, 0.0 }
  0xc0   : > { %v643_v15 = vpop.f32.mrf.mxu0 }
  0xc1   : > { %v644_v17 = vadd.f32 %v643_v15, %v630_v14 }
  0xc3   : > { %v647_v19 = vsel %vm572_vm0, %v644_v17, 0.0  ;;  %v656_v20 = vmul.f32 %v644_v17, %v644_v17 }
  0xc4   : > { %v648_v21 = vadd.f32 %v647_v19, %v646_v18 }
  0xc5   : > { %v658_v23 = vsel %vm572_vm0, %v656_v20, 0.0 }
  0xc6   : > { %v649_v24 = vrot.slane %v648_v21, 4  ;;  %v659_v25 = vadd.f32 %v658_v23, %v657_v22 }
  0xc8   : > { %v650_v26 = vadd.f32 %v649_v24, %v648_v21  ;;  %v660_v27 = vrot.slane %v659_v25, 4 }
  0xca   : > { %v651_v28 = vrot.slane %v650_v26, 2  ;;  %v661_v29 = vadd.f32 %v660_v27, %v659_v25 }
  0xcc   : > { %v652_v30 = vadd.f32 %v651_v28, %v650_v26  ;;  %v662_v31 = vrot.slane %v661_v29, 2 }
  0xce   : > { %v653_v32 = vrot.slane %v652_v30, 1  ;;  %v663_v33 = vadd.f32 %v662_v31, %v661_v29 }
  0xd0   : > { %v654_v34 = vadd.f32 %v653_v32, %v652_v30  ;;  %v664_v35 = vrot.slane %v663_v33, 1 }
  0xd2   : > { %1032 = vmatmul.msk.f32.vlgmr.msrb.gmra.mxu1 %vm572_vm0, %v654_v34  ;;  %v665_v36 = vadd.f32 %v664_v35, %v663_v33 }
  0xd4   : > { %1033 = vmatmul.msk.f32.vlgmr.msrb.gmra.mxu2 %vm572_vm0, %v665_v36 }
 0x14f   : > { %v694_v37 = vpop.f32.mrf.mxu1 }
 0x150   : > { %1034 = vmatmul.msk.f32.vlgmr.msrb.gmra.mxu3 %vm724_vm1, %v694_v37 }
 0x157   : > { %v717_v38 = vpop.f32.mrf.mxu2 }
 0x158   : > { %1035 = vmatmul.msk.f32.vlgmr.msra.gmra.mxu1 %vm724_vm1, %v717_v38 }
 0x1d3   : > { %v745_v39 = vpop.f32.mrf.mxu3 }
 0x1d4   : > { %v748_v40 = vmul.f32 0.03125, %v745_v39 }
 0x1d5   : > { %v769_v41 = vpop.f32.mrf.mxu1 }
 0x1d6   : > { %v773_v42 = vmul.f32 %v748_v40, %v748_v40  ;;  %v772_v43 = vmul.f32 0.03125, %v769_v41  ;;  %v786_v53 = vperm.slane %v748_v40, 0 }
 0x1d8   : > { %v774_v44 = vsub.f32 %v772_v43, %v773_v42  ;;  %v787_v56 = vsub.f32 %v642_v12, %v786_v53  ;;  %v788_v57 = vsub.f32 %v644_v17, %v786_v53 }
 0x1da   : > { %v775_v45 = vadd.f32 1e-06, %v774_v44 }
 0x1dc   : > { %1090 = vrsqrt.f32 %v775_v45  ;;  %vm782_vm3 = vweird.f32 %v775_v45 }
 0x1e2   : > { %v1091_v46 = vpop.eup %1090 }
 0x1e3   : > { %v777_v47 = vmul.f32 %v1091_v46, %v775_v45  ;;  %vm783_vm2 = vweird.f32 %v1091_v46 }
 0x1e4   : > { %vm784_vm4 = vmor %vm782_vm3, %vm783_vm2 }
 0x1e5   : > { %v778_v48 = vmul.f32 %v1091_v46, %v777_v47 }
 0x1e7   : > { %v779_v49 = vmul.f32 0.5, %v778_v48 }
 0x1e9   : > { %v780_v50 = vsub.f32 1.5, %v779_v49 }
 0x1eb   : > { %v781_v51 = vmul.f32 %v1091_v46, %v780_v50 }
 0x1ed   : > { %v785_v54 = vsel %vm784_vm4, %v1091_v46, %v781_v51 }
 0x1ee   : > { %v790_v55 = vmul.f32 %v789_v52, %v785_v54 }
 0x1f0   : > { %v791_v58 = vperm.slane %v790_v55, 0 }
 0x1f2   : > { %v792_v60 = vmul.f32 %v791_v58, %v787_v56  ;;  %v793_v61 = vmul.f32 %v791_v58, %v788_v57 }
 0x1f4   : > { %v798_v62 = vadd.f32 %v1089_v59, %v792_v60  ;;  %v799_v63 = vadd.f32 %v1089_v59, %v793_v61 }
 0x1f6   : > { %v800_v0 = vmax.f32 %v798_v62, 0.0  ;;  %v801_v1 = vmax.f32 %v799_v63, 0.0 }
 0x1f8   : > { %802 = vst.msk [vmem:[%s251_s18] sm:$0xff] %vm572_vm0, %v800_v0 }
 0x1f9   : > { %803 = vst.msk [vmem:[%s251_s18 + $0x8] sm:$0xff] %vm572_vm0, %v801_v1 }
 0x1fa PF: > { %s16_s21 = sadd.s32 1, %s1098_s21  }
 0x1fb   : > { %p13_p4 = scmp.ge.s32.totalorder %s16_s21, 4  }
 0x1fd   :  { %15 = sbr.rel (!%p13_p4) target bundleno = 1 (0x1), region = 74 }

// kernel: resnetv2_forward.20
= control target key start
LH: loop header
LB: loop body
LE: loop exit
PB: predicated region body
PF: predicated region fallthrough
CT: control target
= control target key end

     0   :  { %s622_s15 = smov 0   ;;  %s773_s0 = inlined_call_operand.vmem [shape: bf16[2,16,128], index: 0, kind: input, shape index: {}]   ;;  %s774_s1 = inlined_call_operand.vmem [shape: bf16[128,256], index: 1, kind: input, shape index: {}]   ;;  %s775_s2 = inlined_call_operand.vmem [shape: f32[1,256], index: 2, kind: input, shape index: {}]   ;;  %s776_s3 = inlined_call_operand.vmem [shape: f32[1,256], index: 3, kind: input, shape index: {}]   ;;  %s777_s4 = inlined_call_operand.vmem [shape: f32[2,16,256], index: 4, kind: output, shape index: {}]  }
   0x1 LB: > { %s479_s16 = sadd.s32 4294967295, %s595_s15   ;;  %p483_p0 = scmp.ge.s32.totalorder %s595_s15, 1  ;;  %s595_s15 = sphi %s622_s15, %s14_s15  }
   0x2   : > { %p162_p1 = scmp.lt.s32.totalorder %s595_s15, 3 }
   0x4   : > { %p163_p2 = pnand %p483_p0, %p162_p1 }
   0x5   : > { %p188_p3 = scmp.lt.s32.totalorder (!%p163_p2), %s479_s16, 1 }
   0x6   : > { %166 = sbr.rel (%p163_p2) target bundleno = 231 (0xe7), region = 36 }
   0xb   : > { %v550_v0 = vld [vmem:[%s774_s1 + $0x70] sm:$0xf]  ;;  %v576_v1 = vld [vmem:[%s774_s1 + $0x74] sm:$0xf0]  ;;  %v575_v2 = vld [vmem:[%s774_s1 + $0x74] sm:$0xf] }
   0xc   : > { %v551_v3 = vor.u32 %v576_v1, %v550_v0  ;;  %v552_v4 = vld [vmem:[%s774_s1 + $0x78] sm:$0xf0]  ;;  %v542_v5 = vld [vmem:[%s774_s1 + $0x60] sm:$0xf]  ;;  %v574_v6 = vld [vmem:[%s774_s1 + $0x64] sm:$0xf0] }
   0xd   : > { %v555_v7 = vor.u32 %v575_v2, %v552_v4  ;;  %v573_v8 = vld [vmem:[%s774_s1 + $0x64] sm:$0xf]  ;;  %v544_v9 = vld [vmem:[%s774_s1 + $0x68] sm:$0xf0]  ;;  %v543_v10 = vor.u32 %v574_v6, %v542_v5  ;;  %v534_v12 = vld [vmem:[%s774_s1 + $0x50] sm:$0xf] }
   0xe   : > { %302 = vmatpush.bf16.msra.mxu0 %v551_v3  ;;  %v547_v11 = vor.u32 %v573_v8, %v544_v9  ;;  %v572_v13 = vld [vmem:[%s774_s1 + $0x54] sm:$0xf0]  ;;  %v571_v14 = vld [vmem:[%s774_s1 + $0x54] sm:$0xf]  ;;  %v536_v15 = vld [vmem:[%s774_s1 + $0x58] sm:$0xf0] }
   0xf   : > { %316 = vmatpush.bf16.msra.mxu1 %v555_v7  ;;  %v535_v16 = vor.u32 %v572_v13, %v534_v12  ;;  %v539_v17 = vor.u32 %v571_v14, %v536_v15  ;;  %v526_v18 = vld [vmem:[%s774_s1 + $0x40] sm:$0xf]  ;;  %v570_v19 = vld [vmem:[%s774_s1 + $0x44] sm:$0xf0]  ;;  %v569_v20 = vld [vmem:[%s774_s1 + $0x44] sm:$0xf] }
  0x10   : > { %v528_v21 = vld [vmem:[%s774_s1 + $0x48] sm:$0xf0]  ;;  %v527_v22 = vor.u32 %v570_v19, %v526_v18  ;;  %v518_v24 = vld [vmem:[%s774_s1 + $0x30] sm:$0xf]  ;;  %v568_v25 = vld [vmem:[%s774_s1 + $0x34] sm:$0xf0] }
  0x11   : > { %v531_v23 = vor.u32 %v569_v20, %v528_v21  ;;  %v567_v26 = vld [vmem:[%s774_s1 + $0x34] sm:$0xf]  ;;  %v520_v27 = vld [vmem:[%s774_s1 + $0x38] sm:$0xf0]  ;;  %v519_v28 = vor.u32 %v568_v25, %v518_v24  ;;  %v510_v30 = vld [vmem:[%s774_s1 + $0x20] sm:$0xf] }
  0x12   : > { %303 = vmatpush.bf16.msra.mxu0 %v543_v10  ;;  %v523_v29 = vor.u32 %v567_v26, %v520_v27  ;;  %v566_v31 = vld [vmem:[%s774_s1 + $0x24] sm:$0xf0]  ;;  %v565_v32 = vld [vmem:[%s774_s1 + $0x24] sm:$0xf]  ;;  %v512_v33 = vld [vmem:[%s774_s1 + $0x28] sm:$0xf0] }
  0x13   : > { %317 = vmatpush.bf16.msra.mxu1 %v547_v11  ;;  %v511_v34 = vor.u32 %v566_v31, %v510_v30  ;;  %v515_v35 = vor.u32 %v565_v32, %v512_v33  ;;  %v502_v36 = vld [vmem:[%s774_s1 + $0x10] sm:$0xf]  ;;  %v564_v37 = vld [vmem:[%s774_s1 + $0x14] sm:$0xf0]  ;;  %s779_s16 = smov (!%p188_p3, %s479_s16), 1 }
  0x14   : > { %v563_v38 = vld [vmem:[%s774_s1 + $0x14] sm:$0xf]  ;;  %v504_v39 = vld [vmem:[%s774_s1 + $0x18] sm:$0xf0]  ;;  %v503_v40 = vor.u32 %v564_v37, %v502_v36  ;;  %v494_v42 = vld [vmem:[%s774_s1] sm:$0xf] }
  0x15   : > { %v507_v41 = vor.u32 %v563_v38, %v504_v39  ;;  %v562_v43 = vld [vmem:[%s774_s1 + $0x4] sm:$0xf0]  ;;  %s558_s29 = sshll.u32 %s779_s16, 3  ;;  %v561_v44 = vld [vmem:[%s774_s1 + $0x4] sm:$0xf]  ;;  %s559_s17 = sshll.u32 %s779_s16, 5 }
  0x16   : > { %304 = vmatpush.bf16.msra.mxu0 %v535_v16  ;;  %v496_v45 = vld [vmem:[%s774_s1 + $0x8] sm:$0xf0]  ;;  %v495_v46 = vor.u32 %v562_v43, %v494_v42  ;;  %s192_s10 = scalar_lea.vmem %s773_s0, %s558_s29  ;;  %v396_v38 = vld [vmem:[%s775_s2] sm:$0x3]  ;;  %s197_s20 = scalar_lea.vmem %s777_s4, %s559_s17 }
  0x17   : > { %318 = vmatpush.bf16.msra.mxu1 %v539_v17  ;;  %v499_v47 = vor.u32 %v561_v44, %v496_v45  ;;  %v560_v48 = vld [vmem:[%s192_s10] sm:$0xff]  ;;  %v399_v44 = vperm.slane %v396_v38, 1 }
  0x1a   : > { %305 = vmatpush.bf16.msra.mxu0 %v527_v22 }
  0x1b   : > { %319 = vmatpush.bf16.msra.mxu1 %v531_v23 }
  0x1e   : > { %306 = vmatpush.bf16.msra.mxu0 %v519_v28 }
  0x1f   : > { %320 = vmatpush.bf16.msra.mxu1 %v523_v29 }
  0x22   : > { %307 = vmatpush.bf16.msra.mxu0 %v511_v34 }
  0x23   : > { %321 = vmatpush.bf16.msra.mxu1 %v515_v35 }
  0x26   : > { %308 = vmatpush.bf16.msra.mxu0 %v503_v40 }
  0x27   : > { %322 = vmatpush.bf16.msra.mxu1 %v507_v41  ;;  %v398_v41 = vperm.slane %v396_v38, 0 }
  0x2a   : > { %309 = vmatpush.bf16.msra.mxu0 %v495_v46 }
  0x2b   : > { %323 = vmatpush.bf16.msra.mxu1 %v499_v47  ;;  %v410_v47 = vld [vmem:[%s776_s3] sm:$0x3] }
  0x2d   : > { %310 = vmatmul.bf16.vlgmr.msra.gmra.mxu0 %v560_v48 }
  0x2e   : > { %324 = vmatmul.bf16.vlgmr.msra.gmra.mxu1 %v560_v48 }
  0xaa   : > { %v736_v49 = vpop.f32.mrf.mxu0 }
  0xab   : > { %v738_v50 = vpop.f32.mrf.mxu1  ;;  %v344_v52 = vmul.f32 %v736_v49, %v736_v49 }
  0xac   : > { %v345_v56 = vmul.f32 %v738_v50, %v738_v50 }
  0xb2   : > { %v740_v51 = vpop.f32.mrf.mxu0 }
  0xb3   : > { %v330_v53 = vadd.f32 %v740_v51, %v736_v49  ;;  %v346_v54 = vmul.f32 %v740_v51, %v740_v51  ;;  %v748_v55 = vpop.f32.mrf.mxu1 }
  0xb4   : > { %v337_v57 = vadd.f32 %v748_v55, %v738_v50  ;;  %v347_v58 = vmul.f32 %v748_v55, %v748_v55 }
  0xb5   : > { %v331_v59 = vrot.slane %v330_v53, 4  ;;  %v348_v60 = vadd.f32 %v346_v54, %v344_v52 }
  0xb6   : > { %v338_v61 = vrot.slane %v337_v57, 4  ;;  %v355_v62 = vadd.f32 %v347_v58, %v345_v56  ;;  %v412_v58 = vperm.slane %v410_v47, 0 }
  0xb7   : > { %v332_v63 = vadd.f32 %v331_v59, %v330_v53  ;;  %v349_v0 = vrot.slane %v348_v60, 4 }
  0xb8   : > { %v339_v1 = vadd.f32 %v338_v61, %v337_v57  ;;  %v356_v2 = vrot.slane %v355_v62, 4 }
  0xb9   : > { %v333_v3 = vrot.slane %v332_v63, 2  ;;  %v350_v4 = vadd.f32 %v349_v0, %v348_v60 }
  0xba   : > { %v340_v5 = vrot.slane %v339_v1, 2  ;;  %v357_v6 = vadd.f32 %v356_v2, %v355_v62  ;;  %v413_v62 = vperm.slane %v410_v47, 1 }
  0xbb   : > { %v334_v7 = vadd.f32 %v333_v3, %v332_v63  ;;  %v351_v8 = vrot.slane %v350_v4, 2 }
  0xbc   : > { %v341_v9 = vadd.f32 %v340_v5, %v339_v1  ;;  %v358_v10 = vrot.slane %v357_v6, 2 }
  0xbd   : > { %v335_v11 = vrot.slane %v334_v7, 1  ;;  %v352_v12 = vadd.f32 %v351_v8, %v350_v4 }
  0xbe   : > { %v342_v13 = vrot.slane %v341_v9, 1  ;;  %v359_v14 = vadd.f32 %v358_v10, %v357_v6 }
  0xbf   : > { %v336_v15 = vadd.f32 %v335_v11, %v334_v7  ;;  %v353_v16 = vrot.slane %v352_v12, 1 }
  0xc0   : > { %v343_v17 = vadd.f32 %v342_v13, %v341_v9  ;;  %v360_v18 = vrot.slane %v359_v14, 1 }
  0xc1   : > { %v354_v19 = vadd.f32 %v353_v16, %v352_v12  ;;  %v362_v20 = vmul.f32 0.0625, %v336_v15 }
  0xc2   : > { %v361_v21 = vadd.f32 %v360_v18, %v359_v14  ;;  %v363_v22 = vmul.f32 0.0625, %v343_v17 }
  0xc3   : > { %v364_v23 = vmul.f32 0.0625, %v354_v19  ;;  %v366_v24 = vmul.f32 %v362_v20, %v362_v20  ;;  %v392_v54 = vsub.f32 %v736_v49, %v362_v20  ;;  %v394_v56 = vsub.f32 %v740_v51, %v362_v20 }
  0xc4   : > { %v365_v25 = vmul.f32 0.0625, %v361_v21  ;;  %v367_v26 = vmul.f32 %v363_v22, %v363_v22  ;;  %v393_v59 = vsub.f32 %v738_v50, %v363_v22  ;;  %v395_v60 = vsub.f32 %v748_v55, %v363_v22 }
  0xc5   : > { %v368_v27 = vsub.f32 %v364_v23, %v366_v24 }
  0xc6   : > { %v369_v28 = vsub.f32 %v365_v25, %v367_v26 }
  0xc7   : > { %v370_v29 = vadd.f32 1e-05, %v368_v27 }
  0xc8   : > { %v371_v30 = vadd.f32 1e-05, %v369_v28 }
  0xc9   : > { %585 = vrsqrt.f32 %v370_v29  ;;  %vm378_vm2 = vweird.f32 %v370_v29 }
  0xca   : > { %587 = vrsqrt.f32 %v371_v30  ;;  %vm388_vm4 = vweird.f32 %v371_v30 }
  0xcf   : > { %v586_v31 = vpop.eup %585 }
  0xd0   : > { %v588_v32 = vpop.eup %587  ;;  %v373_v33 = vmul.f32 %v586_v31, %v370_v29  ;;  %vm379_vm0 = vweird.f32 %v586_v31 }
  0xd1   : > { %v383_v34 = vmul.f32 %v588_v32, %v371_v30  ;;  %vm389_vm1 = vweird.f32 %v588_v32  ;;  %vm380_vm3 = vmor %vm378_vm2, %vm379_vm0 }
  0xd2   : > { %v374_v35 = vmul.f32 %v586_v31, %v373_v33  ;;  %vm390_vm5 = vmor %vm388_vm4, %vm389_vm1 }
  0xd3   : > { %v384_v36 = vmul.f32 %v588_v32, %v383_v34 }
  0xd4   : > { %v375_v37 = vmul.f32 0.5, %v374_v35 }
  0xd5   : > { %v385_v39 = vmul.f32 0.5, %v384_v36 }
  0xd6   : > { %v376_v40 = vsub.f32 1.5, %v375_v37 }
  0xd7   : > { %v386_v42 = vsub.f32 1.5, %v385_v39 }
  0xd8   : > { %v377_v43 = vmul.f32 %v586_v31, %v376_v40 }
  0xd9   : > { %v387_v45 = vmul.f32 %v588_v32, %v386_v42 }
  0xda   : > { %v381_v46 = vsel %vm380_vm3, %v586_v31, %v377_v43 }
  0xdb   : > { %v402_v48 = vmul.f32 %v398_v41, %v381_v46  ;;  %v391_v52 = vsel %vm390_vm5, %v588_v32, %v387_v45 }
  0xdc   : > { %v403_v53 = vmul.f32 %v399_v44, %v391_v52 }
  0xdd   : > { %v404_v57 = vperm.slane %v402_v48, 0 }
  0xde   : > { %v405_v61 = vperm.slane %v403_v53, 0 }
  0xdf   : > { %v406_v63 = vmul.f32 %v404_v57, %v392_v54  ;;  %v408_v0 = vmul.f32 %v404_v57, %v394_v56 }
  0xe0   : > { %v407_v1 = vmul.f32 %v405_v61, %v393_v59  ;;  %v409_v2 = vmul.f32 %v405_v61, %v395_v60 }
  0xe1   : > { %v416_v3 = vadd.f32 %v412_v58, %v406_v63  ;;  %v418_v49 = vadd.f32 %v412_v58, %v408_v0 }
  0xe2   : > { %v417_v4 = vadd.f32 %v413_v62, %v407_v1  ;;  %v419_v51 = vadd.f32 %v413_v62, %v409_v2 }
  0xe3   : > { %420 = vst [vmem:[%s197_s20] sm:$0xff] %v416_v3 }
  0xe4   : > { %422 = vst [vmem:[%s197_s20 + $0x10] sm:$0xff] %v418_v49 }
  0xe5   : > { %421 = vst [vmem:[%s197_s20 + $0x8] sm:$0xff] %v417_v4 }
  0xe6   : > { %423 = vst [vmem:[%s197_s20 + $0x18] sm:$0xff] %v419_v51 }
  0xe7 PF: > { %s14_s15 = sadd.s32 1, %s595_s15  }
  0xe8   : > { %p11_p4 = scmp.ge.s32.totalorder %s14_s15, 4  }
  0xea   :  { %13 = sbr.rel (!%p11_p4) target bundleno = 1 (0x1), region = 66 }

// kernel: resnetv2_forward.23
= control target key start
LH: loop header
LB: loop body
LE: loop exit
PB: predicated region body
PF: predicated region fallthrough
CT: control target
= control target key end

     0   :  { %s896_s24 = smov 0   ;;  %s1126_s0 = inlined_call_operand.vmem [shape: bf16[2,16,64], index: 0, kind: input, shape index: {}]   ;;  %s1127_s1 = inlined_call_operand.vmem [shape: bf16[64,256], index: 1, kind: input, shape index: {}]   ;;  %s1128_s2 = inlined_call_operand.vmem [shape: f32[2,16,256], index: 2, kind: input, shape index: {}]   ;;  %s1129_s3 = inlined_call_operand.vmem [shape: f32[256,32], index: 3, kind: input, shape index: {}]   ;;  %s1130_s4 = inlined_call_operand.vmem [shape: f32[32,256], index: 4, kind: input, shape index: {}]   ;;  %s1131_s5 = inlined_call_operand.vmem [shape: f32[1,256], index: 5, kind: input, shape index: {}]   ;;  %s1132_s6 = inlined_call_operand.vmem [shape: f32[1,256], index: 6, kind: input, shape index: {}]   ;;  %s1133_s7 = inlined_call_operand.vmem [shape: f32[2,16,256], index: 7, kind: output, shape index: {}]  }
   0x1 LB: > { %s769_s25 = sadd.s32 4294967295, %s854_s24   ;;  %p773_p0 = scmp.ge.s32.totalorder %s854_s24, 1  ;;  %s854_s24 = sphi %s896_s24, %s17_s24  }
   0x2   : > { %p247_p1 = scmp.lt.s32.totalorder %s854_s24, 3 }
   0x4   : > { %p248_p2 = pnand %p773_p0, %p247_p1 }
   0x5   : > { %p284_p3 = scmp.lt.s32.totalorder (!%p248_p2), %s769_s25, 1 }
   0x6   : > { %251 = sbr.rel (%p248_p2) target bundleno = 492 (0x1ec), region = 48 }
   0xb   : > { %v810_v0 = vld [vmem:[%s1127_s1 + $0x30] sm:$0xf]  ;;  %v835_v1 = vld [vmem:[%s1127_s1 + $0x34] sm:$0xf0]  ;;  %v834_v2 = vld [vmem:[%s1127_s1 + $0x34] sm:$0xf] }
   0xc   : > { %v811_v3 = vor.u32 %v835_v1, %v810_v0  ;;  %v812_v4 = vld [vmem:[%s1127_s1 + $0x38] sm:$0xf0]  ;;  %v802_v5 = vld [vmem:[%s1127_s1 + $0x20] sm:$0xf]  ;;  %v833_v6 = vld [vmem:[%s1127_s1 + $0x24] sm:$0xf0] }
   0xd   : > { %v815_v7 = vor.u32 %v834_v2, %v812_v4  ;;  %v832_v8 = vld [vmem:[%s1127_s1 + $0x24] sm:$0xf]  ;;  %v804_v9 = vld [vmem:[%s1127_s1 + $0x28] sm:$0xf0]  ;;  %v803_v10 = vor.u32 %v833_v6, %v802_v5  ;;  %v794_v12 = vld [vmem:[%s1127_s1 + $0x10] sm:$0xf] }
   0xe   : > { %363 = vmatpush.bf16.msra.mxu0 %v811_v3  ;;  %v807_v11 = vor.u32 %v832_v8, %v804_v9  ;;  %v831_v13 = vld [vmem:[%s1127_s1 + $0x14] sm:$0xf0]  ;;  %v830_v14 = vld [vmem:[%s1127_s1 + $0x14] sm:$0xf]  ;;  %v796_v15 = vld [vmem:[%s1127_s1 + $0x18] sm:$0xf0] }
   0xf   : > { %377 = vmatpush.bf16.msra.mxu1 %v815_v7  ;;  %v434_v16 = vld [vmem:[%s1129_s3 + $0x78] sm:$0xff]  ;;  %v433_v18 = vld [vmem:[%s1129_s3 + $0x70] sm:$0xff]  ;;  %v795_v20 = vor.u32 %v831_v13, %v794_v12  ;;  %s1135_s25 = smov (!%p284_p3, %s769_s25), 1  ;;  %v432_v21 = vld [vmem:[%s1129_s3 + $0x68] sm:$0xff]  ;;  %v799_v22 = vor.u32 %v830_v14, %v796_v15  ;;  %vm355_vm0 = vcmask 523264   ;;  %vm539_vm1 = vcmask 261120  }
  0x10   : > { %v450_v17 = vld [vmem:[%s1129_s3 + $0xf8] sm:$0xff]  ;;  %451 = vmatpush.msra.mxu2 %v434_v16  ;;  %v449_v19 = vld [vmem:[%s1129_s3 + $0xf0] sm:$0xff]  ;;  %v786_v23 = vld [vmem:[%s1127_s1] sm:$0xf]  ;;  %s824_s28 = sshll.u32 %s1135_s25, 3  ;;  %s825_s16 = sshll.u32 %s1135_s25, 5 }
  0x11   : > { %471 = vmatpush.msra.mxu3 %v450_v17  ;;  %v829_v24 = vld [vmem:[%s1127_s1 + $0x4] sm:$0xf0]  ;;  %v828_v26 = vld [vmem:[%s1127_s1 + $0x4] sm:$0xf]  ;;  %v788_v27 = vld [vmem:[%s1127_s1 + $0x8] sm:$0xf0]  ;;  %s288_s12 = scalar_lea.vmem %s1126_s0, %s824_s28  ;;  %s293_s21 = scalar_lea.vmem %s1128_s2, %s825_s16 }
  0x12   : > { %364 = vmatpush.bf16.msra.mxu0 %v803_v10  ;;  %452 = vmatpush.msra.mxu2 %v433_v18  ;;  %v448_v25 = vld [vmem:[%s1129_s3 + $0xe8] sm:$0xff]  ;;  %v431_v28 = vld [vmem:[%s1129_s3 + $0x60] sm:$0xff]  ;;  %v787_v30 = vor.u32 %v829_v24, %v786_v23  ;;  %v791_v31 = vor.u32 %v828_v26, %v788_v27  ;;  %v430_v33 = vld [vmem:[%s1129_s3 + $0x58] sm:$0xff]  ;;  %s298_s26 = scalar_lea.vmem %s1133_s7, %s825_s16 }
  0x13   : > { %378 = vmatpush.bf16.msra.mxu1 %v807_v11  ;;  %472 = vmatpush.msra.mxu3 %v449_v19  ;;  %v447_v29 = vld [vmem:[%s1129_s3 + $0xe0] sm:$0xff]  ;;  %v446_v34 = vld [vmem:[%s1129_s3 + $0xd8] sm:$0xff]  ;;  %v429_v35 = vld [vmem:[%s1129_s3 + $0x50] sm:$0xff] }
  0x14   : > { %453 = vmatpush.msra.mxu2 %v432_v21  ;;  %v827_v32 = vld [vmem:[%s288_s12] sm:$0xff]  ;;  %v445_v36 = vld [vmem:[%s1129_s3 + $0xd0] sm:$0xff]  ;;  %v428_v37 = vld [vmem:[%s1129_s3 + $0x48] sm:$0xff] }
  0x15   : > { %473 = vmatpush.msra.mxu3 %v448_v25  ;;  %v444_v38 = vld [vmem:[%s1129_s3 + $0xc8] sm:$0xff]  ;;  %v427_v39 = vld [vmem:[%s1129_s3 + $0x40] sm:$0xff]  ;;  %v426_v41 = vld [vmem:[%s1129_s3 + $0x38] sm:$0xff] }
  0x16   : > { %365 = vmatpush.bf16.msra.mxu0 %v795_v20  ;;  %454 = vmatpush.msra.mxu2 %v431_v28  ;;  %v443_v40 = vld [vmem:[%s1129_s3 + $0xc0] sm:$0xff]  ;;  %v442_v42 = vld [vmem:[%s1129_s3 + $0xb8] sm:$0xff]  ;;  %v425_v43 = vld [vmem:[%s1129_s3 + $0x30] sm:$0xff] }
  0x17   : > { %379 = vmatpush.bf16.msra.mxu1 %v799_v22  ;;  %474 = vmatpush.msra.mxu3 %v447_v29  ;;  %v441_v44 = vld [vmem:[%s1129_s3 + $0xb0] sm:$0xff]  ;;  %v424_v45 = vld [vmem:[%s1129_s3 + $0x28] sm:$0xff]  ;;  %v423_v47 = vld [vmem:[%s1129_s3 + $0x20] sm:$0xff] }
  0x18   : > { %455 = vmatpush.msra.mxu2 %v430_v33  ;;  %v440_v46 = vld [vmem:[%s1129_s3 + $0xa8] sm:$0xff]  ;;  %v439_v48 = vld [vmem:[%s1129_s3 + $0xa0] sm:$0xff]  ;;  %v422_v49 = vld [vmem:[%s1129_s3 + $0x18] sm:$0xff] }
  0x19   : > { %475 = vmatpush.msra.mxu3 %v446_v34  ;;  %v438_v50 = vld [vmem:[%s1129_s3 + $0x98] sm:$0xff]  ;;  %v421_v51 = vld [vmem:[%s1129_s3 + $0x10] sm:$0xff]  ;;  %v420_v53 = vld [vmem:[%s1129_s3 + $0x8] sm:$0xff] }
  0x1a   : > { %366 = vmatpush.bf16.msra.mxu0 %v787_v30  ;;  %456 = vmatpush.msra.mxu2 %v429_v35  ;;  %v437_v52 = vld [vmem:[%s1129_s3 + $0x90] sm:$0xff]  ;;  %v436_v54 = vld [vmem:[%s1129_s3 + $0x88] sm:$0xff]  ;;  %v419_v55 = vld [vmem:[%s1129_s3] sm:$0xff] }
  0x1b   : > { %380 = vmatpush.bf16.msra.mxu1 %v791_v31  ;;  %476 = vmatpush.msra.mxu3 %v445_v36  ;;  %v435_v56 = vld [vmem:[%s1129_s3 + $0x80] sm:$0xff]  ;;  %v537_v57 = vld [vmem:[%s1130_s4 + $0x30] sm:$0xff]  ;;  %v538_v58 = vld [vmem:[%s1130_s4 + $0x38] sm:$0xff] }
  0x1c   : > { %457 = vmatpush.msra.mxu2 %v428_v37  ;;  %v535_v31 = vld [vmem:[%s1130_s4 + $0x20] sm:$0xff] }
  0x1d   : > { %816 = vmatmul.msk.bf16.vlgmr.msra.gmra.mxu0 %vm355_vm0, %v827_v32  ;;  %477 = vmatpush.msra.mxu3 %v444_v38 }
  0x1e   : > { %491 = vmatpush.msrb.mxu0 %v434_v16  ;;  %817 = vmatmul.msk.bf16.vlgmr.msra.gmra.mxu1 %vm355_vm0, %v827_v32  ;;  %v536_v32 = vld [vmem:[%s1130_s4 + $0x28] sm:$0xff] }
  0x1f   : > { %511 = vmatpush.msrb.mxu1 %v450_v17  ;;  %458 = vmatpush.msra.mxu2 %v427_v39 }
  0x20   : > { %492 = vmatpush.msrb.mxu0 %v433_v18  ;;  %478 = vmatpush.msra.mxu3 %v443_v40 }
  0x21   : > { %512 = vmatpush.msrb.mxu1 %v449_v19  ;;  %459 = vmatpush.msra.mxu2 %v426_v41 }
  0x22   : > { %493 = vmatpush.msrb.mxu0 %v432_v21  ;;  %479 = vmatpush.msra.mxu3 %v442_v42 }
  0x23   : > { %513 = vmatpush.msrb.mxu1 %v448_v25  ;;  %460 = vmatpush.msra.mxu2 %v425_v43 }
  0x24   : > { %494 = vmatpush.msrb.mxu0 %v431_v28  ;;  %480 = vmatpush.msra.mxu3 %v441_v44 }
  0x25   : > { %514 = vmatpush.msrb.mxu1 %v447_v29  ;;  %461 = vmatpush.msra.mxu2 %v424_v45 }
  0x26   : > { %495 = vmatpush.msrb.mxu0 %v430_v33  ;;  %481 = vmatpush.msra.mxu3 %v440_v46  ;;  %v533_v33 = vld [vmem:[%s1130_s4 + $0x10] sm:$0xff] }
  0x27   : > { %515 = vmatpush.msrb.mxu1 %v446_v34  ;;  %462 = vmatpush.msra.mxu2 %v423_v47  ;;  %v534_v34 = vld [vmem:[%s1130_s4 + $0x18] sm:$0xff] }
  0x28   : > { %496 = vmatpush.msrb.mxu0 %v429_v35  ;;  %482 = vmatpush.msra.mxu3 %v439_v48  ;;  %v531_v35 = vld [vmem:[%s1130_s4] sm:$0xff] }
  0x29   : > { %516 = vmatpush.msrb.mxu1 %v445_v36  ;;  %463 = vmatpush.msra.mxu2 %v422_v49  ;;  %v532_v36 = vld [vmem:[%s1130_s4 + $0x8] sm:$0xff] }
  0x2a   : > { %497 = vmatpush.msrb.mxu0 %v428_v37  ;;  %483 = vmatpush.msra.mxu3 %v438_v50 }
  0x2b   : > { %517 = vmatpush.msrb.mxu1 %v444_v38  ;;  %464 = vmatpush.msra.mxu2 %v421_v51 }
  0x2c   : > { %498 = vmatpush.msrb.mxu0 %v427_v39  ;;  %484 = vmatpush.msra.mxu3 %v437_v52 }
  0x2d   : > { %518 = vmatpush.msrb.mxu1 %v443_v40  ;;  %465 = vmatpush.msra.mxu2 %v420_v53 }
  0x2e   : > { %499 = vmatpush.msrb.mxu0 %v426_v41  ;;  %485 = vmatpush.msra.mxu3 %v436_v54 }
  0x2f   : > { %519 = vmatpush.msrb.mxu1 %v442_v42  ;;  %466 = vmatpush.msra.mxu2 %v419_v55 }
  0x30   : > { %500 = vmatpush.msrb.mxu0 %v425_v43  ;;  %486 = vmatpush.msra.mxu3 %v435_v56 }
  0x31   : > { %520 = vmatpush.msrb.mxu1 %v441_v44  ;;  %555 = vmatpush.msrb.mxu2 %v537_v57 }
  0x32   : > { %501 = vmatpush.msrb.mxu0 %v424_v45  ;;  %575 = vmatpush.msrb.mxu3 %v538_v58 }
  0x33   : > { %521 = vmatpush.msrb.mxu1 %v440_v46  ;;  %556 = vmatpush.msrb.mxu2 %v535_v31 }
  0x34   : > { %502 = vmatpush.msrb.mxu0 %v423_v47  ;;  %576 = vmatpush.msrb.mxu3 %v536_v32 }
  0x35   : > { %522 = vmatpush.msrb.mxu1 %v439_v48  ;;  %557 = vmatpush.msrb.mxu2 %v533_v33 }
  0x36   : > { %503 = vmatpush.msrb.mxu0 %v422_v49  ;;  %577 = vmatpush.msrb.mxu3 %v534_v34 }
  0x37   : > { %523 = vmatpush.msrb.mxu1 %v438_v50  ;;  %558 = vmatpush.msrb.mxu2 %v531_v35 }
  0x38   : > { %504 = vmatpush.msrb.mxu0 %v421_v51  ;;  %578 = vmatpush.msrb.mxu3 %v532_v36 }
  0x39   : > { %524 = vmatpush.msrb.mxu1 %v437_v52 }
  0x3a   : > { %505 = vmatpush.msrb.mxu0 %v420_v53 }
  0x3b   : > { %525 = vmatpush.msrb.mxu1 %v436_v54 }
  0x3c   : > { %506 = vmatpush.msrb.mxu0 %v419_v55 }
  0x3d   : > { %526 = vmatpush.msrb.mxu1 %v435_v56 }
  0x9a   : > { %v1064_v59 = vpop.f32.mrf.mxu0 }
  0x9b   : > { %v1066_v60 = vpop.f32.mrf.mxu1  ;;  %v401_v62 = vmul.f32 %v1064_v59, %v1064_v59 }
  0x9c   : > { %v402_v2 = vmul.f32 %v1066_v60, %v1066_v60 }
  0xa2   : > { %v1068_v61 = vpop.f32.mrf.mxu0 }
  0xa3   : > { %v387_v63 = vadd.f32 %v1068_v61, %v1064_v59  ;;  %v403_v0 = vmul.f32 %v1068_v61, %v1068_v61  ;;  %v1076_v1 = vpop.f32.mrf.mxu1 }
  0xa4   : > { %v394_v3 = vadd.f32 %v1076_v1, %v1066_v60  ;;  %v404_v4 = vmul.f32 %v1076_v1, %v1076_v1 }
  0xa5   : > { %v388_v5 = vrot.slane %v387_v63, 4  ;;  %v405_v6 = vadd.f32 %v403_v0, %v401_v62 }
  0xa6   : > { %v395_v7 = vrot.slane %v394_v3, 4  ;;  %v412_v8 = vadd.f32 %v404_v4, %v402_v2  ;;  %v662_v4 = vld [vmem:[%s1131_s5] sm:$0x3] }
  0xa7   : > { %v406_v9 = vrot.slane %v405_v6, 4  ;;  %v389_v10 = vadd.f32 %v388_v5, %v387_v63 }
  0xa8   : > { %v413_v11 = vrot.slane %v412_v8, 4  ;;  %v396_v12 = vadd.f32 %v395_v7, %v394_v3  ;;  %v664_v7 = vperm.slane %v662_v4, 0 }
  0xa9   : > { %v407_v13 = vadd.f32 %v406_v9, %v405_v6  ;;  %v390_v14 = vrot.slane %v389_v10, 2 }
  0xaa   : > { %v414_v15 = vadd.f32 %v413_v11, %v412_v8  ;;  %v397_v16 = vrot.slane %v396_v12, 2 }
  0xab   : > { %v391_v17 = vadd.f32 %v390_v14, %v389_v10  ;;  %v408_v18 = vrot.slane %v407_v13, 2  ;;  %v665_v10 = vperm.slane %v662_v4, 1 }
  0xac   : > { %v398_v19 = vadd.f32 %v397_v16, %v396_v12  ;;  %v415_v20 = vrot.slane %v414_v15, 2 }
  0xad   : > { %v392_v21 = vrot.slane %v391_v17, 1  ;;  %v409_v22 = vadd.f32 %v408_v18, %v407_v13 }
  0xae   : > { %v399_v23 = vrot.slane %v398_v19, 1  ;;  %v416_v24 = vadd.f32 %v415_v20, %v414_v15  ;;  %v676_v15 = vld [vmem:[%s1132_s6] sm:$0x3] }
  0xaf   : > { %v393_v25 = vadd.f32 %v392_v21, %v391_v17  ;;  %v410_v26 = vrot.slane %v409_v22, 1 }
  0xb0   : > { %v400_v27 = vadd.f32 %v399_v23, %v398_v19  ;;  %v417_v28 = vrot.slane %v416_v24, 1 }
  0xb1   : > { %467 = vmatmul.f32.vlgmr.msra.gmra.mxu2 %v393_v25  ;;  %v411_v29 = vadd.f32 %v410_v26, %v409_v22  ;;  %v678_v22 = vperm.slane %v676_v15, 0  ;;  %v679_v26 = vperm.slane %v676_v15, 1 }
  0xb2   : > { %487 = vmatmul.f32.vlgmr.msra.gmra.mxu3 %v400_v27  ;;  %v418_v30 = vadd.f32 %v417_v28, %v416_v24  ;;  %600 = vmatpush.msra.mxu2 %v537_v57 }
  0xb3   : > { %507 = vmatmul.f32.vlgmr.msrb.gmra.mxu0 %v411_v29  ;;  %620 = vmatpush.msra.mxu3 %v538_v58  ;;  %v686_v29 = vld [vmem:[%s293_s21] sm:$0xff] }
  0xb4   : > { %527 = vmatmul.f32.vlgmr.msrb.gmra.mxu1 %v418_v30  ;;  %601 = vmatpush.msra.mxu2 %v535_v31  ;;  %v688_v30 = vld [vmem:[%s293_s21 + $0x10] sm:$0xff] }
  0xb5   : > { %621 = vmatpush.msra.mxu3 %v536_v32 }
  0xb6   : > { %602 = vmatpush.msra.mxu2 %v533_v33  ;;  %v687_v33 = vld [vmem:[%s293_s21 + $0x8] sm:$0xff] }
  0xb7   : > { %622 = vmatpush.msra.mxu3 %v534_v34  ;;  %v689_v34 = vld [vmem:[%s293_s21 + $0x18] sm:$0xff] }
  0xb8   : > { %603 = vmatpush.msra.mxu2 %v531_v35 }
  0xb9   : > { %623 = vmatpush.msra.mxu3 %v532_v36 }
 0x130   : > { %v508_v40 = vpop.f32.mrf.mxu0 }
 0x131   : > { %v528_v41 = vpop.f32.mrf.mxu1 }
 0x132   : > { %v529_v42 = vadd.f32 %v528_v41, %v508_v40 }
 0x134   : > { %v468_v37 = vpop.f32.mrf.mxu2 }
 0x135   : > { %v488_v38 = vpop.f32.mrf.mxu3 }
 0x136   : > { %v489_v39 = vadd.f32 %v488_v38, %v468_v37 }
 0x138   : > { %818 = vmatmul.msk.f32.vlgmr.msrb.gmra.mxu2 %vm539_vm1, %v489_v39  ;;  %819 = vmatmul.msk.f32.vlgmr.msrb.gmra.mxu3 %vm539_vm1, %v489_v39 }
 0x140   : > { %820 = vmatmul.msk.f32.vlgmr.msra.gmra.mxu2 %vm539_vm1, %v529_v42  ;;  %821 = vmatmul.msk.f32.vlgmr.msra.gmra.mxu3 %vm539_vm1, %v529_v42 }
 0x1bb   : > { %v560_v43 = vpop.f32.mrf.mxu2  ;;  %v580_v44 = vpop.f32.mrf.mxu3 }
 0x1bc   : > { %v583_v45 = vmul.f32 0.0078125, %v560_v43  ;;  %v584_v46 = vmul.f32 0.0078125, %v580_v44 }
 0x1be   : > { %v630_v49 = vmul.f32 %v583_v45, %v583_v45  ;;  %v631_v50 = vmul.f32 %v584_v46, %v584_v46  ;;  %v656_v11 = vperm.slane %v583_v45, 0  ;;  %v657_v13 = vperm.slane %v584_v46, 0 }
 0x1c0   : > { %v658_v19 = vsub.f32 %v1064_v59, %v656_v11  ;;  %v660_v20 = vsub.f32 %v1068_v61, %v656_v11  ;;  %v659_v23 = vsub.f32 %v1066_v60, %v657_v13  ;;  %v661_v24 = vsub.f32 %v1076_v1, %v657_v13 }
 0x1c3   : > { %v605_v47 = vpop.f32.mrf.mxu2  ;;  %v625_v48 = vpop.f32.mrf.mxu3 }
 0x1c4   : > { %v628_v51 = vmul.f32 0.0078125, %v605_v47  ;;  %v629_v52 = vmul.f32 0.0078125, %v625_v48 }
 0x1c6   : > { %v632_v53 = vsub.f32 %v628_v51, %v630_v49  ;;  %v633_v54 = vsub.f32 %v629_v52, %v631_v50 }
 0x1c8   : > { %v634_v55 = vadd.f32 1e-06, %v632_v53  ;;  %v635_v56 = vadd.f32 1e-06, %v633_v54 }
 0x1ca   : > { %844 = vrsqrt.f32 %v634_v55  ;;  %vm642_vm4 = vweird.f32 %v634_v55  ;;  %vm652_vm6 = vweird.f32 %v635_v56 }
 0x1cb   : > { %846 = vrsqrt.f32 %v635_v56 }
 0x1d0   : > { %v845_v57 = vpop.eup %844 }
 0x1d1   : > { %v847_v58 = vpop.eup %846  ;;  %v637_v62 = vmul.f32 %v845_v57, %v634_v55  ;;  %vm643_vm2 = vweird.f32 %v845_v57 }
 0x1d2   : > { %v647_v63 = vmul.f32 %v847_v58, %v635_v56  ;;  %vm653_vm3 = vweird.f32 %v847_v58  ;;  %vm644_vm5 = vmor %vm642_vm4, %vm643_vm2 }
 0x1d3   : > { %v638_v0 = vmul.f32 %v845_v57, %v637_v62  ;;  %vm654_vm7 = vmor %vm652_vm6, %vm653_vm3 }
 0x1d4   : > { %v648_v2 = vmul.f32 %v847_v58, %v647_v63 }
 0x1d5   : > { %v639_v3 = vmul.f32 0.5, %v638_v0 }
 0x1d6   : > { %v649_v5 = vmul.f32 0.5, %v648_v2 }
 0x1d7   : > { %v640_v6 = vsub.f32 1.5, %v639_v3 }
 0x1d8   : > { %v650_v8 = vsub.f32 1.5, %v649_v5 }
 0x1d9   : > { %v641_v9 = vmul.f32 %v845_v57, %v640_v6 }
 0x1da   : > { %v651_v12 = vmul.f32 %v847_v58, %v650_v8 }
 0x1db   : > { %v645_v14 = vsel %vm644_vm5, %v845_v57, %v641_v9 }
 0x1dc   : > { %v668_v16 = vmul.f32 %v664_v7, %v645_v14  ;;  %v655_v17 = vsel %vm654_vm7, %v847_v58, %v651_v12 }
 0x1dd   : > { %v669_v18 = vmul.f32 %v665_v10, %v655_v17 }
 0x1de   : > { %v670_v21 = vperm.slane %v668_v16, 0 }
 0x1df   : > { %v671_v25 = vperm.slane %v669_v18, 0 }
 0x1e0   : > { %v672_v27 = vmul.f32 %v670_v21, %v658_v19  ;;  %v674_v28 = vmul.f32 %v670_v21, %v660_v20 }
 0x1e1   : > { %v673_v31 = vmul.f32 %v671_v25, %v659_v23  ;;  %v675_v32 = vmul.f32 %v671_v25, %v661_v24 }
 0x1e2   : > { %v682_v59 = vadd.f32 %v678_v22, %v672_v27  ;;  %v684_v35 = vadd.f32 %v678_v22, %v674_v28 }
 0x1e3   : > { %v683_v61 = vadd.f32 %v679_v26, %v673_v31  ;;  %v685_v36 = vadd.f32 %v679_v26, %v675_v32 }
 0x1e4   : > { %v690_v37 = vadd.f32 %v686_v29, %v682_v59  ;;  %v692_v38 = vadd.f32 %v688_v30, %v684_v35 }
 0x1e5   : > { %v691_v60 = vadd.f32 %v687_v33, %v683_v61  ;;  %v693_v1 = vadd.f32 %v689_v34, %v685_v36 }
 0x1e6   : > { %v694_v39 = vmax.f32 %v690_v37, 0.0  ;;  %v696_v40 = vmax.f32 %v692_v38, 0.0 }
 0x1e7   : > { %v695_v41 = vmax.f32 %v691_v60, 0.0  ;;  %v697_v42 = vmax.f32 %v693_v1, 0.0 }
 0x1e8   : > { %698 = vst [vmem:[%s298_s26] sm:$0xff] %v694_v39 }
 0x1e9   : > { %700 = vst [vmem:[%s298_s26 + $0x10] sm:$0xff] %v696_v40 }
 0x1ea   : > { %699 = vst [vmem:[%s298_s26 + $0x8] sm:$0xff] %v695_v41 }
 0x1eb   : > { %701 = vst [vmem:[%s298_s26 + $0x18] sm:$0xff] %v697_v42 }
 0x1ec PF: > { %s17_s24 = sadd.s32 1, %s854_s24  }
 0x1ed   : > { %p14_p4 = scmp.ge.s32.totalorder %s17_s24, 4  }
 0x1ef   :  { %16 = sbr.rel (!%p14_p4) target bundleno = 1 (0x1), region = 81 }

// kernel: resnetv2_forward.24
= control target key start
LH: loop header
LB: loop body
LE: loop exit
PB: predicated region body
PF: predicated region fallthrough
CT: control target
= control target key end

     0   :  { %s1303_s15 = smov 0   ;;  %s1795_s0 = inlined_call_operand.vmem [shape: bf16[2,4,256], index: 0, kind: input, shape index: {}]   ;;  %s1796_s1 = inlined_call_operand.vmem [shape: bf16[256,512], index: 1, kind: input, shape index: {}]   ;;  %s1797_s2 = inlined_call_operand.vmem [shape: f32[1,512], index: 2, kind: input, shape index: {}]   ;;  %s1798_s3 = inlined_call_operand.vmem [shape: f32[1,512], index: 3, kind: input, shape index: {}]   ;;  %s1799_s4 = inlined_call_operand.vmem [shape: f32[2,4,512], index: 4, kind: output, shape index: {}]  }
   0x1 LB: > { %s921_s16 = sadd.s32 4294967295, %s1276_s15   ;;  %p925_p0 = scmp.ge.s32.totalorder %s1276_s15, 1  ;;  %s1276_s15 = sphi %s1303_s15, %s14_s15  }
   0x2   : > { %p162_p1 = scmp.lt.s32.totalorder %s1276_s15, 3 }
   0x4   : > { %p163_p2 = pnand %p925_p0, %p162_p1 }
   0x5   : > { %p188_p3 = scmp.lt.s32.totalorder (!%p163_p2), %s921_s16, 1 }
   0x6   : > { %166 = sbr.rel (%p163_p2) target bundleno = 264 (0x108), region = 36 }
   0xb   : > { %v1044_v0 = vld [vmem:[%s1796_s1 + $0xe0] sm:$0xf]  ;;  %v1220_v1 = vld [vmem:[%s1796_s1 + $0xec] sm:$0xf0]  ;;  %v1218_v5 = vld [vmem:[%s1796_s1 + $0xe4] sm:$0xf] }
   0xc   : > { %v1172_v2 = vld [vmem:[%s1796_s1 + $0x1e0] sm:$0xf]  ;;  %v1045_v3 = vor.u32 %v1220_v1, %v1044_v0  ;;  %v1252_v4 = vld [vmem:[%s1796_s1 + $0x1ec] sm:$0xf0]  ;;  %v1046_v6 = vld [vmem:[%s1796_s1 + $0xf0] sm:$0xf0] }
   0xd   : > { %v1173_v7 = vor.u32 %v1252_v4, %v1172_v2  ;;  %v1049_v8 = vor.u32 %v1218_v5, %v1046_v6  ;;  %v1250_v9 = vld [vmem:[%s1796_s1 + $0x1e4] sm:$0xf]  ;;  %v1174_v10 = vld [vmem:[%s1796_s1 + $0x1f0] sm:$0xf0]  ;;  %v1028_v11 = vld [vmem:[%s1796_s1 + $0xc0] sm:$0xf] }
   0xe   : > { %589 = vmatpush.bf16.msra.mxu0 %v1045_v3  ;;  %v1177_v12 = vor.u32 %v1250_v9, %v1174_v10  ;;  %v1216_v13 = vld [vmem:[%s1796_s1 + $0xcc] sm:$0xf0]  ;;  %v1156_v14 = vld [vmem:[%s1796_s1 + $0x1c0] sm:$0xf]  ;;  %v1214_v18 = vld [vmem:[%s1796_s1 + $0xc4] sm:$0xf] }
   0xf   : > { %v1248_v15 = vld [vmem:[%s1796_s1 + $0x1cc] sm:$0xf0]  ;;  %602 = vmatpush.bf16.msra.mxu1 %v1173_v7  ;;  %615 = vmatpush.bf16.msra.mxu2 %v1049_v8  ;;  %v1029_v16 = vor.u32 %v1216_v13, %v1028_v11  ;;  %v1030_v19 = vld [vmem:[%s1796_s1 + $0xd0] sm:$0xf0]  ;;  %v1246_v20 = vld [vmem:[%s1796_s1 + $0x1c4] sm:$0xf] }
  0x10   : > { %v1157_v17 = vor.u32 %v1248_v15, %v1156_v14  ;;  %628 = vmatpush.bf16.msra.mxu3 %v1177_v12  ;;  %v1033_v21 = vor.u32 %v1214_v18, %v1030_v19  ;;  %v1158_v22 = vld [vmem:[%s1796_s1 + $0x1d0] sm:$0xf0]  ;;  %v1012_v23 = vld [vmem:[%s1796_s1 + $0xa0] sm:$0xf]  ;;  %v1212_v24 = vld [vmem:[%s1796_s1 + $0xac] sm:$0xf0] }
  0x11   : > { %v1161_v25 = vor.u32 %v1246_v20, %v1158_v22  ;;  %v1140_v26 = vld [vmem:[%s1796_s1 + $0x1a0] sm:$0xf]  ;;  %v1244_v27 = vld [vmem:[%s1796_s1 + $0x1ac] sm:$0xf0]  ;;  %v1210_v28 = vld [vmem:[%s1796_s1 + $0xa4] sm:$0xf]  ;;  %v1013_v29 = vor.u32 %v1212_v24, %v1012_v23 }
  0x12   : > { %590 = vmatpush.bf16.msra.mxu0 %v1029_v16  ;;  %v1014_v30 = vld [vmem:[%s1796_s1 + $0xb0] sm:$0xf0]  ;;  %v1242_v31 = vld [vmem:[%s1796_s1 + $0x1a4] sm:$0xf]  ;;  %v1141_v33 = vor.u32 %v1244_v27, %v1140_v26  ;;  %v996_v35 = vld [vmem:[%s1796_s1 + $0x80] sm:$0xf] }
  0x13   : > { %v1142_v32 = vld [vmem:[%s1796_s1 + $0x1b0] sm:$0xf0]  ;;  %603 = vmatpush.bf16.msra.mxu1 %v1157_v17  ;;  %616 = vmatpush.bf16.msra.mxu2 %v1033_v21  ;;  %v1017_v34 = vor.u32 %v1210_v28, %v1014_v30  ;;  %v1208_v36 = vld [vmem:[%s1796_s1 + $0x8c] sm:$0xf0]  ;;  %v1124_v37 = vld [vmem:[%s1796_s1 + $0x180] sm:$0xf] }
  0x14   : > { %629 = vmatpush.bf16.msra.mxu3 %v1161_v25  ;;  %v1145_v38 = vor.u32 %v1242_v31, %v1142_v32  ;;  %v1240_v39 = vld [vmem:[%s1796_s1 + $0x18c] sm:$0xf0]  ;;  %v1206_v40 = vld [vmem:[%s1796_s1 + $0x84] sm:$0xf]  ;;  %v998_v41 = vld [vmem:[%s1796_s1 + $0x90] sm:$0xf0]  ;;  %v997_v44 = vor.u32 %v1208_v36, %v996_v35 }
  0x15   : > { %v1238_v42 = vld [vmem:[%s1796_s1 + $0x184] sm:$0xf]  ;;  %v1126_v43 = vld [vmem:[%s1796_s1 + $0x190] sm:$0xf0]  ;;  %v1125_v45 = vor.u32 %v1240_v39, %v1124_v37  ;;  %v1001_v46 = vor.u32 %v1206_v40, %v998_v41  ;;  %v980_v47 = vld [vmem:[%s1796_s1 + $0x60] sm:$0xf] }
  0x16   : > { %591 = vmatpush.bf16.msra.mxu0 %v1013_v29  ;;  %v1204_v48 = vld [vmem:[%s1796_s1 + $0x6c] sm:$0xf0]  ;;  %v1108_v49 = vld [vmem:[%s1796_s1 + $0x160] sm:$0xf]  ;;  %v1129_v50 = vor.u32 %v1238_v42, %v1126_v43  ;;  %v1202_v52 = vld [vmem:[%s1796_s1 + $0x64] sm:$0xf] }
  0x17   : > { %604 = vmatpush.bf16.msra.mxu1 %v1141_v33  ;;  %617 = vmatpush.bf16.msra.mxu2 %v1017_v34  ;;  %v1236_v51 = vld [vmem:[%s1796_s1 + $0x16c] sm:$0xf0]  ;;  %v982_v53 = vld [vmem:[%s1796_s1 + $0x70] sm:$0xf0]  ;;  %v1234_v54 = vld [vmem:[%s1796_s1 + $0x164] sm:$0xf]  ;;  %v981_v56 = vor.u32 %v1204_v48, %v980_v47 }
  0x18   : > { %630 = vmatpush.bf16.msra.mxu3 %v1145_v38  ;;  %v1110_v55 = vld [vmem:[%s1796_s1 + $0x170] sm:$0xf0]  ;;  %v1109_v57 = vor.u32 %v1236_v51, %v1108_v49  ;;  %v985_v58 = vor.u32 %v1202_v52, %v982_v53  ;;  %v964_v59 = vld [vmem:[%s1796_s1 + $0x40] sm:$0xf]  ;;  %v1200_v60 = vld [vmem:[%s1796_s1 + $0x4c] sm:$0xf0] }
  0x19   : > { %v1092_v61 = vld [vmem:[%s1796_s1 + $0x140] sm:$0xf]  ;;  %v1113_v62 = vor.u32 %v1234_v54, %v1110_v55  ;;  %v1232_v63 = vld [vmem:[%s1796_s1 + $0x14c] sm:$0xf0]  ;;  %v1198_v0 = vld [vmem:[%s1796_s1 + $0x44] sm:$0xf]  ;;  %v965_v4 = vor.u32 %v1200_v60, %v964_v59 }
  0x1a   : > { %592 = vmatpush.bf16.msra.mxu0 %v997_v44  ;;  %v966_v1 = vld [vmem:[%s1796_s1 + $0x50] sm:$0xf0]  ;;  %v1230_v2 = vld [vmem:[%s1796_s1 + $0x144] sm:$0xf]  ;;  %v1093_v5 = vor.u32 %v1232_v63, %v1092_v61  ;;  %v948_v7 = vld [vmem:[%s1796_s1 + $0x20] sm:$0xf] }
  0x1b   : > { %605 = vmatpush.bf16.msra.mxu1 %v1125_v45  ;;  %618 = vmatpush.bf16.msra.mxu2 %v1001_v46  ;;  %v1094_v3 = vld [vmem:[%s1796_s1 + $0x150] sm:$0xf0]  ;;  %v969_v6 = vor.u32 %v1198_v0, %v966_v1  ;;  %v1196_v8 = vld [vmem:[%s1796_s1 + $0x2c] sm:$0xf0]  ;;  %v1076_v9 = vld [vmem:[%s1796_s1 + $0x120] sm:$0xf] }
  0x1c   : > { %631 = vmatpush.bf16.msra.mxu3 %v1129_v50  ;;  %v1097_v10 = vor.u32 %v1230_v2, %v1094_v3  ;;  %v1228_v11 = vld [vmem:[%s1796_s1 + $0x12c] sm:$0xf0]  ;;  %v1194_v12 = vld [vmem:[%s1796_s1 + $0x24] sm:$0xf]  ;;  %v950_v13 = vld [vmem:[%s1796_s1 + $0x30] sm:$0xf0]  ;;  %v949_v17 = vor.u32 %v1196_v8, %v948_v7 }
  0x1d   : > { %v1226_v14 = vld [vmem:[%s1796_s1 + $0x124] sm:$0xf]  ;;  %v1078_v15 = vld [vmem:[%s1796_s1 + $0x130] sm:$0xf0]  ;;  %v932_v16 = vld [vmem:[%s1796_s1] sm:$0xf]  ;;  %v1077_v21 = vor.u32 %v1228_v11, %v1076_v9  ;;  %v953_v22 = vor.u32 %v1194_v12, %v950_v13 }
  0x1e   : > { %593 = vmatpush.bf16.msra.mxu0 %v981_v56  ;;  %v1192_v18 = vld [vmem:[%s1796_s1 + $0xc] sm:$0xf0]  ;;  %v1060_v19 = vld [vmem:[%s1796_s1 + $0x100] sm:$0xf]  ;;  %v1190_v23 = vld [vmem:[%s1796_s1 + $0x4] sm:$0xf]  ;;  %v1081_v25 = vor.u32 %v1226_v14, %v1078_v15 }
  0x1f   : > { %606 = vmatpush.bf16.msra.mxu1 %v1109_v57  ;;  %619 = vmatpush.bf16.msra.mxu2 %v985_v58  ;;  %v1224_v20 = vld [vmem:[%s1796_s1 + $0x10c] sm:$0xf0]  ;;  %v934_v24 = vld [vmem:[%s1796_s1 + $0x10] sm:$0xf0]  ;;  %v1222_v26 = vld [vmem:[%s1796_s1 + $0x104] sm:$0xf]  ;;  %v933_v31 = vor.u32 %v1192_v18, %v932_v16 }
  0x20   : > { %632 = vmatpush.bf16.msra.mxu3 %v1113_v62  ;;  %v1062_v27 = vld [vmem:[%s1796_s1 + $0x110] sm:$0xf0]  ;;  %v1052_v28 = vld [vmem:[%s1796_s1 + $0xe8] sm:$0xf]  ;;  %v1221_v29 = vld [vmem:[%s1796_s1 + $0xf4] sm:$0xf0]  ;;  %v1061_v35 = vor.u32 %v1224_v20, %v1060_v19  ;;  %v937_v36 = vor.u32 %v1190_v23, %v934_v24 }
  0x21   : > { %v1180_v30 = vld [vmem:[%s1796_s1 + $0x1e8] sm:$0xf]  ;;  %s1803_s16 = smov (!%p188_p3, %s921_s16), 1  ;;  %v1253_v32 = vld [vmem:[%s1796_s1 + $0x1f4] sm:$0xf0]  ;;  %v1065_v39 = vor.u32 %v1222_v26, %v1062_v27  ;;  %v1053_v40 = vor.u32 %v1221_v29, %v1052_v28  ;;  %vm693_vm0 = vcmask 1043456  }
  0x22   : > { %594 = vmatpush.bf16.msra.mxu0 %v965_v4  ;;  %v1219_v33 = vld [vmem:[%s1796_s1 + $0xec] sm:$0xf]  ;;  %v1054_v34 = vld [vmem:[%s1796_s1 + $0xf8] sm:$0xf0]  ;;  %s1188_s17 = sshll.u32 %s1803_s16, 2  ;;  %v1181_v43 = vor.u32 %v1253_v32, %v1180_v30 }
  0x23   : > { %607 = vmatpush.bf16.msra.mxu1 %v1093_v5  ;;  %620 = vmatpush.bf16.msra.mxu2 %v969_v6  ;;  %v1251_v37 = vld [vmem:[%s1796_s1 + $0x1ec] sm:$0xf]  ;;  %v1182_v38 = vld [vmem:[%s1796_s1 + $0x1f8] sm:$0xf0]  ;;  %s192_s20 = scalar_lea.vmem %s1795_s0, %s1188_s17  ;;  %v1036_v41 = vld [vmem:[%s1796_s1 + $0xc8] sm:$0xf]  ;;  %v1057_v44 = vor.u32 %v1219_v33, %v1054_v34 }
  0x24   : > { %633 = vmatpush.bf16.msra.mxu3 %v1097_v10  ;;  %v1217_v42 = vld [vmem:[%s1796_s1 + $0xd4] sm:$0xf0]  ;;  %v198_v45 = vld [vmem:[%s192_s20] sm:$0xf]  ;;  %v1164_v46 = vld [vmem:[%s1796_s1 + $0x1c8] sm:$0xf]  ;;  %v1185_v48 = vor.u32 %v1251_v37, %v1182_v38 }
  0x25   : > { %v1249_v47 = vld [vmem:[%s1796_s1 + $0x1d4] sm:$0xf0]  ;;  %264 = vst [vmem:[#allocation1] ss:$4 sm:$0xff] %v198_v45  ;;  %v1215_v49 = vld [vmem:[%s1796_s1 + $0xcc] sm:$0xf]  ;;  %v1037_v51 = vor.u32 %v1217_v42, %v1036_v41 }
  0x26   : > { %595 = vmatpush.bf16.msra.mxu0 %v949_v17  ;;  %v1038_v50 = vld [vmem:[%s1796_s1 + $0xd8] sm:$0xf0]  ;;  %v1247_v52 = vld [vmem:[%s1796_s1 + $0x1cc] sm:$0xf]  ;;  %v1165_v54 = vor.u32 %v1249_v47, %v1164_v46  ;;  %v1020_v56 = vld [vmem:[%s1796_s1 + $0xa8] sm:$0xf] }
  0x27   : > { %608 = vmatpush.bf16.msra.mxu1 %v1077_v21  ;;  %621 = vmatpush.bf16.msra.mxu2 %v953_v22  ;;  %v1166_v53 = vld [vmem:[%s1796_s1 + $0x1d8] sm:$0xf0]  ;;  %v1041_v55 = vor.u32 %v1215_v49, %v1038_v50  ;;  %v1213_v57 = vld [vmem:[%s1796_s1 + $0xb4] sm:$0xf0]  ;;  %v1148_v58 = vld [vmem:[%s1796_s1 + $0x1a8] sm:$0xf] }
  0x28   : > { %634 = vmatpush.bf16.msra.mxu3 %v1081_v25  ;;  %v1245_v59 = vld [vmem:[%s1796_s1 + $0x1b4] sm:$0xf0]  ;;  %v1211_v60 = vld [vmem:[%s1796_s1 + $0xac] sm:$0xf]  ;;  %v1022_v61 = vld [vmem:[%s1796_s1 + $0xb8] sm:$0xf0]  ;;  %v1169_v0 = vor.u32 %v1247_v52, %v1166_v53  ;;  %v1021_v1 = vor.u32 %v1213_v57, %v1020_v56 }
  0x29   : > { %v1243_v62 = vld [vmem:[%s1796_s1 + $0x1ac] sm:$0xf]  ;;  %v1150_v63 = vld [vmem:[%s1796_s1 + $0x1b8] sm:$0xf0]  ;;  %v1004_v2 = vld [vmem:[%s1796_s1 + $0x88] sm:$0xf]  ;;  %v1149_v7 = vor.u32 %v1245_v59, %v1148_v58  ;;  %v1025_v8 = vor.u32 %v1211_v60, %v1022_v61 }
  0x2a   : > { %596 = vmatpush.bf16.msra.mxu0 %v933_v31  ;;  %v1209_v3 = vld [vmem:[%s1796_s1 + $0x94] sm:$0xf0]  ;;  %v1132_v4 = vld [vmem:[%s1796_s1 + $0x188] sm:$0xf]  ;;  %v1207_v10 = vld [vmem:[%s1796_s1 + $0x8c] sm:$0xf]  ;;  %v1153_v12 = vor.u32 %v1243_v62, %v1150_v63 }
  0x2b   : > { %609 = vmatpush.bf16.msra.mxu1 %v1061_v35  ;;  %622 = vmatpush.bf16.msra.mxu2 %v937_v36  ;;  %v1241_v9 = vld [vmem:[%s1796_s1 + $0x194] sm:$0xf0]  ;;  %v1006_v11 = vld [vmem:[%s1796_s1 + $0x98] sm:$0xf0]  ;;  %v1005_v13 = vor.u32 %v1209_v3, %v1004_v2  ;;  %v1239_v14 = vld [vmem:[%s1796_s1 + $0x18c] sm:$0xf] }
  0x2c   : > { %635 = vmatpush.bf16.msra.mxu3 %v1065_v39  ;;  %v1594_v5 = vld.sshfl [vmem:[#allocation1] sm:$0xff pattern:$0x73625140]  ;;  %v1596_v6 = vld.sshfl [vmem:[#allocation1 + $0x8] sm:$0xff pattern:$0x73625140]  ;;  %v1133_v16 = vor.u32 %v1241_v9, %v1132_v4  ;;  %v1009_v17 = vor.u32 %v1207_v10, %v1006_v11 }
  0x2d   : > { %597 = vmatmul.bf16.vlgmr.msra.gmra.mxu0 %v1594_v5  ;;  %v1134_v15 = vld [vmem:[%s1796_s1 + $0x198] sm:$0xf0]  ;;  %v988_v18 = vld [vmem:[%s1796_s1 + $0x68] sm:$0xf]  ;;  %v1205_v19 = vld [vmem:[%s1796_s1 + $0x74] sm:$0xf0] }
  0x2e   : > { %641 = vmatpush.bf16.msrb.mxu0 %v1053_v40  ;;  %610 = vmatmul.bf16.vlgmr.msra.gmra.mxu1 %v1596_v6  ;;  %v1116_v20 = vld [vmem:[%s1796_s1 + $0x168] sm:$0xf]  ;;  %v1237_v21 = vld [vmem:[%s1796_s1 + $0x174] sm:$0xf0]  ;;  %v1203_v22 = vld [vmem:[%s1796_s1 + $0x6c] sm:$0xf]  ;;  %v1137_v24 = vor.u32 %v1239_v14, %v1134_v15  ;;  %v989_v25 = vor.u32 %v1205_v19, %v988_v18 }
  0x2f   : > { %654 = vmatpush.bf16.msrb.mxu1 %v1181_v43  ;;  %667 = vmatpush.bf16.msrb.mxu2 %v1057_v44  ;;  %v990_v23 = vld [vmem:[%s1796_s1 + $0x78] sm:$0xf0]  ;;  %v1235_v26 = vld [vmem:[%s1796_s1 + $0x16c] sm:$0xf]  ;;  %v1117_v28 = vor.u32 %v1237_v21, %v1116_v20  ;;  %v972_v30 = vld [vmem:[%s1796_s1 + $0x48] sm:$0xf] }
  0x30   : > { %680 = vmatpush.bf16.msrb.mxu3 %v1185_v48  ;;  %623 = vmatmul.bf16.vlgmr.msra.gmra.mxu2 %v1594_v5  ;;  %v1118_v27 = vld [vmem:[%s1796_s1 + $0x178] sm:$0xf0]  ;;  %v993_v29 = vor.u32 %v1203_v22, %v990_v23  ;;  %v1201_v31 = vld [vmem:[%s1796_s1 + $0x54] sm:$0xf0]  ;;  %v1100_v32 = vld [vmem:[%s1796_s1 + $0x148] sm:$0xf] }
  0x31   : > { %636 = vmatmul.bf16.vlgmr.msra.gmra.mxu3 %v1596_v6  ;;  %v1233_v33 = vld [vmem:[%s1796_s1 + $0x154] sm:$0xf0]  ;;  %v1199_v34 = vld [vmem:[%s1796_s1 + $0x4c] sm:$0xf]  ;;  %v974_v35 = vld [vmem:[%s1796_s1 + $0x58] sm:$0xf0]  ;;  %v1121_v36 = vor.u32 %v1235_v26, %v1118_v27  ;;  %v973_v37 = vor.u32 %v1201_v31, %v972_v30 }
  0x32   : > { %642 = vmatpush.bf16.msrb.mxu0 %v1037_v51  ;;  %v1231_v38 = vld [vmem:[%s1796_s1 + $0x14c] sm:$0xf]  ;;  %v1102_v39 = vld [vmem:[%s1796_s1 + $0x158] sm:$0xf0]  ;;  %v1101_v40 = vor.u32 %v1233_v33, %v1100_v32  ;;  %v977_v41 = vor.u32 %v1199_v34, %v974_v35  ;;  %v956_v42 = vld [vmem:[%s1796_s1 + $0x28] sm:$0xf] }
  0x33   : > { %655 = vmatpush.bf16.msrb.mxu1 %v1165_v54  ;;  %668 = vmatpush.bf16.msrb.mxu2 %v1041_v55  ;;  %v1197_v43 = vld [vmem:[%s1796_s1 + $0x34] sm:$0xf0]  ;;  %v1084_v44 = vld [vmem:[%s1796_s1 + $0x128] sm:$0xf]  ;;  %v1195_v46 = vld [vmem:[%s1796_s1 + $0x2c] sm:$0xf]  ;;  %v1105_v48 = vor.u32 %v1231_v38, %v1102_v39 }
  0x34   : > { %681 = vmatpush.bf16.msrb.mxu3 %v1169_v0  ;;  %v1229_v45 = vld [vmem:[%s1796_s1 + $0x134] sm:$0xf0]  ;;  %v958_v47 = vld [vmem:[%s1796_s1 + $0x38] sm:$0xf0]  ;;  %v957_v49 = vor.u32 %v1197_v43, %v956_v42  ;;  %v1227_v50 = vld [vmem:[%s1796_s1 + $0x12c] sm:$0xf] }
  0x35   : > { %v1086_v51 = vld [vmem:[%s1796_s1 + $0x138] sm:$0xf0]  ;;  %v1085_v52 = vor.u32 %v1229_v45, %v1084_v44  ;;  %v961_v53 = vor.u32 %v1195_v46, %v958_v47  ;;  %v940_v54 = vld [vmem:[%s1796_s1 + $0x8] sm:$0xf]  ;;  %v1193_v55 = vld [vmem:[%s1796_s1 + $0x14] sm:$0xf0] }
  0x36   : > { %643 = vmatpush.bf16.msrb.mxu0 %v1021_v1  ;;  %v1068_v56 = vld [vmem:[%s1796_s1 + $0x108] sm:$0xf]  ;;  %v1225_v57 = vld [vmem:[%s1796_s1 + $0x114] sm:$0xf0]  ;;  %v1191_v58 = vld [vmem:[%s1796_s1 + $0xc] sm:$0xf]  ;;  %v1089_v60 = vor.u32 %v1227_v50, %v1086_v51  ;;  %v941_v61 = vor.u32 %v1193_v55, %v940_v54 }
  0x37   : > { %656 = vmatpush.bf16.msrb.mxu1 %v1149_v7  ;;  %669 = vmatpush.bf16.msrb.mxu2 %v1025_v8  ;;  %v942_v59 = vld [vmem:[%s1796_s1 + $0x18] sm:$0xf0]  ;;  %v1069_v62 = vor.u32 %v1225_v57, %v1068_v56  ;;  %v1223_v0 = vld [vmem:[%s1796_s1 + $0x10c] sm:$0xf]  ;;  %s1189_s17 = sshll.u32 %s1803_s16, 4 }
  0x38   : > { %682 = vmatpush.bf16.msrb.mxu3 %v1153_v12  ;;  %v945_v63 = vor.u32 %v1191_v58, %v942_v59  ;;  %v1070_v1 = vld [vmem:[%s1796_s1 + $0x118] sm:$0xf0]  ;;  %s1781_s20 = scalar_lea.vmem %s1799_s4, %s1189_s17 }
  0x39   : > { %v1073_v2 = vor.u32 %v1223_v0, %v1070_v1 }
  0x3a   : > { %644 = vmatpush.bf16.msrb.mxu0 %v1005_v13 }
  0x3b   : > { %657 = vmatpush.bf16.msrb.mxu1 %v1133_v16  ;;  %670 = vmatpush.bf16.msrb.mxu2 %v1009_v17 }
  0x3c   : > { %683 = vmatpush.bf16.msrb.mxu3 %v1137_v24 }
  0x3e   : > { %645 = vmatpush.bf16.msrb.mxu0 %v989_v25 }
  0x3f   : > { %658 = vmatpush.bf16.msrb.mxu1 %v1117_v28  ;;  %671 = vmatpush.bf16.msrb.mxu2 %v993_v29 }
  0x40   : > { %684 = vmatpush.bf16.msrb.mxu3 %v1121_v36 }
  0x42   : > { %646 = vmatpush.bf16.msrb.mxu0 %v973_v37 }
  0x43   : > { %659 = vmatpush.bf16.msrb.mxu1 %v1101_v40  ;;  %672 = vmatpush.bf16.msrb.mxu2 %v977_v41 }
  0x44   : > { %685 = vmatpush.bf16.msrb.mxu3 %v1105_v48 }
  0x46   : > { %647 = vmatpush.bf16.msrb.mxu0 %v957_v49 }
  0x47   : > { %660 = vmatpush.bf16.msrb.mxu1 %v1085_v52  ;;  %673 = vmatpush.bf16.msrb.mxu2 %v961_v53 }
  0x48   : > { %686 = vmatpush.bf16.msrb.mxu3 %v1089_v60 }
  0x4a   : > { %648 = vmatpush.bf16.msrb.mxu0 %v941_v61 }
  0x4b   : > { %661 = vmatpush.bf16.msrb.mxu1 %v1069_v62  ;;  %674 = vmatpush.bf16.msrb.mxu2 %v945_v63 }
  0x4c   : > { %687 = vmatpush.bf16.msrb.mxu3 %v1073_v2 }
  0x4d   : > { %649 = vmatmul.bf16.vlgmr.msrb.gmra.mxu0 %v1594_v5 }
  0x4e   : > { %662 = vmatmul.bf16.vlgmr.msrb.gmra.mxu1 %v1596_v6  ;;  %675 = vmatmul.bf16.vlgmr.msrb.gmra.mxu2 %v1594_v5 }
  0x4f   : > { %688 = vmatmul.bf16.vlgmr.msrb.gmra.mxu3 %v1596_v6 }
  0xaa   : > { %v598_v3 = vpop.f32.mrf.mxu0 }
  0xab   : > { %v611_v4 = vpop.f32.mrf.mxu1 }
  0xac   : > { %v1717_v7 = vadd.f32 %v611_v4, %v598_v3 }
  0xae   : > { %v694_v8 = vsel %vm693_vm0, %v1717_v7, 0.0  ;;  %v722_v9 = vmul.f32 %v1717_v7, %v1717_v7 }
  0xaf   : > { %v695_v10 = vrot.slane %v694_v8, 4 }
  0xb0   : > { %v726_v11 = vsel %vm693_vm0, %v722_v9, 0.0 }
  0xb1   : > { %v696_v12 = vadd.f32 %v695_v10, %v694_v8  ;;  %v727_v13 = vrot.slane %v726_v11, 4 }
  0xb2   : > { %v600_v17 = vpop.f32.mrf.mxu0 }
  0xb3   : > { %v624_v14 = vpop.f32.mrf.mxu2  ;;  %v697_v15 = vrot.slane %v696_v12, 2  ;;  %v728_v6 = vadd.f32 %v727_v13, %v726_v11  ;;  %v613_v18 = vpop.f32.mrf.mxu1 }
  0xb4   : > { %v637_v5 = vpop.f32.mrf.mxu3 }
  0xb5   : > { %v1724_v16 = vadd.f32 %v637_v5, %v624_v14  ;;  %v698_v19 = vadd.f32 %v697_v15, %v696_v12  ;;  %v729_v20 = vrot.slane %v728_v6, 2  ;;  %v1751_v5 = vld [vmem:[%s1797_s2] sm:$0xf] }
  0xb7   : > { %v701_v21 = vsel %vm693_vm0, %v1724_v16, 0.0  ;;  %v723_v22 = vmul.f32 %v1724_v16, %v1724_v16  ;;  %v699_v24 = vrot.slane %v698_v19, 1  ;;  %v730_v25 = vadd.f32 %v729_v20, %v728_v6 }
  0xb8   : > { %v702_v23 = vrot.slane %v701_v21, 4 }
  0xb9   : > { %v733_v26 = vsel %vm693_vm0, %v723_v22, 0.0  ;;  %v700_v29 = vadd.f32 %v699_v24, %v698_v19  ;;  %v731_v30 = vrot.slane %v730_v25, 1  ;;  %v820_v24 = vperm.slane %v1751_v5, 0 }
  0xba   : > { %v703_v27 = vadd.f32 %v702_v23, %v701_v21  ;;  %v734_v28 = vrot.slane %v733_v26, 4 }
  0xbb   : > { %v626_v33 = vpop.f32.mrf.mxu2  ;;  %v732_v35 = vadd.f32 %v731_v30, %v730_v25  ;;  %v1731_v36 = vmul.f32 0.25, %v700_v29 }
  0xbc   : > { %v704_v31 = vrot.slane %v703_v27, 2  ;;  %v735_v32 = vadd.f32 %v734_v28, %v733_v26  ;;  %v639_v34 = vpop.f32.mrf.mxu3 }
  0xbd   : > { %v758_v39 = vmul.f32 0.25, %v732_v35  ;;  %v762_v40 = vmul.f32 %v1731_v36, %v1731_v36 }
  0xbe   : > { %v705_v37 = vadd.f32 %v704_v31, %v703_v27  ;;  %v736_v38 = vrot.slane %v735_v32, 2 }
  0xbf   : > { %v766_v43 = vsub.f32 %v758_v39, %v762_v40 }
  0xc0   : > { %v706_v41 = vrot.slane %v705_v37, 1  ;;  %v737_v42 = vadd.f32 %v736_v38, %v735_v32 }
  0xc1   : > { %v770_v46 = vadd.f32 1e-05, %v766_v43 }
  0xc2   : > { %v707_v44 = vadd.f32 %v706_v41, %v705_v37  ;;  %v738_v45 = vrot.slane %v737_v42, 1 }
  0xc3   : > { %1262 = vrsqrt.f32 %v770_v46  ;;  %vm780_vm1 = vweird.f32 %v770_v46 }
  0xc4   : > { %v739_v47 = vadd.f32 %v738_v45, %v737_v42  ;;  %v1735_v48 = vmul.f32 0.25, %v707_v44  ;;  %v821_v42 = vperm.slane %v1751_v5, 1 }
  0xc6   : > { %v759_v49 = vmul.f32 0.25, %v739_v47  ;;  %v763_v50 = vmul.f32 %v1735_v48, %v1735_v48 }
  0xc8   : > { %v767_v53 = vsub.f32 %v759_v49, %v763_v50 }
  0xc9   : > { %v1263_v58 = vpop.eup %1262 }
  0xca   : > { %v650_v51 = vpop.f32.mrf.mxu0  ;;  %v771_v55 = vadd.f32 1e-05, %v767_v53  ;;  %v775_v60 = vmul.f32 %v1263_v58, %v770_v46  ;;  %vm781_vm2 = vweird.f32 %v1263_v58  ;;  %v840_v53 = vld [vmem:[%s1798_s3] sm:$0xf] }
  0xcb   : > { %v663_v52 = vpop.f32.mrf.mxu1  ;;  %vm1753_vm3 = vmor %vm780_vm1, %vm781_vm2 }
  0xcc   : > { %v1739_v54 = vadd.f32 %v663_v52, %v650_v51  ;;  %1264 = vrsqrt.f32 %v771_v55  ;;  %v776_v63 = vmul.f32 %v1263_v58, %v775_v60  ;;  %vm790_vm4 = vweird.f32 %v771_v55 }
  0xcd   : > { %v843_v60 = vperm.slane %v840_v53, 1 }
  0xce   : > { %v708_v56 = vsel %vm693_vm0, %v1739_v54, 0.0  ;;  %v724_v57 = vmul.f32 %v1739_v54, %v1739_v54  ;;  %v777_v8 = vmul.f32 0.5, %v776_v63 }
  0xcf   : > { %v709_v59 = vrot.slane %v708_v56, 4 }
  0xd0   : > { %v740_v62 = vsel %vm693_vm0, %v724_v57, 0.0  ;;  %v778_v14 = vsub.f32 1.5, %v777_v8 }
  0xd1   : > { %v710_v61 = vadd.f32 %v709_v59, %v708_v56  ;;  %v741_v0 = vrot.slane %v740_v62, 4  ;;  %v676_v1 = vpop.f32.mrf.mxu2  ;;  %v814_v59 = vsub.f32 %v1717_v7, %v1731_v36 }
  0xd2   : > { %v652_v2 = vpop.f32.mrf.mxu0  ;;  %v689_v10 = vpop.f32.mrf.mxu3  ;;  %v779_v20 = vmul.f32 %v1263_v58, %v778_v14 }
  0xd3   : > { %v711_v3 = vrot.slane %v710_v61, 2  ;;  %v665_v4 = vpop.f32.mrf.mxu1  ;;  %v742_v9 = vadd.f32 %v741_v0, %v740_v62  ;;  %v1746_v12 = vadd.f32 %v689_v10, %v676_v1  ;;  %v1265_v13 = vpop.eup %1264  ;;  %v842_v2 = vperm.slane %v840_v53, 0 }
  0xd4   : > { %v785_v17 = vmul.f32 %v1265_v13, %v771_v55  ;;  %v783_v27 = vsel %vm1753_vm3, %v1263_v58, %v779_v20  ;;  %vm791_vm5 = vweird.f32 %v1265_v13 }
  0xd5   : > { %v712_v11 = vadd.f32 %v711_v3, %v710_v61  ;;  %v743_v15 = vrot.slane %v742_v9, 2  ;;  %v715_v19 = vsel %vm693_vm0, %v1746_v12, 0.0  ;;  %v725_v23 = vmul.f32 %v1746_v12, %v1746_v12  ;;  %vm792_vm6 = vmor %vm790_vm4, %vm791_vm5 }
  0xd6   : > { %v716_v22 = vrot.slane %v715_v19, 4  ;;  %v786_v25 = vmul.f32 %v1265_v13, %v785_v17  ;;  %v828_v39 = vmul.f32 %v820_v24, %v783_v27  ;;  %v815_v61 = vsub.f32 %v1724_v16, %v1735_v48 }
  0xd7   : > { %v713_v18 = vrot.slane %v712_v11, 1  ;;  %v744_v21 = vadd.f32 %v743_v15, %v742_v9  ;;  %v747_v33 = vsel %vm693_vm0, %v725_v23, 0.0  ;;  %v823_v27 = vperm.slane %v1751_v5, 3 }
  0xd8   : > { %v717_v29 = vadd.f32 %v716_v22, %v715_v19  ;;  %v787_v31 = vmul.f32 0.5, %v786_v25  ;;  %v748_v37 = vrot.slane %v747_v33, 4  ;;  %v832_v51 = vperm.slane %v828_v39, 0 }
  0xd9   : > { %v714_v26 = vadd.f32 %v713_v18, %v712_v11  ;;  %v745_v28 = vrot.slane %v744_v21, 1  ;;  %v678_v30 = vpop.f32.mrf.mxu2  ;;  %v822_v22 = vperm.slane %v1751_v5, 2  ;;  %v844_v39 = vperm.slane %v840_v53, 2 }
  0xda   : > { %v718_v35 = vrot.slane %v717_v29, 2  ;;  %v691_v38 = vpop.f32.mrf.mxu3  ;;  %v788_v40 = vsub.f32 1.5, %v787_v31  ;;  %v749_v45 = vadd.f32 %v748_v37, %v747_v33  ;;  %v836_v1 = vmul.f32 %v832_v51, %v814_v59 }
  0xdb   : > { %v1764_v32 = vmul.f32 0.25, %v714_v26  ;;  %v746_v34 = vadd.f32 %v745_v28, %v744_v21  ;;  %v845_v37 = vperm.slane %v840_v53, 3 }
  0xdc   : > { %v719_v44 = vadd.f32 %v718_v35, %v717_v29  ;;  %v789_v46 = vmul.f32 %v1265_v13, %v788_v40  ;;  %v750_v50 = vrot.slane %v749_v45, 2 }
  0xdd   : > { %v764_v41 = vmul.f32 %v1764_v32, %v1764_v32  ;;  %v760_v43 = vmul.f32 0.25, %v746_v34  ;;  %v816_v33 = vsub.f32 %v1739_v54, %v1764_v32 }
  0xde   : > { %v720_v49 = vrot.slane %v719_v44, 1  ;;  %v793_v52 = vsel %vm792_vm6, %v1265_v13, %v789_v46  ;;  %v751_v58 = vadd.f32 %v750_v50, %v749_v45  ;;  %v850_v13 = vadd.f32 %v842_v2, %v836_v1 }
  0xdf   : > { %v768_v47 = vsub.f32 %v760_v43, %v764_v41  ;;  %v829_v55 = vmul.f32 %v821_v42, %v793_v52 }
  0xe0   : > { %v721_v57 = vadd.f32 %v720_v49, %v719_v44  ;;  %v752_v63 = vrot.slane %v751_v58, 1 }
  0xe1   : > { %v772_v56 = vadd.f32 1e-05, %v768_v47  ;;  %v833_v62 = vperm.slane %v829_v55, 0 }
  0xe2   : > { %v757_v0 = vmul.f32 0.25, %v721_v57  ;;  %v753_v4 = vadd.f32 %v752_v63, %v751_v58 }
  0xe3   : > { %1266 = vrsqrt.f32 %v772_v56  ;;  %v837_v3 = vmul.f32 %v833_v62, %v815_v61  ;;  %vm800_vm8 = vweird.f32 %v772_v56 }
  0xe4   : > { %v765_v8 = vmul.f32 %v757_v0, %v757_v0  ;;  %v761_v10 = vmul.f32 0.25, %v753_v4  ;;  %v817_v34 = vsub.f32 %v1746_v12, %v757_v0 }
  0xe5   : > { %v851_v9 = vadd.f32 %v843_v60, %v837_v3 }
  0xe6   : > { %v769_v16 = vsub.f32 %v761_v10, %v765_v8 }
  0xe7   : > { %v858_v7 = vrot.slane %v851_v9, 4 }
  0xe8   : > { %v773_v14 = vadd.f32 1e-05, %v769_v16 }
  0xe9   : > { %v1267_v11 = vpop.eup %1266  ;;  %v860_v48 = vsel %vm693_vm0, %v850_v13, %v858_v7 }
  0xea   : > { %v795_v36 = vmul.f32 %v1267_v11, %v772_v56  ;;  %864 = vst [vmem:[%s1781_s20] sm:$0xff] %v860_v48  ;;  %1268 = vrsqrt.f32 %v773_v14  ;;  %vm801_vm7 = vweird.f32 %v1267_v11  ;;  %vm810_vm11 = vweird.f32 %v773_v14 }
  0xeb   : > { %vm802_vm9 = vmor %vm800_vm8, %vm801_vm7 }
  0xec   : > { %v796_v15 = vmul.f32 %v1267_v11, %v795_v36 }
  0xee   : > { %v797_v6 = vmul.f32 0.5, %v796_v15 }
  0xf0   : > { %v798_v17 = vsub.f32 1.5, %v797_v6  ;;  %v1269_v18 = vpop.eup %1268 }
  0xf1   : > { %v805_v20 = vmul.f32 %v1269_v18, %v773_v14  ;;  %vm811_vm10 = vweird.f32 %v1269_v18 }
  0xf2   : > { %v799_v19 = vmul.f32 %v1267_v11, %v798_v17  ;;  %vm812_vm12 = vmor %vm810_vm11, %vm811_vm10 }
  0xf3   : > { %v806_v21 = vmul.f32 %v1269_v18, %v805_v20 }
  0xf4   : > { %v803_v23 = vsel %vm802_vm9, %v1267_v11, %v799_v19 }
  0xf5   : > { %v807_v24 = vmul.f32 0.5, %v806_v21  ;;  %v830_v26 = vmul.f32 %v822_v22, %v803_v23 }
  0xf7   : > { %v808_v25 = vsub.f32 1.5, %v807_v24  ;;  %v834_v30 = vperm.slane %v830_v26, 0 }
  0xf9   : > { %v809_v28 = vmul.f32 %v1269_v18, %v808_v25  ;;  %v838_v38 = vmul.f32 %v834_v30, %v816_v33 }
  0xfb   : > { %v813_v29 = vsel %vm812_vm12, %v1269_v18, %v809_v28  ;;  %v852_v42 = vadd.f32 %v844_v39, %v838_v38 }
  0xfc   : > { %v831_v31 = vmul.f32 %v823_v27, %v813_v29 }
  0xfe   : > { %v835_v35 = vperm.slane %v831_v31, 0 }
 0x100   : > { %v839_v40 = vmul.f32 %v835_v35, %v817_v34 }
 0x102   : > { %v853_v41 = vadd.f32 %v845_v37, %v839_v40 }
 0x104   : > { %v859_v5 = vrot.slane %v853_v41, 4 }
 0x106   : > { %v861_v43 = vsel %vm693_vm0, %v852_v42, %v859_v5 }
 0x107   : > { %865 = vst [vmem:[%s1781_s20 + $0x8] sm:$0xff] %v861_v43 }
 0x108 PF: > { %s14_s15 = sadd.s32 1, %s1276_s15  }
 0x109   : > { %p11_p4 = scmp.ge.s32.totalorder %s14_s15, 4  }
 0x10b   :  { %13 = sbr.rel (!%p11_p4) target bundleno = 1 (0x1), region = 66 }

// kernel: resnetv2_forward.25
= control target key start
LH: loop header
LB: loop body
LE: loop exit
PB: predicated region body
PF: predicated region fallthrough
CT: control target
= control target key end

     0   :  { %s790_s21 = smov 0   ;;  %s932_s0 = inlined_call_operand.vmem [shape: bf16[2,16,256], index: 0, kind: input, shape index: {}]   ;;  %s933_s1 = inlined_call_operand.vmem [shape: bf16[256,128], index: 1, kind: input, shape index: {}]   ;;  %s934_s2 = inlined_call_operand.vmem [shape: f32[128,32], index: 2, kind: input, shape index: {}]   ;;  %s935_s3 = inlined_call_operand.vmem [shape: f32[32,128], index: 3, kind: input, shape index: {}]   ;;  %s936_s4 = inlined_call_operand.vmem [shape: f32[1,128], index: 4, kind: input, shape index: {}]   ;;  %s937_s5 = inlined_call_operand.vmem [shape: f32[1,128], index: 5, kind: input, shape index: {}]   ;;  %s938_s6 = inlined_call_operand.vmem [shape: f32[2,16,128], index: 6, kind: output, shape index: {}]  }
   0x1 LB: > { %s631_s22 = sadd.s32 4294967295, %s753_s21   ;;  %p635_p0 = scmp.ge.s32.totalorder %s753_s21, 1  ;;  %s753_s21 = sphi %s790_s21, %s16_s21  }
   0x2   : > { %p212_p1 = scmp.lt.s32.totalorder %s753_s21, 3 }
   0x4   : > { %p213_p2 = pnand %p635_p0, %p212_p1 }
   0x5   : > { %p242_p3 = scmp.lt.s32.totalorder (!%p213_p2), %s631_s22, 1 }
   0x6   : > { %216 = sbr.rel (%p213_p2) target bundleno = 496 (0x1f0), region = 44 }
   0xb   : > { %v727_v0 = vld [vmem:[%s933_s1 + $0x38] sm:$0xff]  ;;  %v726_v2 = vld [vmem:[%s933_s1 + $0x30] sm:$0xff]  ;;  %v725_v5 = vld [vmem:[%s933_s1 + $0x28] sm:$0xff]  ;;  %s940_s22 = smov (!%p242_p3, %s631_s22), 1  ;;  %vm496_vm0 = vcmask 261120  }
   0xc   : > { %v735_v1 = vld [vmem:[%s933_s1 + $0x78] sm:$0xff]  ;;  %392 = vmatpush.bf16.msra.mxu0 %v727_v0  ;;  %v734_v3 = vld [vmem:[%s933_s1 + $0x70] sm:$0xff]  ;;  %v733_v6 = vld [vmem:[%s933_s1 + $0x68] sm:$0xff]  ;;  %s716_s7 = sshll.u32 %s940_s22, 4 }
   0xd   : > { %406 = vmatpush.bf16.msra.mxu1 %v735_v1  ;;  %v451_v4 = vld [vmem:[%s934_s2 + $0x78] sm:$0xff]  ;;  %v450_v7 = vld [vmem:[%s934_s2 + $0x70] sm:$0xff]  ;;  %v449_v8 = vld [vmem:[%s934_s2 + $0x68] sm:$0xff]  ;;  %s246_s14 = scalar_lea.vmem %s932_s0, %s716_s7  ;;  %s251_s17 = scalar_lea.vmem %s938_s6, %s716_s7 }
   0xe   : > { %452 = vmatpush.msra.mxu2 %v451_v4  ;;  %472 = vmatpush.msra.mxu3 %v451_v4  ;;  %v724_v9 = vld [vmem:[%s933_s1 + $0x20] sm:$0xff]  ;;  %v723_v11 = vld [vmem:[%s933_s1 + $0x18] sm:$0xff]  ;;  %v722_v13 = vld [vmem:[%s933_s1 + $0x10] sm:$0xff] }
   0xf   : > { %v732_v10 = vld [vmem:[%s933_s1 + $0x60] sm:$0xff]  ;;  %v731_v12 = vld [vmem:[%s933_s1 + $0x58] sm:$0xff]  ;;  %v730_v14 = vld [vmem:[%s933_s1 + $0x50] sm:$0xff] }
  0x10   : > { %393 = vmatpush.bf16.msra.mxu0 %v726_v2  ;;  %453 = vmatpush.msra.mxu2 %v450_v7  ;;  %v721_v15 = vld [vmem:[%s933_s1 + $0x8] sm:$0xff]  ;;  %v720_v17 = vld [vmem:[%s933_s1] sm:$0xff]  ;;  %v447_v26 = vld [vmem:[%s934_s2 + $0x58] sm:$0xff] }
  0x11   : > { %407 = vmatpush.bf16.msra.mxu1 %v734_v3  ;;  %473 = vmatpush.msra.mxu3 %v450_v7  ;;  %v729_v16 = vld [vmem:[%s933_s1 + $0x48] sm:$0xff]  ;;  %v728_v18 = vld [vmem:[%s933_s1 + $0x40] sm:$0xff]  ;;  %v446_v27 = vld [vmem:[%s934_s2 + $0x50] sm:$0xff] }
  0x12   : > { %454 = vmatpush.msra.mxu2 %v449_v8  ;;  %v642_v19 = vld [vmem:[%s246_s14] sm:$0xf]  ;;  %v719_v20 = vld [vmem:[%s246_s14 + $0x4] sm:$0xf0]  ;;  %v718_v21 = vld [vmem:[%s246_s14 + $0x4] sm:$0xf] }
  0x13   : > { %474 = vmatpush.msra.mxu3 %v449_v8  ;;  %v644_v22 = vld [vmem:[%s246_s14 + $0x8] sm:$0xf0]  ;;  %v643_v23 = vor.u32 %v719_v20, %v642_v19  ;;  %v448_v25 = vld [vmem:[%s934_s2 + $0x60] sm:$0xff]  ;;  %v443_v30 = vld [vmem:[%s934_s2 + $0x38] sm:$0xff] }
  0x14   : > { %394 = vmatpush.bf16.msra.mxu0 %v725_v5  ;;  %v647_v24 = vor.u32 %v718_v21, %v644_v22  ;;  %455 = vmatpush.msra.mxu2 %v448_v25  ;;  %v445_v28 = vld [vmem:[%s934_s2 + $0x48] sm:$0xff]  ;;  %v444_v29 = vld [vmem:[%s934_s2 + $0x40] sm:$0xff]  ;;  %v442_v31 = vld [vmem:[%s934_s2 + $0x30] sm:$0xff] }
  0x15   : > { %408 = vmatpush.bf16.msra.mxu1 %v733_v6  ;;  %475 = vmatpush.msra.mxu3 %v448_v25  ;;  %v441_v32 = vld [vmem:[%s934_s2 + $0x28] sm:$0xff]  ;;  %v440_v33 = vld [vmem:[%s934_s2 + $0x20] sm:$0xff]  ;;  %v439_v34 = vld [vmem:[%s934_s2 + $0x18] sm:$0xff] }
  0x16   : > { %456 = vmatpush.msra.mxu2 %v447_v26  ;;  %v438_v35 = vld [vmem:[%s934_s2 + $0x10] sm:$0xff]  ;;  %v437_v36 = vld [vmem:[%s934_s2 + $0x8] sm:$0xff]  ;;  %v436_v37 = vld [vmem:[%s934_s2] sm:$0xff] }
  0x17   : > { %476 = vmatpush.msra.mxu3 %v447_v26  ;;  %v495_v38 = vld [vmem:[%s935_s3 + $0x18] sm:$0xff]  ;;  %v494_v39 = vld [vmem:[%s935_s3 + $0x10] sm:$0xff]  ;;  %v493_v40 = vld [vmem:[%s935_s3 + $0x8] sm:$0xff] }
  0x18   : > { %395 = vmatpush.bf16.msra.mxu0 %v724_v9  ;;  %457 = vmatpush.msra.mxu2 %v446_v27  ;;  %v492_v41 = vld [vmem:[%s935_s3] sm:$0xff] }
  0x19   : > { %409 = vmatpush.bf16.msra.mxu1 %v732_v10  ;;  %477 = vmatpush.msra.mxu3 %v446_v27  ;;  %v744_v22 = vld [vmem:[%s937_s5] ss:$0 sm:$0xff] }
  0x1a   : > { %458 = vmatpush.msra.mxu2 %v445_v28 }
  0x1b   : > { %478 = vmatpush.msra.mxu3 %v445_v28 }
  0x1c   : > { %396 = vmatpush.bf16.msra.mxu0 %v723_v11  ;;  %459 = vmatpush.msra.mxu2 %v444_v29 }
  0x1d   : > { %410 = vmatpush.bf16.msra.mxu1 %v731_v12  ;;  %479 = vmatpush.msra.mxu3 %v444_v29 }
  0x1e   : > { %460 = vmatpush.msra.mxu2 %v443_v30 }
  0x1f   : > { %480 = vmatpush.msra.mxu3 %v443_v30 }
  0x20   : > { %397 = vmatpush.bf16.msra.mxu0 %v722_v13  ;;  %461 = vmatpush.msra.mxu2 %v442_v31 }
  0x21   : > { %411 = vmatpush.bf16.msra.mxu1 %v730_v14  ;;  %481 = vmatpush.msra.mxu3 %v442_v31 }
  0x22   : > { %462 = vmatpush.msra.mxu2 %v441_v32 }
  0x23   : > { %482 = vmatpush.msra.mxu3 %v441_v32 }
  0x24   : > { %398 = vmatpush.bf16.msra.mxu0 %v721_v15  ;;  %463 = vmatpush.msra.mxu2 %v440_v33  ;;  %v561_v15 = vld [vmem:[%s936_s4] sm:$0x1] }
  0x25   : > { %412 = vmatpush.bf16.msra.mxu1 %v729_v16  ;;  %483 = vmatpush.msra.mxu3 %v440_v33 }
  0x26   : > { %464 = vmatpush.msra.mxu2 %v439_v34 }
  0x27   : > { %484 = vmatpush.msra.mxu3 %v439_v34 }
  0x28   : > { %399 = vmatpush.bf16.msra.mxu0 %v720_v17  ;;  %465 = vmatpush.msra.mxu2 %v438_v35 }
  0x29   : > { %413 = vmatpush.bf16.msra.mxu1 %v728_v18  ;;  %485 = vmatpush.msra.mxu3 %v438_v35 }
  0x2a   : > { %466 = vmatpush.msra.mxu2 %v437_v36 }
  0x2b   : > { %400 = vmatmul.bf16.vlgmr.msra.gmra.mxu0 %v643_v23  ;;  %486 = vmatpush.msra.mxu3 %v437_v36 }
  0x2c   : > { %414 = vmatmul.bf16.vlgmr.msra.gmra.mxu1 %v647_v24  ;;  %467 = vmatpush.msra.mxu2 %v436_v37 }
  0x2d   : > { %487 = vmatpush.msra.mxu3 %v436_v37 }
  0x2e   : > { %512 = vmatpush.msrb.mxu2 %v495_v38 }
  0x2f   : > { %536 = vmatpush.msrb.mxu3 %v495_v38 }
  0x30   : > { %513 = vmatpush.msrb.mxu2 %v494_v39 }
  0x31   : > { %537 = vmatpush.msrb.mxu3 %v494_v39 }
  0x32   : > { %514 = vmatpush.msrb.mxu2 %v493_v40 }
  0x33   : > { %538 = vmatpush.msrb.mxu3 %v493_v40 }
  0x34   : > { %515 = vmatpush.msrb.mxu2 %v492_v41 }
  0x35   : > { %539 = vmatpush.msrb.mxu3 %v492_v41 }
  0xa8   : > { %v401_v42 = vpop.f32.mrf.mxu0 }
  0xa9   : > { %v415_v43 = vpop.f32.mrf.mxu1 }
  0xaa   : > { %v416_v44 = vadd.f32 %v415_v43, %v401_v42 }
  0xac   : > { %v427_v48 = vmul.f32 %v416_v44, %v416_v44 }
  0xb0   : > { %v403_v45 = vpop.f32.mrf.mxu0 }
  0xb1   : > { %v417_v46 = vpop.f32.mrf.mxu1 }
  0xb2   : > { %v418_v47 = vadd.f32 %v417_v46, %v403_v45 }
  0xb4   : > { %v420_v49 = vadd.f32 %v418_v47, %v416_v44  ;;  %v428_v50 = vmul.f32 %v418_v47, %v418_v47 }
  0xb6   : > { %v421_v51 = vrot.slane %v420_v49, 4  ;;  %v429_v52 = vadd.f32 %v428_v50, %v427_v48 }
  0xb8   : > { %v422_v53 = vadd.f32 %v421_v51, %v420_v49  ;;  %v430_v54 = vrot.slane %v429_v52, 4 }
  0xba   : > { %v423_v55 = vrot.slane %v422_v53, 2  ;;  %v431_v56 = vadd.f32 %v430_v54, %v429_v52 }
  0xbc   : > { %v424_v57 = vadd.f32 %v423_v55, %v422_v53  ;;  %v432_v58 = vrot.slane %v431_v56, 2 }
  0xbe   : > { %v425_v59 = vrot.slane %v424_v57, 1  ;;  %v433_v60 = vadd.f32 %v432_v58, %v431_v56 }
  0xc0   : > { %v426_v61 = vadd.f32 %v425_v59, %v424_v57  ;;  %v434_v62 = vrot.slane %v433_v60, 1 }
  0xc2   : > { %468 = vmatmul.f32.vlgmr.msra.gmra.mxu2 %v426_v61  ;;  %v435_v63 = vadd.f32 %v434_v62, %v433_v60 }
  0xc4   : > { %488 = vmatmul.f32.vlgmr.msra.gmra.mxu3 %v435_v63 }
 0x145   : > { %v469_v0 = vpop.f32.mrf.mxu2 }
 0x146   : > { %712 = vmatmul.msk.f32.vlgmr.msrb.gmra.mxu2 %vm496_vm0, %v469_v0 }
 0x147   : > { %v489_v1 = vpop.f32.mrf.mxu3 }
 0x148   : > { %713 = vmatmul.msk.f32.vlgmr.msrb.gmra.mxu3 %vm496_vm0, %v489_v1 }
 0x1c9   : > { %v517_v2 = vpop.f32.mrf.mxu2 }
 0x1ca   : > { %v520_v3 = vmul.f32 0.015625, %v517_v2 }
 0x1cb   : > { %v541_v4 = vpop.f32.mrf.mxu3 }
 0x1cc   : > { %v545_v5 = vmul.f32 %v520_v3, %v520_v3  ;;  %v544_v6 = vmul.f32 0.015625, %v541_v4  ;;  %v558_v16 = vperm.slane %v520_v3, 0 }
 0x1ce   : > { %v546_v7 = vsub.f32 %v544_v6, %v545_v5  ;;  %v559_v19 = vsub.f32 %v416_v44, %v558_v16  ;;  %v560_v20 = vsub.f32 %v418_v47, %v558_v16 }
 0x1d0   : > { %v547_v8 = vadd.f32 1e-06, %v546_v7 }
 0x1d2   : > { %745 = vrsqrt.f32 %v547_v8  ;;  %vm554_vm2 = vweird.f32 %v547_v8 }
 0x1d8   : > { %v746_v9 = vpop.eup %745 }
 0x1d9   : > { %v549_v10 = vmul.f32 %v746_v9, %v547_v8  ;;  %vm555_vm1 = vweird.f32 %v746_v9 }
 0x1da   : > { %vm556_vm3 = vmor %vm554_vm2, %vm555_vm1 }
 0x1db   : > { %v550_v11 = vmul.f32 %v746_v9, %v549_v10 }
 0x1dd   : > { %v551_v12 = vmul.f32 0.5, %v550_v11 }
 0x1df   : > { %v552_v13 = vsub.f32 1.5, %v551_v12 }
 0x1e1   : > { %v553_v14 = vmul.f32 %v746_v9, %v552_v13 }
 0x1e3   : > { %v557_v17 = vsel %vm556_vm3, %v746_v9, %v553_v14 }
 0x1e4   : > { %v562_v18 = vmul.f32 %v561_v15, %v557_v17 }
 0x1e6   : > { %v563_v21 = vperm.slane %v562_v18, 0 }
 0x1e8   : > { %v564_v23 = vmul.f32 %v563_v21, %v559_v19  ;;  %v565_v24 = vmul.f32 %v563_v21, %v560_v20 }
 0x1ea   : > { %v570_v25 = vadd.f32 %v744_v22, %v564_v23  ;;  %v571_v26 = vadd.f32 %v744_v22, %v565_v24 }
 0x1ec   : > { %v572_v27 = vmax.f32 %v570_v25, 0.0  ;;  %v573_v28 = vmax.f32 %v571_v26, 0.0 }
 0x1ee   : > { %574 = vst [vmem:[%s251_s17] sm:$0xff] %v572_v27 }
 0x1ef   : > { %575 = vst [vmem:[%s251_s17 + $0x8] sm:$0xff] %v573_v28 }
 0x1f0 PF: > { %s16_s21 = sadd.s32 1, %s753_s21  }
 0x1f1   : > { %p13_p4 = scmp.ge.s32.totalorder %s16_s21, 4  }
 0x1f3   :  { %15 = sbr.rel (!%p13_p4) target bundleno = 1 (0x1), region = 74 }

// kernel: resnetv2_forward.26
= control target key start
LH: loop header
LB: loop body
LE: loop exit
PB: predicated region body
PF: predicated region fallthrough
CT: control target
= control target key end

     0   :  { %s1601_s21 = smov 0   ;;  %s1904_s0 = inlined_call_operand.vmem [shape: bf16[2,4,1152], index: 0, kind: input, shape index: {}]   ;;  %s1905_s1 = inlined_call_operand.vmem [shape: bf16[1152,128], index: 1, kind: input, shape index: {}]   ;;  %s1906_s2 = inlined_call_operand.vmem [shape: f32[128,32], index: 2, kind: input, shape index: {}]   ;;  %s1907_s3 = inlined_call_operand.vmem [shape: f32[32,128], index: 3, kind: input, shape index: {}]   ;;  %s1908_s4 = inlined_call_operand.vmem [shape: f32[1,128], index: 4, kind: input, shape index: {}]   ;;  %s1909_s5 = inlined_call_operand.vmem [shape: f32[1,128], index: 5, kind: input, shape index: {}]   ;;  %s1910_s6 = inlined_call_operand.vmem [shape: f32[2,4,128], index: 6, kind: output, shape index: {}]  }
   0x1 LB: > { %s1175_s22 = sadd.s32 4294967295, %s1564_s21   ;;  %p1179_p0 = scmp.ge.s32.totalorder %s1564_s21, 1  ;;  %s1564_s21 = sphi %s1601_s21, %s16_s21  }
   0x2   : > { %p212_p1 = scmp.lt.s32.totalorder %s1564_s21, 3 }
   0x4   : > { %p213_p2 = pnand %p1179_p0, %p212_p1 }
   0x5   : > { %p241_p3 = scmp.lt.s32.totalorder (!%p213_p2), %s1175_s22, 1 }
   0x6   : > { %216 = sbr.rel (%p213_p2) target bundleno = 549 (0x225), region = 44 }
   0xb   : > { %v1481_v0 = vld [vmem:[%s1905_s1 + $0x38] sm:$0xff]  ;;  %v1480_v4 = vld [vmem:[%s1905_s1 + $0x30] sm:$0xff]  ;;  %s1912_s22 = smov (!%p241_p3, %s1175_s22), 1  ;;  %v1479_v8 = vld [vmem:[%s1905_s1 + $0x28] sm:$0xff]  ;;  %vm971_vm0 = vcmask 1043456   ;;  %vm1047_vm1 = vcmask 261120  }
   0xc   : > { %v1497_v1 = vld [vmem:[%s1905_s1 + $0xb8] sm:$0xff]  ;;  %854 = vmatpush.bf16.msra.mxu0 %v1481_v0  ;;  %v1496_v5 = vld [vmem:[%s1905_s1 + $0xb0] sm:$0xff]  ;;  %v1495_v9 = vld [vmem:[%s1905_s1 + $0xa8] sm:$0xff]  ;;  %s1546_s25 = smul.u32 18, %s1912_s22  ;;  %s1181_s16 = sshll.u32 %s1912_s22, 2 }
   0xd   : > { %v1505_v2 = vld [vmem:[%s1905_s1 + $0xf8] sm:$0xff]  ;;  %880 = vmatpush.bf16.msra.mxu2 %v1497_v1  ;;  %v1504_v6 = vld [vmem:[%s1905_s1 + $0xf0] sm:$0xff]  ;;  %v1503_v10 = vld [vmem:[%s1905_s1 + $0xe8] sm:$0xff]  ;;  %s249_s19 = scalar_lea.vmem %s1910_s6, %s1181_s16 }
   0xe   : > { %v1489_v3 = vld [vmem:[%s1905_s1 + $0x78] sm:$0xff]  ;;  %893 = vmatpush.bf16.msra.mxu3 %v1505_v2  ;;  %v1488_v7 = vld [vmem:[%s1905_s1 + $0x70] sm:$0xff]  ;;  %v1487_v11 = vld [vmem:[%s1905_s1 + $0x68] sm:$0xff]  ;;  %s245_s12 = scalar_lea.vmem %s1904_s0, %s1546_s25 }
   0xf   : > { %867 = vmatpush.bf16.msra.mxu1 %v1489_v3  ;;  %v1478_v12 = vld [vmem:[%s1905_s1 + $0x20] sm:$0xff]  ;;  %v1477_v16 = vld [vmem:[%s1905_s1 + $0x18] sm:$0xff]  ;;  %v1476_v21 = vld [vmem:[%s1905_s1 + $0x10] sm:$0xff] }
  0x10   : > { %855 = vmatpush.bf16.msra.mxu0 %v1480_v4  ;;  %v1494_v13 = vld [vmem:[%s1905_s1 + $0xa0] sm:$0xff]  ;;  %v1493_v17 = vld [vmem:[%s1905_s1 + $0x98] sm:$0xff]  ;;  %v1492_v22 = vld [vmem:[%s1905_s1 + $0x90] sm:$0xff] }
  0x11   : > { %881 = vmatpush.bf16.msra.mxu2 %v1496_v5  ;;  %v1502_v14 = vld [vmem:[%s1905_s1 + $0xe0] sm:$0xff]  ;;  %v1501_v18 = vld [vmem:[%s1905_s1 + $0xd8] sm:$0xff]  ;;  %v1500_v23 = vld [vmem:[%s1905_s1 + $0xd0] sm:$0xff] }
  0x12   : > { %894 = vmatpush.bf16.msra.mxu3 %v1504_v6  ;;  %v1486_v15 = vld [vmem:[%s1905_s1 + $0x60] sm:$0xff]  ;;  %v1485_v19 = vld [vmem:[%s1905_s1 + $0x58] sm:$0xff]  ;;  %v1484_v24 = vld [vmem:[%s1905_s1 + $0x50] sm:$0xff] }
  0x13   : > { %868 = vmatpush.bf16.msra.mxu1 %v1488_v7  ;;  %v250_v20 = vld [vmem:[%s245_s12] sm:$0xff]  ;;  %v1475_v25 = vld [vmem:[%s1905_s1 + $0x8] sm:$0xff]  ;;  %v252_v29 = vld [vmem:[%s245_s12 + $0x10] sm:$0x3] }
  0x14   : > { %856 = vmatpush.bf16.msra.mxu0 %v1479_v8  ;;  %398 = vst [vmem:[#allocation1] ss:$4 sm:$0xff] %v250_v20  ;;  %v1491_v26 = vld [vmem:[%s1905_s1 + $0x88] sm:$0xff]  ;;  %v1474_v35 = vld [vmem:[%s1905_s1] sm:$0xff]  ;;  %v1513_v37 = vld [vmem:[%s1905_s1 + $0x138] sm:$0xff] }
  0x15   : > { %882 = vmatpush.bf16.msra.mxu2 %v1495_v9  ;;  %v1499_v27 = vld [vmem:[%s1905_s1 + $0xc8] sm:$0xff]  ;;  %v1490_v36 = vld [vmem:[%s1905_s1 + $0x80] sm:$0xff]  ;;  %v1529_v38 = vld [vmem:[%s1905_s1 + $0x1b8] sm:$0xff] }
  0x16   : > { %895 = vmatpush.bf16.msra.mxu3 %v1503_v10  ;;  %v1483_v28 = vld [vmem:[%s1905_s1 + $0x48] sm:$0xff]  ;;  %v1498_v39 = vld [vmem:[%s1905_s1 + $0xc0] sm:$0xff]  ;;  %v1537_v41 = vld [vmem:[%s1905_s1 + $0x1f8] sm:$0xff] }
  0x17   : > { %869 = vmatpush.bf16.msra.mxu1 %v1487_v11  ;;  %v251_v30 = vld [vmem:[%s245_s12 + $0x8] sm:$0xff]  ;;  %v1482_v40 = vld [vmem:[%s1905_s1 + $0x40] sm:$0xff]  ;;  %v1521_v42 = vld [vmem:[%s1905_s1 + $0x178] sm:$0xff] }
  0x18   : > { %857 = vmatpush.bf16.msra.mxu0 %v1478_v12  ;;  %401 = vst [vmem:[#allocation1 + $0x20] ss:$4 sm:$0xff] %v251_v30  ;;  %v1512_v43 = vld [vmem:[%s1905_s1 + $0x130] sm:$0xff]  ;;  %v1511_v47 = vld [vmem:[%s1905_s1 + $0x128] sm:$0xff]  ;;  %v1510_v51 = vld [vmem:[%s1905_s1 + $0x120] sm:$0xff] }
  0x19   : > { %883 = vmatpush.bf16.msra.mxu2 %v1494_v13  ;;  %v1528_v44 = vld [vmem:[%s1905_s1 + $0x1b0] sm:$0xff]  ;;  %v1527_v48 = vld [vmem:[%s1905_s1 + $0x1a8] sm:$0xff]  ;;  %v1526_v52 = vld [vmem:[%s1905_s1 + $0x1a0] sm:$0xff] }
  0x1a   : > { %896 = vmatpush.bf16.msra.mxu3 %v1502_v14  ;;  %v1536_v45 = vld [vmem:[%s1905_s1 + $0x1f0] sm:$0xff]  ;;  %v1535_v49 = vld [vmem:[%s1905_s1 + $0x1e8] sm:$0xff]  ;;  %v1534_v53 = vld [vmem:[%s1905_s1 + $0x1e0] sm:$0xff] }
  0x1b   : > { %870 = vmatpush.bf16.msra.mxu1 %v1486_v15  ;;  %v404_v31 = vld.sshfl [vmem:[#allocation1 + $0x10] sm:$0xff pattern:$0x73625140]  ;;  %v402_v32 = vld.sshfl [vmem:[#allocation1] sm:$0xff pattern:$0x73625140] }
  0x1c   : > { %858 = vmatpush.bf16.msra.mxu0 %v1477_v16  ;;  %v405_v33 = vld.sshfl [vmem:[#allocation1 + $0x18] sm:$0xff pattern:$0x73625140]  ;;  %v403_v34 = vld.sshfl [vmem:[#allocation1 + $0x8] sm:$0xff pattern:$0x73625140] }
  0x1d   : > { %884 = vmatpush.bf16.msra.mxu2 %v1493_v17  ;;  %411 = vst [vmem:[#allocation1] ss:$4 sm:$0xff] %v252_v29  ;;  %v1520_v46 = vld [vmem:[%s1905_s1 + $0x170] sm:$0xff]  ;;  %v1519_v50 = vld [vmem:[%s1905_s1 + $0x168] sm:$0xff]  ;;  %v1518_v54 = vld [vmem:[%s1905_s1 + $0x160] sm:$0xff] }
  0x1e   : > { %897 = vmatpush.bf16.msra.mxu3 %v1501_v18  ;;  %v1509_v55 = vld [vmem:[%s1905_s1 + $0x118] sm:$0xff]  ;;  %v1508_v59 = vld [vmem:[%s1905_s1 + $0x110] sm:$0xff]  ;;  %v1507_v63 = vld [vmem:[%s1905_s1 + $0x108] sm:$0xff] }
  0x1f   : > { %871 = vmatpush.bf16.msra.mxu1 %v1485_v19  ;;  %v1525_v56 = vld [vmem:[%s1905_s1 + $0x198] sm:$0xff]  ;;  %v1524_v60 = vld [vmem:[%s1905_s1 + $0x190] sm:$0xff]  ;;  %v1523_v0 = vld [vmem:[%s1905_s1 + $0x188] sm:$0xff] }
  0x20   : > { %859 = vmatpush.bf16.msra.mxu0 %v1476_v21  ;;  %v1533_v57 = vld [vmem:[%s1905_s1 + $0x1d8] sm:$0xff]  ;;  %v1532_v61 = vld [vmem:[%s1905_s1 + $0x1d0] sm:$0xff]  ;;  %v1531_v1 = vld [vmem:[%s1905_s1 + $0x1c8] sm:$0xff] }
  0x21   : > { %885 = vmatpush.bf16.msra.mxu2 %v1492_v22  ;;  %v1517_v58 = vld [vmem:[%s1905_s1 + $0x158] sm:$0xff]  ;;  %v1516_v62 = vld [vmem:[%s1905_s1 + $0x150] sm:$0xff]  ;;  %v1515_v2 = vld [vmem:[%s1905_s1 + $0x148] sm:$0xff] }
  0x22   : > { %898 = vmatpush.bf16.msra.mxu3 %v1500_v23  ;;  %v1506_v3 = vld [vmem:[%s1905_s1 + $0x100] sm:$0xff]  ;;  %v1545_v5 = vld [vmem:[%s1905_s1 + $0x238] sm:$0xff]  ;;  %v408_v8 = vld.sshfl [vmem:[#allocation1 + $0x30] sm:$0xff pattern:$0x73625140] }
  0x23   : > { %872 = vmatpush.bf16.msra.mxu1 %v1484_v24  ;;  %v1522_v4 = vld [vmem:[%s1905_s1 + $0x180] sm:$0xff]  ;;  %v1544_v10 = vld [vmem:[%s1905_s1 + $0x230] sm:$0xff]  ;;  %v409_v11 = vld.sshfl [vmem:[#allocation1 + $0x38] sm:$0xff pattern:$0x73625140] }
  0x24   : > { %860 = vmatpush.bf16.msra.mxu0 %v1475_v25  ;;  %v1530_v6 = vld [vmem:[%s1905_s1 + $0x1c0] sm:$0xff]  ;;  %v407_v12 = vld.sshfl [vmem:[#allocation1 + $0x28] sm:$0xff pattern:$0x73625140]  ;;  %v1541_v15 = vld [vmem:[%s1905_s1 + $0x218] sm:$0xff] }
  0x25   : > { %886 = vmatpush.bf16.msra.mxu2 %v1491_v26  ;;  %v1514_v7 = vld [vmem:[%s1905_s1 + $0x140] sm:$0xff]  ;;  %v1543_v13 = vld [vmem:[%s1905_s1 + $0x228] sm:$0xff]  ;;  %v1540_v16 = vld [vmem:[%s1905_s1 + $0x210] sm:$0xff] }
  0x26   : > { %899 = vmatpush.bf16.msra.mxu3 %v1499_v27  ;;  %v406_v9 = vld.sshfl [vmem:[#allocation1 + $0x20] sm:$0xff pattern:$0x73625140]  ;;  %v1539_v17 = vld [vmem:[%s1905_s1 + $0x208] sm:$0xff]  ;;  %v1002_v22 = vld [vmem:[%s1906_s2 + $0x78] sm:$0xff] }
  0x27   : > { %873 = vmatpush.bf16.msra.mxu1 %v1483_v28  ;;  %v1542_v14 = vld [vmem:[%s1905_s1 + $0x220] sm:$0xff]  ;;  %v1001_v23 = vld [vmem:[%s1906_s2 + $0x70] sm:$0xff]  ;;  %v1000_v25 = vld [vmem:[%s1906_s2 + $0x68] sm:$0xff] }
  0x28   : > { %861 = vmatpush.bf16.msra.mxu0 %v1474_v35  ;;  %v1538_v18 = vld [vmem:[%s1905_s1 + $0x200] sm:$0xff]  ;;  %v998_v30 = vld [vmem:[%s1906_s2 + $0x58] sm:$0xff] }
  0x29   : > { %887 = vmatpush.bf16.msra.mxu2 %v1490_v36  ;;  %v412_v19 = vld.sshfl [vmem:[#allocation1] sm:$0xff pattern:$0x73625140]  ;;  %v994_v36 = vld [vmem:[%s1906_s2 + $0x38] sm:$0xff] }
  0x2a   : > { %900 = vmatpush.bf16.msra.mxu3 %v1498_v39  ;;  %v999_v28 = vld [vmem:[%s1906_s2 + $0x60] sm:$0xff]  ;;  %v992_v39 = vld [vmem:[%s1906_s2 + $0x28] sm:$0xff] }
  0x2b   : > { %874 = vmatpush.bf16.msra.mxu1 %v1482_v40  ;;  %862 = vmatmul.bf16.vlgmr.msra.gmra.mxu0 %v402_v32  ;;  %v995_v35 = vld [vmem:[%s1906_s2 + $0x40] sm:$0xff] }
  0x2c   : > { %906 = vmatpush.bf16.msrb.mxu0 %v1513_v37  ;;  %888 = vmatmul.bf16.vlgmr.msra.gmra.mxu2 %v404_v31  ;;  %v997_v31 = vld [vmem:[%s1906_s2 + $0x50] sm:$0xff] }
  0x2d   : > { %932 = vmatpush.bf16.msrb.mxu2 %v1529_v38  ;;  %901 = vmatmul.bf16.vlgmr.msra.gmra.mxu3 %v405_v33  ;;  %v996_v33 = vld [vmem:[%s1906_s2 + $0x48] sm:$0xff]  ;;  %v993_v37 = vld [vmem:[%s1906_s2 + $0x30] sm:$0xff] }
  0x2e   : > { %945 = vmatpush.bf16.msrb.mxu3 %v1537_v41  ;;  %875 = vmatmul.bf16.vlgmr.msra.gmra.mxu1 %v403_v34  ;;  %v991_v41 = vld [vmem:[%s1906_s2 + $0x20] sm:$0xff] }
  0x2f   : > { %919 = vmatpush.bf16.msrb.mxu1 %v1521_v42 }
  0x30   : > { %907 = vmatpush.bf16.msrb.mxu0 %v1512_v43  ;;  %v990_v43 = vld [vmem:[%s1906_s2 + $0x18] sm:$0xff] }
  0x31   : > { %933 = vmatpush.bf16.msrb.mxu2 %v1528_v44 }
  0x32   : > { %946 = vmatpush.bf16.msrb.mxu3 %v1536_v45  ;;  %v989_v45 = vld [vmem:[%s1906_s2 + $0x10] sm:$0xff] }
  0x33   : > { %920 = vmatpush.bf16.msrb.mxu1 %v1520_v46  ;;  %v988_v46 = vld [vmem:[%s1906_s2 + $0x8] sm:$0xff] }
  0x34   : > { %908 = vmatpush.bf16.msrb.mxu0 %v1511_v47 }
  0x35   : > { %934 = vmatpush.bf16.msrb.mxu2 %v1527_v48 }
  0x36   : > { %947 = vmatpush.bf16.msrb.mxu3 %v1535_v49 }
  0x37   : > { %921 = vmatpush.bf16.msrb.mxu1 %v1519_v50  ;;  %v987_v50 = vld [vmem:[%s1906_s2] sm:$0xff] }
  0x38   : > { %909 = vmatpush.bf16.msrb.mxu0 %v1510_v51 }
  0x39   : > { %935 = vmatpush.bf16.msrb.mxu2 %v1526_v52 }
  0x3a   : > { %948 = vmatpush.bf16.msrb.mxu3 %v1534_v53 }
  0x3b   : > { %922 = vmatpush.bf16.msrb.mxu1 %v1518_v54  ;;  %v1046_v54 = vld [vmem:[%s1907_s3 + $0x18] sm:$0xff] }
  0x3c   : > { %910 = vmatpush.bf16.msrb.mxu0 %v1509_v55  ;;  %v1045_v55 = vld [vmem:[%s1907_s3 + $0x10] sm:$0xff] }
  0x3d   : > { %936 = vmatpush.bf16.msrb.mxu2 %v1525_v56 }
  0x3e   : > { %949 = vmatpush.bf16.msrb.mxu3 %v1533_v57 }
  0x3f   : > { %923 = vmatpush.bf16.msrb.mxu1 %v1517_v58  ;;  %v1044_v58 = vld [vmem:[%s1907_s3 + $0x8] sm:$0xff] }
  0x40   : > { %911 = vmatpush.bf16.msrb.mxu0 %v1508_v59  ;;  %v1043_v59 = vld [vmem:[%s1907_s3] sm:$0xff] }
  0x41   : > { %937 = vmatpush.bf16.msrb.mxu2 %v1524_v60 }
  0x42   : > { %950 = vmatpush.bf16.msrb.mxu3 %v1532_v61 }
  0x43   : > { %924 = vmatpush.bf16.msrb.mxu1 %v1516_v62 }
  0x44   : > { %912 = vmatpush.bf16.msrb.mxu0 %v1507_v63 }
  0x45   : > { %938 = vmatpush.bf16.msrb.mxu2 %v1523_v0 }
  0x46   : > { %951 = vmatpush.bf16.msrb.mxu3 %v1531_v1 }
  0x47   : > { %925 = vmatpush.bf16.msrb.mxu1 %v1515_v2 }
  0x48   : > { %913 = vmatpush.bf16.msrb.mxu0 %v1506_v3 }
  0x49   : > { %939 = vmatpush.bf16.msrb.mxu2 %v1522_v4 }
  0x4a   : > { %952 = vmatpush.bf16.msrb.mxu3 %v1530_v6 }
  0x4b   : > { %926 = vmatpush.bf16.msrb.mxu1 %v1514_v7  ;;  %914 = vmatmul.bf16.vlgmr.msrb.gmra.mxu0 %v406_v9 }
  0x4c   : > { %958 = vmatpush.bf16.msra.mxu0 %v1545_v5  ;;  %940 = vmatmul.bf16.vlgmr.msrb.gmra.mxu2 %v408_v8 }
  0x4d   : > { %953 = vmatmul.bf16.vlgmr.msrb.gmra.mxu3 %v409_v11  ;;  %1023 = vmatpush.msra.mxu2 %v1002_v22 }
  0x4e   : > { %927 = vmatmul.bf16.vlgmr.msrb.gmra.mxu1 %v407_v12  ;;  %1063 = vmatpush.msra.mxu3 %v1046_v54 }
  0x4f   : > { %1003 = vmatpush.msra.mxu1 %v1002_v22  ;;  %1024 = vmatpush.msra.mxu2 %v1001_v23 }
  0x50   : > { %959 = vmatpush.bf16.msra.mxu0 %v1544_v10  ;;  %1064 = vmatpush.msra.mxu3 %v1045_v55 }
  0x51   : > { %1004 = vmatpush.msra.mxu1 %v1001_v23  ;;  %1025 = vmatpush.msra.mxu2 %v1000_v25 }
  0x52   : > { %1065 = vmatpush.msra.mxu3 %v1044_v58 }
  0x53   : > { %1005 = vmatpush.msra.mxu1 %v1000_v25  ;;  %1026 = vmatpush.msra.mxu2 %v999_v28 }
  0x54   : > { %960 = vmatpush.bf16.msra.mxu0 %v1543_v13  ;;  %1066 = vmatpush.msra.mxu3 %v1043_v59 }
  0x55   : > { %1006 = vmatpush.msra.mxu1 %v999_v28  ;;  %1027 = vmatpush.msra.mxu2 %v998_v30 }
  0x56   : > { %1087 = vmatpush.msrb.mxu3 %v1046_v54 }
  0x57   : > { %1007 = vmatpush.msra.mxu1 %v998_v30  ;;  %1028 = vmatpush.msra.mxu2 %v997_v31 }
  0x58   : > { %961 = vmatpush.bf16.msra.mxu0 %v1542_v14  ;;  %1088 = vmatpush.msrb.mxu3 %v1045_v55 }
  0x59   : > { %1008 = vmatpush.msra.mxu1 %v997_v31  ;;  %1029 = vmatpush.msra.mxu2 %v996_v33 }
  0x5a   : > { %1089 = vmatpush.msrb.mxu3 %v1044_v58 }
  0x5b   : > { %1009 = vmatpush.msra.mxu1 %v996_v33  ;;  %1030 = vmatpush.msra.mxu2 %v995_v35 }
  0x5c   : > { %962 = vmatpush.bf16.msra.mxu0 %v1541_v15  ;;  %1090 = vmatpush.msrb.mxu3 %v1043_v59 }
  0x5d   : > { %1010 = vmatpush.msra.mxu1 %v995_v35  ;;  %1031 = vmatpush.msra.mxu2 %v994_v36 }
  0x5f   : > { %1011 = vmatpush.msra.mxu1 %v994_v36  ;;  %1032 = vmatpush.msra.mxu2 %v993_v37 }
  0x60   : > { %963 = vmatpush.bf16.msra.mxu0 %v1540_v16 }
  0x61   : > { %1012 = vmatpush.msra.mxu1 %v993_v37  ;;  %1033 = vmatpush.msra.mxu2 %v992_v39 }
  0x63   : > { %1013 = vmatpush.msra.mxu1 %v992_v39  ;;  %1034 = vmatpush.msra.mxu2 %v991_v41 }
  0x64   : > { %964 = vmatpush.bf16.msra.mxu0 %v1539_v17 }
  0x65   : > { %1014 = vmatpush.msra.mxu1 %v991_v41  ;;  %1035 = vmatpush.msra.mxu2 %v990_v43 }
  0x67   : > { %1015 = vmatpush.msra.mxu1 %v990_v43  ;;  %1036 = vmatpush.msra.mxu2 %v989_v45 }
  0x68   : > { %965 = vmatpush.bf16.msra.mxu0 %v1538_v18 }
  0x69   : > { %1016 = vmatpush.msra.mxu1 %v989_v45  ;;  %1037 = vmatpush.msra.mxu2 %v988_v46 }
  0x6b   : > { %966 = vmatmul.bf16.vlgmr.msra.gmra.mxu0 %v412_v19  ;;  %1017 = vmatpush.msra.mxu1 %v988_v46 }
  0x6c   : > { %1038 = vmatpush.msra.mxu2 %v987_v50 }
  0x6d   : > { %1018 = vmatpush.msra.mxu1 %v987_v50 }
  0xa8   : > { %v863_v20 = vpop.f32.mrf.mxu0 }
  0xab   : > { %v876_v21 = vpop.f32.mrf.mxu1 }
  0xac   : > { %v877_v42 = vadd.f32 %v876_v21, %v863_v20 }
  0xaf   : > { %v889_v24 = vpop.f32.mrf.mxu2 }
  0xb0   : > { %v902_v26 = vpop.f32.mrf.mxu3  ;;  %v865_v27 = vpop.f32.mrf.mxu0  ;;  %v890_v47 = vadd.f32 %v889_v24, %v877_v42 }
  0xb2   : > { %v903_v52 = vadd.f32 %v902_v26, %v890_v47 }
  0xb3   : > { %v878_v29 = vpop.f32.mrf.mxu1 }
  0xb7   : > { %v891_v32 = vpop.f32.mrf.mxu2 }
  0xb8   : > { %v904_v34 = vpop.f32.mrf.mxu3  ;;  %v1111_v32 = vld [vmem:[%s1908_s4] sm:$0x1] }
  0xc8   : > { %v915_v38 = vpop.f32.mrf.mxu0 }
  0xc9   : > { %v916_v56 = vadd.f32 %v915_v38, %v903_v52  ;;  %v1555_v38 = vld [vmem:[%s1909_s5] ss:$0 sm:$0xff] }
  0xcb   : > { %v928_v40 = vpop.f32.mrf.mxu1 }
  0xcc   : > { %v929_v60 = vadd.f32 %v928_v40, %v916_v56 }
  0xcf   : > { %v941_v44 = vpop.f32.mrf.mxu2 }
  0xd0   : > { %v954_v48 = vpop.f32.mrf.mxu3  ;;  %v917_v49 = vpop.f32.mrf.mxu0  ;;  %v942_v61 = vadd.f32 %v941_v44, %v929_v60 }
  0xd2   : > { %v955_v62 = vadd.f32 %v954_v48, %v942_v61 }
  0xd3   : > { %v930_v51 = vpop.f32.mrf.mxu1 }
  0xd7   : > { %v943_v53 = vpop.f32.mrf.mxu2 }
  0xd8   : > { %v956_v57 = vpop.f32.mrf.mxu3 }
  0xe8   : > { %v967_v63 = vpop.f32.mrf.mxu0 }
  0xe9   : > { %v968_v0 = vadd.f32 %v967_v63, %v955_v62 }
  0xeb   : > { %v972_v1 = vsel %vm971_vm0, %v968_v0, 0.0  ;;  %v979_v2 = vmul.f32 %v968_v0, %v968_v0 }
  0xec   : > { %v973_v3 = vrot.slane %v972_v1, 4 }
  0xed   : > { %v980_v4 = vsel %vm971_vm0, %v979_v2, 0.0 }
  0xee   : > { %v974_v5 = vadd.f32 %v973_v3, %v972_v1  ;;  %v981_v6 = vrot.slane %v980_v4, 4 }
  0xf0   : > { %v975_v7 = vrot.slane %v974_v5, 2  ;;  %v982_v8 = vadd.f32 %v981_v6, %v980_v4  ;;  %v969_v9 = vpop.f32.mrf.mxu0 }
  0xf2   : > { %v976_v10 = vadd.f32 %v975_v7, %v974_v5  ;;  %v983_v11 = vrot.slane %v982_v8, 2 }
  0xf4   : > { %v977_v12 = vrot.slane %v976_v10, 1  ;;  %v984_v13 = vadd.f32 %v983_v11, %v982_v8 }
  0xf6   : > { %v978_v14 = vadd.f32 %v977_v12, %v976_v10  ;;  %v985_v15 = vrot.slane %v984_v13, 1 }
  0xf8   : > { %1019 = vmatmul.f32.vlgmr.msra.gmra.mxu1 %v978_v14  ;;  %v986_v16 = vadd.f32 %v985_v15, %v984_v13 }
  0xfa   : > { %1039 = vmatmul.f32.vlgmr.msra.gmra.mxu2 %v986_v16 }
 0x175   : > { %v1020_v17 = vpop.f32.mrf.mxu1 }
 0x176   : > { %1470 = vmatmul.msk.f32.vlgmr.msra.gmra.mxu3 %vm1047_vm1, %v1020_v17 }
 0x17d   : > { %v1040_v18 = vpop.f32.mrf.mxu2 }
 0x17e   : > { %1471 = vmatmul.msk.f32.vlgmr.msrb.gmra.mxu3 %vm1047_vm1, %v1040_v18 }
 0x1f9   : > { %v1068_v19 = vpop.f32.mrf.mxu3 }
 0x1fa   : > { %v1071_v20 = vmul.f32 0.0625, %v1068_v19 }
 0x1fc   : > { %v1096_v22 = vmul.f32 %v1071_v20, %v1071_v20  ;;  %v1109_v33 = vperm.slane %v1071_v20, 0 }
 0x1fe   : > { %v1110_v36 = vsub.f32 %v968_v0, %v1109_v33 }
 0x201   : > { %v1092_v21 = vpop.f32.mrf.mxu3 }
 0x202   : > { %v1095_v23 = vmul.f32 0.0625, %v1092_v21 }
 0x204   : > { %v1097_v24 = vsub.f32 %v1095_v23, %v1096_v22 }
 0x206   : > { %v1098_v25 = vadd.f32 1e-06, %v1097_v24 }
 0x208   : > { %1556 = vrsqrt.f32 %v1098_v25  ;;  %vm1105_vm3 = vweird.f32 %v1098_v25 }
 0x20e   : > { %v1557_v26 = vpop.eup %1556 }
 0x20f   : > { %v1100_v27 = vmul.f32 %v1557_v26, %v1098_v25  ;;  %vm1106_vm2 = vweird.f32 %v1557_v26 }
 0x210   : > { %vm1107_vm4 = vmor %vm1105_vm3, %vm1106_vm2 }
 0x211   : > { %v1101_v28 = vmul.f32 %v1557_v26, %v1100_v27 }
 0x213   : > { %v1102_v29 = vmul.f32 0.5, %v1101_v28 }
 0x215   : > { %v1103_v30 = vsub.f32 1.5, %v1102_v29 }
 0x217   : > { %v1104_v31 = vmul.f32 %v1557_v26, %v1103_v30 }
 0x219   : > { %v1108_v34 = vsel %vm1107_vm4, %v1557_v26, %v1104_v31 }
 0x21a   : > { %v1112_v35 = vmul.f32 %v1111_v32, %v1108_v34 }
 0x21c   : > { %v1113_v37 = vperm.slane %v1112_v35, 0 }
 0x21e   : > { %v1114_v39 = vmul.f32 %v1113_v37, %v1110_v36 }
 0x220   : > { %v1119_v40 = vadd.f32 %v1555_v38, %v1114_v39 }
 0x222   : > { %v1120_v41 = vmax.f32 %v1119_v40, 0.0 }
 0x224   : > { %1121 = vst [vmem:[%s249_s19] sm:$0xf] %v1120_v41 }
 0x225 PF: > { %s16_s21 = sadd.s32 1, %s1564_s21  }
 0x226   : > { %p13_p4 = scmp.ge.s32.totalorder %s16_s21, 4  }
 0x228   :  { %15 = sbr.rel (!%p13_p4) target bundleno = 1 (0x1), region = 75 }

// kernel: resnetv2_forward.27
= control target key start
LH: loop header
LB: loop body
LE: loop exit
PB: predicated region body
PF: predicated region fallthrough
CT: control target
= control target key end

     0   :  { %s1461_s24 = smov 0   ;;  %s2245_s0 = inlined_call_operand.vmem [shape: bf16[2,4,128], index: 0, kind: input, shape index: {}]   ;;  %s2246_s1 = inlined_call_operand.vmem [shape: bf16[128,512], index: 1, kind: input, shape index: {}]   ;;  %s2247_s2 = inlined_call_operand.vmem [shape: f32[2,4,512], index: 2, kind: input, shape index: {}]   ;;  %s2248_s3 = inlined_call_operand.vmem [shape: f32[512,32], index: 3, kind: input, shape index: {}]   ;;  %s2249_s4 = inlined_call_operand.vmem [shape: f32[32,512], index: 4, kind: input, shape index: {}]   ;;  %s2250_s5 = inlined_call_operand.vmem [shape: f32[1,512], index: 5, kind: input, shape index: {}]   ;;  %s2251_s6 = inlined_call_operand.vmem [shape: f32[1,512], index: 6, kind: input, shape index: {}]   ;;  %s2252_s7 = inlined_call_operand.vmem [shape: f32[2,4,512], index: 7, kind: output, shape index: {}]  }
   0x1 LB: > { %s1215_s25 = sadd.s32 4294967295, %s1419_s24   ;;  %p1219_p0 = scmp.ge.s32.totalorder %s1419_s24, 1  ;;  %s1419_s24 = sphi %s1461_s24, %s17_s24  }
   0x2   : > { %p246_p1 = scmp.lt.s32.totalorder %s1419_s24, 3 }
   0x4   : > { %p247_p2 = pnand %p1219_p0, %p246_p1 }
   0x5   : > { %p282_p3 = scmp.lt.s32.totalorder (!%p247_p2), %s1215_s25, 1 }
   0x6   : > { %250 = sbr.rel (%p247_p2) target bundleno = 510 (0x1fe), region = 48 }
   0xb   : > { %v1339_v0 = vld [vmem:[%s2246_s1 + $0xe0] sm:$0xf]  ;;  %v1395_v1 = vld [vmem:[%s2246_s1 + $0xec] sm:$0xf0]  ;;  %v1393_v2 = vld [vmem:[%s2246_s1 + $0xe4] sm:$0xf] }
   0xc   : > { %v1340_v3 = vor.u32 %v1395_v1, %v1339_v0  ;;  %v1341_v4 = vld [vmem:[%s2246_s1 + $0xf0] sm:$0xf0]  ;;  %v1347_v5 = vld [vmem:[%s2246_s1 + $0xe8] sm:$0xf]  ;;  %v1396_v6 = vld [vmem:[%s2246_s1 + $0xf4] sm:$0xf0] }
   0xd   : > { %v1344_v7 = vor.u32 %v1393_v2, %v1341_v4  ;;  %v1348_v8 = vor.u32 %v1396_v6, %v1347_v5  ;;  %v1394_v9 = vld [vmem:[%s2246_s1 + $0xec] sm:$0xf]  ;;  %v1349_v10 = vld [vmem:[%s2246_s1 + $0xf8] sm:$0xf0]  ;;  %v1323_v11 = vld [vmem:[%s2246_s1 + $0xc0] sm:$0xf] }
   0xe   : > { %489 = vmatpush.bf16.msra.mxu0 %v1340_v3  ;;  %v1352_v12 = vor.u32 %v1394_v9, %v1349_v10  ;;  %v1391_v13 = vld [vmem:[%s2246_s1 + $0xcc] sm:$0xf0]  ;;  %v1389_v14 = vld [vmem:[%s2246_s1 + $0xc4] sm:$0xf]  ;;  %v1325_v15 = vld [vmem:[%s2246_s1 + $0xd0] sm:$0xf0] }
   0xf   : > { %502 = vmatpush.bf16.msra.mxu1 %v1344_v7  ;;  %515 = vmatpush.bf16.msra.mxu2 %v1348_v8  ;;  %v1324_v16 = vor.u32 %v1391_v13, %v1323_v11  ;;  %v1328_v17 = vor.u32 %v1389_v14, %v1325_v15  ;;  %v1331_v18 = vld [vmem:[%s2246_s1 + $0xc8] sm:$0xf]  ;;  %v1392_v19 = vld [vmem:[%s2246_s1 + $0xd4] sm:$0xf0]  ;;  %v1390_v20 = vld [vmem:[%s2246_s1 + $0xcc] sm:$0xf] }
  0x10   : > { %528 = vmatpush.bf16.msra.mxu3 %v1352_v12  ;;  %v1332_v21 = vor.u32 %v1392_v19, %v1331_v18  ;;  %v1333_v22 = vld [vmem:[%s2246_s1 + $0xd8] sm:$0xf0]  ;;  %v1307_v23 = vld [vmem:[%s2246_s1 + $0xa0] sm:$0xf]  ;;  %v1387_v24 = vld [vmem:[%s2246_s1 + $0xac] sm:$0xf0] }
  0x11   : > { %v1336_v25 = vor.u32 %v1390_v20, %v1333_v22  ;;  %v1385_v26 = vld [vmem:[%s2246_s1 + $0xa4] sm:$0xf]  ;;  %v1309_v27 = vld [vmem:[%s2246_s1 + $0xb0] sm:$0xf0]  ;;  %v1315_v28 = vld [vmem:[%s2246_s1 + $0xa8] sm:$0xf]  ;;  %v1308_v29 = vor.u32 %v1387_v24, %v1307_v23 }
  0x12   : > { %490 = vmatpush.bf16.msra.mxu0 %v1324_v16  ;;  %v1388_v30 = vld [vmem:[%s2246_s1 + $0xb4] sm:$0xf0]  ;;  %v1386_v31 = vld [vmem:[%s2246_s1 + $0xac] sm:$0xf]  ;;  %v1317_v32 = vld [vmem:[%s2246_s1 + $0xb8] sm:$0xf0]  ;;  %v1312_v33 = vor.u32 %v1385_v26, %v1309_v27 }
  0x13   : > { %503 = vmatpush.bf16.msra.mxu1 %v1328_v17  ;;  %516 = vmatpush.bf16.msra.mxu2 %v1332_v21  ;;  %v1316_v34 = vor.u32 %v1388_v30, %v1315_v28  ;;  %v1291_v35 = vld [vmem:[%s2246_s1 + $0x80] sm:$0xf]  ;;  %v1383_v36 = vld [vmem:[%s2246_s1 + $0x8c] sm:$0xf0]  ;;  %v1381_v37 = vld [vmem:[%s2246_s1 + $0x84] sm:$0xf]  ;;  %v1320_v38 = vor.u32 %v1386_v31, %v1317_v32 }
  0x14   : > { %529 = vmatpush.bf16.msra.mxu3 %v1336_v25  ;;  %v1293_v39 = vld [vmem:[%s2246_s1 + $0x90] sm:$0xf0]  ;;  %v1299_v40 = vld [vmem:[%s2246_s1 + $0x88] sm:$0xf]  ;;  %v1384_v41 = vld [vmem:[%s2246_s1 + $0x94] sm:$0xf0]  ;;  %v1292_v44 = vor.u32 %v1383_v36, %v1291_v35 }
  0x15   : > { %v1382_v42 = vld [vmem:[%s2246_s1 + $0x8c] sm:$0xf]  ;;  %v1301_v43 = vld [vmem:[%s2246_s1 + $0x98] sm:$0xf0]  ;;  %v1296_v45 = vor.u32 %v1381_v37, %v1293_v39  ;;  %v1300_v46 = vor.u32 %v1384_v41, %v1299_v40  ;;  %v1275_v47 = vld [vmem:[%s2246_s1 + $0x60] sm:$0xf] }
  0x16   : > { %491 = vmatpush.bf16.msra.mxu0 %v1308_v29  ;;  %v1379_v48 = vld [vmem:[%s2246_s1 + $0x6c] sm:$0xf0]  ;;  %v1377_v49 = vld [vmem:[%s2246_s1 + $0x64] sm:$0xf]  ;;  %v1304_v50 = vor.u32 %v1382_v42, %v1301_v43  ;;  %v1277_v51 = vld [vmem:[%s2246_s1 + $0x70] sm:$0xf0] }
  0x17   : > { %504 = vmatpush.bf16.msra.mxu1 %v1312_v33  ;;  %517 = vmatpush.bf16.msra.mxu2 %v1316_v34  ;;  %v1283_v52 = vld [vmem:[%s2246_s1 + $0x68] sm:$0xf]  ;;  %v1380_v53 = vld [vmem:[%s2246_s1 + $0x74] sm:$0xf0]  ;;  %v1378_v54 = vld [vmem:[%s2246_s1 + $0x6c] sm:$0xf]  ;;  %v1276_v56 = vor.u32 %v1379_v48, %v1275_v47  ;;  %v1280_v57 = vor.u32 %v1377_v49, %v1277_v51 }
  0x18   : > { %530 = vmatpush.bf16.msra.mxu3 %v1320_v38  ;;  %v1285_v55 = vld [vmem:[%s2246_s1 + $0x78] sm:$0xf0]  ;;  %v1284_v58 = vor.u32 %v1380_v53, %v1283_v52  ;;  %v1259_v59 = vld [vmem:[%s2246_s1 + $0x40] sm:$0xf]  ;;  %v1375_v60 = vld [vmem:[%s2246_s1 + $0x4c] sm:$0xf0] }
  0x19   : > { %v1373_v61 = vld [vmem:[%s2246_s1 + $0x44] sm:$0xf]  ;;  %v1288_v62 = vor.u32 %v1378_v54, %v1285_v55  ;;  %v1261_v63 = vld [vmem:[%s2246_s1 + $0x50] sm:$0xf0]  ;;  %v1267_v0 = vld [vmem:[%s2246_s1 + $0x48] sm:$0xf]  ;;  %v1260_v4 = vor.u32 %v1375_v60, %v1259_v59 }
  0x1a   : > { %492 = vmatpush.bf16.msra.mxu0 %v1292_v44  ;;  %v1376_v1 = vld [vmem:[%s2246_s1 + $0x54] sm:$0xf0]  ;;  %v1374_v2 = vld [vmem:[%s2246_s1 + $0x4c] sm:$0xf]  ;;  %v1269_v3 = vld [vmem:[%s2246_s1 + $0x58] sm:$0xf0]  ;;  %v1264_v6 = vor.u32 %v1373_v61, %v1261_v63 }
  0x1b   : > { %505 = vmatpush.bf16.msra.mxu1 %v1296_v45  ;;  %518 = vmatpush.bf16.msra.mxu2 %v1300_v46  ;;  %v1243_v5 = vld [vmem:[%s2246_s1 + $0x20] sm:$0xf]  ;;  %v1268_v7 = vor.u32 %v1376_v1, %v1267_v0  ;;  %v1371_v8 = vld [vmem:[%s2246_s1 + $0x2c] sm:$0xf0]  ;;  %v1369_v9 = vld [vmem:[%s2246_s1 + $0x24] sm:$0xf]  ;;  %v1272_v11 = vor.u32 %v1374_v2, %v1269_v3 }
  0x1c   : > { %531 = vmatpush.bf16.msra.mxu3 %v1304_v50  ;;  %v1245_v10 = vld [vmem:[%s2246_s1 + $0x30] sm:$0xf0]  ;;  %v1251_v12 = vld [vmem:[%s2246_s1 + $0x28] sm:$0xf]  ;;  %v1372_v13 = vld [vmem:[%s2246_s1 + $0x34] sm:$0xf0]  ;;  %v1244_v16 = vor.u32 %v1371_v8, %v1243_v5 }
  0x1d   : > { %v1370_v14 = vld [vmem:[%s2246_s1 + $0x2c] sm:$0xf]  ;;  %v1253_v15 = vld [vmem:[%s2246_s1 + $0x38] sm:$0xf0]  ;;  %v1227_v17 = vld [vmem:[%s2246_s1] sm:$0xf]  ;;  %v1248_v18 = vor.u32 %v1369_v9, %v1245_v10  ;;  %v1252_v19 = vor.u32 %v1372_v13, %v1251_v12 }
  0x1e   : > { %493 = vmatpush.bf16.msra.mxu0 %v1276_v56  ;;  %s2254_s25 = smov (!%p282_p3, %s1215_s25), 1  ;;  %v1367_v20 = vld [vmem:[%s2246_s1 + $0xc] sm:$0xf0]  ;;  %v1365_v21 = vld [vmem:[%s2246_s1 + $0x4] sm:$0xf]  ;;  %v1256_v23 = vor.u32 %v1370_v14, %v1253_v15  ;;  %v1680_v34 = vld [vmem:[%s2248_s3 + $0x78] sm:$0xff] }
  0x1f   : > { %506 = vmatpush.bf16.msra.mxu1 %v1280_v57  ;;  %519 = vmatpush.bf16.msra.mxu2 %v1284_v58  ;;  %v1229_v22 = vld [vmem:[%s2246_s1 + $0x10] sm:$0xf0]  ;;  %v1235_v24 = vld [vmem:[%s2246_s1 + $0x8] sm:$0xf]  ;;  %v1368_v25 = vld [vmem:[%s2246_s1 + $0x14] sm:$0xf0]  ;;  %v1228_v28 = vor.u32 %v1367_v20, %v1227_v17 }
  0x20   : > { %532 = vmatpush.bf16.msra.mxu3 %v1288_v62  ;;  %s1220_s22 = sshll.u32 %s2254_s25, 1  ;;  %s1363_s23 = sshll.u32 %s2254_s25, 4  ;;  %v1366_v26 = vld [vmem:[%s2246_s1 + $0xc] sm:$0xf]  ;;  %v1237_v27 = vld [vmem:[%s2246_s1 + $0x18] sm:$0xf0]  ;;  %v1232_v31 = vor.u32 %v1365_v21, %v1229_v22  ;;  %v1236_v32 = vor.u32 %v1368_v25, %v1235_v24 }
  0x21   : > { %s290_s9 = scalar_lea.vmem %s2247_s2, %s1363_s23  ;;  %s285_s12 = scalar_lea.vmem %s2245_s0, %s1220_s22  ;;  %v1240_v33 = vor.u32 %v1366_v26, %v1237_v27  ;;  %v1685_v36 = vld [vmem:[%s2248_s3 + $0xf8] sm:$0xff]  ;;  %v1691_v37 = vld [vmem:[%s2248_s3 + $0x70] sm:$0xff]  ;;  %v1707_v40 = vld [vmem:[%s2248_s3 + $0x68] sm:$0xff]  ;;  %vm541_vm0 = vcmask 1043456   ;;  %vm842_vm1 = vcmask 261120  }
  0x22   : > { %494 = vmatpush.bf16.msra.mxu0 %v1260_v4  ;;  %v1113_v29 = vld [vmem:[%s290_s9] sm:$0xff]  ;;  %v1114_v30 = vld [vmem:[%s290_s9 + $0x8] sm:$0xff]  ;;  %v1697_v38 = vld [vmem:[%s2248_s3 + $0xf0] sm:$0xff]  ;;  %s295_s19 = scalar_lea.vmem %s2252_s7, %s1363_s23 }
  0x23   : > { %507 = vmatpush.bf16.msra.mxu1 %v1264_v6  ;;  %520 = vmatpush.bf16.msra.mxu2 %v1268_v7  ;;  %1117 = vst [vmem:[#allocation1] ss:$2 sm:$0xff] %v1113_v29  ;;  %v296_v35 = vld [vmem:[%s285_s12] sm:$0x3]  ;;  %v1702_v39 = vld [vmem:[%s2248_s3 + $0x178] sm:$0xff]  ;;  %v1718_v42 = vld [vmem:[%s2248_s3 + $0xe8] sm:$0xff] }
  0x24   : > { %533 = vmatpush.bf16.msra.mxu3 %v1272_v11  ;;  %1119 = vst [vmem:[#allocation1 + $0x10] ss:$2 sm:$0xff] %v1114_v30  ;;  %v1712_v41 = vld [vmem:[%s2248_s3 + $0x1f8] sm:$0xff]  ;;  %v1723_v43 = vld [vmem:[%s2248_s3 + $0x170] sm:$0xff]  ;;  %v1729_v44 = vld [vmem:[%s2248_s3 + $0x60] sm:$0xff] }
  0x25   : > { %v1735_v45 = vld [vmem:[%s2248_s3 + $0x1f0] sm:$0xff]  ;;  %v1741_v46 = vld [vmem:[%s2248_s3 + $0xe0] sm:$0xff]  ;;  %v1747_v47 = vld [vmem:[%s2248_s3 + $0x168] sm:$0xff] }
  0x26   : > { %495 = vmatpush.bf16.msra.mxu0 %v1244_v16  ;;  %v1753_v48 = vld [vmem:[%s2248_s3 + $0x58] sm:$0xff]  ;;  %v1759_v49 = vld [vmem:[%s2248_s3 + $0x1e8] sm:$0xff]  ;;  %v1771_v51 = vld [vmem:[%s2248_s3 + $0x160] sm:$0xff] }
  0x27   : > { %508 = vmatpush.bf16.msra.mxu1 %v1248_v18  ;;  %521 = vmatpush.bf16.msra.mxu2 %v1252_v19  ;;  %v1765_v50 = vld [vmem:[%s2248_s3 + $0xd8] sm:$0xff]  ;;  %v1777_v52 = vld [vmem:[%s2248_s3 + $0x50] sm:$0xff]  ;;  %v1783_v53 = vld [vmem:[%s2248_s3 + $0x1e0] sm:$0xff] }
  0x28   : > { %534 = vmatpush.bf16.msra.mxu3 %v1256_v23  ;;  %v1789_v54 = vld [vmem:[%s2248_s3 + $0xd0] sm:$0xff]  ;;  %v1795_v55 = vld [vmem:[%s2248_s3 + $0x158] sm:$0xff]  ;;  %v1801_v56 = vld [vmem:[%s2248_s3 + $0x48] sm:$0xff] }
  0x29   : > { %v1807_v57 = vld [vmem:[%s2248_s3 + $0x1d8] sm:$0xff]  ;;  %v1813_v58 = vld [vmem:[%s2248_s3 + $0xc8] sm:$0xff]  ;;  %v1819_v59 = vld [vmem:[%s2248_s3 + $0x150] sm:$0xff] }
  0x2a   : > { %496 = vmatpush.bf16.msra.mxu0 %v1228_v28  ;;  %v1825_v60 = vld [vmem:[%s2248_s3 + $0x40] sm:$0xff]  ;;  %v1831_v61 = vld [vmem:[%s2248_s3 + $0x1d0] sm:$0xff]  ;;  %v1843_v63 = vld [vmem:[%s2248_s3 + $0x148] sm:$0xff] }
  0x2b   : > { %509 = vmatpush.bf16.msra.mxu1 %v1232_v31  ;;  %522 = vmatpush.bf16.msra.mxu2 %v1236_v32  ;;  %v1837_v62 = vld [vmem:[%s2248_s3 + $0xc0] sm:$0xff]  ;;  %v1849_v0 = vld [vmem:[%s2248_s3 + $0x38] sm:$0xff]  ;;  %v1855_v1 = vld [vmem:[%s2248_s3 + $0x1c8] sm:$0xff] }
  0x2c   : > { %535 = vmatpush.bf16.msra.mxu3 %v1240_v33  ;;  %v1861_v2 = vld [vmem:[%s2248_s3 + $0xb8] sm:$0xff]  ;;  %v1867_v3 = vld [vmem:[%s2248_s3 + $0x140] sm:$0xff]  ;;  %v1873_v4 = vld [vmem:[%s2248_s3 + $0x30] sm:$0xff] }
  0x2d   : > { %497 = vmatmul.bf16.vlgmr.msra.gmra.mxu0 %v296_v35  ;;  %v1879_v5 = vld [vmem:[%s2248_s3 + $0x1c0] sm:$0xff]  ;;  %v1885_v6 = vld [vmem:[%s2248_s3 + $0xb0] sm:$0xff]  ;;  %v1891_v7 = vld [vmem:[%s2248_s3 + $0x138] sm:$0xff] }
  0x2e   : > { %666 = vmatpush.msrb.mxu0 %v1680_v34  ;;  %510 = vmatmul.bf16.vlgmr.msra.gmra.mxu1 %v296_v35  ;;  %v1897_v8 = vld [vmem:[%s2248_s3 + $0x28] sm:$0xff]  ;;  %v1903_v9 = vld [vmem:[%s2248_s3 + $0x1b8] sm:$0xff]  ;;  %v1915_v11 = vld [vmem:[%s2248_s3 + $0x130] sm:$0xff] }
  0x2f   : > { %686 = vmatpush.msrb.mxu1 %v1685_v36  ;;  %523 = vmatmul.bf16.vlgmr.msra.gmra.mxu2 %v296_v35  ;;  %v1909_v10 = vld [vmem:[%s2248_s3 + $0xa8] sm:$0xff]  ;;  %v1921_v12 = vld [vmem:[%s2248_s3 + $0x20] sm:$0xff]  ;;  %v1927_v13 = vld [vmem:[%s2248_s3 + $0x1b0] sm:$0xff] }
  0x30   : > { %536 = vmatmul.bf16.vlgmr.msra.gmra.mxu3 %v296_v35  ;;  %667 = vmatpush.msrb.mxu0 %v1691_v37  ;;  %v1933_v14 = vld [vmem:[%s2248_s3 + $0xa0] sm:$0xff]  ;;  %v1939_v15 = vld [vmem:[%s2248_s3 + $0x128] sm:$0xff]  ;;  %v1945_v16 = vld [vmem:[%s2248_s3 + $0x18] sm:$0xff] }
  0x31   : > { %687 = vmatpush.msrb.mxu1 %v1697_v38  ;;  %706 = vmatpush.msrb.mxu2 %v1702_v39  ;;  %v1951_v17 = vld [vmem:[%s2248_s3 + $0x1a8] sm:$0xff]  ;;  %v1957_v18 = vld [vmem:[%s2248_s3 + $0x98] sm:$0xff]  ;;  %v1963_v19 = vld [vmem:[%s2248_s3 + $0x120] sm:$0xff] }
  0x32   : > { %668 = vmatpush.msrb.mxu0 %v1707_v40  ;;  %726 = vmatpush.msrb.mxu3 %v1712_v41  ;;  %v1969_v20 = vld [vmem:[%s2248_s3 + $0x10] sm:$0xff]  ;;  %v1975_v21 = vld [vmem:[%s2248_s3 + $0x1a0] sm:$0xff]  ;;  %v1987_v23 = vld [vmem:[%s2248_s3 + $0x118] sm:$0xff] }
  0x33   : > { %688 = vmatpush.msrb.mxu1 %v1718_v42  ;;  %707 = vmatpush.msrb.mxu2 %v1723_v43  ;;  %v1981_v22 = vld [vmem:[%s2248_s3 + $0x90] sm:$0xff]  ;;  %v1993_v24 = vld [vmem:[%s2248_s3 + $0x8] sm:$0xff]  ;;  %v1999_v25 = vld [vmem:[%s2248_s3 + $0x198] sm:$0xff] }
  0x34   : > { %669 = vmatpush.msrb.mxu0 %v1729_v44  ;;  %727 = vmatpush.msrb.mxu3 %v1735_v45  ;;  %v2005_v26 = vld [vmem:[%s2248_s3 + $0x88] sm:$0xff]  ;;  %v2011_v27 = vld [vmem:[%s2248_s3 + $0x110] sm:$0xff]  ;;  %v2017_v28 = vld [vmem:[%s2248_s3] sm:$0xff] }
  0x35   : > { %689 = vmatpush.msrb.mxu1 %v1741_v46  ;;  %708 = vmatpush.msrb.mxu2 %v1747_v47  ;;  %v2023_v29 = vld [vmem:[%s2248_s3 + $0x190] sm:$0xff]  ;;  %v2029_v30 = vld [vmem:[%s2248_s3 + $0x80] sm:$0xff]  ;;  %v2037_v31 = vld [vmem:[%s2248_s3 + $0x108] sm:$0xff] }
  0x36   : > { %670 = vmatpush.msrb.mxu0 %v1753_v48  ;;  %728 = vmatpush.msrb.mxu3 %v1759_v49  ;;  %v2044_v32 = vld [vmem:[%s2248_s3 + $0x188] sm:$0xff]  ;;  %v2051_v33 = vld [vmem:[%s2248_s3 + $0x100] sm:$0xff] }
  0x37   : > { %690 = vmatpush.msrb.mxu1 %v1765_v50  ;;  %709 = vmatpush.msrb.mxu2 %v1771_v51  ;;  %v2058_v35 = vld [vmem:[%s2248_s3 + $0x180] sm:$0xff] }
  0x38   : > { %671 = vmatpush.msrb.mxu0 %v1777_v52  ;;  %729 = vmatpush.msrb.mxu3 %v1783_v53 }
  0x39   : > { %691 = vmatpush.msrb.mxu1 %v1789_v54  ;;  %710 = vmatpush.msrb.mxu2 %v1795_v55 }
  0x3a   : > { %672 = vmatpush.msrb.mxu0 %v1801_v56  ;;  %730 = vmatpush.msrb.mxu3 %v1807_v57 }
  0x3b   : > { %692 = vmatpush.msrb.mxu1 %v1813_v58  ;;  %711 = vmatpush.msrb.mxu2 %v1819_v59 }
  0x3c   : > { %673 = vmatpush.msrb.mxu0 %v1825_v60  ;;  %731 = vmatpush.msrb.mxu3 %v1831_v61 }
  0x3d   : > { %693 = vmatpush.msrb.mxu1 %v1837_v62  ;;  %712 = vmatpush.msrb.mxu2 %v1843_v63 }
  0x3e   : > { %674 = vmatpush.msrb.mxu0 %v1849_v0  ;;  %732 = vmatpush.msrb.mxu3 %v1855_v1 }
  0x3f   : > { %694 = vmatpush.msrb.mxu1 %v1861_v2  ;;  %713 = vmatpush.msrb.mxu2 %v1867_v3 }
  0x40   : > { %675 = vmatpush.msrb.mxu0 %v1873_v4  ;;  %733 = vmatpush.msrb.mxu3 %v1879_v5 }
  0x41   : > { %695 = vmatpush.msrb.mxu1 %v1885_v6  ;;  %714 = vmatpush.msrb.mxu2 %v1891_v7 }
  0x42   : > { %676 = vmatpush.msrb.mxu0 %v1897_v8  ;;  %734 = vmatpush.msrb.mxu3 %v1903_v9 }
  0x43   : > { %696 = vmatpush.msrb.mxu1 %v1909_v10  ;;  %715 = vmatpush.msrb.mxu2 %v1915_v11 }
  0x44   : > { %677 = vmatpush.msrb.mxu0 %v1921_v12  ;;  %735 = vmatpush.msrb.mxu3 %v1927_v13 }
  0x45   : > { %697 = vmatpush.msrb.mxu1 %v1933_v14  ;;  %716 = vmatpush.msrb.mxu2 %v1939_v15 }
  0x46   : > { %678 = vmatpush.msrb.mxu0 %v1945_v16  ;;  %736 = vmatpush.msrb.mxu3 %v1951_v17 }
  0x47   : > { %698 = vmatpush.msrb.mxu1 %v1957_v18  ;;  %717 = vmatpush.msrb.mxu2 %v1963_v19 }
  0x48   : > { %679 = vmatpush.msrb.mxu0 %v1969_v20  ;;  %737 = vmatpush.msrb.mxu3 %v1975_v21 }
  0x49   : > { %699 = vmatpush.msrb.mxu1 %v1981_v22  ;;  %718 = vmatpush.msrb.mxu2 %v1987_v23 }
  0x4a   : > { %680 = vmatpush.msrb.mxu0 %v1993_v24  ;;  %738 = vmatpush.msrb.mxu3 %v1999_v25 }
  0x4b   : > { %700 = vmatpush.msrb.mxu1 %v2005_v26  ;;  %719 = vmatpush.msrb.mxu2 %v2011_v27 }
  0x4c   : > { %681 = vmatpush.msrb.mxu0 %v2017_v28  ;;  %739 = vmatpush.msrb.mxu3 %v2023_v29 }
  0x4d   : > { %701 = vmatpush.msrb.mxu1 %v2029_v30  ;;  %720 = vmatpush.msrb.mxu2 %v2037_v31 }
  0x4e   : > { %746 = vmatpush.msra.mxu0 %v1680_v34  ;;  %740 = vmatpush.msrb.mxu3 %v2044_v32 }
  0x4f   : > { %766 = vmatpush.msra.mxu1 %v1685_v36  ;;  %721 = vmatpush.msrb.mxu2 %v2051_v33 }
  0x50   : > { %747 = vmatpush.msra.mxu0 %v1691_v37  ;;  %741 = vmatpush.msrb.mxu3 %v2058_v35 }
  0x51   : > { %767 = vmatpush.msra.mxu1 %v1697_v38  ;;  %786 = vmatpush.msra.mxu2 %v1702_v39 }
  0x52   : > { %748 = vmatpush.msra.mxu0 %v1707_v40  ;;  %806 = vmatpush.msra.mxu3 %v1712_v41 }
  0x53   : > { %768 = vmatpush.msra.mxu1 %v1718_v42  ;;  %787 = vmatpush.msra.mxu2 %v1723_v43 }
  0x54   : > { %749 = vmatpush.msra.mxu0 %v1729_v44  ;;  %807 = vmatpush.msra.mxu3 %v1735_v45 }
  0x55   : > { %769 = vmatpush.msra.mxu1 %v1741_v46  ;;  %788 = vmatpush.msra.mxu2 %v1747_v47 }
  0x56   : > { %750 = vmatpush.msra.mxu0 %v1753_v48  ;;  %808 = vmatpush.msra.mxu3 %v1759_v49 }
  0x57   : > { %770 = vmatpush.msra.mxu1 %v1765_v50  ;;  %789 = vmatpush.msra.mxu2 %v1771_v51 }
  0x58   : > { %751 = vmatpush.msra.mxu0 %v1777_v52  ;;  %809 = vmatpush.msra.mxu3 %v1783_v53 }
  0x59   : > { %771 = vmatpush.msra.mxu1 %v1789_v54  ;;  %790 = vmatpush.msra.mxu2 %v1795_v55 }
  0x5a   : > { %752 = vmatpush.msra.mxu0 %v1801_v56  ;;  %810 = vmatpush.msra.mxu3 %v1807_v57 }
  0x5b   : > { %772 = vmatpush.msra.mxu1 %v1813_v58  ;;  %791 = vmatpush.msra.mxu2 %v1819_v59 }
  0x5c   : > { %753 = vmatpush.msra.mxu0 %v1825_v60  ;;  %811 = vmatpush.msra.mxu3 %v1831_v61 }
  0x5d   : > { %773 = vmatpush.msra.mxu1 %v1837_v62  ;;  %792 = vmatpush.msra.mxu2 %v1843_v63 }
  0x5e   : > { %754 = vmatpush.msra.mxu0 %v1849_v0  ;;  %812 = vmatpush.msra.mxu3 %v1855_v1 }
  0x5f   : > { %774 = vmatpush.msra.mxu1 %v1861_v2  ;;  %793 = vmatpush.msra.mxu2 %v1867_v3 }
  0x60   : > { %755 = vmatpush.msra.mxu0 %v1873_v4  ;;  %813 = vmatpush.msra.mxu3 %v1879_v5 }
  0x61   : > { %775 = vmatpush.msra.mxu1 %v1885_v6  ;;  %794 = vmatpush.msra.mxu2 %v1891_v7 }
  0x62   : > { %756 = vmatpush.msra.mxu0 %v1897_v8  ;;  %814 = vmatpush.msra.mxu3 %v1903_v9 }
  0x63   : > { %776 = vmatpush.msra.mxu1 %v1909_v10  ;;  %795 = vmatpush.msra.mxu2 %v1915_v11 }
  0x64   : > { %757 = vmatpush.msra.mxu0 %v1921_v12  ;;  %815 = vmatpush.msra.mxu3 %v1927_v13 }
  0x65   : > { %777 = vmatpush.msra.mxu1 %v1933_v14  ;;  %796 = vmatpush.msra.mxu2 %v1939_v15 }
  0x66   : > { %758 = vmatpush.msra.mxu0 %v1945_v16  ;;  %816 = vmatpush.msra.mxu3 %v1951_v17 }
  0x67   : > { %778 = vmatpush.msra.mxu1 %v1957_v18  ;;  %797 = vmatpush.msra.mxu2 %v1963_v19 }
  0x68   : > { %759 = vmatpush.msra.mxu0 %v1969_v20  ;;  %817 = vmatpush.msra.mxu3 %v1975_v21 }
  0x69   : > { %779 = vmatpush.msra.mxu1 %v1981_v22  ;;  %798 = vmatpush.msra.mxu2 %v1987_v23 }
  0x6a   : > { %760 = vmatpush.msra.mxu0 %v1993_v24  ;;  %818 = vmatpush.msra.mxu3 %v1999_v25 }
  0x6b   : > { %780 = vmatpush.msra.mxu1 %v2005_v26  ;;  %799 = vmatpush.msra.mxu2 %v2011_v27 }
  0x6c   : > { %761 = vmatpush.msra.mxu0 %v2017_v28  ;;  %819 = vmatpush.msra.mxu3 %v2023_v29 }
  0x6d   : > { %781 = vmatpush.msra.mxu1 %v2029_v30  ;;  %800 = vmatpush.msra.mxu2 %v2037_v31 }
  0x6e   : > { %820 = vmatpush.msra.mxu3 %v2044_v32 }
  0x6f   : > { %801 = vmatpush.msra.mxu2 %v2051_v33 }
  0x70   : > { %821 = vmatpush.msra.mxu3 %v2058_v35 }
  0xaa   : > { %v2125_v34 = vpop.f32.mrf.mxu0 }
  0xab   : > { %v542_v36 = vsel %vm541_vm0, %v2125_v34, 0.0  ;;  %v570_v37 = vmul.f32 %v2125_v34, %v2125_v34  ;;  %v2131_v38 = vpop.f32.mrf.mxu1 }
  0xac   : > { %v543_v39 = vrot.slane %v542_v36, 4  ;;  %v549_v40 = vsel %vm541_vm0, %v2131_v38, 0.0  ;;  %v571_v41 = vmul.f32 %v2131_v38, %v2131_v38 }
  0xad   : > { %v574_v42 = vsel %vm541_vm0, %v570_v37, 0.0  ;;  %v550_v43 = vrot.slane %v549_v40, 4 }
  0xae   : > { %v544_v44 = vadd.f32 %v543_v39, %v542_v36  ;;  %v575_v45 = vrot.slane %v574_v42, 4  ;;  %v581_v46 = vsel %vm541_vm0, %v571_v41, 0.0  ;;  %v841_v41 = vld [vmem:[%s2249_s4 + $0x78] sm:$0xff] }
  0xaf   : > { %v551_v47 = vadd.f32 %v550_v43, %v549_v40  ;;  %v582_v48 = vrot.slane %v581_v46, 4  ;;  %v839_v43 = vld [vmem:[%s2249_s4 + $0x68] sm:$0xff] }
  0xb0   : > { %v545_v49 = vrot.slane %v544_v44, 2  ;;  %v576_v50 = vadd.f32 %v575_v45, %v574_v42  ;;  %v838_v42 = vld [vmem:[%s2249_s4 + $0x60] sm:$0xff]  ;;  %v837_v45 = vld [vmem:[%s2249_s4 + $0x58] sm:$0xff] }
  0xb1   : > { %v552_v51 = vrot.slane %v551_v47, 2  ;;  %v583_v52 = vadd.f32 %v582_v48, %v581_v46  ;;  %v834_v46 = vld [vmem:[%s2249_s4 + $0x40] sm:$0xff]  ;;  %v836_v48 = vld [vmem:[%s2249_s4 + $0x50] sm:$0xff] }
  0xb2   : > { %v2139_v53 = vpop.f32.mrf.mxu2  ;;  %v577_v54 = vrot.slane %v576_v50, 2  ;;  %v500_v58 = vpop.f32.mrf.mxu0  ;;  %v546_v59 = vadd.f32 %v545_v49, %v544_v44  ;;  %v840_v44 = vld [vmem:[%s2249_s4 + $0x70] sm:$0xff]  ;;  %v833_v49 = vld [vmem:[%s2249_s4 + $0x38] sm:$0xff] }
  0xb3   : > { %v556_v55 = vsel %vm541_vm0, %v2139_v53, 0.0  ;;  %v572_v56 = vmul.f32 %v2139_v53, %v2139_v53  ;;  %v2145_v57 = vpop.f32.mrf.mxu3  ;;  %v513_v63 = vpop.f32.mrf.mxu1  ;;  %v584_v0 = vrot.slane %v583_v52, 2  ;;  %v553_v11 = vadd.f32 %v552_v51, %v551_v47  ;;  %v835_v47 = vld [vmem:[%s2249_s4 + $0x48] sm:$0xff]  ;;  %v828_v58 = vld [vmem:[%s2249_s4 + $0x10] sm:$0xff] }
  0xb4   : > { %v557_v60 = vrot.slane %v556_v55, 4  ;;  %v563_v61 = vsel %vm541_vm0, %v2145_v57, 0.0  ;;  %v573_v62 = vmul.f32 %v2145_v57, %v2145_v57  ;;  %v547_v3 = vrot.slane %v546_v59, 1  ;;  %v831_v51 = vld [vmem:[%s2249_s4 + $0x28] sm:$0xff] }
  0xb5   : > { %v588_v1 = vsel %vm541_vm0, %v572_v56, 0.0  ;;  %v564_v2 = vrot.slane %v563_v61, 4  ;;  %v578_v4 = vadd.f32 %v577_v54, %v576_v50  ;;  %v554_v16 = vrot.slane %v553_v11, 1  ;;  %v830_v50 = vld [vmem:[%s2249_s4 + $0x20] sm:$0xff]  ;;  %v829_v54 = vld [vmem:[%s2249_s4 + $0x18] sm:$0xff]  ;;  %v827_v56 = vld [vmem:[%s2249_s4 + $0x8] sm:$0xff] }
  0xb6   : > { %v558_v5 = vadd.f32 %v557_v60, %v556_v55  ;;  %v589_v6 = vrot.slane %v588_v1, 4  ;;  %v595_v7 = vsel %vm541_vm0, %v573_v62, 0.0  ;;  %v548_v10 = vadd.f32 %v547_v3, %v546_v59  ;;  %v826_v55 = vld [vmem:[%s2249_s4] sm:$0xff] }
  0xb7   : > { %v565_v8 = vadd.f32 %v564_v2, %v563_v61  ;;  %v596_v9 = vrot.slane %v595_v7, 4  ;;  %v585_v17 = vadd.f32 %v584_v0, %v583_v52  ;;  %v555_v23 = vadd.f32 %v554_v16, %v553_v11  ;;  %v832_v52 = vld [vmem:[%s2249_s4 + $0x30] sm:$0xff] }
  0xb8   : > { %v559_v12 = vrot.slane %v558_v5, 2  ;;  %v590_v13 = vadd.f32 %v589_v6, %v588_v1  ;;  %682 = vmatmul.f32.vlgmr.msrb.gmra.mxu0 %v548_v10  ;;  %v579_v25 = vrot.slane %v578_v4, 1 }
  0xb9   : > { %v566_v14 = vrot.slane %v565_v8, 2  ;;  %v597_v15 = vadd.f32 %v596_v9, %v595_v7  ;;  %702 = vmatmul.f32.vlgmr.msrb.gmra.mxu1 %v555_v23  ;;  %v586_v33 = vrot.slane %v585_v17, 1  ;;  %858 = vmatpush.msrb.mxu0 %v838_v42 }
  0xba   : > { %v591_v18 = vrot.slane %v590_v13, 2  ;;  %v526_v19 = vpop.f32.mrf.mxu2  ;;  %v560_v20 = vadd.f32 %v559_v12, %v558_v5  ;;  %v580_v32 = vadd.f32 %v579_v25, %v578_v4  ;;  %878 = vmatpush.msrb.mxu1 %v839_v43 }
  0xbb   : > { %v598_v21 = vrot.slane %v597_v15, 2  ;;  %v539_v22 = vpop.f32.mrf.mxu3  ;;  %v567_v24 = vadd.f32 %v566_v14, %v565_v8  ;;  %v587_v36 = vadd.f32 %v586_v33, %v585_v17  ;;  %859 = vmatpush.msrb.mxu0 %v834_v46 }
  0xbc   : > { %v561_v26 = vrot.slane %v560_v20, 1  ;;  %v592_v28 = vadd.f32 %v591_v18, %v590_v13  ;;  %879 = vmatpush.msrb.mxu1 %v835_v47 }
  0xbd   : > { %v568_v27 = vrot.slane %v567_v24, 1  ;;  %v599_v30 = vadd.f32 %v598_v21, %v597_v15  ;;  %860 = vmatpush.msrb.mxu0 %v830_v50 }
  0xbe   : > { %v562_v29 = vadd.f32 %v561_v26, %v560_v20  ;;  %v593_v35 = vrot.slane %v592_v28, 1  ;;  %880 = vmatpush.msrb.mxu1 %v831_v51 }
  0xbf   : > { %v569_v31 = vadd.f32 %v568_v27, %v567_v24  ;;  %v600_v37 = vrot.slane %v599_v30, 1  ;;  %861 = vmatpush.msrb.mxu0 %v826_v55 }
  0xc0   : > { %722 = vmatmul.f32.vlgmr.msrb.gmra.mxu2 %v562_v29  ;;  %762 = vmatmul.f32.vlgmr.msra.gmra.mxu0 %v580_v32  ;;  %v594_v39 = vadd.f32 %v593_v35, %v592_v28 }
  0xc1   : > { %742 = vmatmul.f32.vlgmr.msrb.gmra.mxu3 %v569_v31  ;;  %782 = vmatmul.f32.vlgmr.msra.gmra.mxu1 %v587_v36  ;;  %v601_v40 = vadd.f32 %v600_v37, %v599_v30 }
  0xc2   : > { %918 = vmatpush.msrb.mxu3 %v841_v41  ;;  %898 = vmatpush.msrb.mxu2 %v840_v44 }
  0xc3   : > { %881 = vmatpush.msrb.mxu1 %v827_v56  ;;  %945 = vmatpush.msra.mxu0 %v838_v42 }
  0xc4   : > { %919 = vmatpush.msrb.mxu3 %v837_v45  ;;  %899 = vmatpush.msrb.mxu2 %v836_v48 }
  0xc5   : > { %965 = vmatpush.msra.mxu1 %v839_v43  ;;  %946 = vmatpush.msra.mxu0 %v834_v46 }
  0xc6   : > { %920 = vmatpush.msrb.mxu3 %v833_v49  ;;  %900 = vmatpush.msrb.mxu2 %v832_v52 }
  0xc7   : > { %966 = vmatpush.msra.mxu1 %v835_v47  ;;  %947 = vmatpush.msra.mxu0 %v830_v50 }
  0xc8   : > { %802 = vmatmul.f32.vlgmr.msra.gmra.mxu2 %v594_v39  ;;  %921 = vmatpush.msrb.mxu3 %v829_v54 }
  0xc9   : > { %822 = vmatmul.f32.vlgmr.msra.gmra.mxu3 %v601_v40  ;;  %901 = vmatpush.msrb.mxu2 %v828_v58 }
  0xca   : > { %1005 = vmatpush.msra.mxu3 %v841_v41  ;;  %967 = vmatpush.msra.mxu1 %v831_v51 }
  0xcb   : > { %985 = vmatpush.msra.mxu2 %v840_v44  ;;  %948 = vmatpush.msra.mxu0 %v826_v55  ;;  %v1077_v44 = vld [vmem:[%s2250_s5] sm:$0xf] }
  0xcc   : > { %1006 = vmatpush.msra.mxu3 %v837_v45  ;;  %968 = vmatpush.msra.mxu1 %v827_v56  ;;  %v1079_v51 = vperm.slane %v1077_v44, 0 }
  0xcd   : > { %986 = vmatpush.msra.mxu2 %v836_v48 }
  0xce   : > { %1007 = vmatpush.msra.mxu3 %v833_v49 }
  0xcf   : > { %987 = vmatpush.msra.mxu2 %v832_v52 }
  0xd0   : > { %1008 = vmatpush.msra.mxu3 %v829_v54 }
  0xd1   : > { %988 = vmatpush.msra.mxu2 %v828_v58 }
 0x135   : > { %v683_v59 = vpop.f32.mrf.mxu0 }
 0x136   : > { %v703_v60 = vpop.f32.mrf.mxu1 }
 0x137   : > { %v704_v61 = vadd.f32 %v703_v60, %v683_v59  ;;  %v1080_v59 = vperm.slane %v1077_v44, 1 }
 0x13d   : > { %v763_v2 = vpop.f32.mrf.mxu0 }
 0x13e   : > { %v783_v3 = vpop.f32.mrf.mxu1 }
 0x13f   : > { %v784_v4 = vadd.f32 %v783_v3, %v763_v2 }
 0x143   : > { %v723_v62 = vpop.f32.mrf.mxu2 }
 0x144   : > { %v724_v63 = vadd.f32 %v723_v62, %v704_v61  ;;  %v743_v0 = vpop.f32.mrf.mxu3  ;;  %v1099_v61 = vld [vmem:[%s2251_s6] sm:$0xf] }
 0x146   : > { %v744_v1 = vadd.f32 %v743_v0, %v724_v63 }
 0x148   : > { %1353 = vmatmul.msk.f32.vlgmr.msrb.gmra.mxu0 %vm842_vm1, %v744_v1  ;;  %1354 = vmatmul.msk.f32.vlgmr.msrb.gmra.mxu1 %vm842_vm1, %v744_v1 }
 0x149   : > { %1355 = vmatmul.msk.f32.vlgmr.msrb.gmra.mxu2 %vm842_vm1, %v744_v1  ;;  %1356 = vmatmul.msk.f32.vlgmr.msrb.gmra.mxu3 %vm842_vm1, %v744_v1 }
 0x14b   : > { %v803_v5 = vpop.f32.mrf.mxu2 }
 0x14c   : > { %v804_v6 = vadd.f32 %v803_v5, %v784_v4  ;;  %v823_v7 = vpop.f32.mrf.mxu3 }
 0x14e   : > { %v824_v8 = vadd.f32 %v823_v7, %v804_v6  ;;  %v1101_v7 = vperm.slane %v1099_v61, 0 }
 0x150   : > { %1357 = vmatmul.msk.f32.vlgmr.msra.gmra.mxu0 %vm842_vm1, %v824_v8  ;;  %1358 = vmatmul.msk.f32.vlgmr.msra.gmra.mxu1 %vm842_vm1, %v824_v8 }
 0x151   : > { %1359 = vmatmul.msk.f32.vlgmr.msra.gmra.mxu2 %vm842_vm1, %v824_v8  ;;  %1360 = vmatmul.msk.f32.vlgmr.msra.gmra.mxu3 %vm842_vm1, %v824_v8 }
 0x1c5   : > { %v863_v9 = vpop.f32.mrf.mxu0  ;;  %v883_v10 = vpop.f32.mrf.mxu1 }
 0x1c6   : > { %v926_v11 = vmul.f32 0.015625, %v863_v9  ;;  %v927_v12 = vmul.f32 0.015625, %v883_v10  ;;  %v1102_v9 = vperm.slane %v1099_v61, 1 }
 0x1c8   : > { %v1017_v17 = vmul.f32 %v926_v11, %v926_v11  ;;  %v1018_v18 = vmul.f32 %v927_v12, %v927_v12  ;;  %v1069_v49 = vperm.slane %v926_v11, 0  ;;  %v1070_v54 = vperm.slane %v927_v12, 0 }
 0x1ca   : > { %v1073_v0 = vsub.f32 %v2125_v34, %v1069_v49  ;;  %v1074_v3 = vsub.f32 %v2131_v38, %v1070_v54  ;;  %v1082_v34 = vperm.slane %v1077_v44, 3  ;;  %v1120_v38 = vld.sshfl [vmem:[#allocation1] sm:$0xff pattern:$0x75316420] }
 0x1cc   : > { %v903_v13 = vpop.f32.mrf.mxu2  ;;  %v923_v14 = vpop.f32.mrf.mxu3 }
 0x1cd   : > { %v950_v15 = vpop.f32.mrf.mxu0  ;;  %v970_v16 = vpop.f32.mrf.mxu1  ;;  %v2209_v21 = vmul.f32 0.015625, %v903_v13  ;;  %v2211_v24 = vmul.f32 0.015625, %v923_v14  ;;  %v1081_v13 = vperm.slane %v1077_v44, 2 }
 0x1ce   : > { %v1013_v19 = vmul.f32 0.015625, %v950_v15  ;;  %v1014_v20 = vmul.f32 0.015625, %v970_v16 }
 0x1cf   : > { %v1019_v27 = vmul.f32 %v2209_v21, %v2209_v21  ;;  %v1020_v30 = vmul.f32 %v2211_v24, %v2211_v24  ;;  %v1071_v16 = vperm.slane %v2209_v21, 0 }
 0x1d0   : > { %v1021_v22 = vsub.f32 %v1013_v19, %v1017_v17  ;;  %v1022_v23 = vsub.f32 %v1014_v20, %v1018_v18 }
 0x1d2   : > { %v1025_v25 = vadd.f32 1e-06, %v1021_v22  ;;  %v1026_v26 = vadd.f32 1e-06, %v1022_v23  ;;  %v1072_v22 = vperm.slane %v2211_v24, 0  ;;  %v1104_v24 = vperm.slane %v1099_v61, 3 }
 0x1d4   : > { %1405 = vrsqrt.f32 %v1025_v25  ;;  %v990_v28 = vpop.f32.mrf.mxu2  ;;  %v1010_v29 = vpop.f32.mrf.mxu3  ;;  %vm1035_vm4 = vweird.f32 %v1025_v25  ;;  %vm1045_vm6 = vweird.f32 %v1026_v26 }
 0x1d5   : > { %1407 = vrsqrt.f32 %v1026_v26  ;;  %v1015_v31 = vmul.f32 0.015625, %v990_v28  ;;  %v1016_v32 = vmul.f32 0.015625, %v1010_v29  ;;  %v1075_v29 = vsub.f32 %v2139_v53, %v1071_v16 }
 0x1d7   : > { %v1023_v33 = vsub.f32 %v1015_v31, %v1019_v27  ;;  %v1024_v35 = vsub.f32 %v1016_v32, %v1020_v30 }
 0x1d9   : > { %v1027_v36 = vadd.f32 1e-06, %v1023_v33  ;;  %v2217_v37 = vadd.f32 1e-06, %v1024_v35  ;;  %v1103_v35 = vperm.slane %v1099_v61, 2 }
 0x1da   : > { %v1406_v39 = vpop.eup %1405 }
 0x1db   : > { %v1408_v40 = vpop.eup %1407  ;;  %v1030_v41 = vmul.f32 %v1406_v39, %v1025_v25  ;;  %1409 = vrsqrt.f32 %v1027_v36  ;;  %vm1036_vm2 = vweird.f32 %v1406_v39  ;;  %vm1055_vm10 = vweird.f32 %v1027_v36  ;;  %v1121_v25 = vld.sshfl [vmem:[#allocation1 + $0x8] sm:$0xff pattern:$0x75316420] }
 0x1dc   : > { %v1040_v42 = vmul.f32 %v1408_v40, %v1026_v26  ;;  %1411 = vrsqrt.f32 %v2217_v37  ;;  %vm1046_vm3 = vweird.f32 %v1408_v40  ;;  %vm1037_vm5 = vmor %vm1035_vm4, %vm1036_vm2  ;;  %vm1065_vm12 = vweird.f32 %v2217_v37 }
 0x1dd   : > { %v1031_v43 = vmul.f32 %v1406_v39, %v1030_v41  ;;  %vm1047_vm7 = vmor %vm1045_vm6, %vm1046_vm3  ;;  %v1122_v41 = vld.sshfl [vmem:[#allocation1 + $0x10] sm:$0xff pattern:$0x75316420] }
 0x1de   : > { %v1041_v45 = vmul.f32 %v1408_v40, %v1040_v42 }
 0x1df   : > { %v1032_v46 = vmul.f32 0.5, %v1031_v43 }
 0x1e0   : > { %v1042_v47 = vmul.f32 0.5, %v1041_v45  ;;  %v1123_v45 = vld.sshfl [vmem:[#allocation1 + $0x18] sm:$0xff pattern:$0x75316420] }
 0x1e1   : > { %v1410_v48 = vpop.eup %1409  ;;  %v1033_v50 = vsub.f32 1.5, %v1032_v46 }
 0x1e2   : > { %v1412_v52 = vpop.eup %1411  ;;  %v1043_v55 = vsub.f32 1.5, %v1042_v47  ;;  %v1050_v56 = vmul.f32 %v1410_v48, %v1027_v36  ;;  %vm1056_vm8 = vweird.f32 %v1410_v48  ;;  %v1076_v36 = vsub.f32 %v2145_v57, %v1072_v22 }
 0x1e3   : > { %v1034_v58 = vmul.f32 %v1406_v39, %v1033_v50  ;;  %v1060_v60 = vmul.f32 %v1412_v52, %v2217_v37  ;;  %vm1066_vm9 = vweird.f32 %v1412_v52  ;;  %vm1057_vm11 = vmor %vm1055_vm10, %vm1056_vm8 }
 0x1e4   : > { %v1044_v62 = vmul.f32 %v1408_v40, %v1043_v55  ;;  %v1051_v63 = vmul.f32 %v1410_v48, %v1050_v56  ;;  %vm1067_vm13 = vmor %vm1065_vm12, %vm1066_vm9 }
 0x1e5   : > { %v1038_v1 = vsel %vm1037_vm5, %v1406_v39, %v1034_v58  ;;  %v1061_v2 = vmul.f32 %v1412_v52, %v1060_v60 }
 0x1e6   : > { %v1087_v4 = vmul.f32 %v1079_v51, %v1038_v1  ;;  %v1048_v5 = vsel %vm1047_vm7, %v1408_v40, %v1044_v62  ;;  %v1052_v6 = vmul.f32 0.5, %v1051_v63 }
 0x1e7   : > { %v1088_v8 = vmul.f32 %v1080_v59, %v1048_v5  ;;  %v1062_v10 = vmul.f32 0.5, %v1061_v2 }
 0x1e8   : > { %v1091_v11 = vperm.slane %v1087_v4, 0  ;;  %v1053_v12 = vsub.f32 1.5, %v1052_v6 }
 0x1e9   : > { %v1092_v14 = vperm.slane %v1088_v8, 0  ;;  %v1063_v15 = vsub.f32 1.5, %v1062_v10 }
 0x1ea   : > { %v1095_v17 = vmul.f32 %v1091_v11, %v1073_v0  ;;  %v1054_v18 = vmul.f32 %v1410_v48, %v1053_v12 }
 0x1eb   : > { %v1096_v19 = vmul.f32 %v1092_v14, %v1074_v3  ;;  %v1064_v20 = vmul.f32 %v1412_v52, %v1063_v15 }
 0x1ec   : > { %v1109_v23 = vadd.f32 %v1101_v7, %v1095_v17  ;;  %v1058_v26 = vsel %vm1057_vm11, %v1410_v48, %v1054_v18 }
 0x1ed   : > { %v1110_v27 = vadd.f32 %v1102_v9, %v1096_v19  ;;  %v1089_v28 = vmul.f32 %v1081_v13, %v1058_v26  ;;  %v1068_v21 = vsel %vm1067_vm13, %v1412_v52, %v1064_v20 }
 0x1ee   : > { %v1090_v30 = vmul.f32 %v1082_v34, %v1068_v21  ;;  %v1128_v31 = vadd.f32 %v1120_v38, %v1109_v23 }
 0x1ef   : > { %v1129_v32 = vadd.f32 %v1121_v25, %v1110_v27  ;;  %v1093_v33 = vperm.slane %v1089_v28, 0 }
 0x1f0   : > { %v1094_v37 = vperm.slane %v1090_v30, 0  ;;  %v1132_v43 = vmax.f32 %v1128_v31, 0.0 }
 0x1f1   : > { %v1133_v39 = vmax.f32 %v1129_v32, 0.0  ;;  %v1097_v40 = vmul.f32 %v1093_v33, %v1075_v29 }
 0x1f2   : > { %v1098_v42 = vmul.f32 %v1094_v37, %v1076_v36 }
 0x1f3   : > { %v1140_v53 = vrot.slane %v1133_v39, 4  ;;  %v1111_v44 = vadd.f32 %v1103_v35, %v1097_v40 }
 0x1f4   : > { %v1112_v46 = vadd.f32 %v1104_v24, %v1098_v42 }
 0x1f5   : > { %v1142_v47 = vsel %vm541_vm0, %v1132_v43, %v1140_v53  ;;  %v1130_v57 = vadd.f32 %v1122_v41, %v1111_v44 }
 0x1f6   : > { %1146 = vst [vmem:[%s295_s19] sm:$0xff] %v1142_v47  ;;  %v1131_v48 = vadd.f32 %v1123_v45, %v1112_v46 }
 0x1f7   : > { %v1134_v50 = vmax.f32 %v1130_v57, 0.0 }
 0x1f8   : > { %v1135_v49 = vmax.f32 %v1131_v48, 0.0 }
 0x1fa   : > { %v1141_v51 = vrot.slane %v1135_v49, 4 }
 0x1fc   : > { %v1143_v52 = vsel %vm541_vm0, %v1134_v50, %v1141_v51 }
 0x1fd   : > { %1147 = vst [vmem:[%s295_s19 + $0x8] sm:$0xff] %v1143_v52 }
 0x1fe PF: > { %s17_s24 = sadd.s32 1, %s1419_s24  }
 0x1ff   : > { %p14_p4 = scmp.ge.s32.totalorder %s17_s24, 4  }
 0x201   :  { %16 = sbr.rel (!%p14_p4) target bundleno = 1 (0x1), region = 82 }

</bundles_post_ra>
